<compile_context>
chip_gen: v7x
topology: tpu7x:2x2x1
jax: 0.10.0
libtpu: 0.0.40
codegen_flags: <defaults>
</compile_context>

<pallas_src>
import functools

import jax
import jax.numpy as jnp
from jax import lax
from jax.experimental import pallas as pl
from jax.experimental.pallas import tpu as pltpu


# ----------------------------------------------------------------------------
# NGCF propagation layer: tiled  side = A @ E  with fused GC/Bi epilogue
# ----------------------------------------------------------------------------

def ngcf_layer_kernel(a_ref, ek_ref, ei_ref, wgc_ref, wbi_ref, b_ref,
                      ego_ref, norm_ref, acc_ref, *, d_out):
    """Grid = (N // tm, N // tk); axis 1 is the A@E reduction."""
    k = pl.program_id(1)

    @pl.when(k == 0)
    def _():
        acc_ref[...] = jnp.zeros_like(acc_ref)

    # bf16 MXU inputs, f32 accumulation.  A tile already lives in HBM as bf16
    # (dominant O(N^2) traffic halved); E rows are cast on the fly.
    acc_ref[...] += jnp.dot(a_ref[...], ek_ref[...].astype(jnp.bfloat16),
                            preferred_element_type=jnp.float32)

    @pl.when(k == pl.num_programs(1) - 1)
    def _():
        side = acc_ref[...]                               # (tm, D) f32
        e_i = ei_ref[...]                                 # (tm, D) f32, same rows as out
        # Fused GC/Bi projection: W_gc/W_bi were packed host-side into
        # lane-wider (D, 2*d_out) halves so the result is one (tm, 2*d_out)
        # slab -> single bias add + single LeakyReLU pass.
        y = (jnp.dot(side, wgc_ref[...], preferred_element_type=jnp.float32)
             + jnp.dot(e_i * side, wbi_ref[...], preferred_element_type=jnp.float32)
             + b_ref[...])
        y = jnp.where(y >= 0.0, y, 0.01 * y)              # LeakyReLU(0.01)
        ego = y[:, :d_out] + y[:, d_out:]                 # sum_emb + bi_emb
        ego_ref[...] = ego
        # F.normalize(p=2, dim=1): ego / max(||ego||, 1e-12) via EUP rsqrt.
        sumsq = jnp.sum(ego * ego, axis=-1, keepdims=True)
        norm_ref[...] = ego * lax.rsqrt(jnp.maximum(sumsq, 1e-24))


def ngcf_layer(adj_bf16, ego, w_gc, b_gc, w_bi, b_bi, *, tm=128, tk=128):
    n, d = ego.shape
    d_out = w_gc.shape[1]
    tm = min(tm, n)
    tk = min(tk, n)
    assert n % tm == 0 and n % tk == 0, "pick N divisible by tile sizes"

    # Pack the two projections into a lane-wider slab:
    #   side @ [W_gc | 0]  +  (e*side) @ [0 | W_bi]  ->  [sum_emb | bi_emb]
    zeros = jnp.zeros((d, d_out), jnp.float32)
    w_gc2 = jnp.concatenate([w_gc, zeros], axis=1)        # (D, 2*d_out)
    w_bi2 = jnp.concatenate([zeros, w_bi], axis=1)        # (D, 2*d_out)
    b2 = jnp.concatenate([b_gc, b_bi], axis=1)            # (1, 2*d_out)

    flops = 2 * n * n * d + 2 * 2 * n * d * (2 * d_out)
    bytes_accessed = (n * n * 2                 # bf16 adjacency
                      + 2 * n * d * 4           # ego streamed twice (k- and i-indexed)
                      + 2 * d * 2 * d_out * 4   # packed weights
                      + 2 * n * d_out * 4)      # two outputs

    return pl.pallas_call(
        functools.partial(ngcf_layer_kernel, d_out=d_out),
        out_shape=(jax.ShapeDtypeStruct((n, d_out), jnp.float32),
                   jax.ShapeDtypeStruct((n, d_out), jnp.float32)),
        grid_spec=pltpu.PrefetchScalarGridSpec(
            num_scalar_prefetch=0,
            grid=(n // tm, n // tk),
            in_specs=[
                pl.BlockSpec((tm, tk), lambda i, k: (i, k)),        # A tile
                pl.BlockSpec((tk, d), lambda i, k: (k, 0)),         # E rows (reduction)
                pl.BlockSpec((tm, d), lambda i, k: (i, 0)),         # E rows (output rows)
                pl.BlockSpec((d, 2 * d_out), lambda i, k: (0, 0)),  # packed W_gc
                pl.BlockSpec((d, 2 * d_out), lambda i, k: (0, 0)),  # packed W_bi
                pl.BlockSpec((1, 2 * d_out), lambda i, k: (0, 0)),  # packed bias
            ],
            out_specs=(
                pl.BlockSpec((tm, d_out), lambda i, k: (i, 0)),     # ego (next layer)
                pl.BlockSpec((tm, d_out), lambda i, k: (i, 0)),     # norm (concat)
            ),
            scratch_shapes=[pltpu.VMEM((tm, d), jnp.float32)],
        ),
        compiler_params=pltpu.CompilerParams(
            dimension_semantics=("parallel", "arbitrary"),
            vmem_limit_bytes=32 * 1024 * 1024,
        ),
        cost_estimate=pl.CostEstimate(
            flops=flops, transcendentals=n, bytes_accessed=bytes_accessed),
    )(adj_bf16, ego, ego, w_gc2, w_bi2, b2)


# ----------------------------------------------------------------------------
# Fused KGCN aggregation + dot-product + sigmoid head (batch-tiled grid)
# ----------------------------------------------------------------------------

def kgcn_head_kernel(u1_ref, u_ref, i_ref, ne_ref, nr_ref, w_ref, b_ref,
                     out_ref):
    """scores = softmax_k(u . r), agg = sum_k scores*ent,
       i2 = relu((item + agg) @ W + b),  out = sigmoid(sum(u1 * i2))."""
    u = u_ref[...]                                        # (tb, D)
    ne = ne_ref[...]                                      # (tb, K, D)
    nr = nr_ref[...]                                      # (tb, K, D)

    scores = jnp.sum(u[:, None, :] * nr, axis=-1)         # (tb, K)
    scores = scores - jnp.max(scores, axis=-1, keepdims=True)
    e = jnp.exp(scores)
    p = e * pl.reciprocal(jnp.sum(e, axis=-1, keepdims=True), approx=True)

    agg = jnp.sum(p[:, :, None] * ne, axis=1)             # (tb, D)

    x = i_ref[...] + agg                                  # 'sum' aggregator
    y = jnp.dot(x, w_ref[...], preferred_element_type=jnp.float32) + b_ref[...]
    i2 = jnp.maximum(y, 0.0)                              # F.relu

    s = jnp.sum(u1_ref[...] * i2, axis=-1, keepdims=True)  # (tb, 1)
    # numerically stable sigmoid
    ez = jnp.exp(-jnp.abs(s))
    out_ref[...] = jnp.where(s >= 0.0, 1.0, ez) / (1.0 + ez)


def kgcn_head(u1, user_emb, item_emb, nbr_ent, nbr_rel, w, b, *, tb=128):
    bsz, feat = u1.shape
    d = item_emb.shape[1]
    k = nbr_ent.shape[1]
    assert feat == d, "emb*(1+L) must equal e_dim (as in the PyTorch module)"
    tb = min(tb, bsz)
    assert bsz % tb == 0

    out = pl.pallas_call(
        kgcn_head_kernel,
        out_shape=jax.ShapeDtypeStruct((bsz, 1), jnp.float32),
        grid_spec=pltpu.PrefetchScalarGridSpec(
            num_scalar_prefetch=0,
            grid=(bsz // tb,),
            in_specs=[
                pl.BlockSpec((tb, feat), lambda i: (i, 0)),
                pl.BlockSpec((tb, d), lambda i: (i, 0)),
                pl.BlockSpec((tb, d), lambda i: (i, 0)),
                pl.BlockSpec((tb, k, d), lambda i: (i, 0, 0)),
                pl.BlockSpec((tb, k, d), lambda i: (i, 0, 0)),
                pl.BlockSpec((d, d), lambda i: (0, 0)),
                pl.BlockSpec((1, d), lambda i: (0, 0)),
            ],
            out_specs=pl.BlockSpec((tb, 1), lambda i: (i, 0)),
        ),
        compiler_params=pltpu.CompilerParams(
            dimension_semantics=("parallel",),
            vmem_limit_bytes=32 * 1024 * 1024,
        ),
    )(u1, user_emb, item_emb, nbr_ent, nbr_rel, w, b)
    return out[:, 0]                                      # (B,)


# ----------------------------------------------------------------------------
# Model glue (plain JAX): parameter setup, gathers, layer concatenation
# ----------------------------------------------------------------------------

def renorm_max1(x, eps=1e-7):
    """nn.Embedding(max_norm=1) lookup semantics: renorm rows with ||x|| > 1."""
    nrm = jnp.linalg.norm(x, axis=-1, keepdims=True)
    scale = jnp.where(nrm > 1.0, 1.0 / (nrm + eps), 1.0)
    return x * scale


def ng_kgcn_forward(params, norm_adj, adj_entity, adj_relation,
                    user_ids, item_ids):
    # ---------------- NGCF branch (model1) ----------------
    ego = jnp.concatenate([params["ngcf_user_emb"], params["ngcf_item_emb"]],
                          axis=0)                            # (N, emb)
    adj_bf16 = norm_adj.astype(jnp.bfloat16)                 # bf16 HBM adjacency
    all_embs = [ego]
    for k in range(len(params["ngcf_W_gc"])):
        ego, norm_emb = ngcf_layer(adj_bf16, ego,
                                   params["ngcf_W_gc"][k], params["ngcf_b_gc"][k],
                                   params["ngcf_W_bi"][k], params["ngcf_b_bi"][k])
        all_embs.append(norm_emb)
    all_embs = jnp.concatenate(all_embs, axis=1)             # (N, emb*(1+L))
    u1_g_embeddings = all_embs[user_ids]                     # (B, emb*(1+L))

    # ---------------- KGCN branch (model2) gathers ----------------
    user_emb = renorm_max1(params["kgcn_user_emb"][user_ids])       # (B, D)
    item_emb = renorm_max1(params["kgcn_entity_emb"][item_ids])     # (B, D)
    nbr_e_ids = adj_entity[item_ids]                                # (B, K)
    nbr_r_ids = adj_relation[item_ids]                              # (B, K)
    nbr_ent = renorm_max1(params["kgcn_entity_emb"][nbr_e_ids])     # (B, K, D)
    nbr_rel = renorm_max1(params["kgcn_relation_emb"][nbr_r_ids])   # (B, K, D)

    # ---------------- fused KGCN aggregate + dot + sigmoid ----------------
    out = kgcn_head(u1_g_embeddings, user_emb, item_emb, nbr_ent, nbr_rel,
                    params["kgcn_W"], params["kgcn_b"])             # (B,)
    return out


# ----------------------------------------------------------------------------
# Deterministic parameter / input construction
# ----------------------------------------------------------------------------

def build_everything():
    key = jax.random.PRNGKey(0)
    keys = jax.random.split(key, 16)

    # sizes (small but multi-tile: N = 256 -> NGCF grid (2, 2) of 128x128 tiles;
    # emb*(1+L) == e_dim so the final multiply matches the PyTorch code)
    n_user, n_item = 96, 160
    emb_size = 8
    layer_sizes = [8]                 # one NGCF layer -> concat dim = 16
    n_users_kg, n_entitys, n_relations = 96, 160, 8
    n_neighbors = 8
    e_dim = 16
    batch = 128

    N = n_user + n_item

    # symmetric-normalized bipartite adjacency (densified; bf16 at kernel time)
    r = (jax.random.uniform(keys[0], (n_user, n_item)) < 0.1).astype(jnp.float32)
    adj = jnp.zeros((N, N), jnp.float32)
    adj = adj.at[:n_user, n_user:].set(r)
    adj = adj.at[n_user:, :n_user].set(r.T)
    deg = jnp.maximum(jnp.sum(adj, axis=1), 1.0)
    d_inv_sqrt = 1.0 / jnp.sqrt(deg)
    norm_adj = adj * d_inv_sqrt[:, None] * d_inv_sqrt[None, :]

    params = {
        # NGCF (xavier-style small normals)
        "ngcf_user_emb": 0.1 * jax.random.normal(keys[1], (n_user, emb_size)),
        "ngcf_item_emb": 0.1 * jax.random.normal(keys[2], (n_item, emb_size)),
        "ngcf_W_gc": [0.1 * jax.random.normal(keys[3], (emb_size, layer_sizes[0]))],
        "ngcf_b_gc": [0.1 * jax.random.normal(keys[4], (1, layer_sizes[0]))],
        "ngcf_W_bi": [0.1 * jax.random.normal(keys[5], (emb_size, layer_sizes[0]))],
        "ngcf_b_bi": [0.1 * jax.random.normal(keys[6], (1, layer_sizes[0]))],
        # KGCN
        "kgcn_user_emb": jax.random.normal(keys[7], (n_users_kg, e_dim)),
        "kgcn_entity_emb": jax.random.normal(keys[8], (n_entitys, e_dim)),
        "kgcn_relation_emb": jax.random.normal(keys[9], (n_relations, e_dim)),
        "kgcn_W": 0.1 * jax.random.normal(keys[10], (e_dim, e_dim)),
        "kgcn_b": 0.1 * jax.random.normal(keys[11], (1, e_dim)),
    }
    params = jax.tree_util.tree_map(lambda x: x.astype(jnp.float32), params)

    adj_entity = jax.random.randint(keys[12], (n_entitys, n_neighbors), 0, n_entitys)
    adj_relation = jax.random.randint(keys[13], (n_entitys, n_neighbors), 0, n_relations)

    user_ids = jax.random.randint(keys[14], (batch,), 0, n_user)
    item_ids = jax.random.randint(keys[15], (batch,), 0, n_item)

    return params, norm_adj, adj_entity, adj_relation, user_ids, item_ids


if __name__ == "__main__":
    (params, norm_adj, adj_entity, adj_relation,
     user_ids, item_ids) = build_everything()

    fwd = jax.jit(functools.partial(ng_kgcn_forward, params, norm_adj,
                                    adj_entity, adj_relation))
    out = fwd(user_ids, item_ids)
    jax.block_until_ready(out)

    assert out.shape == (user_ids.shape[0],)
    assert bool(jnp.all(jnp.isfinite(out)))
    assert bool(jnp.all((out >= 0.0) & (out <= 1.0)))
    print("KERNEL_OK")
</pallas_src>

<mosaic_0001>
module attributes {stable_mosaic.version = 11 : i64} {
  func.func @ngcf_layer_kernel(%arg0: i32, %arg1: i32, %arg2: memref<128x128xbf16, #tpu.memory_space<vmem>>, %arg3: memref<128x8xf32, #tpu.memory_space<vmem>>, %arg4: memref<128x8xf32, #tpu.memory_space<vmem>>, %arg5: memref<8x16xf32, #tpu.memory_space<vmem>>, %arg6: memref<8x16xf32, #tpu.memory_space<vmem>>, %arg7: memref<1x16xf32, #tpu.memory_space<vmem>>, %arg8: memref<128x8xf32, #tpu.memory_space<vmem>>, %arg9: memref<128x8xf32, #tpu.memory_space<vmem>>, %arg10: memref<128x8xf32, #tpu.memory_space<vmem>>) attributes {dimension_semantics = [#tpu.dimension_semantics<parallel>, #tpu.dimension_semantics<arbitrary>], iteration_bounds = array<i64: 2, 2>, scalar_prefetch = 0 : i64, scratch_operands = 1 : i64, tpu.core_type = #tpu.core_type<tc>, window_params = [{transform_indices = @transform_0, window_bounds = array<i64: 128, 128>}, {transform_indices = @transform_1, window_bounds = array<i64: 128, 8>}, {transform_indices = @transform_2, window_bounds = array<i64: 128, 8>}, {pipeline_mode = #tpu.pipeline_mode<synchronous>, transform_indices = @transform_3, window_bounds = array<i64: 8, 16>}, {pipeline_mode = #tpu.pipeline_mode<synchronous>, transform_indices = @transform_4, window_bounds = array<i64: 8, 16>}, {pipeline_mode = #tpu.pipeline_mode<synchronous>, transform_indices = @transform_5, window_bounds = array<i64: 1, 16>}, {transform_indices = @transform_6, window_bounds = array<i64: 128, 8>}, {transform_indices = @transform_7, window_bounds = array<i64: 128, 8>}]} {
    %c0_i32 = arith.constant 0 : i32
    %0 = arith.cmpi eq, %arg1, %c0_i32 : i32
    %1 = arith.extui %0 : i1 to i32
    %c0_i32_0 = arith.constant 0 : i32
    %2 = arith.cmpi ne, %1, %c0_i32_0 : i32
    scf.if %2 {
      %cst_9 = arith.constant 0.000000e+00 : f32
      %13 = vector.broadcast %cst_9 : f32 to vector<128x8xf32>
      %c0_10 = arith.constant 0 : index
      %c0_11 = arith.constant 0 : index
      %14 = vector.load %arg10[%c0_10, %c0_11] : memref<128x8xf32, #tpu.memory_space<vmem>>, vector<128x8xf32>
      tpu.vector_store %arg10[%c0_10, %c0_11], %13 {strides = array<i32>} : memref<128x8xf32, #tpu.memory_space<vmem>>, vector<128x8xf32>,
    } else {
    }
    %c0 = arith.constant 0 : index
    %c0_1 = arith.constant 0 : index
    %3 = vector.load %arg10[%c0, %c0_1] : memref<128x8xf32, #tpu.memory_space<vmem>>, vector<128x8xf32>
    %c0_2 = arith.constant 0 : index
    %c0_3 = arith.constant 0 : index
    %4 = vector.load %arg2[%c0_2, %c0_3] : memref<128x128xbf16, #tpu.memory_space<vmem>>, vector<128x128xbf16>
    %c0_4 = arith.constant 0 : index
    %c0_5 = arith.constant 0 : index
    %5 = vector.load %arg3[%c0_4, %c0_5] : memref<128x8xf32, #tpu.memory_space<vmem>>, vector<128x8xf32>
    %6 = arith.truncf %5 : vector<128x8xf32> to vector<128x8xbf16>
    %cst = arith.constant dense<0.000000e+00> : vector<128x8xf32>
    %7 = tpu.matmul %4, %6, %cst {dimension_numbers = #tpu.dot_dimension_numbers<[1], [0], [0], [1], [0, 0, 1, 1], [], []>} : vector<128x128xbf16>, vector<128x8xbf16>, vector<128x8xf32> -> vector<128x8xf32>
    %8 = arith.addf %3, %7 : vector<128x8xf32>
    %c0_6 = arith.constant 0 : index
    %c0_7 = arith.constant 0 : index
    %9 = vector.load %arg10[%c0_6, %c0_7] : memref<128x8xf32, #tpu.memory_space<vmem>>, vector<128x8xf32>
    tpu.vector_store %arg10[%c0_6, %c0_7], %8 {strides = array<i32>} : memref<128x8xf32, #tpu.memory_space<vmem>>, vector<128x8xf32>,
    %c1_i32 = arith.constant 1 : i32
    %10 = arith.cmpi eq, %arg1, %c1_i32 : i32
    %11 = arith.extui %10 : i1 to i32
    %c0_i32_8 = arith.constant 0 : i32
    %12 = arith.cmpi ne, %11, %c0_i32_8 : i32
    scf.if %12 {
      %c0_9 = arith.constant 0 : index
      %c0_10 = arith.constant 0 : index
      %13 = vector.load %arg10[%c0_9, %c0_10] : memref<128x8xf32, #tpu.memory_space<vmem>>, vector<128x8xf32>
      %c0_11 = arith.constant 0 : index
      %c0_12 = arith.constant 0 : index
      %14 = vector.load %arg4[%c0_11, %c0_12] : memref<128x8xf32, #tpu.memory_space<vmem>>, vector<128x8xf32>
      %c0_13 = arith.constant 0 : index
      %c0_14 = arith.constant 0 : index
      %15 = vector.load %arg5[%c0_13, %c0_14] : memref<8x16xf32, #tpu.memory_space<vmem>>, vector<8x16xf32>
      %cst_15 = arith.constant dense<0.000000e+00> : vector<128x16xf32>
      %16 = tpu.matmul %13, %15, %cst_15 {dimension_numbers = #tpu.dot_dimension_numbers<[1], [0], [0], [1], [0, 0, 1, 1], [], []>} : vector<128x8xf32>, vector<8x16xf32>, vector<128x16xf32> -> vector<128x16xf32>
      %17 = arith.mulf %14, %13 : vector<128x8xf32>
      %c0_16 = arith.constant 0 : index
      %c0_17 = arith.constant 0 : index
      %18 = vector.load %arg6[%c0_16, %c0_17] : memref<8x16xf32, #tpu.memory_space<vmem>>, vector<8x16xf32>
      %cst_18 = arith.constant dense<0.000000e+00> : vector<128x16xf32>
      %19 = tpu.matmul %17, %18, %cst_18 {dimension_numbers = #tpu.dot_dimension_numbers<[1], [0], [0], [1], [0, 0, 1, 1], [], []>} : vector<128x8xf32>, vector<8x16xf32>, vector<128x16xf32> -> vector<128x16xf32>
      %20 = arith.addf %16, %19 : vector<128x16xf32>
      %c0_19 = arith.constant 0 : index
      %c0_20 = arith.constant 0 : index
      %21 = vector.load %arg7[%c0_19, %c0_20] : memref<1x16xf32, #tpu.memory_space<vmem>>, vector<1x16xf32>
      %22 = vector.broadcast %21 : vector<1x16xf32> to vector<128x16xf32>
      %23 = arith.addf %20, %22 : vector<128x16xf32>
      %cst_21 = arith.constant 0.000000e+00 : f32
      %24 = vector.broadcast %cst_21 : f32 to vector<128x16xf32>
      %25 = arith.cmpf oge, %23, %24 : vector<128x16xf32>
      %cst_22 = arith.constant 0.00999999977 : f32
      %26 = vector.broadcast %cst_22 : f32 to vector<128x16xf32>
      %27 = arith.mulf %26, %23 : vector<128x16xf32>
      %28 = arith.select %25, %23, %27 : vector<128x16xi1>, vector<128x16xf32>
      %29 = vector.extract_strided_slice %28 {offsets = [0, 0], sizes = [128, 8], strides = [1, 1]} : vector<128x16xf32> to vector<128x8xf32>
      %30 = vector.extract_strided_slice %28 {offsets = [0, 8], sizes = [128, 8], strides = [1, 1]} : vector<128x16xf32> to vector<128x8xf32>
      %31 = arith.addf %29, %30 : vector<128x8xf32>
      %c0_23 = arith.constant 0 : index
      %c0_24 = arith.constant 0 : index
      %32 = vector.load %arg8[%c0_23, %c0_24] : memref<128x8xf32, #tpu.memory_space<vmem>>, vector<128x8xf32>
      tpu.vector_store %arg8[%c0_23, %c0_24], %31 {strides = array<i32>} : memref<128x8xf32, #tpu.memory_space<vmem>>, vector<128x8xf32>,
      %33 = arith.mulf %31, %31 : vector<128x8xf32>
      %cst_25 = arith.constant dense<0.000000e+00> : vector<128xf32>
      %34 = vector.multi_reduction <add>, %33, %cst_25 [1] : vector<128x8xf32> to vector<128xf32>
      %35 = vector.shape_cast %34 : vector<128xf32> to vector<128x1xf32>
      %cst_26 = arith.constant 1.000000e-24 : f32
      %36 = vector.broadcast %cst_26 : f32 to vector<128x1xf32>
      %37 = arith.maximumf %35, %36 : vector<128x1xf32>
      %38 = math.rsqrt %37 : vector<128x1xf32>
      %39 = vector.broadcast %38 : vector<128x1xf32> to vector<128x8xf32>
      %40 = arith.mulf %31, %39 : vector<128x8xf32>
      %c0_27 = arith.constant 0 : index
      %c0_28 = arith.constant 0 : index
      %41 = vector.load %arg9[%c0_27, %c0_28] : memref<128x8xf32, #tpu.memory_space<vmem>>, vector<128x8xf32>
      tpu.vector_store %arg9[%c0_27, %c0_28], %40 {strides = array<i32>} : memref<128x8xf32, #tpu.memory_space<vmem>>, vector<128x8xf32>,
    } else {
    }
    return
  }
  func.func @transform_0(%arg0: i32, %arg1: i32) -> (i32, i32) {
    %c0_i32 = arith.constant 0 : i32
    return %arg0, %arg1 : i32, i32
  }
  func.func @transform_1(%arg0: i32, %arg1: i32) -> (i32, i32) {
    %c0_i32 = arith.constant 0 : i32
    %c0_i32_0 = arith.constant 0 : i32
    return %arg1, %c0_i32 : i32, i32
  }
  func.func @transform_2(%arg0: i32, %arg1: i32) -> (i32, i32) {
    %c0_i32 = arith.constant 0 : i32
    %c0_i32_0 = arith.constant 0 : i32
    return %arg0, %c0_i32 : i32, i32
  }
  func.func @transform_3(%arg0: i32, %arg1: i32) -> (i32, i32) {
    %c0_i32 = arith.constant 0 : i32
    %c0_i32_0 = arith.constant 0 : i32
    %c0_i32_1 = arith.constant 0 : i32
    return %c0_i32, %c0_i32_0 : i32, i32
  }
  func.func @transform_4(%arg0: i32, %arg1: i32) -> (i32, i32) {
    %c0_i32 = arith.constant 0 : i32
    %c0_i32_0 = arith.constant 0 : i32
    %c0_i32_1 = arith.constant 0 : i32
    return %c0_i32, %c0_i32_0 : i32, i32
  }
  func.func @transform_5(%arg0: i32, %arg1: i32) -> (i32, i32) {
    %c0_i32 = arith.constant 0 : i32
    %c0_i32_0 = arith.constant 0 : i32
    %c0_i32_1 = arith.constant 0 : i32
    return %c0_i32, %c0_i32_0 : i32, i32
  }
  func.func @transform_6(%arg0: i32, %arg1: i32) -> (i32, i32) {
    %c0_i32 = arith.constant 0 : i32
    %c0_i32_0 = arith.constant 0 : i32
    return %arg0, %c0_i32 : i32, i32
  }
  func.func @transform_7(%arg0: i32, %arg1: i32) -> (i32, i32) {
    %c0_i32 = arith.constant 0 : i32
    %c0_i32_0 = arith.constant 0 : i32
    return %arg0, %c0_i32 : i32, i32
  }
}

module attributes {stable_mosaic.version = 11 : i64} {
  func.func @kgcn_head_kernel(%arg0: i32, %arg1: memref<128x16xf32, #tpu.memory_space<vmem>>, %arg2: memref<128x16xf32, #tpu.memory_space<vmem>>, %arg3: memref<128x16xf32, #tpu.memory_space<vmem>>, %arg4: memref<128x8x16xf32, #tpu.memory_space<vmem>>, %arg5: memref<128x8x16xf32, #tpu.memory_space<vmem>>, %arg6: memref<16x16xf32, #tpu.memory_space<vmem>>, %arg7: memref<1x16xf32, #tpu.memory_space<vmem>>, %arg8: memref<128x1xf32, #tpu.memory_space<vmem>>) attributes {dimension_semantics = [#tpu.dimension_semantics<parallel>], iteration_bounds = array<i64: 1>, scalar_prefetch = 0 : i64, scratch_operands = 0 : i64, tpu.core_type = #tpu.core_type<tc>, window_params = [{transform_indices = @transform_0, window_bounds = array<i64: 128, 16>}, {transform_indices = @transform_1, window_bounds = array<i64: 128, 16>}, {transform_indices = @transform_2, window_bounds = array<i64: 128, 16>}, {transform_indices = @transform_3, window_bounds = array<i64: 128, 8, 16>}, {transform_indices = @transform_4, window_bounds = array<i64: 128, 8, 16>}, {pipeline_mode = #tpu.pipeline_mode<synchronous>, transform_indices = @transform_5, window_bounds = array<i64: 16, 16>}, {pipeline_mode = #tpu.pipeline_mode<synchronous>, transform_indices = @transform_6, window_bounds = array<i64: 1, 16>}, {transform_indices = @transform_7, window_bounds = array<i64: 128, 1>}]} {
    %c0 = arith.constant 0 : index
    %c0_0 = arith.constant 0 : index
    %0 = vector.load %arg2[%c0, %c0_0] : memref<128x16xf32, #tpu.memory_space<vmem>>, vector<128x16xf32>
    %c0_1 = arith.constant 0 : index
    %c0_2 = arith.constant 0 : index
    %c0_3 = arith.constant 0 : index
    %1 = vector.load %arg4[%c0_1, %c0_2, %c0_3] : memref<128x8x16xf32, #tpu.memory_space<vmem>>, vector<128x8x16xf32>
    %c0_4 = arith.constant 0 : index
    %c0_5 = arith.constant 0 : index
    %c0_6 = arith.constant 0 : index
    %2 = vector.load %arg5[%c0_4, %c0_5, %c0_6] : memref<128x8x16xf32, #tpu.memory_space<vmem>>, vector<128x8x16xf32>
    %3 = vector.shape_cast %0 : vector<128x16xf32> to vector<128x1x16xf32>
    %4 = vector.broadcast %3 : vector<128x1x16xf32> to vector<128x8x16xf32>
    %5 = arith.mulf %4, %2 : vector<128x8x16xf32>
    %cst = arith.constant dense<0.000000e+00> : vector<128x8xf32>
    %6 = vector.multi_reduction <add>, %5, %cst [2] : vector<128x8x16xf32> to vector<128x8xf32>
    %cst_7 = arith.constant dense<0xFF800000> : vector<128xf32>
    %7 = vector.multi_reduction <maximumf>, %6, %cst_7 [1] : vector<128x8xf32> to vector<128xf32>
    %8 = vector.shape_cast %7 : vector<128xf32> to vector<128x1xf32>
    %9 = vector.broadcast %8 : vector<128x1xf32> to vector<128x8xf32>
    %10 = arith.subf %6, %9 : vector<128x8xf32>
    %11 = math.exp %10 : vector<128x8xf32>
    %cst_8 = arith.constant dense<0.000000e+00> : vector<128xf32>
    %12 = vector.multi_reduction <add>, %11, %cst_8 [1] : vector<128x8xf32> to vector<128xf32>
    %13 = vector.shape_cast %12 : vector<128xf32> to vector<128x1xf32>
    %14 = tpu.reciprocal %13 {approx = true} : vector<128x1xf32> -> vector<128x1xf32>
    %15 = vector.broadcast %14 : vector<128x1xf32> to vector<128x8xf32>
    %16 = arith.mulf %11, %15 : vector<128x8xf32>
    %17 = vector.shape_cast %16 : vector<128x8xf32> to vector<128x8x1xf32>
    %18 = vector.broadcast %17 : vector<128x8x1xf32> to vector<128x8x16xf32>
    %19 = arith.mulf %18, %1 : vector<128x8x16xf32>
    %cst_9 = arith.constant dense<0.000000e+00> : vector<128x16xf32>
    %20 = vector.multi_reduction <add>, %19, %cst_9 [1] : vector<128x8x16xf32> to vector<128x16xf32>
    %c0_10 = arith.constant 0 : index
    %c0_11 = arith.constant 0 : index
    %21 = vector.load %arg3[%c0_10, %c0_11] : memref<128x16xf32, #tpu.memory_space<vmem>>, vector<128x16xf32>
    %22 = arith.addf %21, %20 : vector<128x16xf32>
    %c0_12 = arith.constant 0 : index
    %c0_13 = arith.constant 0 : index
    %23 = vector.load %arg6[%c0_12, %c0_13] : memref<16x16xf32, #tpu.memory_space<vmem>>, vector<16x16xf32>
    %cst_14 = arith.constant dense<0.000000e+00> : vector<128x16xf32>
    %24 = tpu.matmul %22, %23, %cst_14 {dimension_numbers = #tpu.dot_dimension_numbers<[1], [0], [0], [1], [0, 0, 1, 1], [], []>} : vector<128x16xf32>, vector<16x16xf32>, vector<128x16xf32> -> vector<128x16xf32>
    %c0_15 = arith.constant 0 : index
    %c0_16 = arith.constant 0 : index
    %25 = vector.load %arg7[%c0_15, %c0_16] : memref<1x16xf32, #tpu.memory_space<vmem>>, vector<1x16xf32>
    %26 = vector.broadcast %25 : vector<1x16xf32> to vector<128x16xf32>
    %27 = arith.addf %24, %26 : vector<128x16xf32>
    %cst_17 = arith.constant 0.000000e+00 : f32
    %28 = vector.broadcast %cst_17 : f32 to vector<128x16xf32>
    %29 = arith.maximumf %27, %28 : vector<128x16xf32>
    %c0_18 = arith.constant 0 : index
    %c0_19 = arith.constant 0 : index
    %30 = vector.load %arg1[%c0_18, %c0_19] : memref<128x16xf32, #tpu.memory_space<vmem>>, vector<128x16xf32>
    %31 = arith.mulf %30, %29 : vector<128x16xf32>
    %cst_20 = arith.constant dense<0.000000e+00> : vector<128xf32>
    %32 = vector.multi_reduction <add>, %31, %cst_20 [1] : vector<128x16xf32> to vector<128xf32>
    %33 = vector.shape_cast %32 : vector<128xf32> to vector<128x1xf32>
    %34 = math.absf %33 : vector<128x1xf32>
    %cst_21 = arith.constant 0.000000e+00 : f32
    %35 = vector.broadcast %cst_21 : f32 to vector<128x1xf32>
    %36 = arith.subf %35, %34 : vector<128x1xf32>
    %37 = math.exp %36 : vector<128x1xf32>
    %cst_22 = arith.constant 0.000000e+00 : f32
    %38 = vector.broadcast %cst_22 : f32 to vector<128x1xf32>
    %39 = arith.cmpf oge, %33, %38 : vector<128x1xf32>
    %cst_23 = arith.constant 1.000000e+00 : f32
    %40 = vector.broadcast %cst_23 : f32 to vector<128x1xf32>
    %41 = arith.select %39, %40, %37 : vector<128x1xi1>, vector<128x1xf32>
    %cst_24 = arith.constant 1.000000e+00 : f32
    %42 = vector.broadcast %cst_24 : f32 to vector<128x1xf32>
    %43 = arith.addf %42, %37 : vector<128x1xf32>
    %44 = arith.divf %41, %43 : vector<128x1xf32>
    %c0_25 = arith.constant 0 : index
    %c0_26 = arith.constant 0 : index
    %45 = vector.load %arg8[%c0_25, %c0_26] : memref<128x1xf32, #tpu.memory_space<vmem>>, vector<128x1xf32>
    tpu.vector_store %arg8[%c0_25, %c0_26], %44 {strides = array<i32>} : memref<128x1xf32, #tpu.memory_space<vmem>>, vector<128x1xf32>,
    return
  }
  func.func @transform_0(%arg0: i32) -> (i32, i32) {
    %c0_i32 = arith.constant 0 : i32
    %c0_i32_0 = arith.constant 0 : i32
    return %arg0, %c0_i32 : i32, i32
  }
  func.func @transform_1(%arg0: i32) -> (i32, i32) {
    %c0_i32 = arith.constant 0 : i32
    %c0_i32_0 = arith.constant 0 : i32
    return %arg0, %c0_i32 : i32, i32
  }
  func.func @transform_2(%arg0: i32) -> (i32, i32) {
    %c0_i32 = arith.constant 0 : i32
    %c0_i32_0 = arith.constant 0 : i32
    return %arg0, %c0_i32 : i32, i32
  }
  func.func @transform_3(%arg0: i32) -> (i32, i32, i32) {
    %c0_i32 = arith.constant 0 : i32
    %c0_i32_0 = arith.constant 0 : i32
    %c0_i32_1 = arith.constant 0 : i32
    return %arg0, %c0_i32, %c0_i32_0 : i32, i32, i32
  }
  func.func @transform_4(%arg0: i32) -> (i32, i32, i32) {
    %c0_i32 = arith.constant 0 : i32
    %c0_i32_0 = arith.constant 0 : i32
    %c0_i32_1 = arith.constant 0 : i32
    return %arg0, %c0_i32, %c0_i32_0 : i32, i32, i32
  }
  func.func @transform_5(%arg0: i32) -> (i32, i32) {
    %c0_i32 = arith.constant 0 : i32
    %c0_i32_0 = arith.constant 0 : i32
    %c0_i32_1 = arith.constant 0 : i32
    return %c0_i32, %c0_i32_0 : i32, i32
  }
  func.func @transform_6(%arg0: i32) -> (i32, i32) {
    %c0_i32 = arith.constant 0 : i32
    %c0_i32_0 = arith.constant 0 : i32
    %c0_i32_1 = arith.constant 0 : i32
    return %c0_i32, %c0_i32_0 : i32, i32
  }
  func.func @transform_7(%arg0: i32) -> (i32, i32) {
    %c0_i32 = arith.constant 0 : i32
    %c0_i32_0 = arith.constant 0 : i32
    return %arg0, %c0_i32 : i32, i32
  }
}

</mosaic_0001>

<bundles_post_ra>
// kernel: ng_kgcn_forward.2
= control target key start
LH: loop header
LB: loop body
LE: loop exit
PB: predicated region body
PF: predicated region fallthrough
CT: control target
= control target key end

     0   :  { %s2722_s0 = inlined_call_operand.vmem [shape: bf16[256,256], index: 0, kind: input, shape index: {}]   ;;  %s2723_s1 = inlined_call_operand.vmem [shape: f32[256,8], index: 1, kind: input, shape index: {}, may-alias: {1,2}]   ;;  %s2724_s2 = inlined_call_operand.vmem [shape: f32[256,8], index: 2, kind: input, shape index: {}, may-alias: {1,2}]   ;;  %s2725_s3 = inlined_call_operand.vmem [shape: f32[8,16], index: 3, kind: input, shape index: {}]   ;;  %s2726_s4 = inlined_call_operand.vmem [shape: f32[8,16], index: 4, kind: input, shape index: {}]   ;;  %s2727_s5 = inlined_call_operand.vmem [shape: f32[1,16], index: 5, kind: input, shape index: {}]   ;;  %s2728_s6 = inlined_call_operand.hbm [shape: f32[256,8], index: 6, kind: output, shape index: {0}]   ;;  %s2729_s7 = inlined_call_operand.vmem [shape: f32[256,8], index: 7, kind: output, shape index: {1}]  }
   0x1   :  { %2737 = sst [smem:[#allocation15_spill]] %s2722_s0 }
   0x2   :  { %13 = vsyncpa [#allocation5], 0 }
   0x3   :  { %15 = vsyncpa [#allocation5 + $0x1], 0  ;;  %s2120_s24 = smov 0   ;;  %s2122_s25 = smov 0  }
   0x4   :  { %s2124_s26 = smov 0   ;;  %s2126_s27 = smov 0  }
   0x5   :  { %s2128_s28 = smov 0   ;;  %s2130_s29 = smov 0  }
   0x6   :  { %s2132_s30 = smov 0   ;;  %s2134_s8 = smov 0  }
   0x7   :  { %s2136_s9 = smov 0   ;;  %s2138_s10 = smov 0  }
   0x8 LB: > { %2738 = sst [smem:[#allocation7_spill]] %s2053_s28  ;;  %s1599_s11 = sadd.s32 4294967295, %s2073_s10   ;;  %s2073_s10 = sphi %s2138_s10, %s21_s10   ;;  %s2069_s9 = sphi %s2136_s9, %s2758_s9   ;;  %s2065_s8 = sphi %s2134_s8, %s2757_s8   ;;  %s2061_s30 = sphi %s2132_s30, %s2756_s30   ;;  %s2057_s29 = sphi %s2130_s29, %s2755_s29   ;;  %s2053_s28 = sphi %s2128_s28, %s2754_s28   ;;  %s2049_s27 = sphi %s2126_s27, %s2753_s27   ;;  %s2045_s26 = sphi %s2124_s26, %s2761_s26   ;;  %s2041_s25 = sphi %s2122_s25, %s2760_s25   ;;  %s2037_s24 = sphi %s2120_s24, %s2759_s24  }
   0x9   : > { %2739 = sst [smem:[#allocation8_spill]] %s2065_s8  ;;  %s1600_s12 = sadd.s32 4294967294, %s2073_s10  }
   0xa   : > { %2740 = sst [smem:[#allocation9_spill]] %s2069_s9  ;;  %s30_s13 = sadd.s32 1, %s2065_s8 }
   0xb   : > { %s33_s14 = sadd.s32 1, %s2069_s9  ;;  %p31_p0 = scmp.ge.s32.totalorder %s30_s13, 2 }
   0xc   : > { %s42_s15 = sadd.s32 1, %s2053_s28  ;;  %p49_p1 = scmp.ne.s32.totalorder %s2053_s28, %s2049_s27 }
   0xd   : > { %p50_p2 = scmp.eq.s32.totalorder %s2073_s10, 0  ;;  %s2763_s13 = smov (%p31_p0, %s30_s13), 0 }
   0xe   : > { %2741 = sst [smem:[#allocation10_spill]] %s2763_s13  ;;  %s2765_s14 = smov (!%p31_p0, %s33_s14), %s2069_s9 }
   0xf   : > { %s38_s16 = ssub.s32 %s2065_s8, %s2763_s13  ;;  %p2183_p3 = por %p50_p2, %p49_p1 }
  0x10   : > { %p35_p4 = scmp.ge.s32.totalorder %s2765_s14, 2  ;;  %s183_s18 = sadd.s32 1, %s2045_s26 }
  0x11   : > { %p193_p5 = scmp.ne.s32.totalorder %s2045_s26, %s2041_s25  ;;  %p194_p6 = scmp.eq.s32.totalorder %s1599_s11, 3 }
  0x12   : > { %s2767_s14 = smov (%p35_p4, %s2765_s14), 0  ;;  %p199_p8 = scmp.ne.s32.totalorder %s2041_s25, %s2037_s24 }
  0x13   : > { %2743 = sst [smem:[#allocation11_spill]] %s2767_s14  ;;  %p2192_p7 = por %p194_p6, %p193_p5 }
  0x14   : > { %s37_s20 = ssub.s32 %s2069_s9, %s2767_s14  ;;  %p200_p9 = scmp.eq.s32.totalorder %s1600_s12, 3 }
  0x15   : > { %s39_s21 = sor.u32 %s38_s16, %s37_s20  ;;  %p181_p10 = scmp.eq.s32.totalorder %s37_s20, 0 }
  0x16   : > { %p40_p11 = scmp.eq.s32.totalorder %s39_s21, 0  ;;  %p2200_p12 = por %p200_p9, %p199_p8 }
  0x17   : > { %s2205_s23 = scalar_select %p181_p10, %s2045_s26, %s183_s18  }
  0x18   : > { %s2745_s22 = scalar_select %p2200_p12, 1, 0 }
  0x19   : > { %2747 = sst [smem:[#allocation13_spill]] %s2205_s23  ;;  %p1602_p13 = scmp.ge.s32.totalorder %s2073_s10, 4 }
  0x1a   : > { %2746 = sst [smem:[#allocation12_spill]] %s2745_s22 }
  0x1b   : > { %s2208_s11 = scalar_select %p40_p11, %s2053_s28, %s42_s15  }
  0x1c   : > { %251 = sbr.rel (%p1602_p13) target bundleno = 55 (0x37), region = 28 }
  0x1d   : > { %2748 = sst [smem:[#allocation14_spill]] %s2208_s11 }
  0x23   : > { %254 = sbr.rel (!%p2183_p3) target bundleno = 55 (0x37), region = 32  ;;  %s256_s12 = sand.u32 (%p2183_p3), 1, %s2053_s28  }
  0x24   : > { %s1664_s16 = sshll.u32 (%p2183_p3), %s2069_s9, 5  ;;  %s1603_s20 = sshll.u32 (%p2183_p3), %s256_s12, 6 }
  0x25   : > { %s261_s21 = sadd.s32 (%p2183_p3), %s2065_s8, %s1664_s16  ;;  %s2749_s0 = sld [smem:[#allocation15_spill]] (%p2183_p3) }
  0x26   : > { %s1606_s14 = sshll.u32 (%p2183_p3), %s261_s21, 2  ;;  %s258_s15 = scalar_lea.vmem (%p2183_p3), [#allocation3], %s1603_s20 }
  0x2b   : > { %s2219_s18 = scalar_lea.vmem %s2749_s0, %s1606_s14 }
  0x2c   : > { %v279_v0 = vld [vmem:[%s2219_s18] sm:$0xf]  ;;  %v281_v1 = vld [vmem:[%s2219_s18 + $0x8] sm:$0xf]  ;;  %v283_v2 = vld [vmem:[%s2219_s18 + $0x10] sm:$0xf] }
  0x2d   : > { %280 = vst [vmem:[%s258_s15] sm:$0xf] %v279_v0  ;;  %282 = vst [vmem:[%s258_s15 + $0x4] sm:$0xf] %v281_v1  ;;  %v285_v3 = vld [vmem:[%s2219_s18 + $0x18] sm:$0xf] }
  0x2e   : > { %284 = vst [vmem:[%s258_s15 + $0x8] sm:$0xf] %v283_v2  ;;  %v287_v4 = vld [vmem:[%s2219_s18 + $0x20] sm:$0xf]  ;;  %v289_v5 = vld [vmem:[%s2219_s18 + $0x28] sm:$0xf] }
  0x2f   : > { %286 = vst [vmem:[%s258_s15 + $0xc] sm:$0xf] %v285_v3  ;;  %288 = vst [vmem:[%s258_s15 + $0x10] sm:$0xf] %v287_v4  ;;  %v291_v6 = vld [vmem:[%s2219_s18 + $0x30] sm:$0xf] }
  0x30   : > { %290 = vst [vmem:[%s258_s15 + $0x14] sm:$0xf] %v289_v5  ;;  %v293_v7 = vld [vmem:[%s2219_s18 + $0x38] sm:$0xf]  ;;  %v295_v8 = vld [vmem:[%s2219_s18 + $0x40] sm:$0xf] }
  0x31   : > { %292 = vst [vmem:[%s258_s15 + $0x18] sm:$0xf] %v291_v6  ;;  %294 = vst [vmem:[%s258_s15 + $0x1c] sm:$0xf] %v293_v7  ;;  %v297_v9 = vld [vmem:[%s2219_s18 + $0x48] sm:$0xf] }
  0x32   : > { %296 = vst [vmem:[%s258_s15 + $0x20] sm:$0xf] %v295_v8  ;;  %v299_v10 = vld [vmem:[%s2219_s18 + $0x50] sm:$0xf]  ;;  %v301_v11 = vld [vmem:[%s2219_s18 + $0x58] sm:$0xf] }
  0x33   : > { %298 = vst [vmem:[%s258_s15 + $0x24] sm:$0xf] %v297_v9  ;;  %300 = vst [vmem:[%s258_s15 + $0x28] sm:$0xf] %v299_v10  ;;  %v303_v12 = vld [vmem:[%s2219_s18 + $0x60] sm:$0xf] }
  0x34   : > { %302 = vst [vmem:[%s258_s15 + $0x2c] sm:$0xf] %v301_v11  ;;  %v305_v13 = vld [vmem:[%s2219_s18 + $0x68] sm:$0xf]  ;;  %v307_v14 = vld [vmem:[%s2219_s18 + $0x70] sm:$0xf] }
  0x35   : > { %304 = vst [vmem:[%s258_s15 + $0x30] sm:$0xf] %v303_v12  ;;  %306 = vst [vmem:[%s258_s15 + $0x34] sm:$0xf] %v305_v13  ;;  %v309_v15 = vld [vmem:[%s2219_s18 + $0x78] sm:$0xf] }
  0x36   : > { %308 = vst [vmem:[%s258_s15 + $0x38] sm:$0xf] %v307_v14  ;;  %310 = vst [vmem:[%s258_s15 + $0x3c] sm:$0xf] %v309_v15 }
  0x37 PF: > { %p1607_p0 = scmp.ge.s32.totalorder %s2073_s10, 1  ;;  %p382_p1 = scmp.lt.s32.totalorder %s2073_s10, 5 }
  0x39   : > { %p383_p2 = pnand %p1607_p0, %p382_p1 }
  0x3a   : > { %s389_s13 = sand.u32 (!%p383_p2), 1, %s2049_s27   ;;  %s2735_s14 = sand.u32 (!%p383_p2), 1, %s2041_s25  }
  0x3b   : > { %386 = sbr.rel (%p383_p2) target bundleno = 897 (0x381), region = 81  ;;  %s1608_s17 = sshll.u32 (!%p383_p2), %s389_s13, 6 }
  0x3c   : > { %s1609_s22 = sshll.u32 (!%p383_p2), %s2735_s14, 7  ;;  %s1610_s12 = sshll.u32 (!%p383_p2), %s2057_s29, 4 }
  0x3d   : > { %s1612_s16 = sshll.u32 (!%p383_p2), %s2061_s30, 4  ;;  %p437_p3 = scmp.lt.s32.totalorder (!%p383_p2), %s1610_s12, 31 }
  0x3e   : > { %p443_p4 = scmp.lt.s32.totalorder (!%p383_p2), %s1612_s16, 31  ;;  %s2260_s28 = scalar_lea.vmem (!%p383_p2), [#allocation3], %s1608_s17 }
  0x3f   : > { %s2262_s23 = scalar_lea.vmem (!%p383_p2), [#allocation4], %s1609_s22  ;;  %p1616_p5 = scmp.ne.s32.totalorder (!%p383_p2), %s2057_s29, 0 }
  0x42   : > { %s2769_s12 = smov (!%p437_p3, %s1610_s12), 31  ;;  %s2771_s16 = smov (!%p443_p4, %s1612_s16), 31 }
  0x43   : > { %s1611_s20 = sshll.u32 %s2769_s12, 3  ;;  %s1613_s0 = sshll.u32 %s2771_s16, 3  ;;  %vm460_vm0 = vcmask (!%p1616_p5), 64512   ;;  %v2075_v16 = vmov (!%p1616_p5), 0.0  }
  0x44   : > { %s2248_s15 = scalar_lea.vmem %s2723_s1, %s1611_s20  ;;  %s2253_s27 = scalar_lea.vmem %s2724_s2, %s1613_s0  ;;  %461 = vst.msk [vmem:[#allocation2] sm:$0xff] (!%p1616_p5), %vm460_vm0, %v2075_v16  ;;  %462 = vst.msk [vmem:[#allocation2 + $0x8] sm:$0xff] (!%p1616_p5), %vm460_vm0, %v2075_v16 }
  0x45   : > { %s2258_s11 = scalar_lea.vmem %s2729_s7, %s1613_s0  ;;  %459 = sbr.rel (%p1616_p5) target bundleno = 76 (0x4c), region = 89  ;;  %463 = vst.msk [vmem:[#allocation2 + $0x10] sm:$0xff] (!%p1616_p5), %vm460_vm0, %v2075_v16  ;;  %464 = vst.msk [vmem:[#allocation2 + $0x18] sm:$0xff] (!%p1616_p5), %vm460_vm0, %v2075_v16 }
  0x46   : > { %465 = vst.msk [vmem:[#allocation2 + $0x20] sm:$0xff] (!%p1616_p5), %vm460_vm0, %v2075_v16  ;;  %466 = vst.msk [vmem:[#allocation2 + $0x28] sm:$0xff] (!%p1616_p5), %vm460_vm0, %v2075_v16 }
  0x47   : > { %467 = vst.msk [vmem:[#allocation2 + $0x30] sm:$0xff] (!%p1616_p5), %vm460_vm0, %v2075_v16  ;;  %468 = vst.msk [vmem:[#allocation2 + $0x38] sm:$0xff] (!%p1616_p5), %vm460_vm0, %v2075_v16 }
  0x48   : > { %469 = vst.msk [vmem:[#allocation2 + $0x40] sm:$0xff] (!%p1616_p5), %vm460_vm0, %v2075_v16  ;;  %470 = vst.msk [vmem:[#allocation2 + $0x48] sm:$0xff] (!%p1616_p5), %vm460_vm0, %v2075_v16 }
  0x49   : > { %471 = vst.msk [vmem:[#allocation2 + $0x50] sm:$0xff] (!%p1616_p5), %vm460_vm0, %v2075_v16  ;;  %472 = vst.msk [vmem:[#allocation2 + $0x58] sm:$0xff] (!%p1616_p5), %vm460_vm0, %v2075_v16 }
  0x4a   : > { %473 = vst.msk [vmem:[#allocation2 + $0x60] sm:$0xff] (!%p1616_p5), %vm460_vm0, %v2075_v16  ;;  %474 = vst.msk [vmem:[#allocation2 + $0x68] sm:$0xff] (!%p1616_p5), %vm460_vm0, %v2075_v16 }
  0x4b   : > { %475 = vst.msk [vmem:[#allocation2 + $0x70] sm:$0xff] (!%p1616_p5), %vm460_vm0, %v2075_v16  ;;  %476 = vst.msk [vmem:[#allocation2 + $0x78] sm:$0xff] (!%p1616_p5), %vm460_vm0, %v2075_v16 }
  0x4c PF: > { %v509_v17 = vld [vmem:[%s2248_s15] sm:$0xff]  ;;  %v510_v18 = vld [vmem:[%s2248_s15 + $0x8] sm:$0xff]  ;;  %v511_v19 = vld [vmem:[%s2248_s15 + $0x10] sm:$0xff]  ;;  %vm694_vm1 = vcmask 64512   ;;  %p1625_p6 = scmp.ne.s32.totalorder %s2057_s29, 1 }
  0x4d   : > { %v525_v20 = vpack.c.bf16 %v510_v18, %v509_v17  ;;  %v512_v21 = vld [vmem:[%s2248_s15 + $0x18] sm:$0xff]  ;;  %v513_v23 = vld [vmem:[%s2248_s15 + $0x20] sm:$0xff]  ;;  %v514_v24 = vld [vmem:[%s2248_s15 + $0x28] sm:$0xff]  ;;  %s2076_s17 = smov (!%p1625_p6), 120  }
  0x4e   : > { %v526_v22 = vpack.c.bf16 %v512_v21, %v511_v19  ;;  %v515_v25 = vld [vmem:[%s2248_s15 + $0x30] sm:$0xff]  ;;  %v527_v26 = vpack.c.bf16 %v514_v24, %v513_v23  ;;  %v516_v27 = vld [vmem:[%s2248_s15 + $0x38] sm:$0xff]  ;;  %v1923_v28 = vld [vmem:[%s2260_s28] sm:$0xff]  }
  0x4f   : > { %1716 = vmatprep.subr.bf16.mxu0 %v525_v20  ;;  %1800 = vmatprep.subr.bf16.mxu1 %v525_v20  ;;  %v1924_v29 = vld [vmem:[%s2260_s28 + $0x20] sm:$0xff]   ;;  %v528_v30 = vpack.c.bf16 %v516_v27, %v515_v25  ;;  %v518_v32 = vld [vmem:[%s2248_s15 + $0x48] sm:$0xff]  ;;  %v519_v34 = vld [vmem:[%s2248_s15 + $0x50] sm:$0xff] }
  0x50   : > { %1717 = vmatpush3.bf16.msra.mxu0 %v525_v20  ;;  %1808 = vmatpush3.bf16.msra.mxu1 %v525_v20  ;;  %v517_v31 = vld [vmem:[%s2248_s15 + $0x40] sm:$0xff]  ;;  %v520_v35 = vld [vmem:[%s2248_s15 + $0x58] sm:$0xff]  ;;  %v522_v38 = vld [vmem:[%s2248_s15 + $0x68] sm:$0xff] }
  0x51   : > { %1718 = vmatprep.subr.bf16.mxu0 %v526_v22  ;;  %1801 = vmatprep.subr.bf16.mxu1 %v526_v22  ;;  %v529_v33 = vpack.c.bf16 %v518_v32, %v517_v31  ;;  %v530_v36 = vpack.c.bf16 %v520_v35, %v519_v34  ;;  %v521_v37 = vld [vmem:[%s2248_s15 + $0x60] sm:$0xff]  ;;  %v523_v40 = vld [vmem:[%s2248_s15 + $0x70] sm:$0xff]  ;;  %v524_v41 = vld [vmem:[%s2248_s15 + $0x78] sm:$0xff] }
  0x52   : > { %1732 = vmatprep.mubr.bf16.mxu0 %v1923_v28  ;;  %1740 = vmatprep.mubr.bf16.mxu1 %v1924_v29  ;;  %v531_v39 = vpack.c.bf16 %v522_v38, %v521_v37  ;;  %v532_v42 = vpack.c.bf16 %v524_v41, %v523_v40  ;;  %v1925_v43 = vld [vmem:[%s2260_s28 + $0x8] sm:$0xff]   ;;  %v1927_v45 = vld [vmem:[%s2260_s28 + $0x10] sm:$0xff]   ;;  %v1929_v47 = vld [vmem:[%s2260_s28 + $0x18] sm:$0xff]  }
  0x53   : > { %v1926_v44 = vld [vmem:[%s2260_s28 + $0x28] sm:$0xff]   ;;  %v1928_v46 = vld [vmem:[%s2260_s28 + $0x30] sm:$0xff]   ;;  %v1930_v48 = vld [vmem:[%s2260_s28 + $0x38] sm:$0xff]  }
  0x54   : > { %1719 = vmatpush3.bf16.msra.mxu0 %v526_v22  ;;  %1809 = vmatpush3.bf16.msra.mxu1 %v526_v22  ;;  %v479_v49 = vld [vmem:[#allocation2 + $0x10] sm:$0xff]  ;;  %v477_v51 = vld [vmem:[#allocation2] sm:$0xff]  ;;  %v480_v55 = vld [vmem:[#allocation2 + $0x18] sm:$0xff] }
  0x55   : > { %1720 = vmatprep.subr.bf16.mxu0 %v527_v26  ;;  %1802 = vmatprep.subr.bf16.mxu1 %v527_v26  ;;  %v487_v50 = vld [vmem:[#allocation2 + $0x50] sm:$0xff]  ;;  %v485_v52 = vld [vmem:[#allocation2 + $0x40] sm:$0xff]  ;;  %v488_v56 = vld [vmem:[#allocation2 + $0x58] sm:$0xff] }
  0x56   : > { %v478_v61 = vld [vmem:[#allocation2 + $0x8] sm:$0xff]  ;;  %v483_v9 = vld [vmem:[#allocation2 + $0x30] sm:$0xff]  ;;  %v481_v11 = vld [vmem:[#allocation2 + $0x20] sm:$0xff] }
  0x57   : > { %v486_v62 = vld [vmem:[#allocation2 + $0x48] sm:$0xff]  ;;  %v491_v10 = vld [vmem:[#allocation2 + $0x70] sm:$0xff]  ;;  %v489_v12 = vld [vmem:[#allocation2 + $0x60] sm:$0xff] }
  0x58   : > { %1721 = vmatpush3.bf16.msra.mxu0 %v527_v26  ;;  %1810 = vmatpush3.bf16.msra.mxu1 %v527_v26  ;;  %v484_v15 = vld [vmem:[#allocation2 + $0x38] sm:$0xff]  ;;  %v482_v21 = vld [vmem:[#allocation2 + $0x28] sm:$0xff]  ;;  %v764_v34 = vld [vmem:[%s2726_s4] sm:$0xff] (!%p1625_p6) }
  0x59   : > { %1722 = vmatprep.subr.bf16.mxu0 %v528_v30  ;;  %1803 = vmatprep.subr.bf16.mxu1 %v528_v30  ;;  %v492_v16 = vld [vmem:[#allocation2 + $0x78] sm:$0xff]  ;;  %v490_v22 = vld [vmem:[#allocation2 + $0x68] sm:$0xff] }
  0x5a   : > { %v732_v38 = vld [vmem:[%s2253_s27 + $0x8] sm:$0xff] (!%p1625_p6) }
  0x5c   : > { %1723 = vmatpush3.bf16.msra.mxu0 %v528_v30  ;;  %1811 = vmatpush3.bf16.msra.mxu1 %v528_v30 }
  0x5d   : > { %1724 = vmatprep.subr.bf16.mxu0 %v529_v33  ;;  %1804 = vmatprep.subr.bf16.mxu1 %v529_v33 }
  0x60   : > { %1725 = vmatpush3.bf16.msra.mxu0 %v529_v33  ;;  %1812 = vmatpush3.bf16.msra.mxu1 %v529_v33  ;;  %v747_v33 = vld [vmem:[%s2725_s3] sm:$0xff] (!%p1625_p6) }
  0x61   : > { %1726 = vmatprep.subr.bf16.mxu0 %v530_v36  ;;  %1805 = vmatprep.subr.bf16.mxu1 %v530_v36 }
  0x64   : > { %1727 = vmatpush3.bf16.msra.mxu0 %v530_v36  ;;  %1813 = vmatpush3.bf16.msra.mxu1 %v530_v36  ;;  %v731_v36 = vld [vmem:[%s2253_s27] sm:$0xff] (!%p1625_p6) }
  0x65   : > { %1728 = vmatprep.subr.bf16.mxu0 %v531_v39  ;;  %1806 = vmatprep.subr.bf16.mxu1 %v531_v39 }
  0x68   : > { %1729 = vmatpush3.bf16.msra.mxu0 %v531_v39  ;;  %1814 = vmatpush3.bf16.msra.mxu1 %v531_v39 }
  0x69   : > { %1730 = vmatprep.subr.bf16.mxu0 %v532_v42  ;;  %1807 = vmatprep.subr.bf16.mxu1 %v532_v42 }
  0x6c   : > { %1731 = vmatpush3.bf16.msra.mxu0 %v532_v42  ;;  %1815 = vmatpush3.bf16.msra.mxu1 %v532_v42  ;;  %v733_v42 = vld [vmem:[%s2253_s27 + $0x10] sm:$0xff] (!%p1625_p6) }
  0x6d   : > { %1774 = vmatprep.subr.mxu0 (!%p1625_p6), %v747_v33  ;;  %1748 = vmatprep.subr.mxu1 (!%p1625_p6), %v764_v34 }
  0x6f   : > { %1733 = vmatmul.mubr.bf16.vlgmr.msra.gmra.mrb[0].mxu0 %v1925_v43  ;;  %1741 = vmatmul.mubr.bf16.vlgmr.msra.gmra.mrb[0].mxu1 %v1926_v44 }
  0x70   : > { %1736 = vmatprep.mubr.bf16.mxu0 %v1927_v45  ;;  %1744 = vmatprep.mubr.bf16.mxu1 %v1928_v46  ;;  %v734_v45 = vld [vmem:[%s2253_s27 + $0x18] sm:$0xff] (!%p1625_p6) }
  0x71   : > { %1775 = vmatpush3.msra.mxu0 (!%p1625_p6), %v747_v33  ;;  %1749 = vmatpush3.msra.mxu1 (!%p1625_p6), %v764_v34 }
  0x77   : > { %1737 = vmatmul.mubr.bf16.gmra.mrb[4].mxu0 %v1929_v47  ;;  %1745 = vmatmul.mubr.bf16.gmra.mrb[4].mxu1 %v1930_v48  ;;  %v735_v47 = vld [vmem:[%s2253_s27 + $0x20] sm:$0xff] (!%p1625_p6) }
 0x142   : > { %v1734_v53 = vpop.f32.mrb[0].mxu0  ;;  %v1742_v54 = vpop.f32.mrb[0].mxu1 }
 0x143   : > { %v680_v57 = vadd.f32 %v1734_v53, %v479_v49  ;;  %v688_v58 = vadd.f32 %v1742_v54, %v487_v50  ;;  %v615_v59 = vpop.f32.mrb[1].mxu0  ;;  %v647_v60 = vpop.f32.mrb[1].mxu1  ;;  %v737_v53 = vld [vmem:[%s2253_s27 + $0x30] sm:$0xff] (!%p1625_p6) }
 0x144   : > { %v678_v63 = vadd.f32 %v615_v59, %v477_v51  ;;  %v686_v0 = vadd.f32 %v647_v60, %v485_v52  ;;  %v1735_v1 = vpop.f32.mrb[2].mxu0  ;;  %v1743_v2 = vpop.f32.mrb[2].mxu1  ;;  %v736_v51 = vld [vmem:[%s2253_s27 + $0x28] sm:$0xff] (!%p1625_p6)  ;;  %v739_v59 = vld [vmem:[%s2253_s27 + $0x40] sm:$0xff] (!%p1625_p6) }
 0x145   : > { %697 = vst.msk [vmem:[#allocation2 + $0x10] sm:$0xff] %vm694_vm1, %v680_v57  ;;  %705 = vst.msk [vmem:[#allocation2 + $0x50] sm:$0xff] %vm694_vm1, %v688_v58  ;;  %v681_v3 = vadd.f32 %v1735_v1, %v480_v55  ;;  %v689_v4 = vadd.f32 %v1743_v2, %v488_v56  ;;  %v618_v5 = vpop.f32.mrb[3].mxu0  ;;  %v650_v6 = vpop.f32.mrb[3].mxu1  ;;  %v738_v57 = vld [vmem:[%s2253_s27 + $0x38] sm:$0xff] (!%p1625_p6)  ;;  %v741_v1 = vld [vmem:[%s2253_s27 + $0x50] sm:$0xff] (!%p1625_p6) }
 0x146   : > { %695 = vst.msk [vmem:[#allocation2] sm:$0xff] %vm694_vm1, %v678_v63  ;;  %703 = vst.msk [vmem:[#allocation2 + $0x40] sm:$0xff] %vm694_vm1, %v686_v0  ;;  %v679_v7 = vadd.f32 %v618_v5, %v478_v61  ;;  %v687_v8 = vadd.f32 %v650_v6, %v486_v62  ;;  %v740_v63 = vld [vmem:[%s2253_s27 + $0x48] sm:$0xff] (!%p1625_p6)  ;;  %v742_v5 = vld [vmem:[%s2253_s27 + $0x58] sm:$0xff] (!%p1625_p6) }
 0x147   : > { %698 = vst.msk [vmem:[#allocation2 + $0x18] sm:$0xff] %vm694_vm1, %v681_v3  ;;  %706 = vst.msk [vmem:[#allocation2 + $0x58] sm:$0xff] %vm694_vm1, %v689_v4 }
 0x148   : > { %696 = vst.msk [vmem:[#allocation2 + $0x8] sm:$0xff] %vm694_vm1, %v679_v7  ;;  %704 = vst.msk [vmem:[#allocation2 + $0x48] sm:$0xff] %vm694_vm1, %v687_v8  ;;  %v743_v7 = vld [vmem:[%s2253_s27 + $0x60] sm:$0xff] (!%p1625_p6) }
 0x14a   : > { %v1738_v13 = vpop.f32.mrb[4].mxu0  ;;  %v1746_v14 = vpop.f32.mrb[4].mxu1  ;;  %714 = sbr.rel (%p1625_p6) target bundleno = 871 (0x367), region = 93 }
 0x14b   : > { %v684_v17 = vadd.f32 %v1738_v13, %v483_v9  ;;  %v692_v18 = vadd.f32 %v1746_v14, %v491_v10  ;;  %v631_v19 = vpop.f32.mrb[5].mxu0  ;;  %v663_v20 = vpop.f32.mrb[5].mxu1  ;;  %v745_v13 = vld [vmem:[%s2253_s27 + $0x70] sm:$0xff] (!%p1625_p6) }
 0x14c   : > { %v682_v23 = vadd.f32 %v631_v19, %v481_v11  ;;  %v690_v24 = vadd.f32 %v663_v20, %v489_v12  ;;  %v1739_v25 = vpop.f32.mrb[6].mxu0  ;;  %v1747_v26 = vpop.f32.mrb[6].mxu1  ;;  %v717_v41 = vld [vmem:[#allocation2 + $0x10] sm:$0xff] (!%p1625_p6)  ;;  %v744_v11 = vld [vmem:[%s2253_s27 + $0x68] sm:$0xff] (!%p1625_p6) }
 0x14d   : > { %701 = vst.msk [vmem:[#allocation2 + $0x30] sm:$0xff] %vm694_vm1, %v684_v17  ;;  %709 = vst.msk [vmem:[#allocation2 + $0x70] sm:$0xff] %vm694_vm1, %v692_v18  ;;  %v685_v27 = vadd.f32 %v1739_v25, %v484_v15  ;;  %v693_v28 = vadd.f32 %v1747_v26, %v492_v16  ;;  %v634_v29 = vpop.f32.mrb[7].mxu0  ;;  %v666_v30 = vpop.f32.mrb[7].mxu1  ;;  %v715_v35 = vld [vmem:[#allocation2] sm:$0xff] (!%p1625_p6)  ;;  %v750_v44 = vmul.f32 (!%p1625_p6), %v733_v42, %v717_v41  ;;  %v725_v0 = vld [vmem:[#allocation2 + $0x50] sm:$0xff] (!%p1625_p6) }
 0x14e   : > { %699 = vst.msk [vmem:[#allocation2 + $0x20] sm:$0xff] %vm694_vm1, %v682_v23  ;;  %707 = vst.msk [vmem:[#allocation2 + $0x60] sm:$0xff] %vm694_vm1, %v690_v24  ;;  %v683_v31 = vadd.f32 %v634_v29, %v482_v21  ;;  %v691_v32 = vadd.f32 %v666_v30, %v490_v22  ;;  %1776 = vmatprep.mubr.msk.f32.mxu0 (!%p1625_p6), %vm694_vm1, %v715_v35  ;;  %v748_v39 = vmul.f32 (!%p1625_p6), %v731_v36, %v715_v35  ;;  %v718_v43 = vld [vmem:[#allocation2 + $0x18] sm:$0xff] (!%p1625_p6)  ;;  %v723_v58 = vld [vmem:[#allocation2 + $0x40] sm:$0xff] (!%p1625_p6) }
 0x14f   : > { %702 = vst.msk [vmem:[#allocation2 + $0x38] sm:$0xff] %vm694_vm1, %v685_v27  ;;  %710 = vst.msk [vmem:[#allocation2 + $0x78] sm:$0xff] %vm694_vm1, %v693_v28  ;;  %v716_v37 = vld [vmem:[#allocation2 + $0x8] sm:$0xff] (!%p1625_p6)  ;;  %v751_v48 = vmul.f32 (!%p1625_p6), %v734_v45, %v718_v43  ;;  %v756_v61 = vmul.f32 (!%p1625_p6), %v739_v59, %v723_v58  ;;  %v758_v3 = vmul.f32 (!%p1625_p6), %v741_v1, %v725_v0  ;;  %v726_v4 = vld [vmem:[#allocation2 + $0x58] sm:$0xff] (!%p1625_p6) }
 0x150   : > { %700 = vst.msk [vmem:[#allocation2 + $0x28] sm:$0xff] %vm694_vm1, %v683_v31  ;;  %708 = vst.msk [vmem:[#allocation2 + $0x68] sm:$0xff] %vm694_vm1, %v691_v32  ;;  %v749_v40 = vmul.f32 (!%p1625_p6), %v732_v38, %v716_v37  ;;  %1777 = vmatmul.mubr.msk.f32.vlgmr.msra.gmra.mrb[0].mxu0 (!%p1625_p6), %vm694_vm1, %v716_v37  ;;  %1750 = vmatprep.mubr.msk.f32.mxu1 (!%p1625_p6), %vm694_vm1, %v748_v39  ;;  %v724_v62 = vld [vmem:[#allocation2 + $0x48] sm:$0xff] (!%p1625_p6)  ;;  %v759_v8 = vmul.f32 (!%p1625_p6), %v742_v5, %v726_v4  ;;  %v746_v17 = vld [vmem:[%s2253_s27 + $0x78] sm:$0xff] (!%p1625_p6) }
 0x151   : > { %1779 = vmatprep.mubr.msk.f32.mxu0 %vm694_vm1, %v717_v41  ;;  %v757_v2 = vmul.f32 %v740_v63, %v724_v62  ;;  %v2379_v22 = vld [vmem:[%s2727_s5] ss:$0 sm:$0xff] }
 0x152   : > { %1751 = vmatmul.mubr.msk.f32.vlgmr.msra.gmra.mrb[0].mxu1 %vm694_vm1, %v749_v40 }
 0x153   : > { %1753 = vmatprep.mubr.msk.f32.mxu1 %vm694_vm1, %v750_v44 }
 0x154   : > { %1780 = vmatmul.mubr.msk.f32.gmra.mrb[2].mxu0 %vm694_vm1, %v718_v43  ;;  %v721_v52 = vld [vmem:[#allocation2 + $0x30] sm:$0xff] }
 0x155   : > { %v719_v46 = vld [vmem:[#allocation2 + $0x20] sm:$0xff]  ;;  %v754_v55 = vmul.f32 %v737_v53, %v721_v52  ;;  %v729_v12 = vld [vmem:[#allocation2 + $0x70] sm:$0xff] }
 0x156   : > { %v752_v49 = vmul.f32 %v735_v47, %v719_v46  ;;  %1782 = vmatprep.mubr.msk.f32.mxu0 %vm694_vm1, %v719_v46  ;;  %1754 = vmatmul.mubr.msk.f32.gmra.mrb[2].mxu1 %vm694_vm1, %v751_v48  ;;  %v722_v56 = vld [vmem:[#allocation2 + $0x38] sm:$0xff]  ;;  %v727_v6 = vld [vmem:[#allocation2 + $0x60] sm:$0xff]  ;;  %v762_v15 = vmul.f32 %v745_v13, %v729_v12 }
 0x157   : > { %v720_v50 = vld [vmem:[#allocation2 + $0x28] sm:$0xff]  ;;  %v755_v60 = vmul.f32 %v738_v57, %v722_v56  ;;  %v760_v9 = vmul.f32 %v743_v7, %v727_v6  ;;  %v730_v16 = vld [vmem:[#allocation2 + $0x78] sm:$0xff] }
 0x158   : > { %v753_v54 = vmul.f32 %v736_v51, %v720_v50  ;;  %1756 = vmatprep.mubr.msk.f32.mxu1 %vm694_vm1, %v752_v49  ;;  %1783 = vmatmul.mubr.msk.f32.gmra.mrb[4].mxu0 %vm694_vm1, %v720_v50  ;;  %v728_v10 = vld [vmem:[#allocation2 + $0x68] sm:$0xff]  ;;  %v763_v18 = vmul.f32 %v746_v17, %v730_v16 }
 0x159   : > { %1785 = vmatprep.mubr.msk.f32.mxu0 %vm694_vm1, %v721_v52  ;;  %v761_v14 = vmul.f32 %v744_v11, %v728_v10 }
 0x15a   : > { %1757 = vmatmul.mubr.msk.f32.gmra.mrb[4].mxu1 %vm694_vm1, %v753_v54 }
 0x15b   : > { %1759 = vmatprep.mubr.msk.f32.mxu1 %vm694_vm1, %v754_v55 }
 0x15c   : > { %1786 = vmatmul.mubr.msk.f32.gmra.mrb[6].mxu0 %vm694_vm1, %v722_v56 }
 0x15d   : > { %1788 = vmatprep.mubr.msk.f32.mxu0 %vm694_vm1, %v723_v58 }
 0x15e   : > { %1760 = vmatmul.mubr.msk.f32.gmra.mrb[6].mxu1 %vm694_vm1, %v755_v60 }
 0x15f   : > { %1762 = vmatprep.mubr.msk.f32.mxu1 %vm694_vm1, %v756_v61 }
 0x160   : > { %1789 = vmatmul.mubr.msk.f32.gmra.mrb[8].mxu0 %vm694_vm1, %v724_v62 }
 0x161   : > { %1791 = vmatprep.mubr.msk.f32.mxu0 %vm694_vm1, %v725_v0 }
 0x162   : > { %1763 = vmatmul.mubr.msk.f32.gmra.mrb[8].mxu1 %vm694_vm1, %v757_v2 }
 0x163   : > { %1765 = vmatprep.mubr.msk.f32.mxu1 %vm694_vm1, %v758_v3 }
 0x164   : > { %1792 = vmatmul.mubr.msk.f32.gmra.mrb[10].mxu0 %vm694_vm1, %v726_v4 }
 0x165   : > { %1794 = vmatprep.mubr.msk.f32.mxu0 %vm694_vm1, %v727_v6 }
 0x166   : > { %1766 = vmatmul.mubr.msk.f32.gmra.mrb[10].mxu1 %vm694_vm1, %v759_v8 }
 0x167   : > { %1768 = vmatprep.mubr.msk.f32.mxu1 %vm694_vm1, %v760_v9 }
 0x168   : > { %1795 = vmatmul.mubr.msk.f32.gmra.mrb[12].mxu0 %vm694_vm1, %v728_v10 }
 0x169   : > { %1797 = vmatprep.mubr.msk.f32.mxu0 %vm694_vm1, %v729_v12 }
 0x16a   : > { %1769 = vmatmul.mubr.msk.f32.gmra.mrb[12].mxu1 %vm694_vm1, %v761_v14 }
 0x16b   : > { %1771 = vmatprep.mubr.msk.f32.mxu1 %vm694_vm1, %v762_v15 }
 0x16c   : > { %1798 = vmatmul.mubr.msk.f32.gmra.mrb[14].mxu0 %vm694_vm1, %v730_v16 }
 0x16e   : > { %1772 = vmatmul.mubr.msk.f32.gmra.mrb[14].mxu1 %vm694_vm1, %v763_v18 }
 0x223   : > { %v1778_v19 = vpop.f32.mrb[0].mxu0 }
 0x224   : > { %v1072_v20 = vpop.f32.mrb[1].mxu0 }
 0x225   : > { %v1752_v21 = vpop.f32.mrb[0].mxu1 }
 0x226   : > { %v1078_v23 = vadd.f32 %v1778_v19, %v1752_v21  ;;  %v879_v24 = vpop.f32.mrb[1].mxu1 }
 0x227   : > { %v1073_v25 = vadd.f32 %v1072_v20, %v879_v24  ;;  %v1781_v26 = vpop.f32.mrb[2].mxu0 }
 0x228   : > { %v1159_v27 = vadd.f32 %v2379_v22, %v1078_v23  ;;  %v1082_v28 = vpop.f32.mrb[3].mxu0 }
 0x229   : > { %v1158_v29 = vadd.f32 %v2379_v22, %v1073_v25  ;;  %v1755_v30 = vpop.f32.mrb[2].mxu1 }
 0x22a   : > { %v1088_v31 = vadd.f32 %v1781_v26, %v1755_v30  ;;  %v889_v32 = vpop.f32.mrb[3].mxu1  ;;  %vm1175_vm2 = vcmp.ge.f32.partialorder %v1159_v27, 0.0  ;;  %v1191_v33 = vmul.f32 0.01, %v1159_v27 }
 0x22b   : > { %v1083_v34 = vadd.f32 %v1082_v28, %v889_v32  ;;  %v1784_v35 = vpop.f32.mrb[4].mxu0  ;;  %v1190_v39 = vmul.f32 0.01, %v1158_v29  ;;  %vm1174_vm3 = vcmp.ge.f32.partialorder %v1158_v29, 0.0 }
 0x22c   : > { %v1161_v36 = vadd.f32 %v2379_v22, %v1088_v31  ;;  %v2384_v37 = vsel %vm1175_vm2, %v1159_v27, %v1191_v33  ;;  %v1092_v38 = vpop.f32.mrb[5].mxu0 }
 0x22d   : > { %v1160_v40 = vadd.f32 %v2379_v22, %v1083_v34  ;;  %1240 = vrot.lane.b32.xlu0 %v2384_v37, %s2076_s17  ;;  %v1758_v41 = vpop.f32.mrb[4].mxu1  ;;  %v2390_v48 = vsel %vm1174_vm3, %v1158_v29, %v1190_v39 }
 0x22e   : > { %v1098_v42 = vadd.f32 %v1784_v35, %v1758_v41  ;;  %v899_v43 = vpop.f32.mrb[5].mxu1  ;;  %vm1177_vm4 = vcmp.ge.f32.partialorder %v1161_v36, 0.0  ;;  %v1193_v44 = vmul.f32 0.01, %v1161_v36 }
 0x22f   : > { %v1093_v45 = vadd.f32 %v1092_v38, %v899_v43  ;;  %v1787_v46 = vpop.f32.mrb[6].mxu0  ;;  %v1192_v51 = vmul.f32 0.01, %v1160_v40  ;;  %vm1176_vm5 = vcmp.ge.f32.partialorder %v1160_v40, 0.0 }
 0x230   : > { %v1163_v47 = vadd.f32 %v2379_v22, %v1098_v42  ;;  %v2392_v49 = vsel %vm1177_vm4, %v1161_v36, %v1193_v44  ;;  %v1102_v50 = vpop.f32.mrb[7].mxu0 }
 0x231   : > { %v1162_v52 = vadd.f32 %v2379_v22, %v1093_v45  ;;  %1238 = vrot.lane.b32.xlu0 %v2390_v48, %s2076_s17  ;;  %1244 = vrot.lane.b32.xlu1 %v2392_v49, %s2076_s17  ;;  %v1761_v53 = vpop.f32.mrb[6].mxu1  ;;  %v2400_v61 = vsel %vm1176_vm5, %v1160_v40, %v1192_v51 }
 0x232   : > { %v1108_v54 = vadd.f32 %v1787_v46, %v1761_v53  ;;  %v909_v55 = vpop.f32.mrb[7].mxu1  ;;  %v1195_v56 = vmul.f32 0.01, %v1163_v47  ;;  %vm1179_vm7 = vcmp.ge.f32.partialorder %v1163_v47, 0.0 }
 0x233   : > { %v1103_v57 = vadd.f32 %v1102_v50, %v909_v55  ;;  %v1790_v58 = vpop.f32.mrb[8].mxu0  ;;  %vm1178_vm6 = vcmp.ge.f32.partialorder %v1162_v52, 0.0  ;;  %v1194_v59 = vmul.f32 0.01, %v1162_v52 }
 0x234   : > { %v1165_v60 = vadd.f32 %v2379_v22, %v1108_v54  ;;  %v1112_v62 = vpop.f32.mrb[9].mxu0  ;;  %v2409_v4 = vsel %vm1179_vm7, %v1163_v47, %v1195_v56 }
 0x235   : > { %v1164_v63 = vadd.f32 %v2379_v22, %v1103_v57  ;;  %1242 = vrot.lane.b32.xlu1 %v2400_v61, %s2076_s17  ;;  %v1764_v0 = vpop.f32.mrb[8].mxu1  ;;  %v2405_v1 = vsel %vm1178_vm6, %v1162_v52, %v1194_v59 }
 0x236   : > { %v1118_v2 = vadd.f32 %v1790_v58, %v1764_v0  ;;  %1246 = vrot.lane.b32.xlu0 %v2405_v1, %s2076_s17  ;;  %v919_v3 = vpop.f32.mrb[9].mxu1  ;;  %v1197_v5 = vmul.f32 0.01, %v1165_v60  ;;  %vm1181_vm9 = vcmp.ge.f32.partialorder %v1165_v60, 0.0 }
 0x237   : > { %v1113_v6 = vadd.f32 %v1112_v62, %v919_v3  ;;  %v1793_v7 = vpop.f32.mrb[10].mxu0  ;;  %vm1180_vm8 = vcmp.ge.f32.partialorder %v1164_v63, 0.0  ;;  %v1196_v8 = vmul.f32 0.01, %v1164_v63 }
 0x238   : > { %v1167_v9 = vadd.f32 %v2379_v22, %v1118_v2  ;;  %v1122_v10 = vpop.f32.mrb[11].mxu0  ;;  %v2419_v16 = vsel %vm1181_vm9, %v1165_v60, %v1197_v5 }
 0x239   : > { %v1166_v11 = vadd.f32 %v2379_v22, %v1113_v6  ;;  %1248 = vrot.lane.b32.xlu1 %v2409_v4, %s2076_s17  ;;  %v1767_v12 = vpop.f32.mrb[10].mxu1  ;;  %v2415_v13 = vsel %vm1180_vm8, %v1164_v63, %v1196_v8 }
 0x23a   : > { %v1128_v14 = vadd.f32 %v1793_v7, %v1767_v12  ;;  %1250 = vrot.lane.b32.xlu0 %v2415_v13, %s2076_s17  ;;  %v929_v15 = vpop.f32.mrb[11].mxu1  ;;  %v1199_v17 = vmul.f32 0.01, %v1167_v9  ;;  %vm1183_vm11 = vcmp.ge.f32.partialorder %v1167_v9, 0.0 }
 0x23b   : > { %v1123_v18 = vadd.f32 %v1122_v10, %v929_v15  ;;  %v1796_v19 = vpop.f32.mrb[12].mxu0  ;;  %vm1182_vm10 = vcmp.ge.f32.partialorder %v1166_v11, 0.0  ;;  %v1198_v20 = vmul.f32 0.01, %v1166_v11 }
 0x23c   : > { %v1169_v21 = vadd.f32 %v2379_v22, %v1128_v14  ;;  %v1132_v23 = vpop.f32.mrb[13].mxu0  ;;  %v2429_v29 = vsel %vm1183_vm11, %v1167_v9, %v1199_v17 }
 0x23d   : > { %v1168_v24 = vadd.f32 %v2379_v22, %v1123_v18  ;;  %1252 = vrot.lane.b32.xlu1 %v2419_v16, %s2076_s17  ;;  %v1770_v25 = vpop.f32.mrb[12].mxu1  ;;  %v2425_v26 = vsel %vm1182_vm10, %v1166_v11, %v1198_v20 }
 0x23e   : > { %v1138_v27 = vadd.f32 %v1796_v19, %v1770_v25  ;;  %1254 = vrot.lane.b32.xlu0 %v2425_v26, %s2076_s17  ;;  %v939_v28 = vpop.f32.mrb[13].mxu1  ;;  %v1201_v30 = vmul.f32 0.01, %v1169_v21  ;;  %vm1185_vm13 = vcmp.ge.f32.partialorder %v1169_v21, 0.0 }
 0x23f   : > { %v1133_v31 = vadd.f32 %v1132_v23, %v939_v28  ;;  %v1799_v32 = vpop.f32.mrb[14].mxu0  ;;  %vm1184_vm12 = vcmp.ge.f32.partialorder %v1168_v24, 0.0  ;;  %v1200_v33 = vmul.f32 0.01, %v1168_v24 }
 0x240   : > { %v1171_v34 = vadd.f32 %v2379_v22, %v1138_v27  ;;  %v1142_v35 = vpop.f32.mrb[15].mxu0  ;;  %v2439_v42 = vsel %vm1185_vm13, %v1169_v21, %v1201_v30 }
 0x241   : > { %v1170_v36 = vadd.f32 %v2379_v22, %v1133_v31  ;;  %1256 = vrot.lane.b32.xlu1 %v2429_v29, %s2076_s17  ;;  %v1773_v38 = vpop.f32.mrb[14].mxu1  ;;  %v2435_v39 = vsel %vm1184_vm12, %v1168_v24, %v1200_v33 }
 0x242   : > { %v1148_v40 = vadd.f32 %v1799_v32, %v1773_v38  ;;  %1258 = vrot.lane.b32.xlu0 %v2435_v39, %s2076_s17  ;;  %v949_v41 = vpop.f32.mrb[15].mxu1  ;;  %v1203_v43 = vmul.f32 0.01, %v1171_v34  ;;  %vm1187_vm15 = vcmp.ge.f32.partialorder %v1171_v34, 0.0 }
 0x243   : > { %v1143_v44 = vadd.f32 %v1142_v35, %v949_v41  ;;  %vm1186_vm14 = vcmp.ge.f32.partialorder %v1170_v36, 0.0  ;;  %v1202_v45 = vmul.f32 0.01, %v1170_v36 }
 0x244   : > { %v1173_v46 = vadd.f32 %v2379_v22, %v1148_v40  ;;  %v2449_v51 = vsel %vm1187_vm15, %v1171_v34, %v1203_v43 }
 0x245   : > { %v1172_v47 = vadd.f32 %v2379_v22, %v1143_v44  ;;  %1260 = vrot.lane.b32.xlu1 %v2439_v42, %s2076_s17  ;;  %v2445_v50 = vsel %vm1186_vm14, %v1170_v36, %v1202_v45 }
 0x246   : > { %1262 = vrot.lane.b32.xlu0 %v2445_v50, %s2076_s17  ;;  %v1205_v52 = vmul.f32 0.01, %v1173_v46  ;;  %vm1189_vm2 = vcmp.ge.f32.partialorder %v1173_v46, 0.0 }
 0x247   : > { %vm1188_vm0 = vcmp.ge.f32.partialorder %v1172_v47, 0.0  ;;  %v1204_v53 = vmul.f32 0.01, %v1172_v47 }
 0x248   : > { %v2457_v54 = vsel %vm1189_vm2, %v1173_v46, %v1205_v52 }
 0x249   : > { %1264 = vrot.lane.b32.xlu1 %v2449_v51, %s2076_s17  ;;  %v2453_v22 = vsel %vm1188_vm0, %v1172_v47, %v1204_v53 }
 0x24a   : > { %1266 = vrot.lane.b32.xlu0 %v2453_v22, %s2076_s17 }
 0x24d   : > { %1268 = vrot.lane.b32.xlu1 %v2457_v54, %s2076_s17 }
 0x29f   : > { %v1241_v55 = vpop.permute.xlu0 %1240 }
 0x2a0   : > { %v2462_v56 = vadd.f32 %v1241_v55, %v2384_v37 }
 0x2a2   : > { %1303 = vst.msk [vmem:[%s2262_s23 + $0x8] sm:$0xff] %vm694_vm1, %v2462_v56  ;;  %v1319_v57 = vmul.f32 %v2462_v56, %v2462_v56 }
 0x2a3   : > { %v1239_v58 = vpop.permute.xlu0 %1238  ;;  %v1245_v59 = vpop.permute.xlu1 %1244 }
 0x2a4   : > { %v2470_v60 = vadd.f32 %v1239_v58, %v2390_v48  ;;  %v2473_v62 = vadd.f32 %v1245_v59, %v2392_v49  ;;  %v1337_v63 = vsel %vm694_vm1, %v1319_v57, 0.0 }
 0x2a5   : > { %1338 = vadd.xlane.f32.xlu1 %v1337_v63 }
 0x2a6   : > { %1302 = vst.msk [vmem:[%s2262_s23] sm:$0xff] %vm694_vm1, %v2470_v60  ;;  %1305 = vst.msk [vmem:[%s2262_s23 + $0x18] sm:$0xff] %vm694_vm1, %v2473_v62  ;;  %v1318_v37 = vmul.f32 %v2470_v60, %v2470_v60  ;;  %v1321_v3 = vmul.f32 %v2473_v62, %v2473_v62 }
 0x2a7   : > { %v1243_v0 = vpop.permute.xlu1 %1242 }
 0x2a8   : > { %v2485_v2 = vadd.f32 %v1243_v0, %v2400_v61  ;;  %v1247_v48 = vpop.permute.xlu0 %1246  ;;  %v1334_v49 = vsel %vm694_vm1, %v1318_v37, 0.0  ;;  %v1343_v9 = vsel %vm694_vm1, %v1321_v3, 0.0 }
 0x2a9   : > { %v2491_v5 = vadd.f32 %v1247_v48, %v2405_v1  ;;  %1335 = vadd.xlane.f32.xlu0 %v1334_v49 }
 0x2aa   : > { %1304 = vst.msk [vmem:[%s2262_s23 + $0x10] sm:$0xff] %vm694_vm1, %v2485_v2  ;;  %v1320_v1 = vmul.f32 %v2485_v2, %v2485_v2 }
 0x2ab   : > { %1306 = vst.msk [vmem:[%s2262_s23 + $0x20] sm:$0xff] %vm694_vm1, %v2491_v5  ;;  %v1249_v61 = vpop.permute.xlu1 %1248  ;;  %v1322_v6 = vmul.f32 %v2491_v5, %v2491_v5 }
 0x2ac   : > { %v2502_v7 = vadd.f32 %v1249_v61, %v2409_v4  ;;  %v1251_v8 = vpop.permute.xlu0 %1250  ;;  %v1340_v15 = vsel %vm694_vm1, %v1320_v1, 0.0 }
 0x2ad   : > { %v2508_v10 = vadd.f32 %v1251_v8, %v2415_v13  ;;  %1344 = vadd.xlane.f32.xlu0 %v1343_v9  ;;  %v1346_v11 = vsel %vm694_vm1, %v1322_v6, 0.0 }
 0x2ae   : > { %1307 = vst.msk [vmem:[%s2262_s23 + $0x28] sm:$0xff] %vm694_vm1, %v2502_v7  ;;  %1347 = vadd.xlane.f32.xlu1 %v1346_v11  ;;  %v1323_v17 = vmul.f32 %v2502_v7, %v2502_v7 }
 0x2af   : > { %1308 = vst.msk [vmem:[%s2262_s23 + $0x30] sm:$0xff] %vm694_vm1, %v2508_v10  ;;  %v1253_v4 = vpop.permute.xlu1 %1252  ;;  %v1324_v12 = vmul.f32 %v2508_v10, %v2508_v10 }
 0x2b0   : > { %v2520_v14 = vadd.f32 %v1253_v4, %v2419_v16  ;;  %v1255_v13 = vpop.permute.xlu0 %1254  ;;  %v1349_v24 = vsel %vm694_vm1, %v1323_v17, 0.0 }
 0x2b1   : > { %v2526_v18 = vadd.f32 %v1255_v13, %v2425_v26  ;;  %1341 = vadd.xlane.f32.xlu0 %v1340_v15  ;;  %v1352_v19 = vsel %vm694_vm1, %v1324_v12, 0.0 }
 0x2b2   : > { %1309 = vst.msk [vmem:[%s2262_s23 + $0x38] sm:$0xff] %vm694_vm1, %v2520_v14  ;;  %1353 = vadd.xlane.f32.xlu1 %v1352_v19  ;;  %v1325_v25 = vmul.f32 %v2520_v14, %v2520_v14 }
 0x2b3   : > { %1310 = vst.msk [vmem:[%s2262_s23 + $0x40] sm:$0xff] %vm694_vm1, %v2526_v18  ;;  %v1257_v16 = vpop.permute.xlu1 %1256  ;;  %v1326_v20 = vmul.f32 %v2526_v18, %v2526_v18 }
 0x2b4   : > { %v2538_v21 = vadd.f32 %v1257_v16, %v2429_v29  ;;  %v1259_v23 = vpop.permute.xlu0 %1258  ;;  %v1355_v32 = vsel %vm694_vm1, %v1325_v25, 0.0 }
 0x2b5   : > { %v2544_v26 = vadd.f32 %v1259_v23, %v2435_v39  ;;  %1350 = vadd.xlane.f32.xlu0 %v1349_v24  ;;  %v1358_v27 = vsel %vm694_vm1, %v1326_v20, 0.0 }
 0x2b6   : > { %1311 = vst.msk [vmem:[%s2262_s23 + $0x48] sm:$0xff] %vm694_vm1, %v2538_v21  ;;  %1359 = vadd.xlane.f32.xlu1 %v1358_v27  ;;  %v1327_v33 = vmul.f32 %v2538_v21, %v2538_v21 }
 0x2b7   : > { %1312 = vst.msk [vmem:[%s2262_s23 + $0x50] sm:$0xff] %vm694_vm1, %v2544_v26  ;;  %v1261_v28 = vpop.permute.xlu1 %1260  ;;  %v1328_v29 = vmul.f32 %v2544_v26, %v2544_v26 }
 0x2b8   : > { %v2556_v30 = vadd.f32 %v1261_v28, %v2439_v42  ;;  %v1263_v31 = vpop.permute.xlu0 %1262  ;;  %v1361_v41 = vsel %vm694_vm1, %v1327_v33, 0.0 }
 0x2b9   : > { %v2562_v34 = vadd.f32 %v1263_v31, %v2445_v50  ;;  %1356 = vadd.xlane.f32.xlu0 %v1355_v32  ;;  %v1364_v35 = vsel %vm694_vm1, %v1328_v29, 0.0 }
 0x2ba   : > { %1313 = vst.msk [vmem:[%s2262_s23 + $0x58] sm:$0xff] %vm694_vm1, %v2556_v30  ;;  %1365 = vadd.xlane.f32.xlu1 %v1364_v35  ;;  %v1329_v42 = vmul.f32 %v2556_v30, %v2556_v30 }
 0x2bb   : > { %1314 = vst.msk [vmem:[%s2262_s23 + $0x60] sm:$0xff] %vm694_vm1, %v2562_v34  ;;  %v1265_v36 = vpop.permute.xlu1 %1264  ;;  %v1330_v38 = vmul.f32 %v2562_v34, %v2562_v34 }
 0x2bc   : > { %v2574_v39 = vadd.f32 %v1265_v36, %v2449_v51  ;;  %v1267_v40 = vpop.permute.xlu0 %1266  ;;  %v1367_v50 = vsel %vm694_vm1, %v1329_v42, 0.0 }
 0x2bd   : > { %v2580_v43 = vadd.f32 %v1267_v40, %v2453_v22  ;;  %1362 = vadd.xlane.f32.xlu0 %v1361_v41  ;;  %v1370_v44 = vsel %vm694_vm1, %v1330_v38, 0.0 }
 0x2be   : > { %1315 = vst.msk [vmem:[%s2262_s23 + $0x68] sm:$0xff] %vm694_vm1, %v2574_v39  ;;  %1371 = vadd.xlane.f32.xlu1 %v1370_v44  ;;  %v1331_v51 = vmul.f32 %v2574_v39, %v2574_v39 }
 0x2bf   : > { %1316 = vst.msk [vmem:[%s2262_s23 + $0x70] sm:$0xff] %vm694_vm1, %v2580_v43  ;;  %v1269_v45 = vpop.permute.xlu1 %1268  ;;  %v1332_v46 = vmul.f32 %v2580_v43, %v2580_v43 }
 0x2c0   : > { %v2592_v47 = vadd.f32 %v1269_v45, %v2457_v54  ;;  %v1373_v53 = vsel %vm694_vm1, %v1331_v51, 0.0 }
 0x2c1   : > { %1368 = vadd.xlane.f32.xlu0 %v1367_v50  ;;  %v1376_v52 = vsel %vm694_vm1, %v1332_v46, 0.0 }
 0x2c2   : > { %1317 = vst.msk [vmem:[%s2262_s23 + $0x78] sm:$0xff] %vm694_vm1, %v2592_v47  ;;  %1377 = vadd.xlane.f32.xlu1 %v1376_v52  ;;  %v1333_v22 = vmul.f32 %v2592_v47, %v2592_v47 }
 0x2c4   : > { %v1379_v54 = vsel %vm694_vm1, %v1333_v22, 0.0 }
 0x2c5   : > { %1374 = vadd.xlane.f32.xlu0 %v1373_v53 }
 0x2c9   : > { %1380 = vadd.xlane.f32.xlu0 %v1379_v54 }
 0x332   : > { %v1339_v55 = vpop.xlane.xlu1 %1338 }
 0x333   : > { %v1383_v57 = vmax.f32 %v1339_v55, 1e-24 }
 0x335   : > { %1931 = vrsqrt.f32 %v1383_v57 }
 0x336   : > { %v1336_v58 = vpop.xlane.xlu0 %1335 }
 0x337   : > { %v1382_v59 = vmax.f32 %v1336_v58, 1e-24 }
 0x339   : > { %1933 = vrsqrt.f32 %v1382_v59 }
 0x33a   : > { %v1345_v63 = vpop.xlane.xlu0 %1344 }
 0x33b   : > { %v1385_v37 = vmax.f32 %v1345_v63, 1e-24  ;;  %v1348_v0 = vpop.xlane.xlu1 %1347 }
 0x33c   : > { %v1386_v48 = vmax.f32 %v1348_v0, 1e-24 }
 0x33d   : > { %1935 = vrsqrt.f32 %v1385_v37 }
 0x33e   : > { %1937 = vrsqrt.f32 %v1386_v48  ;;  %v1342_v49 = vpop.xlane.xlu0 %1341 }
 0x33f   : > { %v1932_v3 = vpop.eup %1931  ;;  %v1384_v61 = vmax.f32 %v1342_v49, 1e-24  ;;  %v1354_v6 = vpop.xlane.xlu1 %1353 }
 0x340   : > { %v1415_v8 = vmul.f32 %v1932_v3, %v2462_v56  ;;  %v1388_v9 = vmax.f32 %v1354_v6, 1e-24 }
 0x341   : > { %1939 = vrsqrt.f32 %v1384_v61 }
 0x342   : > { %1431 = vst.msk [vmem:[%s2258_s11 + $0x8] sm:$0xff] %vm694_vm1, %v1415_v8  ;;  %1941 = vrsqrt.f32 %v1388_v9  ;;  %v1351_v1 = vpop.xlane.xlu0 %1350 }
 0x343   : > { %v1934_v11 = vpop.eup %1933  ;;  %v1387_v4 = vmax.f32 %v1351_v1, 1e-24  ;;  %v1360_v12 = vpop.xlane.xlu1 %1359 }
 0x344   : > { %v1414_v13 = vmul.f32 %v1934_v11, %v2470_v60  ;;  %v1390_v15 = vmax.f32 %v1360_v12, 1e-24 }
 0x345   : > { %1943 = vrsqrt.f32 %v1387_v4 }
 0x346   : > { %1430 = vst.msk [vmem:[%s2258_s11] sm:$0xff] %vm694_vm1, %v1414_v13  ;;  %1945 = vrsqrt.f32 %v1390_v15  ;;  %v1357_v17 = vpop.xlane.xlu0 %1356 }
 0x347   : > { %v1936_v56 = vpop.eup %1935  ;;  %v1389_v19 = vmax.f32 %v1357_v17, 1e-24  ;;  %v1366_v16 = vpop.xlane.xlu1 %1365 }
 0x348   : > { %v1938_v20 = vpop.eup %1937  ;;  %v1417_v23 = vmul.f32 %v1936_v56, %v2473_v62  ;;  %v1392_v24 = vmax.f32 %v1366_v16, 1e-24 }
 0x349   : > { %v1418_v25 = vmul.f32 %v1938_v20, %v2491_v5  ;;  %1947 = vrsqrt.f32 %v1389_v19 }
 0x34a   : > { %1433 = vst.msk [vmem:[%s2258_s11 + $0x18] sm:$0xff] %vm694_vm1, %v1417_v23  ;;  %1949 = vrsqrt.f32 %v1392_v24  ;;  %v1363_v60 = vpop.xlane.xlu0 %1362 }
 0x34b   : > { %v1940_v27 = vpop.eup %1939  ;;  %1434 = vst.msk [vmem:[%s2258_s11 + $0x20] sm:$0xff] %vm694_vm1, %v1418_v25  ;;  %v1391_v28 = vmax.f32 %v1363_v60, 1e-24  ;;  %v1372_v29 = vpop.xlane.xlu1 %1371 }
 0x34c   : > { %v1942_v31 = vpop.eup %1941  ;;  %v1416_v32 = vmul.f32 %v1940_v27, %v2485_v2  ;;  %v1394_v62 = vmax.f32 %v1372_v29, 1e-24 }
 0x34d   : > { %v1420_v33 = vmul.f32 %v1942_v31, %v2508_v10  ;;  %1951 = vrsqrt.f32 %v1391_v28 }
 0x34e   : > { %1432 = vst.msk [vmem:[%s2258_s11 + $0x10] sm:$0xff] %vm694_vm1, %v1416_v32  ;;  %1953 = vrsqrt.f32 %v1394_v62  ;;  %v1369_v5 = vpop.xlane.xlu0 %1368 }
 0x34f   : > { %v1944_v35 = vpop.eup %1943  ;;  %1436 = vst.msk [vmem:[%s2258_s11 + $0x30] sm:$0xff] %vm694_vm1, %v1420_v33  ;;  %v1393_v36 = vmax.f32 %v1369_v5, 1e-24  ;;  %v1378_v38 = vpop.xlane.xlu1 %1377 }
 0x350   : > { %v1946_v40 = vpop.eup %1945  ;;  %v1419_v41 = vmul.f32 %v1944_v35, %v2502_v7  ;;  %v1396_v2 = vmax.f32 %v1378_v38, 1e-24 }
 0x351   : > { %v1422_v42 = vmul.f32 %v1946_v40, %v2526_v18  ;;  %1955 = vrsqrt.f32 %v1393_v36 }
 0x352   : > { %1435 = vst.msk [vmem:[%s2258_s11 + $0x28] sm:$0xff] %vm694_vm1, %v1419_v41  ;;  %1957 = vrsqrt.f32 %v1396_v2  ;;  %v1375_v10 = vpop.xlane.xlu0 %1374 }
 0x353   : > { %v1948_v44 = vpop.eup %1947  ;;  %1438 = vst.msk [vmem:[%s2258_s11 + $0x40] sm:$0xff] %vm694_vm1, %v1422_v42  ;;  %v1395_v45 = vmax.f32 %v1375_v10, 1e-24 }
 0x354   : > { %v1950_v46 = vpop.eup %1949  ;;  %v1421_v50 = vmul.f32 %v1948_v44, %v2520_v14 }
 0x355   : > { %v1424_v7 = vmul.f32 %v1950_v46, %v2544_v26  ;;  %1959 = vrsqrt.f32 %v1395_v45 }
 0x356   : > { %1437 = vst.msk [vmem:[%s2258_s11 + $0x38] sm:$0xff] %vm694_vm1, %v1421_v50  ;;  %v1381_v18 = vpop.xlane.xlu0 %1380 }
 0x357   : > { %v1952_v51 = vpop.eup %1951  ;;  %1440 = vst.msk [vmem:[%s2258_s11 + $0x50] sm:$0xff] %vm694_vm1, %v1424_v7  ;;  %v1397_v52 = vmax.f32 %v1381_v18, 1e-24 }
 0x358   : > { %v1954_v53 = vpop.eup %1953  ;;  %v1423_v22 = vmul.f32 %v1952_v51, %v2538_v21 }
 0x359   : > { %v1426_v54 = vmul.f32 %v1954_v53, %v2562_v34  ;;  %1961 = vrsqrt.f32 %v1397_v52 }
 0x35a   : > { %1439 = vst.msk [vmem:[%s2258_s11 + $0x48] sm:$0xff] %vm694_vm1, %v1423_v22 }
 0x35b   : > { %v1956_v14 = vpop.eup %1955  ;;  %1442 = vst.msk [vmem:[%s2258_s11 + $0x60] sm:$0xff] %vm694_vm1, %v1426_v54 }
 0x35c   : > { %v1958_v26 = vpop.eup %1957  ;;  %v1425_v55 = vmul.f32 %v1956_v14, %v2556_v30 }
 0x35d   : > { %v1428_v57 = vmul.f32 %v1958_v26, %v2580_v43 }
 0x35e   : > { %1441 = vst.msk [vmem:[%s2258_s11 + $0x58] sm:$0xff] %vm694_vm1, %v1425_v55 }
 0x35f   : > { %v1960_v58 = vpop.eup %1959  ;;  %1444 = vst.msk [vmem:[%s2258_s11 + $0x70] sm:$0xff] %vm694_vm1, %v1428_v57 }
 0x360   : > { %v1427_v21 = vmul.f32 %v1960_v58, %v2574_v39 }
 0x362   : > { %1443 = vst.msk [vmem:[%s2258_s11 + $0x68] sm:$0xff] %vm694_vm1, %v1427_v21 }
 0x363   : > { %v1962_v34 = vpop.eup %1961 }
 0x364   : > { %v1429_v59 = vmul.f32 %v1962_v34, %v2592_v47 }
 0x366   : > { %1445 = vst.msk [vmem:[%s2258_s11 + $0x78] sm:$0xff] %vm694_vm1, %v1429_v59 }
 0x367 PF: > { %s1665_s22 = sshll.u32 %s2061_s30, 11  ;;  %s1465_s21 = sshll.u32 %s2262_s23, 4  ;;  %s2660_s21 = int_to_ptr.vmem [resolvable:$true] %s1465_s21 }
 0x368   : > { %s2657_s20 = scalar_lea.hbm %s2728_s6, %s1665_s22  ;;  %s2750_s18 = sand.u32 1, %s2041_s25  }
 0x369   : > { %s2664_s15 = scalar_lea.sflag [#allocation5], %s2750_s18  ;;  %s1963_s11 = scalar_lea.vmem %s2660_s21, 2048 }
 0x36a   : > { %p1964_p8 = scmp.ne.s32.totalorder %s2660_s21, %s1963_s11  ;;  %s2077_s30 = smov [#allocation4]  }
 0x36b   : > { %s1967_s27 = sshll.u32 %s2077_s30, 4  ;;  %s1968_s27 = int_to_ptr.vmem [resolvable:$false] %s1967_s27 }
 0x36c   : > { %p1965_p9 = pnand %p1964_p8, %p2192_p7  ;;  %s1969_s13 = scalar_lea.vmem %s1968_s27, 4096 }
 0x36d   : > { %p1970_p11 = scmp.lt.s32.totalorder %s2660_s21, %s1968_s27  ;;  %p1971_p13 = scmp.lt.s32.totalorder %s1969_s13, %s1963_s11 }
 0x36e   : > { %p1966_p10 = pneg %p1965_p9 }
 0x36f   : > { %p1972_p0 = por %p1971_p13, %p1970_p11 }
 0x371   : > { %p1973_p1 = pnand %p1972_p0, %p1966_p10 }
 0x373   : > { %1976 = shalt.err (!%p1973_p1)
}
 0x374   : > { %s1977_s23 = scalar_lea.hbm %s2657_s20, 2048  ;;  %s1981_s8 = scalar_lea.hbm %s2728_s6, 4096 }
 0x375   : > { %p1978_p2 = scmp.ne.s32.totalorder %s2657_s20, %s1977_s23  ;;  %p1982_p5 = scmp.lt.u32.totalorder %s2657_s20, %s2728_s6 }
 0x376   : > { %p1983_p6 = scmp.lt.u32.totalorder %s1981_s8, %s1977_s23  ;;  %p1985_p9 = scmp.lt.u32.totalorder %s1977_s23, %s2657_s20 }
 0x377   : > { %p1979_p3 = pnand %p1978_p2, %p2192_p7 }
 0x378   : > { %p1984_p8 = por %p1983_p6, %p1982_p5 }
 0x379   : > { %p1980_p4 = pneg %p1979_p3 }
 0x37a   : > { %p1986_p10 = por %p1985_p9, %p1984_p8 }
 0x37c   : > { %p1987_p11 = pnand %p1986_p10, %p1980_p4 }
 0x37e   : > { %1990 = shalt.err (!%p1987_p11)
}
 0x37f   : > { %s2078_s14 = smov 128   ;;  %s2079_s17 = smov 8  }
 0x380   : > { %1832 = dma.vmem_to_hbm [thread:$0]  (%p2192_p7), %s2660_s21, 2048, %s2657_s20, %s2664_s15, %s2078_s14, %s2078_s14, %s2079_s17  }
 0x381 PF: > { %p1838_p13 = scmp.ge.s32.totalorder %s2073_s10, 2  ;;  %s1484_s12 = sand.u32 1, %s2037_s24  }
 0x382   : > { %s1485_s16 = scalar_lea.sflag [#allocation5], %s1484_s12 }
 0x383   : > { %p1835_p0 = pnand %p1838_p13, %p2200_p12 }
 0x385   : > { %2032 = dma.done.wait (!%p1835_p0), %s1485_s16, 2048  }
 0x386   : > { %2034 = vsyncadd (!%p1835_p0), %s1485_s16, 4294965248  ;;  %s21_s10 = sadd.s32 1, %s2073_s10   ;;  %s2752_s18 = sld [smem:[#allocation13_spill]] }
 0x387   : > { %p18_p1 = scmp.ge.s32.totalorder %s21_s10, 6   ;;  %s2753_s27 = sld [smem:[#allocation7_spill]] }
 0x388   : > { %s2754_s28 = sld [smem:[#allocation14_spill]]  ;;  %s2755_s29 = sld [smem:[#allocation8_spill]] }
 0x389   : > { %s2756_s30 = sld [smem:[#allocation9_spill]]  ;;  %s2757_s8 = sld [smem:[#allocation10_spill]] }
 0x38a   : > { %s2758_s9 = sld [smem:[#allocation11_spill]]  ;;  %s2759_s24 = smov %s2041_s25 }
 0x38b   : > { %s2760_s25 = smov %s2045_s26  ;;  %20 = sbr.rel (!%p18_p1) target bundleno = 8 (0x8), region = 151 }
 0x38c   : > { %s2761_s26 = smov %s2752_s18 }
 0x392   :  { %1498 = vsyncpa [#allocation5], 1 }
 0x393   :  { %1500 = vsyncpa [#allocation5 + $0x1], 1 }

// kernel: ng_kgcn_forward.3
= control target key start
LH: loop header
LB: loop body
LE: loop exit
PB: predicated region body
PF: predicated region fallthrough
CT: control target
= control target key end

     0   :  { %v318_v0 = vlaneseq  ;;  %v8973_v1 = vmov 1966171168   ;;  %vm1866_vm0 = vcmask 130048   ;;  %vm2893_vm1 = vcmask 1041409   ;;  %s13674_s1 = inlined_call_operand.vmem [shape: f32[128,16], index: 1, kind: input, shape index: {}]   ;;  %s13675_s4 = inlined_call_operand.vmem [shape: f32[128,8,16], index: 4, kind: input, shape index: {}]   ;;  %s13676_s5 = inlined_call_operand.vmem [shape: f32[16,16], index: 5, kind: input, shape index: {}]   ;;  %s13677_s3 = inlined_call_operand.vmem [shape: f32[128,8,16], index: 3, kind: input, shape index: {}]   ;;  %s13678_s2 = inlined_call_operand.vmem [shape: f32[128,16], index: 2, kind: input, shape index: {}]   ;;  %s13679_s6 = inlined_call_operand.vmem [shape: f32[1,16], index: 6, kind: input, shape index: {}]   ;;  %s13680_s0 = inlined_call_operand.vmem [shape: f32[128,16], index: 0, kind: input, shape index: {}]   ;;  %s13681_s7 = inlined_call_operand.vmem [shape: f32[128,1], index: 7, kind: output, shape index: {}]  }
   0x1   :  { %v316_v2 = vunpack.c.l.s4 %v8973_v1  ;;  %v26_v3 = vld [vmem:[%s13674_s1] sm:$0xff]  ;;  %v27_v7 = vld [vmem:[%s13674_s1 + $0x8] sm:$0xff]  ;;  %v172_v25 = vld [vmem:[%s13675_s4 + $0x10] sm:$0xff]  ;;  %vm2895_vm2 = vcmask 1042434   ;;  %vm2897_vm3 = vcmask 1043459   ;;  %vm2899_vm4 = vcmask 1044484  }
   0x2   :  { %v9019_v4 = vshrl.u32 %v318_v0, 7  ;;  %v314_v6 = vcombine.high %v26_v3, %v26_v3  ;;  %v170_v17 = vld [vmem:[%s13675_s4] sm:$0xff]  ;;  %v175_v26 = vld [vmem:[%s13675_s4 + $0x28] sm:$0xff]  ;;  %v363_v36 = vcombine.high %v27_v7, %v27_v7  ;;  %v173_v53 = vld [vmem:[%s13675_s4 + $0x18] sm:$0xff]  ;;  %vm2901_vm5 = vcmask 1045509  }
   0x3   :  { %v317_v5 = vunpack.c.0.s8 %v316_v2  ;;  %v174_v18 = vld [vmem:[%s13675_s4 + $0x20] sm:$0xff]  ;;  %v179_v41 = vld [vmem:[%s13675_s4 + $0x48] sm:$0xff]  ;;  %v176_v58 = vld [vmem:[%s13675_s4 + $0x30] sm:$0xff]  ;;  %vm2903_vm6 = vcmask 1046534   ;;  %vm2905_vm7 = vcmask 1047559   ;;  %vm3028_vm8 = vcmask 64512  }
   0x4   :  { %13919 = vst [vmem:[#allocation2_spill] sm:$0xff] %v9019_v4  ;;  %v9029_v10 = vsub.s32 0, %v9019_v4  ;;  %v178_v34 = vld [vmem:[%s13675_s4 + $0x40] sm:$0xff]  ;;  %v171_v47 = vld [vmem:[%s13675_s4 + $0x8] sm:$0xff]  ;;  %v177_v1 = vld [vmem:[%s13675_s4 + $0x38] sm:$0xff]  ;;  %vm8511_vm10 = vcmask 7168  }
   0x5   :  { %v9025_v8 = vsub.s32 %v317_v5, %v9019_v4  ;;  %v28_v2 = vld [vmem:[%s13674_s1 + $0x10] sm:$0xff] }
   0x6   :  { %13920 = vst [vmem:[#allocation3_spill] sm:$0xff] %v9029_v10 }
   0x7   :  { %v321_v9 = vrot.slane %v26_v3, %v9025_v8  ;;  %v328_v11 = vrot.slane %v314_v6, %v9025_v8  ;;  %v370_v12 = vrot.slane %v27_v7, %v9025_v8  ;;  %v377_v48 = vrot.slane %v363_v36, %v9025_v8 }
   0x9   :  { %v337_v13 = vrot.slane %v321_v9, %v9025_v8  ;;  %v344_v14 = vrot.slane %v328_v11, %v9025_v8  ;;  %v330_v15 = vcombine.high %v328_v11, %v328_v11  ;;  %v386_v16 = vrot.slane %v370_v12, %v9025_v8 }
   0xa   :  { %v378_v19 = vcombine.high %v370_v12, %v370_v12  ;;  %v329_v20 = vcombine.high %v321_v9, %v321_v9  ;;  %v379_v59 = vcombine.high %v377_v48, %v377_v48  ;;  %v393_v7 = vrot.slane %v377_v48, %v9025_v8  ;;  %v180_v9 = vld [vmem:[%s13675_s4 + $0x50] sm:$0xff] }
   0xb   :  { %v1101_v21 = vrot.slane %v337_v13, %v9029_v10  ;;  %v359_v22 = vcombine.high %v337_v13, %v337_v13  ;;  %v1117_v23 = vrot.slane %v344_v14, %v9029_v10  ;;  %v358_v24 = vrot.slane %v330_v15, %v9025_v8 }
   0xc   :  { %v1133_v27 = vrot.slane %v386_v16, %v9029_v10  ;;  %v400_v28 = vrot.slane %v378_v19, %v9025_v8  ;;  %v351_v29 = vrot.slane %v329_v20, %v9025_v8  ;;  %v360_v42 = vcombine.high %v344_v14, %v344_v14 }
   0xd   :  { %v1738_v30 = vmul.f32 %v1101_v21, %v170_v17  ;;  %v1109_v31 = vrot.slane %v359_v22, %v9029_v10  ;;  %v1742_v32 = vmul.f32 %v1117_v23, %v174_v18  ;;  %v1121_v33 = vrot.slane %v358_v24, %v9029_v10  ;;  %v182_v21 = vld [vmem:[%s13675_s4 + $0x60] sm:$0xff] }
   0xe   :  { %v1137_v35 = vrot.slane %v400_v28, %v9029_v10  ;;  %v361_v40 = vcombine.high %v351_v29, %v351_v29  ;;  %v1746_v45 = vmul.f32 %v1133_v27, %v178_v34  ;;  %v1105_v46 = vrot.slane %v351_v29, %v9029_v10  ;;  %v184_v34 = vld [vmem:[%s13675_s4 + $0x70] sm:$0xff] }
   0xf   :  { %v1867_v37 = vsel %vm1866_vm0, %v1738_v30, 0.0  ;;  %v1740_v38 = vmul.f32 %v1109_v31, %v172_v25  ;;  %v1743_v39 = vmul.f32 %v1121_v33, %v175_v26  ;;  %v1879_v44 = vsel %vm1866_vm0, %v1742_v32, 0.0  ;;  %v183_v26 = vld [vmem:[%s13675_s4 + $0x68] sm:$0xff] }
  0x10   :  { %1868 = vadd.xlane.f32.xlu0 %v1867_v37  ;;  %v1747_v50 = vmul.f32 %v1137_v35, %v179_v41  ;;  %v1113_v51 = vrot.slane %v361_v40, %v9029_v10  ;;  %v362_v52 = vcombine.high %v358_v24, %v358_v24  ;;  %v1891_v54 = vsel %vm1866_vm0, %v1746_v45, 0.0  ;;  %v186_v45 = vld [vmem:[%s13675_s4 + $0x80] sm:$0xff] }
  0x11   :  { %v1873_v43 = vsel %vm1866_vm0, %v1740_v38, 0.0  ;;  %v1882_v49 = vsel %vm1866_vm0, %v1743_v39, 0.0  ;;  %v1739_v55 = vmul.f32 %v1105_v46, %v171_v47  ;;  %v1125_v56 = vrot.slane %v360_v42, %v9029_v10  ;;  %v185_v39 = vld [vmem:[%s13675_s4 + $0x78] sm:$0xff] }
  0x12   :  { %1874 = vadd.xlane.f32.xlu1 %v1873_v43  ;;  %v408_v57 = vcombine.high %v386_v16, %v386_v16  ;;  %v1894_v60 = vsel %vm1866_vm0, %v1747_v50, 0.0  ;;  %v1741_v61 = vmul.f32 %v1113_v51, %v173_v53  ;;  %v1129_v62 = vrot.slane %v362_v52, %v9029_v10  ;;  %v181_v16 = vld [vmem:[%s13675_s4 + $0x58] sm:$0xff]  ;;  %v187_v51 = vld [vmem:[%s13675_s4 + $0x88] sm:$0xff] }
  0x13   :  { %v410_v63 = vcombine.high %v400_v28, %v400_v28  ;;  %v1870_v3 = vsel %vm1866_vm0, %v1739_v55, 0.0  ;;  %v1744_v5 = vmul.f32 %v1125_v56, %v176_v58  ;;  %v407_v11 = vrot.slane %v379_v59, %v9025_v8  ;;  %v29_v50 = vld [vmem:[%s13674_s1 + $0x18] sm:$0xff]  ;;  %v188_v56 = vld [vmem:[%s13675_s4 + $0x90] sm:$0xff] }
  0x14   :  { %1880 = vadd.xlane.f32.xlu0 %v1879_v44  ;;  %v1141_v6 = vrot.slane %v408_v57, %v9029_v10  ;;  %v1876_v12 = vsel %vm1866_vm0, %v1741_v61, 0.0  ;;  %v1745_v13 = vmul.f32 %v1129_v62, %v177_v1  ;;  %v419_v15 = vrot.slane %v28_v2, %v9025_v8  ;;  %v189_v62 = vld [vmem:[%s13675_s4 + $0x98] sm:$0xff] }
  0x15   :  { %v1145_v14 = vrot.slane %v410_v63, %v9029_v10  ;;  %v1885_v17 = vsel %vm1866_vm0, %v1744_v5, 0.0  ;;  %v1149_v19 = vrot.slane %v393_v7, %v9029_v10  ;;  %v409_v20 = vcombine.high %v393_v7, %v393_v7  ;;  %v190_v5 = vld [vmem:[%s13675_s4 + $0xa0] sm:$0xff] }
  0x16   :  { %1883 = vadd.xlane.f32.xlu1 %v1882_v49  ;;  %v1748_v18 = vmul.f32 %v1141_v6, %v180_v9  ;;  %v1153_v22 = vrot.slane %v407_v11, %v9029_v10  ;;  %v412_v23 = vcombine.high %v28_v2, %v28_v2  ;;  %v1888_v24 = vsel %vm1866_vm0, %v1745_v13, 0.0 }
  0x17   :  { %v1749_v25 = vmul.f32 %v1145_v14, %v181_v16  ;;  %v411_v27 = vcombine.high %v407_v11, %v407_v11  ;;  %v427_v28 = vcombine.high %v419_v15, %v419_v15  ;;  %v1750_v30 = vmul.f32 %v1149_v19, %v182_v21  ;;  %v191_v14 = vld [vmem:[%s13675_s4 + $0xa8] sm:$0xff]  ;;  %v192_v19 = vld [vmem:[%s13675_s4 + $0xb0] sm:$0xff] }
  0x18   :  { %1892 = vadd.xlane.f32.xlu0 %v1891_v54  ;;  %v1897_v29 = vsel %vm1866_vm0, %v1748_v18, 0.0  ;;  %v1157_v31 = vrot.slane %v409_v20, %v9029_v10  ;;  %v435_v32 = vrot.slane %v419_v15, %v9025_v8  ;;  %v1751_v33 = vmul.f32 %v1153_v22, %v183_v26 }
  0x19   :  { %v1900_v35 = vsel %vm1866_vm0, %v1749_v25, 0.0  ;;  %v1161_v36 = vrot.slane %v411_v27, %v9029_v10  ;;  %v449_v37 = vrot.slane %v427_v28, %v9025_v8  ;;  %v426_v38 = vrot.slane %v412_v23, %v9025_v8  ;;  %v193_v25 = vld [vmem:[%s13675_s4 + $0xb8] sm:$0xff] }
  0x1a   :  { %1895 = vadd.xlane.f32.xlu1 %v1894_v60  ;;  %v1903_v40 = vsel %vm1866_vm0, %v1750_v30, 0.0  ;;  %v1752_v41 = vmul.f32 %v1157_v31, %v184_v34  ;;  %v1165_v42 = vrot.slane %v435_v32, %v9029_v10  ;;  %v457_v43 = vcombine.high %v435_v32, %v435_v32  ;;  %v194_v30 = vld [vmem:[%s13675_s4 + $0xc0] sm:$0xff] }
  0x1b   :  { %v1906_v44 = vsel %vm1866_vm0, %v1751_v33, 0.0  ;;  %v1753_v46 = vmul.f32 %v1161_v36, %v185_v39  ;;  %v1169_v47 = vrot.slane %v449_v37, %v9029_v10  ;;  %v459_v48 = vcombine.high %v449_v37, %v449_v37  ;;  %v30_v36 = vld [vmem:[%s13674_s1 + $0x20] sm:$0xff]  ;;  %v195_v37 = vld [vmem:[%s13675_s4 + $0xc8] sm:$0xff] }
  0x1c   :  { %1871 = vadd.xlane.f32.xlu0 %v1870_v3  ;;  %v428_v49 = vcombine.high %v426_v38, %v426_v38  ;;  %v1909_v52 = vsel %vm1866_vm0, %v1752_v41, 0.0  ;;  %v1754_v53 = vmul.f32 %v1165_v42, %v186_v45  ;;  %v1173_v54 = vrot.slane %v457_v43, %v9029_v10  ;;  %v196_v42 = vld [vmem:[%s13675_s4 + $0xd0] sm:$0xff] }
  0x1d   :  { %v442_v55 = vrot.slane %v426_v38, %v9025_v8  ;;  %v468_v57 = vrot.slane %v29_v50, %v9025_v8  ;;  %v1912_v58 = vsel %vm1866_vm0, %v1753_v46, 0.0  ;;  %v1755_v59 = vmul.f32 %v1169_v47, %v187_v51 }
  0x1e   :  { %1877 = vadd.xlane.f32.xlu1 %v1876_v12  ;;  %v1177_v60 = vrot.slane %v459_v48, %v9029_v10  ;;  %v456_v61 = vrot.slane %v428_v49, %v9025_v8  ;;  %v1915_v63 = vsel %vm1866_vm0, %v1754_v53, 0.0  ;;  %v1756_v1 = vmul.f32 %v1173_v54, %v188_v56  ;;  %v197_v48 = vld [vmem:[%s13675_s4 + $0xd8] sm:$0xff]  ;;  %v198_v53 = vld [vmem:[%s13675_s4 + $0xe0] sm:$0xff] }
  0x1f   :  { %v1181_v2 = vrot.slane %v442_v55, %v9029_v10  ;;  %v458_v3 = vcombine.high %v442_v55, %v442_v55  ;;  %v476_v6 = vcombine.high %v468_v57, %v468_v57  ;;  %v461_v7 = vcombine.high %v29_v50, %v29_v50 }
  0x20   :  { %1886 = vadd.xlane.f32.xlu0 %v1885_v17  ;;  %v1918_v9 = vsel %vm1866_vm0, %v1755_v59, 0.0  ;;  %v1757_v11 = vmul.f32 %v1177_v60, %v189_v62  ;;  %v1185_v12 = vrot.slane %v456_v61, %v9029_v10  ;;  %v460_v13 = vcombine.high %v456_v61, %v456_v61  ;;  %v199_v60 = vld [vmem:[%s13675_s4 + $0xe8] sm:$0xff] }
  0x21   :  { %v1921_v15 = vsel %vm1866_vm0, %v1756_v1, 0.0  ;;  %v1758_v16 = vmul.f32 %v1181_v2, %v190_v5  ;;  %v1189_v17 = vrot.slane %v458_v3, %v9029_v10  ;;  %v484_v18 = vrot.slane %v468_v57, %v9025_v8  ;;  %v200_v2 = vld [vmem:[%s13675_s4 + $0xf0] sm:$0xff] }
  0x22   :  { %1889 = vadd.xlane.f32.xlu1 %v1888_v24  ;;  %v498_v20 = vrot.slane %v476_v6, %v9025_v8  ;;  %v1924_v21 = vsel %vm1866_vm0, %v1757_v11, 0.0  ;;  %v1759_v22 = vmul.f32 %v1185_v12, %v191_v14  ;;  %v1193_v23 = vrot.slane %v460_v13, %v9029_v10  ;;  %v201_v11 = vld [vmem:[%s13675_s4 + $0xf8] sm:$0xff] }
  0x23   :  { %v475_v24 = vrot.slane %v461_v7, %v9025_v8  ;;  %v1927_v26 = vsel %vm1866_vm0, %v1758_v16, 0.0  ;;  %v1760_v27 = vmul.f32 %v1189_v17, %v192_v19  ;;  %v1197_v28 = vrot.slane %v484_v18, %v9029_v10  ;;  %v202_v16 = vld [vmem:[%s13675_s4 + $0x100] sm:$0xff] }
  0x24   :  { %1898 = vadd.xlane.f32.xlu0 %v1897_v29  ;;  %v506_v29 = vcombine.high %v484_v18, %v484_v18  ;;  %v1201_v31 = vrot.slane %v498_v20, %v9029_v10  ;;  %v1930_v32 = vsel %vm1866_vm0, %v1759_v22, 0.0  ;;  %v1761_v33 = vmul.f32 %v1193_v23, %v193_v25  ;;  %v31_v23 = vld [vmem:[%s13674_s1 + $0x28] sm:$0xff] }
  0x25   :  { %v508_v34 = vcombine.high %v498_v20, %v498_v20  ;;  %v1933_v38 = vsel %vm1866_vm0, %v1760_v27, 0.0  ;;  %v1762_v39 = vmul.f32 %v1197_v28, %v194_v30  ;;  %v491_v41 = vrot.slane %v475_v24, %v9025_v8  ;;  %v203_v20 = vld [vmem:[%s13675_s4 + $0x108] sm:$0xff] }
  0x26   :  { %1901 = vadd.xlane.f32.xlu1 %v1900_v35  ;;  %v477_v35 = vcombine.high %v475_v24, %v475_v24  ;;  %v517_v43 = vrot.slane %v30_v36, %v9025_v8  ;;  %v1763_v45 = vmul.f32 %v1201_v31, %v195_v37  ;;  %v510_v55 = vcombine.high %v30_v36, %v30_v36 }
  0x27   :  { %v1209_v46 = vrot.slane %v508_v34, %v9029_v10  ;;  %v1939_v49 = vsel %vm1866_vm0, %v1762_v39, 0.0  ;;  %v1213_v51 = vrot.slane %v491_v41, %v9029_v10  ;;  %v566_v30 = vrot.slane %v31_v23, %v9025_v8  ;;  %v205_v34 = vld [vmem:[%s13675_s4 + $0x118] sm:$0xff] }
  0x28   :  { %1904 = vadd.xlane.f32.xlu0 %v1903_v40  ;;  %v1205_v40 = vrot.slane %v506_v29, %v9029_v10  ;;  %v505_v47 = vrot.slane %v477_v35, %v9025_v8  ;;  %v525_v54 = vcombine.high %v517_v43, %v517_v43  ;;  %v1942_v56 = vsel %vm1866_vm0, %v1763_v45, 0.0  ;;  %v204_v29 = vld [vmem:[%s13675_s4 + $0x110] sm:$0xff] }
  0x29   :  { %v1765_v57 = vmul.f32 %v1209_v46, %v197_v48  ;;  %v1766_v62 = vmul.f32 %v1213_v51, %v198_v53  ;;  %v533_v1 = vrot.slane %v517_v43, %v9025_v8  ;;  %v559_v45 = vcombine.high %v31_v23, %v31_v23  ;;  %v207_v46 = vld [vmem:[%s13675_s4 + $0x128] sm:$0xff]  ;;  %v208_v51 = vld [vmem:[%s13675_s4 + $0x130] sm:$0xff] }
  0x2a   :  { %1907 = vadd.xlane.f32.xlu1 %v1906_v44  ;;  %v1936_v44 = vsel %vm1866_vm0, %v1761_v33, 0.0  ;;  %v1764_v50 = vmul.f32 %v1205_v40, %v196_v42  ;;  %v509_v59 = vcombine.high %v505_v47, %v505_v47  ;;  %v547_v3 = vrot.slane %v525_v54, %v9025_v8  ;;  %v206_v40 = vld [vmem:[%s13675_s4 + $0x120] sm:$0xff] }
  0x2b   :  { %v1948_v5 = vsel %vm1866_vm0, %v1765_v57, 0.0  ;;  %v1951_v12 = vsel %vm1866_vm0, %v1766_v62, 0.0  ;;  %v1229_v14 = vrot.slane %v533_v1, %v9029_v10  ;;  %v209_v57 = vld [vmem:[%s13675_s4 + $0x138] sm:$0xff]  ;;  %v210_v62 = vld [vmem:[%s13675_s4 + $0x140] sm:$0xff] }
  0x2c   :  { %1910 = vadd.xlane.f32.xlu0 %v1909_v52  ;;  %v507_v52 = vcombine.high %v491_v41, %v491_v41  ;;  %v1945_v61 = vsel %vm1866_vm0, %v1764_v50, 0.0  ;;  %v1225_v7 = vrot.slane %v509_v59, %v9029_v10  ;;  %v1233_v17 = vrot.slane %v547_v3, %v9029_v10 }
  0x2d   :  { %v1770_v25 = vmul.f32 %v1229_v14, %v202_v16  ;;  %v574_v41 = vcombine.high %v566_v30, %v566_v30  ;;  %v582_v50 = vrot.slane %v566_v30, %v9025_v8 }
  0x2e   :  { %1913 = vadd.xlane.f32.xlu1 %v1912_v58  ;;  %v1217_v58 = vrot.slane %v505_v47, %v9029_v10  ;;  %v1769_v19 = vmul.f32 %v1225_v7, %v201_v11  ;;  %v1771_v28 = vmul.f32 %v1233_v17, %v203_v20  ;;  %v32_v7 = vld [vmem:[%s13674_s1 + $0x30] sm:$0xff]  ;;  %v213_v20 = vld [vmem:[%s13675_s4 + $0x158] sm:$0xff] }
  0x2f   :  { %v1963_v35 = vsel %vm1866_vm0, %v1770_v25, 0.0  ;;  %v615_v16 = vrot.slane %v32_v7, %v9025_v8 }
  0x30   :  { %1916 = vadd.xlane.f32.xlu0 %v1915_v63  ;;  %v1221_v63 = vrot.slane %v507_v52, %v9029_v10  ;;  %v1767_v6 = vmul.f32 %v1217_v58, %v199_v60  ;;  %v1960_v31 = vsel %vm1866_vm0, %v1769_v19, 0.0  ;;  %v1966_v39 = vsel %vm1866_vm0, %v1771_v28, 0.0 }
  0x31   :  { %v596_v52 = vrot.slane %v574_v41, %v9025_v8  ;;  %v1261_v60 = vrot.slane %v582_v50, %v9029_v10 }
  0x32   :  { %1919 = vadd.xlane.f32.xlu1 %v1918_v9  ;;  %v524_v9 = vrot.slane %v510_v55, %v9025_v8  ;;  %v1768_v13 = vmul.f32 %v1221_v63, %v200_v2  ;;  %v1954_v18 = vsel %vm1866_vm0, %v1767_v6, 0.0 }
  0x33   :  { %v1265_v63 = vrot.slane %v596_v52, %v9029_v10  ;;  %v1778_v11 = vmul.f32 %v1261_v60, %v210_v62 }
  0x34   :  { %1922 = vadd.xlane.f32.xlu0 %v1921_v15  ;;  %v555_v15 = vcombine.high %v533_v1, %v533_v1  ;;  %v526_v22 = vcombine.high %v524_v9, %v524_v9  ;;  %v1957_v24 = vsel %vm1866_vm0, %v1768_v13, 0.0  ;;  %v540_v27 = vrot.slane %v524_v9, %v9025_v8 }
  0x36   :  { %1925 = vadd.xlane.f32.xlu1 %v1924_v21  ;;  %v557_v21 = vcombine.high %v547_v3, %v547_v3  ;;  %v554_v33 = vrot.slane %v526_v22, %v9025_v8  ;;  %v1245_v37 = vrot.slane %v540_v27, %v9029_v10  ;;  %v211_v3 = vld [vmem:[%s13675_s4 + $0x148] sm:$0xff] }
  0x37   :  { %v1779_v14 = vmul.f32 %v1265_v63, %v211_v3  ;;  %v221_v3 = vld [vmem:[%s13675_s4 + $0x198] sm:$0xff] }
  0x38   :  { %1928 = vadd.xlane.f32.xlu0 %v1927_v26  ;;  %v1237_v26 = vrot.slane %v555_v15, %v9029_v10  ;;  %v1249_v43 = vrot.slane %v554_v33, %v9029_v10  ;;  %v1774_v48 = vmul.f32 %v1245_v37, %v206_v40  ;;  %v212_v15 = vld [vmem:[%s13675_s4 + $0x150] sm:$0xff] }
  0x39   :  { %v1990_v25 = vsel %vm1866_vm0, %v1779_v14, 0.0  ;;  %v216_v37 = vld [vmem:[%s13675_s4 + $0x170] sm:$0xff] }
  0x3a   :  { %1931 = vadd.xlane.f32.xlu1 %v1930_v32  ;;  %v1241_v32 = vrot.slane %v557_v21, %v9029_v10  ;;  %v1772_v36 = vmul.f32 %v1237_v26, %v204_v29  ;;  %v1775_v54 = vmul.f32 %v1249_v43, %v207_v46  ;;  %v1975_v58 = vsel %vm1866_vm0, %v1774_v48, 0.0  ;;  %v214_v26 = vld [vmem:[%s13675_s4 + $0x160] sm:$0xff]  ;;  %v217_v43 = vld [vmem:[%s13675_s4 + $0x178] sm:$0xff] }
  0x3b   :  { %v1987_v21 = vsel %vm1866_vm0, %v1778_v11, 0.0  ;;  %v218_v48 = vld [vmem:[%s13675_s4 + $0x180] sm:$0xff] }
  0x3c   :  { %1934 = vadd.xlane.f32.xlu0 %v1933_v38  ;;  %v556_v38 = vcombine.high %v540_v27, %v540_v27  ;;  %v1773_v42 = vmul.f32 %v1241_v32, %v205_v34  ;;  %v1969_v47 = vsel %vm1866_vm0, %v1772_v36, 0.0  ;;  %v1978_v1 = vsel %vm1866_vm0, %v1775_v54, 0.0  ;;  %v215_v32 = vld [vmem:[%s13675_s4 + $0x168] sm:$0xff] }
  0x3d   :  { %v623_v27 = vcombine.high %v615_v16, %v615_v16  ;;  %v631_v36 = vrot.slane %v615_v16, %v9025_v8 }
  0x3e   :  { %1937 = vadd.xlane.f32.xlu1 %v1936_v44  ;;  %v558_v44 = vcombine.high %v554_v33, %v554_v33  ;;  %v1972_v53 = vsel %vm1866_vm0, %v1773_v42, 0.0 }
  0x3f   :  { %v1293_v46 = vrot.slane %v631_v36, %v9029_v10 }
  0x40   :  { %1940 = vadd.xlane.f32.xlu0 %v1939_v49  ;;  %v1253_v49 = vrot.slane %v556_v38, %v9029_v10  ;;  %v1257_v55 = vrot.slane %v558_v44, %v9029_v10  ;;  %v645_v38 = vrot.slane %v623_v27, %v9025_v8 }
  0x42   :  { %1943 = vadd.xlane.f32.xlu1 %v1942_v56  ;;  %v573_v56 = vrot.slane %v559_v45, %v9025_v8  ;;  %v1776_v59 = vmul.f32 %v1253_v49, %v208_v51  ;;  %v1777_v2 = vmul.f32 %v1257_v55, %v209_v57  ;;  %v1297_v49 = vrot.slane %v645_v38, %v9029_v10  ;;  %v33_v55 = vld [vmem:[%s13674_s1 + $0x38] sm:$0xff] }
  0x43   :  { %v1786_v57 = vmul.f32 %v1293_v46, %v218_v48  ;;  %v664_v62 = vrot.slane %v33_v55, %v9025_v8 }
  0x44   :  { %1946 = vadd.xlane.f32.xlu0 %v1945_v61  ;;  %v604_v61 = vcombine.high %v582_v50, %v582_v50  ;;  %v575_v6 = vcombine.high %v573_v56, %v573_v56  ;;  %v1981_v9 = vsel %vm1866_vm0, %v1776_v59, 0.0  ;;  %v589_v13 = vrot.slane %v573_v56, %v9025_v8 }
  0x45   :  { %v1984_v17 = vsel %vm1866_vm0, %v1777_v2, 0.0 }
  0x46   :  { %1949 = vadd.xlane.f32.xlu1 %v1948_v5  ;;  %v606_v5 = vcombine.high %v596_v52, %v596_v52  ;;  %v603_v19 = vrot.slane %v575_v6, %v9025_v8  ;;  %v1277_v23 = vrot.slane %v589_v13, %v9029_v10  ;;  %v219_v52 = vld [vmem:[%s13675_s4 + $0x188] sm:$0xff] }
  0x47   :  { %v1787_v60 = vmul.f32 %v1297_v49, %v219_v52  ;;  %v229_v52 = vld [vmem:[%s13675_s4 + $0x1d8] sm:$0xff] }
  0x48   :  { %1952 = vadd.xlane.f32.xlu0 %v1951_v12  ;;  %v1269_v12 = vrot.slane %v604_v61, %v9029_v10  ;;  %v1281_v29 = vrot.slane %v603_v19, %v9029_v10  ;;  %v607_v30 = vcombine.high %v603_v19, %v603_v19  ;;  %v1782_v34 = vmul.f32 %v1277_v23, %v214_v26  ;;  %v220_v61 = vld [vmem:[%s13675_s4 + $0x190] sm:$0xff] }
  0x49   :  { %v2014_v11 = vsel %vm1866_vm0, %v1787_v60, 0.0  ;;  %v224_v23 = vld [vmem:[%s13675_s4 + $0x1b0] sm:$0xff] }
  0x4a   :  { %1955 = vadd.xlane.f32.xlu1 %v1954_v18  ;;  %v1273_v18 = vrot.slane %v606_v5, %v9029_v10  ;;  %v1780_v22 = vmul.f32 %v1269_v12, %v212_v15  ;;  %v1783_v40 = vmul.f32 %v1281_v29, %v215_v32  ;;  %v1289_v41 = vrot.slane %v607_v30, %v9029_v10  ;;  %v222_v12 = vld [vmem:[%s13675_s4 + $0x1a0] sm:$0xff]  ;;  %v225_v29 = vld [vmem:[%s13675_s4 + $0x1b8] sm:$0xff] }
  0x4b   :  { %v1999_v44 = vsel %vm1866_vm0, %v1782_v34, 0.0  ;;  %v2011_v5 = vsel %vm1866_vm0, %v1786_v57, 0.0  ;;  %v226_v34 = vld [vmem:[%s13675_s4 + $0x1c0] sm:$0xff] }
  0x4c   :  { %1958 = vadd.xlane.f32.xlu0 %v1957_v24  ;;  %v605_v24 = vcombine.high %v589_v13, %v589_v13  ;;  %v1781_v28 = vmul.f32 %v1273_v18, %v213_v20  ;;  %v1993_v33 = vsel %vm1866_vm0, %v1780_v22, 0.0  ;;  %v2002_v50 = vsel %vm1866_vm0, %v1783_v40, 0.0  ;;  %v223_v18 = vld [vmem:[%s13675_s4 + $0x1a8] sm:$0xff] }
  0x4d   :  { %v1785_v51 = vmul.f32 %v1289_v41, %v217_v43  ;;  %v672_v13 = vcombine.high %v664_v62, %v664_v62  ;;  %v680_v22 = vrot.slane %v664_v62, %v9025_v8  ;;  %v34_v41 = vld [vmem:[%s13674_s1 + $0x40] sm:$0xff] }
  0x4e   :  { %1961 = vadd.xlane.f32.xlu1 %v1960_v31  ;;  %v608_v31 = vcombine.high %v32_v7, %v32_v7  ;;  %v713_v48 = vrot.slane %v34_v41, %v9025_v8 }
  0x4f   :  { %v2008_v63 = vsel %vm1866_vm0, %v1785_v51, 0.0  ;;  %v1325_v32 = vrot.slane %v680_v22, %v9029_v10 }
  0x50   :  { %1964 = vadd.xlane.f32.xlu0 %v1963_v35  ;;  %v1285_v35 = vrot.slane %v605_v24, %v9029_v10  ;;  %v622_v42 = vrot.slane %v608_v31, %v9025_v8  ;;  %v694_v24 = vrot.slane %v672_v13, %v9025_v8 }
  0x51   :  { %v1794_v43 = vmul.f32 %v1325_v32, %v226_v34 }
  0x52   :  { %1967 = vadd.xlane.f32.xlu1 %v1966_v39  ;;  %v1996_v39 = vsel %vm1866_vm0, %v1781_v28, 0.0  ;;  %v1784_v45 = vmul.f32 %v1285_v35, %v216_v37  ;;  %v624_v54 = vcombine.high %v622_v42, %v622_v42  ;;  %v638_v59 = vrot.slane %v622_v42, %v9025_v8 }
  0x53   :  { %v1329_v35 = vrot.slane %v694_v24, %v9029_v10 }
  0x54   :  { %1970 = vadd.xlane.f32.xlu0 %v1969_v47  ;;  %v653_v47 = vcombine.high %v631_v36, %v631_v36  ;;  %v2005_v56 = vsel %vm1866_vm0, %v1784_v45, 0.0  ;;  %v652_v2 = vrot.slane %v624_v54, %v9025_v8  ;;  %v1309_v7 = vrot.slane %v638_v59, %v9029_v10 }
  0x56   :  { %1973 = vadd.xlane.f32.xlu1 %v1972_v53  ;;  %v655_v53 = vcombine.high %v645_v38, %v645_v38  ;;  %v1313_v15 = vrot.slane %v652_v2, %v9029_v10  ;;  %v656_v16 = vcombine.high %v652_v2, %v652_v2  ;;  %v1790_v20 = vmul.f32 %v1309_v7, %v222_v12  ;;  %v227_v38 = vld [vmem:[%s13675_s4 + $0x1c8] sm:$0xff]  ;;  %v232_v7 = vld [vmem:[%s13675_s4 + $0x1f0] sm:$0xff] }
  0x57   :  { %v1795_v46 = vmul.f32 %v1329_v35, %v227_v38  ;;  %v237_v38 = vld [vmem:[%s13675_s4 + $0x218] sm:$0xff] }
  0x58   :  { %1976 = vadd.xlane.f32.xlu0 %v1975_v58  ;;  %v1301_v58 = vrot.slane %v653_v47, %v9029_v10  ;;  %v1791_v26 = vmul.f32 %v1313_v15, %v223_v18  ;;  %v1321_v27 = vrot.slane %v656_v16, %v9029_v10  ;;  %v2023_v30 = vsel %vm1866_vm0, %v1790_v20, 0.0  ;;  %v228_v47 = vld [vmem:[%s13675_s4 + $0x1d0] sm:$0xff]  ;;  %v233_v15 = vld [vmem:[%s13675_s4 + $0x1f8] sm:$0xff]  ;;  %v234_v20 = vld [vmem:[%s13675_s4 + $0x200] sm:$0xff] }
  0x59   :  { %v2038_v57 = vsel %vm1866_vm0, %v1795_v46, 0.0 }
  0x5a   :  { %1979 = vadd.xlane.f32.xlu1 %v1978_v1  ;;  %v1305_v1 = vrot.slane %v655_v53, %v9029_v10  ;;  %v1788_v6 = vmul.f32 %v1301_v58, %v220_v61  ;;  %v2026_v36 = vsel %vm1866_vm0, %v1791_v26, 0.0  ;;  %v1793_v37 = vmul.f32 %v1321_v27, %v225_v29  ;;  %v230_v58 = vld [vmem:[%s13675_s4 + $0x1e0] sm:$0xff]  ;;  %v35_v27 = vld [vmem:[%s13674_s1 + $0x48] sm:$0xff] }
  0x5b   :  { %v2035_v53 = vsel %vm1866_vm0, %v1794_v43, 0.0  ;;  %v762_v34 = vrot.slane %v35_v27, %v9025_v8 }
  0x5c   :  { %1982 = vadd.xlane.f32.xlu0 %v1981_v9  ;;  %v654_v9 = vcombine.high %v638_v59, %v638_v59  ;;  %v1789_v14 = vmul.f32 %v1305_v1, %v221_v3  ;;  %v2017_v19 = vsel %vm1866_vm0, %v1788_v6, 0.0  ;;  %v2032_v49 = vsel %vm1866_vm0, %v1793_v37, 0.0  ;;  %v231_v1 = vld [vmem:[%s13675_s4 + $0x1e8] sm:$0xff] }
  0x5d   :  { %v721_v59 = vcombine.high %v713_v48, %v713_v48  ;;  %v729_v6 = vrot.slane %v713_v48, %v9025_v8 }
  0x5e   :  { %1985 = vadd.xlane.f32.xlu1 %v1984_v17  ;;  %v657_v17 = vcombine.high %v33_v55, %v33_v55 }
  0x5f   :  { %v1357_v18 = vrot.slane %v729_v6, %v9029_v10 }
  0x60   :  { %1988 = vadd.xlane.f32.xlu0 %v1987_v21  ;;  %v1317_v21 = vrot.slane %v654_v9, %v9029_v10  ;;  %v671_v28 = vrot.slane %v657_v17, %v9025_v8  ;;  %v743_v9 = vrot.slane %v721_v59, %v9025_v8 }
  0x61   :  { %v1802_v29 = vmul.f32 %v1357_v18, %v234_v20 }
  0x62   :  { %1991 = vadd.xlane.f32.xlu1 %v1990_v25  ;;  %v2020_v25 = vsel %vm1866_vm0, %v1789_v14, 0.0  ;;  %v1792_v31 = vmul.f32 %v1317_v21, %v224_v23  ;;  %v673_v40 = vcombine.high %v671_v28, %v671_v28  ;;  %v687_v45 = vrot.slane %v671_v28, %v9025_v8 }
  0x63   :  { %v1361_v21 = vrot.slane %v743_v9, %v9029_v10 }
  0x64   :  { %1994 = vadd.xlane.f32.xlu0 %v1993_v33  ;;  %v702_v33 = vcombine.high %v680_v22, %v680_v22  ;;  %v2029_v42 = vsel %vm1866_vm0, %v1792_v31, 0.0  ;;  %v701_v51 = vrot.slane %v673_v40, %v9025_v8  ;;  %v1341_v55 = vrot.slane %v687_v45, %v9029_v10 }
  0x66   :  { %1997 = vadd.xlane.f32.xlu1 %v1996_v39  ;;  %v704_v39 = vcombine.high %v694_v24, %v694_v24  ;;  %v1345_v61 = vrot.slane %v701_v51, %v9029_v10  ;;  %v705_v62 = vcombine.high %v701_v51, %v701_v51  ;;  %v1798_v3 = vmul.f32 %v1341_v55, %v230_v58  ;;  %v235_v24 = vld [vmem:[%s13675_s4 + $0x208] sm:$0xff]  ;;  %v240_v55 = vld [vmem:[%s13675_s4 + $0x230] sm:$0xff] }
  0x67   :  { %v1803_v32 = vmul.f32 %v1361_v21, %v235_v24  ;;  %v245_v24 = vld [vmem:[%s13675_s4 + $0x258] sm:$0xff] }
  0x68   :  { %2000 = vadd.xlane.f32.xlu0 %v1999_v44  ;;  %v1333_v44 = vrot.slane %v702_v33, %v9029_v10  ;;  %v1799_v12 = vmul.f32 %v1345_v61, %v231_v1  ;;  %v1353_v13 = vrot.slane %v705_v62, %v9029_v10  ;;  %v2047_v16 = vsel %vm1866_vm0, %v1798_v3, 0.0  ;;  %v236_v33 = vld [vmem:[%s13675_s4 + $0x210] sm:$0xff]  ;;  %v241_v61 = vld [vmem:[%s13675_s4 + $0x238] sm:$0xff]  ;;  %v242_v3 = vld [vmem:[%s13675_s4 + $0x240] sm:$0xff] }
  0x69   :  { %v2062_v43 = vsel %vm1866_vm0, %v1803_v32, 0.0 }
  0x6a   :  { %2003 = vadd.xlane.f32.xlu1 %v2002_v50  ;;  %v1337_v50 = vrot.slane %v704_v39, %v9029_v10  ;;  %v1796_v54 = vmul.f32 %v1333_v44, %v228_v47  ;;  %v2050_v22 = vsel %vm1866_vm0, %v1799_v12, 0.0  ;;  %v1801_v23 = vmul.f32 %v1353_v13, %v233_v15  ;;  %v238_v44 = vld [vmem:[%s13675_s4 + $0x220] sm:$0xff]  ;;  %v36_v13 = vld [vmem:[%s13674_s1 + $0x50] sm:$0xff] }
  0x6b   :  { %v2059_v39 = vsel %vm1866_vm0, %v1802_v29, 0.0  ;;  %v811_v20 = vrot.slane %v36_v13, %v9025_v8 }
  0x6c   :  { %2006 = vadd.xlane.f32.xlu0 %v2005_v56  ;;  %v703_v56 = vcombine.high %v687_v45, %v687_v45  ;;  %v1797_v60 = vmul.f32 %v1337_v50, %v229_v52  ;;  %v2041_v2 = vsel %vm1866_vm0, %v1796_v54, 0.0  ;;  %v2056_v35 = vsel %vm1866_vm0, %v1801_v23, 0.0  ;;  %v239_v50 = vld [vmem:[%s13675_s4 + $0x228] sm:$0xff] }
  0x6d   :  { %v770_v45 = vcombine.high %v762_v34, %v762_v34  ;;  %v778_v54 = vrot.slane %v762_v34, %v9025_v8  ;;  %v819_v32 = vcombine.high %v811_v20, %v811_v20 }
  0x6e   :  { %2009 = vadd.xlane.f32.xlu1 %v2008_v63  ;;  %v706_v63 = vcombine.high %v34_v41, %v34_v41 }
  0x6f   :  { %v1389_v1 = vrot.slane %v778_v54, %v9029_v10 }
  0x70   :  { %2012 = vadd.xlane.f32.xlu0 %v2011_v5  ;;  %v1349_v5 = vrot.slane %v703_v56, %v9029_v10  ;;  %v720_v14 = vrot.slane %v706_v63, %v9025_v8  ;;  %v792_v56 = vrot.slane %v770_v45, %v9025_v8  ;;  %v841_v45 = vrot.slane %v819_v32, %v9025_v8 }
  0x71   :  { %v1810_v15 = vmul.f32 %v1389_v1, %v242_v3 }
  0x72   :  { %2015 = vadd.xlane.f32.xlu1 %v2014_v11  ;;  %v2044_v11 = vsel %vm1866_vm0, %v1797_v60, 0.0  ;;  %v1800_v17 = vmul.f32 %v1349_v5, %v232_v7  ;;  %v722_v26 = vcombine.high %v720_v14, %v720_v14  ;;  %v736_v31 = vrot.slane %v720_v14, %v9025_v8 }
  0x73   :  { %v1393_v5 = vrot.slane %v792_v56, %v9029_v10 }
  0x74   :  { %2018 = vadd.xlane.f32.xlu0 %v2017_v19  ;;  %v751_v19 = vcombine.high %v729_v6, %v729_v6  ;;  %v2053_v28 = vsel %vm1866_vm0, %v1800_v17, 0.0  ;;  %v750_v37 = vrot.slane %v722_v26, %v9025_v8  ;;  %v1373_v41 = vrot.slane %v736_v31, %v9029_v10 }
  0x75   :  { %v2083_v26 = vsel %vm1866_vm0, %v1810_v15, 0.0 }
  0x76   :  { %2021 = vadd.xlane.f32.xlu1 %v2020_v25  ;;  %v753_v25 = vcombine.high %v743_v9, %v743_v9  ;;  %v1377_v47 = vrot.slane %v750_v37, %v9029_v10  ;;  %v754_v48 = vcombine.high %v750_v37, %v750_v37  ;;  %v1806_v52 = vmul.f32 %v1373_v41, %v238_v44  ;;  %v243_v9 = vld [vmem:[%s13675_s4 + $0x248] sm:$0xff]  ;;  %v248_v44 = vld [vmem:[%s13675_s4 + $0x270] sm:$0xff] }
  0x77   :  { %v1811_v18 = vmul.f32 %v1393_v5, %v243_v9  ;;  %v804_v37 = vcombine.high %v36_v13, %v36_v13 }
  0x78   :  { %2024 = vadd.xlane.f32.xlu0 %v2023_v30  ;;  %v1365_v30 = vrot.slane %v751_v19, %v9029_v10  ;;  %v1807_v58 = vmul.f32 %v1377_v47, %v239_v50  ;;  %v1385_v59 = vrot.slane %v754_v48, %v9029_v10  ;;  %v2071_v62 = vsel %vm1866_vm0, %v1806_v52, 0.0  ;;  %v244_v19 = vld [vmem:[%s13675_s4 + $0x250] sm:$0xff] }
  0x79   :  { %v818_v50 = vrot.slane %v804_v37, %v9025_v8 }
  0x7a   :  { %2027 = vadd.xlane.f32.xlu1 %v2026_v36  ;;  %v1369_v36 = vrot.slane %v753_v25, %v9029_v10  ;;  %v1804_v40 = vmul.f32 %v1365_v30, %v236_v33  ;;  %v2074_v6 = vsel %vm1866_vm0, %v1807_v58, 0.0  ;;  %v1809_v7 = vmul.f32 %v1385_v59, %v241_v61 }
  0x7b   :  { %v2086_v30 = vsel %vm1866_vm0, %v1811_v18, 0.0  ;;  %v1425_v58 = vrot.slane %v841_v45, %v9029_v10  ;;  %v820_v1 = vcombine.high %v818_v50, %v818_v50  ;;  %v834_v9 = vrot.slane %v818_v50, %v9025_v8  ;;  %v253_v18 = vld [vmem:[%s13675_s4 + $0x298] sm:$0xff] }
  0x7c   :  { %2030 = vadd.xlane.f32.xlu0 %v2029_v42  ;;  %v752_v42 = vcombine.high %v736_v31, %v736_v31  ;;  %v1805_v46 = vmul.f32 %v1369_v36, %v237_v38  ;;  %v2065_v51 = vsel %vm1866_vm0, %v1804_v40, 0.0  ;;  %v2080_v21 = vsel %vm1866_vm0, %v1809_v7, 0.0  ;;  %v246_v31 = vld [vmem:[%s13675_s4 + $0x260] sm:$0xff]  ;;  %v247_v38 = vld [vmem:[%s13675_s4 + $0x268] sm:$0xff] }
  0x7e   :  { %2033 = vadd.xlane.f32.xlu1 %v2032_v49  ;;  %v755_v49 = vcombine.high %v35_v27, %v35_v27 }
  0x80   :  { %2036 = vadd.xlane.f32.xlu0 %v2035_v53  ;;  %v1381_v53 = vrot.slane %v752_v42, %v9029_v10  ;;  %v769_v60 = vrot.slane %v755_v49, %v9025_v8 }
  0x82   :  { %2039 = vadd.xlane.f32.xlu1 %v2038_v57  ;;  %v2068_v57 = vsel %vm1866_vm0, %v1805_v46, 0.0  ;;  %v1808_v63 = vmul.f32 %v1381_v53, %v240_v55  ;;  %v771_v12 = vcombine.high %v769_v60, %v769_v60  ;;  %v785_v17 = vrot.slane %v769_v60, %v9025_v8 }
  0x84   :  { %2042 = vadd.xlane.f32.xlu0 %v2041_v2  ;;  %v800_v2 = vcombine.high %v778_v54, %v778_v54  ;;  %v2077_v14 = vsel %vm1866_vm0, %v1808_v63, 0.0  ;;  %v799_v23 = vrot.slane %v771_v12, %v9025_v8  ;;  %v801_v29 = vcombine.high %v785_v17, %v785_v17  ;;  %v252_v12 = vld [vmem:[%s13675_s4 + $0x290] sm:$0xff] }
  0x85   :  { %v851_v63 = vcombine.high %v841_v45, %v841_v45 }
  0x86   :  { %2045 = vadd.xlane.f32.xlu1 %v2044_v11  ;;  %v802_v11 = vcombine.high %v792_v56, %v792_v56  ;;  %v803_v36 = vcombine.high %v799_v23, %v799_v23  ;;  %v1413_v42 = vrot.slane %v801_v29, %v9029_v10 }
  0x88   :  { %2048 = vadd.xlane.f32.xlu0 %v2047_v16  ;;  %v1397_v16 = vrot.slane %v800_v2, %v9029_v10  ;;  %v1417_v49 = vrot.slane %v803_v36, %v9029_v10  ;;  %v1816_v54 = vmul.f32 %v1413_v42, %v248_v44  ;;  %v37_v2 = vld [vmem:[%s13674_s1 + $0x58] sm:$0xff] }
  0x89   :  { %v860_v13 = vrot.slane %v37_v2, %v9025_v8  ;;  %v853_v32 = vcombine.high %v37_v2, %v37_v2  ;;  %v38_v2 = vld [vmem:[%s13674_s1 + $0x60] sm:$0xff] }
  0x8a   :  { %2051 = vadd.xlane.f32.xlu1 %v2050_v22  ;;  %v1401_v22 = vrot.slane %v802_v11, %v9029_v10  ;;  %v1812_v27 = vmul.f32 %v1397_v16, %v244_v19  ;;  %v2101_v5 = vsel %vm1866_vm0, %v1816_v54, 0.0  ;;  %v1433_v16 = vrot.slane %v851_v63, %v9029_v10 }
  0x8c   :  { %2054 = vadd.xlane.f32.xlu0 %v2053_v28  ;;  %v1405_v28 = vrot.slane %v785_v17, %v9029_v10  ;;  %v1813_v34 = vmul.f32 %v1401_v22, %v245_v24  ;;  %v2089_v40 = vsel %vm1866_vm0, %v1812_v27, 0.0  ;;  %v848_v17 = vrot.slane %v820_v1, %v9025_v8 }
  0x8d   :  { %v1437_v22 = vrot.slane %v834_v9, %v9029_v10  ;;  %v868_v27 = vcombine.high %v860_v13, %v860_v13  ;;  %v1821_v29 = vmul.f32 %v1433_v16, %v253_v18 }
  0x8e   :  { %2057 = vadd.xlane.f32.xlu1 %v2056_v35  ;;  %v1409_v35 = vrot.slane %v799_v23, %v9029_v10  ;;  %v1814_v41 = vmul.f32 %v1405_v28, %v246_v31  ;;  %v2092_v47 = vsel %vm1866_vm0, %v1813_v34, 0.0  ;;  %v850_v23 = vcombine.high %v834_v9, %v834_v9  ;;  %v255_v34 = vld [vmem:[%s13675_s4 + $0x2a8] sm:$0xff] }
  0x8f   :  { %v852_v31 = vcombine.high %v848_v17, %v848_v17  ;;  %v890_v42 = vrot.slane %v868_v27, %v9025_v8  ;;  %v2116_v44 = vsel %vm1866_vm0, %v1821_v29, 0.0 }
  0x90   :  { %2060 = vadd.xlane.f32.xlu0 %v2059_v39  ;;  %v1815_v48 = vmul.f32 %v1409_v35, %v247_v38  ;;  %v2095_v53 = vsel %vm1866_vm0, %v1814_v41, 0.0  ;;  %v1445_v38 = vrot.slane %v850_v23, %v9029_v10  ;;  %v256_v41 = vld [vmem:[%s13675_s4 + $0x2b0] sm:$0xff] }
  0x91   :  { %v900_v63 = vcombine.high %v890_v42, %v890_v42 }
  0x92   :  { %2063 = vadd.xlane.f32.xlu1 %v2062_v43  ;;  %v827_v43 = vrot.slane %v811_v20, %v9025_v8  ;;  %v2098_v60 = vsel %vm1866_vm0, %v1815_v48, 0.0  ;;  %v867_v48 = vrot.slane %v853_v32, %v9025_v8 }
  0x94   :  { %2066 = vadd.xlane.f32.xlu0 %v2065_v51  ;;  %v249_v51 = vld [vmem:[%s13675_s4 + $0x278] sm:$0xff]  ;;  %v1421_v55 = vrot.slane %v827_v43, %v9029_v10  ;;  %v849_v56 = vcombine.high %v827_v43, %v827_v43  ;;  %v869_v1 = vcombine.high %v867_v48, %v867_v48 }
  0x95   :  { %v1817_v61 = vmul.f32 %v1417_v49, %v249_v51  ;;  %v257_v49 = vld [vmem:[%s13675_s4 + $0x2b8] sm:$0xff] }
  0x96   :  { %2069 = vadd.xlane.f32.xlu1 %v2068_v57  ;;  %v250_v57 = vld [vmem:[%s13675_s4 + $0x280] sm:$0xff]  ;;  %v1429_v7 = vrot.slane %v849_v56, %v9029_v10  ;;  %v897_v18 = vrot.slane %v869_v1, %v9025_v8 }
  0x97   :  { %v2104_v15 = vsel %vm1866_vm0, %v1817_v61, 0.0  ;;  %v258_v56 = vld [vmem:[%s13675_s4 + $0x2c0] sm:$0xff] }
  0x98   :  { %2072 = vadd.xlane.f32.xlu0 %v2071_v62  ;;  %v251_v62 = vld [vmem:[%s13675_s4 + $0x288] sm:$0xff] }
  0x99   :  { %v1819_v11 = vmul.f32 %v1425_v58, %v251_v62  ;;  %v259_v62 = vld [vmem:[%s13675_s4 + $0x2c8] sm:$0xff] }
  0x9a   :  { %2075 = vadd.xlane.f32.xlu1 %v2074_v6  ;;  %v1818_v6 = vmul.f32 %v1421_v55, %v250_v57  ;;  %v1457_v57 = vrot.slane %v890_v42, %v9029_v10 }
  0x9b   :  { %v2110_v24 = vsel %vm1866_vm0, %v1819_v11, 0.0  ;;  %v883_v11 = vrot.slane %v867_v48, %v9025_v8  ;;  %v264_v48 = vld [vmem:[%s13675_s4 + $0x2f0] sm:$0xff] }
  0x9c   :  { %2078 = vadd.xlane.f32.xlu0 %v2077_v14  ;;  %v2107_v20 = vsel %vm1866_vm0, %v1818_v6, 0.0 }
  0x9d   :  { %v9494_v25 = vpop.xlane.xlu0 %1868  ;;  %v899_v27 = vcombine.high %v883_v11, %v883_v11 }
  0x9e   :  { %13921 = vst [vmem:[#allocation4_spill] sm:$0xff] %v9494_v25  ;;  %2081 = vadd.xlane.f32.xlu1 %v2080_v21  ;;  %v1820_v21 = vmul.f32 %v1429_v7, %v252_v12  ;;  %v1827_v12 = vmul.f32 %v1457_v57, %v259_v62  ;;  %v265_v57 = vld [vmem:[%s13675_s4 + $0x2f8] sm:$0xff] }
  0x9f   :  { %v9502_v33 = vpop.xlane.xlu1 %1874 }
  0xa0   :  { %2084 = vadd.xlane.f32.xlu0 %v2083_v26  ;;  %v254_v26 = vld [vmem:[%s13675_s4 + $0x2a0] sm:$0xff]  ;;  %v2113_v36 = vsel %vm1866_vm0, %v1820_v21, 0.0  ;;  %v261_v21 = vld [vmem:[%s13675_s4 + $0x2d8] sm:$0xff]  ;;  %v2134_v29 = vsel %vm1866_vm0, %v1827_v12, 0.0 }
  0xa1   :  { %v9508_v39 = vpop.xlane.xlu0 %1880  ;;  %v1822_v37 = vmul.f32 %v1437_v22, %v254_v26  ;;  %v1469_v26 = vrot.slane %v883_v11, %v9029_v10 }
  0xa2   :  { %2087 = vadd.xlane.f32.xlu1 %v2086_v30  ;;  %v1441_v30 = vrot.slane %v848_v17, %v9029_v10  ;;  %v1465_v17 = vrot.slane %v900_v63, %v9029_v10 }
  0xa3   :  { %v9517_v46 = vpop.xlane.xlu1 %1883  ;;  %v2119_v51 = vsel %vm1866_vm0, %v1822_v37, 0.0  ;;  %v901_v37 = vcombine.high %v897_v18, %v897_v18 }
  0xa4   :  { %2090 = vadd.xlane.f32.xlu0 %v2089_v40  ;;  %v876_v40 = vrot.slane %v860_v13, %v9025_v8  ;;  %v1823_v45 = vmul.f32 %v1441_v30, %v255_v34  ;;  %v260_v13 = vld [vmem:[%s13675_s4 + $0x2d0] sm:$0xff]  ;;  %v262_v30 = vld [vmem:[%s13675_s4 + $0x2e0] sm:$0xff]  ;;  %v1829_v34 = vmul.f32 %v1465_v17, %v261_v21  ;;  %v39_v17 = vld [vmem:[%s13674_s1 + $0x68] sm:$0xff] }
  0xa5   :  { %v9525_v52 = vpop.xlane.xlu0 %1892 }
  0xa6   :  { %2093 = vadd.xlane.f32.xlu1 %v2092_v47  ;;  %v1449_v47 = vrot.slane %v852_v31, %v9029_v10  ;;  %v1453_v54 = vrot.slane %v876_v40, %v9029_v10  ;;  %v898_v55 = vcombine.high %v876_v40, %v876_v40  ;;  %v902_v31 = vcombine.high %v38_v2, %v38_v2  ;;  %v263_v40 = vld [vmem:[%s13675_s4 + $0x2e8] sm:$0xff] }
  0xa7   :  { %v9533_v59 = vpop.xlane.xlu1 %1895 }
  0xa8   :  { %2096 = vadd.xlane.f32.xlu0 %v2095_v53  ;;  %v1824_v53 = vmul.f32 %v1445_v38, %v256_v41  ;;  %v1825_v61 = vmul.f32 %v1449_v47, %v257_v49  ;;  %v1826_v7 = vmul.f32 %v1453_v54, %v258_v56  ;;  %v1461_v9 = vrot.slane %v898_v55, %v9029_v10 }
  0xa9   :  { %v9542_v3 = vpop.xlane.xlu0 %1871  ;;  %v916_v49 = vrot.slane %v902_v31, %v9025_v8  ;;  %v1481_v55 = vrot.slane %v901_v37, %v9029_v10  ;;  %v269_v37 = vld [vmem:[%s13675_s4 + $0x318] sm:$0xff] }
  0xaa   :  { %13922 = vst [vmem:[#allocation5_spill] sm:$0xff] %v9542_v3  ;;  %2099 = vadd.xlane.f32.xlu1 %v2098_v60  ;;  %v2122_v60 = vsel %vm1866_vm0, %v1823_v45, 0.0  ;;  %v2125_v6 = vsel %vm1866_vm0, %v1824_v53, 0.0  ;;  %v2128_v16 = vsel %vm1866_vm0, %v1825_v61, 0.0  ;;  %v2131_v23 = vsel %vm1866_vm0, %v1826_v7, 0.0 }
  0xab   :  { %v9551_v14 = vpop.xlane.xlu1 %1877  ;;  %v1477_v45 = vrot.slane %v899_v27, %v9029_v10  ;;  %v2140_v53 = vsel %vm1866_vm0, %v1829_v34, 0.0  ;;  %v1833_v11 = vmul.f32 %v1481_v55, %v265_v57 }
  0xac   :  { %2102 = vadd.xlane.f32.xlu0 %v2101_v5 }
  0xad   :  { %v9559_v19 = vpop.xlane.xlu0 %1886  ;;  %v1832_v62 = vmul.f32 %v1477_v45, %v264_v48 }
  0xae   :  { %2105 = vadd.xlane.f32.xlu1 %v2104_v15 }
  0xaf   :  { %v9567_v28 = vpop.xlane.xlu1 %1889 }
  0xb0   :  { %2108 = vadd.xlane.f32.xlu0 %v2107_v20  ;;  %v909_v20 = vrot.slane %v38_v2, %v9025_v8  ;;  %v266_v2 = vld [vmem:[%s13675_s4 + $0x300] sm:$0xff] }
  0xb1   :  { %v9573_v35 = vpop.xlane.xlu0 %1898 }
  0xb2   :  { %2111 = vadd.xlane.f32.xlu1 %v2110_v24  ;;  %v1828_v24 = vmul.f32 %v1461_v9, %v260_v13  ;;  %v917_v38 = vcombine.high %v909_v20, %v909_v20  ;;  %v925_v47 = vrot.slane %v909_v20, %v9025_v8  ;;  %v2149_v20 = vsel %vm1866_vm0, %v1832_v62, 0.0 }
  0xb3   :  { %v9582_v43 = vpop.xlane.xlu1 %1901 }
  0xb4   :  { %2114 = vadd.xlane.f32.xlu0 %v2113_v36  ;;  %v1473_v36 = vrot.slane %v897_v18, %v9029_v10  ;;  %v2137_v42 = vsel %vm1866_vm0, %v1828_v24, 0.0  ;;  %v939_v56 = vrot.slane %v917_v38, %v9025_v8  ;;  %v1485_v63 = vrot.slane %v925_v47, %v9029_v10 }
  0xb5   :  { %v9590_v50 = vpop.xlane.xlu0 %1904  ;;  %v947_v1 = vcombine.high %v925_v47, %v925_v47  ;;  %v932_v24 = vrot.slane %v916_v49, %v9025_v8  ;;  %v270_v47 = vld [vmem:[%s13675_s4 + $0x320] sm:$0xff] }
  0xb6   :  { %2117 = vadd.xlane.f32.xlu1 %v2116_v44  ;;  %v1830_v44 = vmul.f32 %v1469_v26, %v262_v30  ;;  %v1831_v54 = vmul.f32 %v1473_v36, %v263_v40  ;;  %v1489_v12 = vrot.slane %v939_v56, %v9029_v10  ;;  %v949_v13 = vcombine.high %v939_v56, %v939_v56  ;;  %v268_v26 = vld [vmem:[%s13675_s4 + $0x310] sm:$0xff]  ;;  %v271_v56 = vld [vmem:[%s13675_s4 + $0x328] sm:$0xff] }
  0xb7   :  { %v9598_v58 = vpop.xlane.xlu1 %1907  ;;  %v1834_v21 = vmul.f32 %v1485_v63, %v266_v2  ;;  %v2152_v30 = vsel %vm1866_vm0, %v1833_v11, 0.0  ;;  %v958_v36 = vrot.slane %v39_v17, %v9025_v8  ;;  %v948_v45 = vcombine.high %v932_v24, %v932_v24  ;;  %v272_v11 = vld [vmem:[%s13675_s4 + $0x330] sm:$0xff] }
  0xb8   :  { %2120 = vadd.xlane.f32.xlu0 %v2119_v51  ;;  %v2143_v61 = vsel %vm1866_vm0, %v1830_v44, 0.0  ;;  %v2146_v9 = vsel %vm1866_vm0, %v1831_v54, 0.0  ;;  %v1497_v34 = vrot.slane %v949_v13, %v9029_v10  ;;  %v1501_v44 = vrot.slane %v932_v24, %v9029_v10 }
  0xb9   :  { %v9607_v5 = vpop.xlane.xlu0 %1910  ;;  %v2155_v40 = vsel %vm1866_vm0, %v1834_v21, 0.0  ;;  %v1509_v2 = vrot.slane %v948_v45, %v9029_v10  ;;  %v273_v21 = vld [vmem:[%s13675_s4 + $0x338] sm:$0xff]  ;;  %v40_v45 = vld [vmem:[%s13674_s1 + $0x70] sm:$0xff] }
  0xba   :  { %13923 = vst [vmem:[#allocation6_spill] sm:$0xff] %v9607_v5  ;;  %2123 = vadd.xlane.f32.xlu1 %v2122_v60  ;;  %v1837_v55 = vmul.f32 %v1497_v34, %v269_v37  ;;  %v274_v34 = vld [vmem:[%s13675_s4 + $0x340] sm:$0xff] }
  0xbb   :  { %v9615_v15 = vpop.xlane.xlu1 %1913 }
  0xbc   :  { %13924 = vst [vmem:[#allocation7_spill] sm:$0xff] %v9615_v15  ;;  %2126 = vadd.xlane.f32.xlu0 %v2125_v6  ;;  %v918_v6 = vcombine.high %v916_v49, %v916_v49  ;;  %v951_v49 = vcombine.high %v39_v17, %v39_v17  ;;  %v2164_v13 = vsel %vm1866_vm0, %v1837_v55, 0.0 }
  0xbd   :  { %v9624_v22 = vpop.xlane.xlu0 %1916 }
  0xbe   :  { %2129 = vadd.xlane.f32.xlu1 %v2128_v16  ;;  %v267_v16 = vld [vmem:[%s13675_s4 + $0x308] sm:$0xff]  ;;  %v946_v27 = vrot.slane %v918_v6, %v9025_v8  ;;  %v974_v6 = vrot.slane %v958_v36, %v9025_v8 }
  0xbf   :  { %v9632_v32 = vpop.xlane.xlu1 %1919  ;;  %v1835_v31 = vmul.f32 %v1489_v12, %v267_v16 }
  0xc0   :  { %2132 = vadd.xlane.f32.xlu0 %v2131_v23  ;;  %v1493_v23 = vrot.slane %v947_v1, %v9029_v10  ;;  %v1505_v48 = vrot.slane %v946_v27, %v9029_v10  ;;  %v950_v57 = vcombine.high %v946_v27, %v946_v27  ;;  %v1838_v1 = vmul.f32 %v1501_v44, %v270_v47  ;;  %v275_v47 = vld [vmem:[%s13675_s4 + $0x348] sm:$0xff] }
  0xc1   :  { %v9638_v41 = vpop.xlane.xlu0 %1922  ;;  %v2158_v54 = vsel %vm1866_vm0, %v1835_v31, 0.0  ;;  %v1517_v27 = vrot.slane %v974_v6, %v9029_v10 }
  0xc2   :  { %2135 = vadd.xlane.f32.xlu1 %v2134_v29  ;;  %v1513_v16 = vrot.slane %v950_v57, %v9029_v10  ;;  %v2167_v24 = vsel %vm1866_vm0, %v1838_v1, 0.0  ;;  %v276_v57 = vld [vmem:[%s13675_s4 + $0x350] sm:$0xff] }
  0xc3   :  { %v9647_v51 = vpop.xlane.xlu1 %1925 }
  0xc4   :  { %2138 = vadd.xlane.f32.xlu0 %v2137_v42  ;;  %v1836_v42 = vmul.f32 %v1493_v23, %v268_v26  ;;  %v1840_v26 = vmul.f32 %v1509_v2, %v272_v11  ;;  %v1841_v37 = vmul.f32 %v1513_v16, %v273_v21  ;;  %v277_v11 = vld [vmem:[%s13675_s4 + $0x358] sm:$0xff] }
  0xc5   :  { %v9655_v60 = vpop.xlane.xlu0 %1928 }
  0xc6   :  { %2141 = vadd.xlane.f32.xlu1 %v2140_v53  ;;  %v2161_v63 = vsel %vm1866_vm0, %v1836_v42, 0.0  ;;  %v2176_v1 = vsel %vm1866_vm0, %v1841_v37, 0.0 }
  0xc7   :  { %v9662_v7 = vpop.xlane.xlu1 %1931 }
  0xc8   :  { %13925 = vst [vmem:[#allocation8_spill] sm:$0xff] %v9662_v7  ;;  %2144 = vadd.xlane.f32.xlu0 %v2143_v61  ;;  %v966_v61 = vcombine.high %v958_v36, %v958_v36  ;;  %v293_v7 = vld [vmem:[%s13675_s4 + $0x3d8] sm:$0xff] }
  0xc9   :  { %v9672_v18 = vpop.xlane.xlu0 %1934 }
  0xca   :  { %13926 = vst [vmem:[#allocation9_spill] sm:$0xff] %v9672_v18  ;;  %2147 = vadd.xlane.f32.xlu1 %v2146_v9  ;;  %v1839_v9 = vmul.f32 %v1505_v48, %v271_v56  ;;  %v988_v17 = vrot.slane %v966_v61, %v9025_v8  ;;  %v1007_v61 = vrot.slane %v40_v45, %v9025_v8 }
  0xcb   :  { %v9681_v29 = vpop.xlane.xlu1 %1937 }
  0xcc   :  { %13927 = vst [vmem:[#allocation10_spill] sm:$0xff] %v9681_v29  ;;  %2150 = vadd.xlane.f32.xlu0 %v2149_v20  ;;  %v965_v20 = vrot.slane %v951_v49, %v9025_v8  ;;  %v2170_v31 = vsel %vm1866_vm0, %v1839_v9, 0.0  ;;  %v998_v42 = vcombine.high %v988_v17, %v988_v17  ;;  %v2173_v49 = vsel %vm1866_vm0, %v1840_v26, 0.0 }
  0xcd   :  { %v9689_v38 = vpop.xlane.xlu0 %1940  ;;  %v1023_v26 = vrot.slane %v1007_v61, %v9025_v8 }
  0xce   :  { %13928 = vst [vmem:[#allocation11_spill] sm:$0xff] %v9689_v38  ;;  %2153 = vadd.xlane.f32.xlu1 %v2152_v30  ;;  %v996_v30 = vcombine.high %v974_v6, %v974_v6  ;;  %v967_v44 = vcombine.high %v965_v20, %v965_v20  ;;  %v981_v56 = vrot.slane %v965_v20, %v9025_v8 }
  0xcf   :  { %v9697_v53 = vpop.xlane.xlu1 %1943  ;;  %v1529_v6 = vrot.slane %v998_v42, %v9029_v10 }
  0xd0   :  { %2156 = vadd.xlane.f32.xlu0 %v2155_v40  ;;  %v1521_v40 = vrot.slane %v988_v17, %v9029_v10  ;;  %v1525_v55 = vrot.slane %v996_v30, %v9029_v10  ;;  %v995_v9 = vrot.slane %v967_v44, %v9025_v8  ;;  %v1533_v20 = vrot.slane %v981_v56, %v9029_v10  ;;  %v279_v44 = vld [vmem:[%s13675_s4 + $0x368] sm:$0xff] }
  0xd1   :  { %v9703_v62 = vpop.xlane.xlu0 %1946  ;;  %v997_v21 = vcombine.high %v981_v56, %v981_v56  ;;  %v1000_v30 = vcombine.high %v40_v45, %v40_v45  ;;  %v1845_v37 = vmul.f32 %v1529_v6, %v277_v11  ;;  %v280_v56 = vld [vmem:[%s13675_s4 + $0x370] sm:$0xff] }
  0xd2   :  { %13929 = vst [vmem:[#allocation12_spill] sm:$0xff] %v9703_v62  ;;  %2159 = vadd.xlane.f32.xlu1 %v2158_v54  ;;  %v1842_v54 = vmul.f32 %v1517_v27, %v274_v34  ;;  %v1843_v2 = vmul.f32 %v1521_v40, %v275_v47  ;;  %v1844_v17 = vmul.f32 %v1525_v55, %v276_v57  ;;  %v41_v47 = vld [vmem:[%s13674_s1 + $0x78] sm:$0xff] }
  0xd3   :  { %v9711_v12 = vpop.xlane.xlu1 %1949  ;;  %v1015_v27 = vcombine.high %v1007_v61, %v1007_v61  ;;  %v1537_v40 = vrot.slane %v995_v9, %v9029_v10  ;;  %v999_v42 = vcombine.high %v995_v9, %v995_v9  ;;  %v1541_v55 = vrot.slane %v997_v21, %v9029_v10  ;;  %v281_v21 = vld [vmem:[%s13675_s4 + $0x378] sm:$0xff] }
  0xd4   :  { %2162 = vadd.xlane.f32.xlu0 %v2161_v63  ;;  %v2179_v16 = vsel %vm1866_vm0, %v1842_v54, 0.0  ;;  %v2182_v34 = vsel %vm1866_vm0, %v1843_v2, 0.0  ;;  %v2185_v45 = vsel %vm1866_vm0, %v1844_v17, 0.0  ;;  %v1549_v57 = vrot.slane %v1023_v26, %v9029_v10  ;;  %v282_v17 = vld [vmem:[%s13675_s4 + $0x380] sm:$0xff] }
  0xd5   :  { %v9720_v23 = vpop.xlane.xlu0 %1952  ;;  %v1037_v61 = vrot.slane %v1015_v27, %v9025_v8  ;;  %v1049_v2 = vcombine.high %v41_v47, %v41_v47  ;;  %v2188_v9 = vsel %vm1866_vm0, %v1845_v37, 0.0  ;;  %v1847_v11 = vmul.f32 %v1537_v40, %v279_v44 }
  0xd6   :  { %13930 = vst [vmem:[#allocation13_spill] sm:$0xff] %v9720_v23  ;;  %2165 = vadd.xlane.f32.xlu1 %v2164_v13  ;;  %v1848_v40 = vmul.f32 %v1541_v55, %v280_v56 }
  0xd7   :  { %v9728_v36 = vpop.xlane.xlu1 %1955  ;;  %v1047_v27 = vcombine.high %v1037_v61, %v1037_v61 }
  0xd8   :  { %13931 = vst [vmem:[#allocation14_spill] sm:$0xff] %v9728_v36  ;;  %2168 = vadd.xlane.f32.xlu0 %v2167_v24  ;;  %v278_v24 = vld [vmem:[%s13675_s4 + $0x360] sm:$0xff] }
  0xd9   :  { %v9737_v48 = vpop.xlane.xlu0 %1958  ;;  %v1846_v54 = vmul.f32 %v1533_v20, %v278_v24  ;;  %v1056_v20 = vrot.slane %v41_v47, %v9025_v8  ;;  %v1045_v24 = vcombine.high %v1023_v26, %v1023_v26  ;;  %v1553_v26 = vrot.slane %v1037_v61, %v9029_v10 }
  0xda   :  { %13932 = vst [vmem:[#allocation15_spill] sm:$0xff] %v9737_v48  ;;  %2171 = vadd.xlane.f32.xlu1 %v2170_v31  ;;  %v1561_v55 = vrot.slane %v1047_v27, %v9029_v10  ;;  %v2197_v61 = vsel %vm1866_vm0, %v1848_v40, 0.0 }
  0xdb   :  { %v9746_v63 = vpop.xlane.xlu1 %1961  ;;  %v2191_v37 = vsel %vm1866_vm0, %v1846_v54, 0.0  ;;  %v1064_v48 = vcombine.high %v1056_v20, %v1056_v20  ;;  %v1557_v54 = vrot.slane %v1045_v24, %v9029_v10 }
  0xdc   :  { %13933 = vst [vmem:[#allocation16_spill] sm:$0xff] %v9746_v63  ;;  %2174 = vadd.xlane.f32.xlu0 %v2173_v49  ;;  %v1063_v63 = vrot.slane %v1049_v2, %v9025_v8 }
  0xdd   :  { %v9754_v13 = vpop.xlane.xlu0 %1964 }
  0xde   :  { %13934 = vst [vmem:[#allocation17_spill] sm:$0xff] %v9754_v13  ;;  %2177 = vadd.xlane.f32.xlu1 %v2176_v1  ;;  %v1014_v1 = vrot.slane %v1000_v30, %v9025_v8  ;;  %v2380_v30 = vand.u32 127, %v318_v0  ;;  %v283_v0 = vld [vmem:[%s13675_s4 + $0x388] sm:$0xff] }
  0xdf   :  { %v9762_v31 = vpop.xlane.xlu1 %1967 }
  0xe0   :  { %2180 = vadd.xlane.f32.xlu0 %v2179_v16  ;;  %v1545_v16 = vrot.slane %v999_v42, %v9029_v10  ;;  %v1850_v42 = vmul.f32 %v1549_v57, %v282_v17  ;;  %v1016_v44 = vcombine.high %v1014_v1, %v1014_v1  ;;  %v1030_v56 = vrot.slane %v1014_v1, %v9025_v8 }
  0xe1   :  { %v9772_v49 = vpop.xlane.xlu0 %1970  ;;  %v1072_v57 = vrot.slane %v1056_v20, %v9025_v8  ;;  %v9810_v2 = vsub.s32 %v2380_v30, %v9019_v4  ;;  %v1851_v30 = vmul.f32 %v1553_v26, %v283_v0  ;;  %v290_v26 = vld [vmem:[%s13675_s4 + $0x3c0] sm:$0xff] }
  0xe2   :  { %13935 = vst [vmem:[#allocation18_spill] sm:$0xff] %v9772_v49  ;;  %2183 = vadd.xlane.f32.xlu1 %v2182_v34  ;;  %v1849_v29 = vmul.f32 %v1545_v16, %v281_v21  ;;  %v285_v16 = vld [vmem:[%s13675_s4 + $0x398] sm:$0xff]  ;;  %v1044_v1 = vrot.slane %v1016_v44, %v9025_v8  ;;  %v1046_v17 = vcombine.high %v1030_v56, %v1030_v56  ;;  %v2203_v40 = vsel %vm1866_vm0, %v1850_v42, 0.0 }
  0xe3   :  { %v9782_v6 = vpop.xlane.xlu1 %1973  ;;  %13938 = vst [vmem:[#allocation21_spill] sm:$0xff] %v9810_v2  ;;  %v1094_v20 = vcombine.high %v1072_v57, %v1072_v57  ;;  %v1065_v21 = vcombine.high %v1063_v63, %v1063_v63  ;;  %v1565_v44 = vrot.slane %v1030_v56, %v9029_v10  ;;  %v1581_v18 = vrot.slane %v1072_v57, %v9029_v10  ;;  %v287_v57 = vld [vmem:[%s13675_s4 + $0x3a8] sm:$0xff] }
  0xe4   :  { %2186 = vadd.xlane.f32.xlu0 %v2185_v45  ;;  %v2194_v45 = vsel %vm1866_vm0, %v1847_v11, 0.0  ;;  %v284_v11 = vld [vmem:[%s13675_s4 + $0x390] sm:$0xff]  ;;  %v2200_v27 = vsel %vm1866_vm0, %v1849_v29, 0.0  ;;  %v286_v29 = vld [vmem:[%s13675_s4 + $0x3a0] sm:$0xff]  ;;  %v1573_v42 = vrot.slane %v1046_v17, %v9029_v10  ;;  %v2206_v56 = vsel %vm1866_vm0, %v1851_v30, 0.0 }
  0xe5   :  { %v9794_v34 = vpop.xlane.xlu0 %1976  ;;  %v1852_v4 = vmul.f32 %v1557_v54, %v284_v11  ;;  %v1589_v0 = vrot.slane %v1094_v20, %v9029_v10  ;;  %v1093_v54 = vrot.slane %v1065_v21, %v9025_v8  ;;  %v291_v21 = vld [vmem:[%s13675_s4 + $0x3c8] sm:$0xff]  ;;  %v2384_v30 = vrot.slane %v9494_v25, %v9810_v2 }
  0xe6   :  { %13936 = vst [vmem:[#allocation19_spill] sm:$0xff] %v9794_v34  ;;  %2189 = vadd.xlane.f32.xlu1 %v2188_v9 }
  0xe7   :  { %v9798_v47 = vpop.xlane.xlu1 %1979 }
  0xe8   :  { %13937 = vst [vmem:[#allocation20_spill] sm:$0xff] %v9798_v47  ;;  %2192 = vadd.xlane.f32.xlu0 %v2191_v37  ;;  %v1086_v37 = vrot.slane %v1064_v48, %v9025_v8  ;;  %v1048_v47 = vcombine.high %v1044_v1, %v1044_v1  ;;  %v1569_v48 = vrot.slane %v1044_v1, %v9029_v10  ;;  %v2209_v1 = vsel %vm1866_vm0, %v1852_v4, 0.0  ;;  %v289_v4 = vld [vmem:[%s13675_s4 + $0x3b8] sm:$0xff] }
  0xe9   :  { %v9812_v9 = vpop.xlane.xlu0 %1982 }
  0xea   :  { %13939 = vst [vmem:[#allocation22_spill] sm:$0xff] %v9812_v9  ;;  %2195 = vadd.xlane.f32.xlu1 %v2194_v45  ;;  %v1853_v9 = vmul.f32 %v1561_v55, %v285_v16  ;;  %v1096_v15 = vcombine.high %v1086_v37, %v1086_v37  ;;  %v1585_v11 = vrot.slane %v1086_v37, %v9029_v10 }
  0xeb   :  { %v9822_v24 = vpop.xlane.xlu1 %1985  ;;  %v1577_v20 = vrot.slane %v1048_v47, %v9029_v10  ;;  %v1855_v47 = vmul.f32 %v1569_v48, %v287_v57 }
  0xec   :  { %13940 = vst [vmem:[#allocation23_spill] sm:$0xff] %v9822_v24  ;;  %2198 = vadd.xlane.f32.xlu0 %v2197_v61  ;;  %v1079_v24 = vrot.slane %v1063_v63, %v9025_v8  ;;  %v2388_v63 = vrot.slane %v9542_v3, %v9810_v2  ;;  %v288_v61 = vld [vmem:[%s13675_s4 + $0x3b0] sm:$0xff]  ;;  %v2212_v17 = vsel %vm1866_vm0, %v1853_v9, 0.0  ;;  %v1854_v3 = vmul.f32 %v1565_v44, %v286_v29 }
  0xed   :  { %v9827_v45 = vpop.xlane.xlu0 %1988  ;;  %v292_v8 = vld [vmem:[%s13675_s4 + $0x3d0] sm:$0xff]  ;;  %v1593_v9 = vrot.slane %v1096_v15, %v9029_v10  ;;  %v1856_v34 = vmul.f32 %v1573_v42, %v288_v61  ;;  %v1859_v29 = vmul.f32 %v1585_v11, %v291_v21  ;;  %v1601_v15 = vrot.slane %v1093_v54, %v9029_v10 }
  0xee   :  { %13941 = vst [vmem:[#allocation24_spill] sm:$0xff] %v9827_v45  ;;  %2201 = vadd.xlane.f32.xlu1 %v2200_v27  ;;  %v1095_v16 = vcombine.high %v1079_v24, %v1079_v24  ;;  %v1097_v27 = vcombine.high %v1093_v54, %v1093_v54  ;;  %v1860_v36 = vmul.f32 %v1589_v0, %v292_v8  ;;  %v296_v0 = vld [vmem:[%s13675_s4 + $0x3f0] sm:$0xff]  ;;  %v2215_v57 = vsel %vm1866_vm0, %v1854_v3, 0.0  ;;  %v297_v8 = vld [vmem:[%s13675_s4 + $0x3f8] sm:$0xff] }
  0xef   :  { %v9844_v55 = vpop.xlane.xlu1 %1991  ;;  %v1597_v25 = vrot.slane %v1079_v24, %v9029_v10  ;;  %v2894_v5 = vsel %vm2893_vm1, %v2388_v63, %v2384_v30  ;;  %v2392_v42 = vrot.slane %v9502_v33, %v9810_v2  ;;  %v295_v24 = vld [vmem:[%s13675_s4 + $0x3e8] sm:$0xff]  ;;  %v2396_v54 = vrot.slane %v9551_v14, %v9810_v2 }
  0xf0   :  { %13942 = vst [vmem:[#allocation25_spill] sm:$0xff] %v9844_v55  ;;  %2204 = vadd.xlane.f32.xlu0 %v2203_v40  ;;  %v1858_v40 = vmul.f32 %v1581_v18, %v290_v26  ;;  %v294_v18 = vld [vmem:[%s13675_s4 + $0x3e0] sm:$0xff]  ;;  %v1605_v48 = vrot.slane %v1095_v16, %v9029_v10  ;;  %v1857_v26 = vmul.f32 %v1577_v20, %v289_v4  ;;  %v9904_v20 = vsel %vm1866_vm0, %v1860_v36, 0.0 }
  0xf1   :  { %v9865_v37 = vpop.xlane.xlu0 %1994  ;;  %v1609_v63 = vrot.slane %v1097_v27, %v9029_v10  ;;  %v1861_v11 = vmul.f32 %v1593_v9, %v293_v7  ;;  %v2896_v16 = vsel %vm2895_vm2, %v2392_v42, %v2894_v5  ;;  %v1862_v21 = vmul.f32 %v1597_v25, %v294_v18 }
  0xf2   :  { %13943 = vst [vmem:[#allocation26_spill] sm:$0xff] %v9865_v37  ;;  %2207 = vadd.xlane.f32.xlu1 %v2206_v56  ;;  %v2227_v61 = vsel %vm1866_vm0, %v1858_v40, 0.0  ;;  %v2221_v3 = vsel %vm1866_vm0, %v1856_v34, 0.0  ;;  %v2230_v30 = vsel %vm1866_vm0, %v1859_v29, 0.0  ;;  %v1863_v7 = vmul.f32 %v1601_v15, %v295_v24 }
  0xf3   :  { %v9876_v44 = vpop.xlane.xlu1 %1997  ;;  %v1864_v4 = vmul.f32 %v1605_v48, %v296_v0  ;;  %v2416_v40 = vrot.slane %v9525_v52, %v9810_v2  ;;  %v2420_v5 = vrot.slane %v9533_v59, %v9810_v2  ;;  %v1865_v36 = vmul.f32 %v1609_v63, %v297_v8 }
  0xf4   :  { %13944 = vst [vmem:[#allocation27_spill] sm:$0xff] %v9876_v44  ;;  %2210 = vadd.xlane.f32.xlu0 %v2209_v1  ;;  %v2218_v1 = vsel %vm1866_vm0, %v1855_v47, 0.0  ;;  %v2898_v25 = vsel %vm2897_vm3, %v2396_v54, %v2896_v16  ;;  %v2424_v9 = vrot.slane %v9573_v35, %v9810_v2  ;;  %v9921_v47 = vsel %vm1866_vm0, %v1861_v11, 0.0 }
  0xf5   :  { %v9894_v56 = vpop.xlane.xlu0 %2000  ;;  %v2400_v29 = vrot.slane %v9508_v39, %v9810_v2  ;;  %v2448_v18 = vrot.slane %v9624_v22, %v9810_v2  ;;  %v2452_v15 = vrot.slane %v9632_v32, %v9810_v2  ;;  %v9930_v48 = vsel %vm1866_vm0, %v1862_v21, 0.0 }
  0xf6   :  { %13945 = vst [vmem:[#allocation28_spill] sm:$0xff] %v9894_v56  ;;  %2213 = vadd.xlane.f32.xlu1 %v2212_v17  ;;  %v2224_v17 = vsel %vm1866_vm0, %v1857_v26, 0.0  ;;  %v2480_v42 = vrot.slane %v9689_v38, %v9810_v2  ;;  %v2484_v26 = vrot.slane %v9697_v53, %v9810_v2  ;;  %v9939_v0 = vsel %vm1866_vm0, %v1863_v7, 0.0 }
  0xf7   :  { %v9906_v27 = vpop.xlane.xlu1 %2003  ;;  %v9942_v63 = vsel %vm1866_vm0, %v1864_v4, 0.0  ;;  %v2907_v54 = vsel %vm2893_vm1, %v2420_v5, %v2416_v40  ;;  %v9948_v11 = vsel %vm1866_vm0, %v1865_v36, 0.0  ;;  %v2900_v8 = vsel %vm2899_vm4, %v2400_v29, %v2898_v25 }
  0xf8   :  { %2216 = vadd.xlane.f32.xlu0 %v2215_v57  ;;  %v2428_v57 = vrot.slane %v9582_v43, %v9810_v2  ;;  %v2404_v16 = vrot.slane %v9517_v46, %v9810_v2  ;;  %v2908_v21 = vsel %vm2895_vm2, %v2424_v9, %v2907_v54  ;;  %v2456_v7 = vrot.slane %v9638_v41, %v9810_v2 }
  0xf9   :  { %v9918_v34 = vpop.xlane.xlu0 %2006  ;;  %v2488_v40 = vrot.slane %v9703_v62, %v9810_v2  ;;  %v2512_v5 = vrot.slane %v9754_v13, %v9810_v2  ;;  %v2516_v36 = vrot.slane %v9762_v31, %v9810_v2  ;;  %v2432_v9 = vrot.slane %v9590_v50, %v9810_v2 }
  0xfa   :  { %2219 = vadd.xlane.f32.xlu1 %v2218_v1  ;;  %v2408_v1 = vrot.slane %v9559_v19, %v9810_v2  ;;  %v2921_v29 = vsel %vm2893_vm1, %v2484_v26, %v2480_v42  ;;  %v2460_v13 = vrot.slane %v9647_v51, %v9810_v2  ;;  %v2548_v25 = vrot.slane %v9844_v55, %v9810_v2 }
  0xfb   :  { %v9936_v24 = vpop.xlane.xlu1 %2009  ;;  %v2436_v42 = vrot.slane %v9598_v58, %v9810_v2 }
  0xfc   :  { %2222 = vadd.xlane.f32.xlu0 %v2221_v3  ;;  %v2914_v3 = vsel %vm2893_vm1, %v2452_v15, %v2448_v18  ;;  %v2902_v18 = vsel %vm2901_vm5, %v2404_v16, %v2900_v8  ;;  %v2909_v15 = vsel %vm2897_vm3, %v2428_v57, %v2908_v21  ;;  %v2492_v8 = vrot.slane %v9711_v12, %v9810_v2 }
  0xfd   :  { %v9958_v4 = vpop.xlane.xlu0 %2012  ;;  %v2915_v26 = vsel %vm2895_vm2, %v2456_v7, %v2914_v3  ;;  %v2520_v57 = vrot.slane %v9772_v49, %v9810_v2  ;;  %v2922_v21 = vsel %vm2895_vm2, %v2488_v40, %v2921_v29  ;;  %v2910_v7 = vsel %vm2899_vm4, %v2432_v9, %v2909_v15  ;;  %v13950_v29 = vld [vmem:[#allocation6_spill] sm:$0xff] }
  0xfe   :  { %13946 = vst [vmem:[#allocation29_spill] sm:$0xff] %v9958_v4  ;;  %2225 = vadd.xlane.f32.xlu1 %v2224_v17  ;;  %v2544_v17 = vrot.slane %v9827_v45, %v9810_v2  ;;  %v2928_v45 = vsel %vm2893_vm1, %v2516_v36, %v2512_v5  ;;  %v2464_v3 = vrot.slane %v9655_v60, %v9810_v2 }
  0xff   :  { %v9972_v54 = vpop.xlane.xlu1 %2015  ;;  %v2552_v49 = vrot.slane %v9865_v37, %v9810_v2  ;;  %v2904_v40 = vsel %vm2903_vm6, %v2408_v1, %v2902_v18  ;;  %v2916_v5 = vsel %vm2897_vm3, %v2460_v13, %v2915_v26  ;;  %v2496_v36 = vrot.slane %v9720_v23, %v9810_v2  ;;  %v13952_v26 = vld [vmem:[#allocation8_spill] sm:$0xff] }
 0x100   :  { %13947 = vst [vmem:[#allocation30_spill] sm:$0xff] %v9972_v54  ;;  %2228 = vadd.xlane.f32.xlu0 %v2227_v61  ;;  %v2576_v61 = vrot.slane %v9958_v4, %v9810_v2  ;;  %v2580_v62 = vrot.slane %v9972_v54, %v9810_v2  ;;  %v2935_v9 = vsel %vm2893_vm1, %v2548_v25, %v2544_v17 }
 0x101   :  { %v9989_v16 = vpop.xlane.xlu0 %2018  ;;  %v2440_v15 = vrot.slane %v13950_v29, %v9810_v2  ;;  %v2923_v4 = vsel %vm2897_vm3, %v2492_v8, %v2922_v21  ;;  %v2929_v1 = vsel %vm2895_vm2, %v2520_v57, %v2928_v45  ;;  %v2468_v37 = vrot.slane %v13952_v26, %v9810_v2  ;;  %v13953_v45 = vld [vmem:[#allocation14_spill] sm:$0xff]  ;;  %v13954_v21 = vld [vmem:[#allocation19_spill] sm:$0xff] }
 0x102   :  { %13948 = vst [vmem:[#allocation31_spill] sm:$0xff] %v9989_v16  ;;  %2231 = vadd.xlane.f32.xlu1 %v2230_v30  ;;  %v2524_v30 = vrot.slane %v9782_v6, %v9810_v2  ;;  %v2584_v13 = vrot.slane %v9989_v16, %v9810_v2  ;;  %v2556_v25 = vrot.slane %v9876_v44, %v9810_v2  ;;  %v13955_v44 = vld [vmem:[#allocation7_spill] sm:$0xff] }
 0x103   :  { %v10002_v38 = vpop.xlane.xlu1 %2021  ;;  %v2911_v17 = vsel %vm2901_vm5, %v2436_v42, %v2910_v7  ;;  %v2917_v8 = vsel %vm2899_vm4, %v2464_v3, %v2916_v5  ;;  %v2500_v57 = vrot.slane %v13953_v45, %v9810_v2  ;;  %v2528_v16 = vrot.slane %v13954_v21, %v9810_v2 }
 0x104   :  { %13949 = vst [vmem:[#allocation32_spill] sm:$0xff] %v10002_v38  ;;  %2234 = vadd.xlane.f32.xlu0 %v9904_v20  ;;  %v2942_v20 = vsel %vm2893_vm1, %v2580_v62, %v2576_v61  ;;  %v2936_v54 = vsel %vm2895_vm2, %v2552_v49, %v2935_v9  ;;  %v2444_v55 = vrot.slane %v13955_v44, %v9810_v2  ;;  %v13956_v61 = vld [vmem:[#allocation9_spill] sm:$0xff] }
 0x105   :  { %v10018_v18 = vpop.xlane.xlu0 %2024  ;;  %v2924_v62 = vsel %vm2899_vm4, %v2496_v36, %v2923_v4  ;;  %v2588_v42 = vrot.slane %v10002_v38, %v9810_v2  ;;  %v2472_v7 = vrot.slane %v13956_v61, %v9810_v2  ;;  %v2560_v49 = vrot.slane %v9894_v56, %v9810_v2  ;;  %v13958_v4 = vld [vmem:[#allocation15_spill] sm:$0xff] }
 0x106   :  { %13951 = vst [vmem:[#allocation6_spill] sm:$0xff] %v10018_v18  ;;  %2237 = vadd.xlane.f32.xlu1 %v9921_v47  ;;  %v2930_v47 = vsel %vm2897_vm3, %v2524_v30, %v2929_v1  ;;  %v2943_v3 = vsel %vm2895_vm2, %v2584_v13, %v2942_v20  ;;  %v2912_v9 = vsel %vm2903_vm6, %v2440_v15, %v2911_v17  ;;  %v13959_v30 = vld [vmem:[#allocation20_spill] sm:$0xff] }
 0x107   :  { %v10033_v23 = vpop.xlane.xlu1 %2027  ;;  %v2504_v36 = vrot.slane %v13958_v4, %v9810_v2  ;;  %v2532_v1 = vrot.slane %v13959_v30, %v9810_v2  ;;  %v2918_v21 = vsel %vm2901_vm5, %v2468_v37, %v2917_v8  ;;  %v2931_v56 = vsel %vm2899_vm4, %v2528_v16, %v2930_v47  ;;  %v13962_v8 = vld [vmem:[#allocation16_spill] sm:$0xff] }
 0x108   :  { %2240 = vadd.xlane.f32.xlu0 %v9930_v48  ;;  %v2937_v48 = vsel %vm2897_vm3, %v2556_v25, %v2936_v54  ;;  %v2592_v13 = vrot.slane %v10018_v18, %v9810_v2  ;;  %v13960_v15 = vrot.slane %v9567_v28, %v9810_v2  ;;  %v2925_v38 = vsel %vm2901_vm5, %v2500_v57, %v2924_v62  ;;  %v13961_v54 = vld [vmem:[#allocation10_spill] sm:$0xff] }
 0x109   :  { %v10047_v5 = vpop.xlane.xlu0 %2030  ;;  %v2476_v25 = vrot.slane %v13961_v54, %v9810_v2  ;;  %v2564_v37 = vrot.slane %v9906_v27, %v9810_v2  ;;  %v2913_v16 = vsel %vm2905_vm7, %v2444_v55, %v2912_v9  ;;  %v2508_v47 = vrot.slane %v13962_v8, %v9810_v2  ;;  %v13963_v18 = vld [vmem:[#allocation22_spill] sm:$0xff] }
 0x10a   :  { %13957 = vst [vmem:[#allocation8_spill] sm:$0xff] %v10047_v5  ;;  %2243 = vadd.xlane.f32.xlu1 %v9939_v0  ;;  %v2906_v17 = vsel %vm2905_vm7, %v13960_v15, %v2904_v40  ;;  %v2944_v0 = vsel %vm2897_vm3, %v2588_v42, %v2943_v3  ;;  %v2536_v40 = vrot.slane %v13963_v18, %v9810_v2 }
 0x10b   :  { %v10060_v20 = vpop.xlane.xlu1 %2033  ;;  %v2938_v57 = vsel %vm2899_vm4, %v2560_v49, %v2937_v48  ;;  %v2919_v15 = vsel %vm2903_vm6, %v2472_v7, %v2918_v21  ;;  %v2596_v4 = vrot.slane %v10033_v23, %v9810_v2  ;;  %v2926_v55 = vsel %vm2903_vm6, %v2504_v36, %v2925_v38  ;;  %v13965_v7 = vld [vmem:[#allocation23_spill] sm:$0xff] }
 0x10c   :  { %2246 = vadd.xlane.f32.xlu0 %v9942_v63  ;;  %v2932_v42 = vsel %vm2901_vm5, %v2532_v1, %v2931_v56  ;;  %v2568_v3 = vrot.slane %v9918_v34, %v9810_v2  ;;  %v2945_v49 = vsel %vm2899_vm4, %v2592_v13, %v2944_v0  ;;  %v3029_v21 = vsel %vm3028_vm8, %v2906_v17, -inf }
 0x10d   :  { %v10079_v62 = vpop.xlane.xlu0 %2036  ;;  %v2540_v48 = vrot.slane %v13965_v7, %v9810_v2  ;;  %v2920_v38 = vsel %vm2905_vm7, %v2476_v25, %v2919_v15  ;;  %v2939_v56 = vsel %vm2901_vm5, %v2564_v37, %v2938_v57  ;;  %v3032_v1 = vsel %vm3028_vm8, %v2913_v16, -inf }
 0x10e   :  { %13964 = vst [vmem:[#allocation14_spill] sm:$0xff] %v10079_v62  ;;  %v2608_v63 = vrot.slane %v10079_v62, %v9810_v2  ;;  %2249 = vadd.xlane.f32.xlu1 %v9948_v11  ;;  %v2600_v11 = vrot.slane %v10047_v5, %v9810_v2  ;;  %v2927_v13 = vsel %vm2905_vm7, %v2508_v47, %v2926_v55  ;;  %v3035_v15 = vsel %vm3028_vm8, %v2920_v38, -inf }
 0x10f   :  { %v10092_v9 = vpop.xlane.xlu1 %2039  ;;  %v2933_v17 = vsel %vm2903_vm6, %v2536_v40, %v2932_v42  ;;  %v2572_v0 = vrot.slane %v9936_v24, %v9810_v2  ;;  %v2946_v37 = vsel %vm2901_vm5, %v2596_v4, %v2945_v49  ;;  %v2940_v16 = vsel %vm2903_vm6, %v2568_v3, %v2939_v56 }
 0x110   :  { %v2612_v62 = vrot.slane %v10092_v9, %v9810_v2  ;;  %3030 = vmax.xlane.f32.xlu0 %v3029_v21  ;;  %v2604_v47 = vrot.slane %v10060_v20, %v9810_v2  ;;  %v3038_v4 = vsel %vm3028_vm8, %v2927_v13, -inf  ;;  %v2947_v42 = vsel %vm2903_vm6, %v2600_v11, %v2946_v37 }
 0x111   :  { %v10103_v36 = vpop.xlane.xlu0 %2042  ;;  %v2941_v38 = vsel %vm2905_vm7, %v2572_v0, %v2940_v16 }
 0x112   :  { %13966 = vst [vmem:[#allocation7_spill] sm:$0xff] %v10103_v36  ;;  %v2949_v21 = vsel %vm2893_vm1, %v2612_v62, %v2608_v63  ;;  %v2616_v25 = vrot.slane %v10103_v36, %v9810_v2  ;;  %3033 = vmax.xlane.f32.xlu1 %v3032_v1  ;;  %v2934_v63 = vsel %vm2905_vm7, %v2540_v48, %v2933_v17 }
 0x113   :  { %v10114_v57 = vpop.xlane.xlu1 %2045  ;;  %v3041_v1 = vsel %vm3028_vm8, %v2934_v63, -inf  ;;  %v2948_v11 = vsel %vm2905_vm7, %v2604_v47, %v2947_v42 }
 0x114   :  { %v2950_v40 = vsel %vm2895_vm2, %v2616_v25, %v2949_v21  ;;  %v2620_v62 = vrot.slane %v10114_v57, %v9810_v2  ;;  %3036 = vmax.xlane.f32.xlu0 %v3035_v15  ;;  %v3044_v21 = vsel %vm3028_vm8, %v2941_v38, -inf  ;;  %v3047_v15 = vsel %vm3028_vm8, %v2948_v11, -inf }
 0x115   :  { %v10124_v55 = vpop.xlane.xlu0 %2048 }
 0x116   :  { %13967 = vst [vmem:[#allocation9_spill] sm:$0xff] %v10124_v55  ;;  %v2951_v49 = vsel %vm2897_vm3, %v2620_v62, %v2950_v40  ;;  %v2624_v3 = vrot.slane %v10124_v55, %v9810_v2  ;;  %3039 = vmax.xlane.f32.xlu1 %v3038_v4 }
 0x117   :  { %v10132_v56 = vpop.xlane.xlu1 %2051 }
 0x118   :  { %v2952_v48 = vsel %vm2899_vm4, %v2624_v3, %v2951_v49  ;;  %v2628_v17 = vrot.slane %v10132_v56, %v9810_v2  ;;  %3042 = vmax.xlane.f32.xlu0 %v3041_v1 }
 0x119   :  { %v10139_v13 = vpop.xlane.xlu0 %2054 }
 0x11a   :  { %13968 = vst [vmem:[#allocation20_spill] sm:$0xff] %v10139_v13  ;;  %v2632_v25 = vrot.slane %v10139_v13, %v9810_v2  ;;  %3045 = vmax.xlane.f32.xlu1 %v3044_v21  ;;  %v2953_v0 = vsel %vm2901_vm5, %v2628_v17, %v2952_v48 }
 0x11b   :  { %v10145_v37 = vpop.xlane.xlu1 %2057 }
 0x11c   :  { %v2636_v16 = vrot.slane %v10145_v37, %v9810_v2  ;;  %3048 = vmax.xlane.f32.xlu0 %v3047_v15  ;;  %v2954_v47 = vsel %vm2903_vm6, %v2632_v25, %v2953_v0 }
 0x11d   :  { %v10151_v40 = vpop.xlane.xlu0 %2060 }
 0x11e   :  { %13969 = vst [vmem:[#allocation10_spill] sm:$0xff] %v10151_v40  ;;  %v2640_v62 = vrot.slane %v10151_v40, %v9810_v2  ;;  %v2955_v63 = vsel %vm2905_vm7, %v2636_v16, %v2954_v47 }
 0x11f   :  { %v10156_v4 = vpop.xlane.xlu1 %2063  ;;  %v3050_v42 = vsel %vm3028_vm8, %v2955_v63, -inf }
 0x120   :  { %13970 = vst [vmem:[#allocation16_spill] sm:$0xff] %v10156_v4  ;;  %v2644_v49 = vrot.slane %v10156_v4, %v9810_v2  ;;  %3051 = vmax.xlane.f32.xlu1 %v3050_v42 }
 0x121   :  { %v10161_v3 = vpop.xlane.xlu0 %2066 }
 0x122   :  { %13971 = vst [vmem:[#allocation22_spill] sm:$0xff] %v10161_v3  ;;  %v2956_v38 = vsel %vm2893_vm1, %v2644_v49, %v2640_v62  ;;  %v2648_v1 = vrot.slane %v10161_v3, %v9810_v2 }
 0x123   :  { %v10166_v48 = vpop.xlane.xlu1 %2069 }
 0x124   :  { %13972 = vst [vmem:[#allocation23_spill] sm:$0xff] %v10166_v48  ;;  %v2957_v17 = vsel %vm2895_vm2, %v2648_v1, %v2956_v38  ;;  %v2652_v11 = vrot.slane %v10166_v48, %v9810_v2 }
 0x125   :  { %v10171_v21 = vpop.xlane.xlu0 %2072 }
 0x126   :  { %13973 = vst [vmem:[#allocation33_spill] sm:$0xff] %v10171_v21  ;;  %v2958_v25 = vsel %vm2897_vm3, %v2652_v11, %v2957_v17  ;;  %v2656_v0 = vrot.slane %v10171_v21, %v9810_v2 }
 0x127   :  { %v10176_v15 = vpop.xlane.xlu1 %2075 }
 0x128   :  { %13974 = vst [vmem:[#allocation34_spill] sm:$0xff] %v10176_v15  ;;  %v2959_v16 = vsel %vm2899_vm4, %v2656_v0, %v2958_v25  ;;  %v2660_v47 = vrot.slane %v10176_v15, %v9810_v2 }
 0x129   :  { %v10181_v62 = vpop.xlane.xlu0 %2078 }
 0x12a   :  { %13975 = vst [vmem:[#allocation35_spill] sm:$0xff] %v10181_v62  ;;  %v2664_v63 = vrot.slane %v10181_v62, %v9810_v2  ;;  %v2960_v42 = vsel %vm2901_vm5, %v2660_v47, %v2959_v16 }
 0x12b   :  { %v10186_v49 = vpop.xlane.xlu1 %2081 }
 0x12c   :  { %13976 = vst [vmem:[#allocation36_spill] sm:$0xff] %v10186_v49  ;;  %v2668_v38 = vrot.slane %v10186_v49, %v9810_v2  ;;  %v2961_v1 = vsel %vm2903_vm6, %v2664_v63, %v2960_v42 }
 0x12d   :  { %v10191_v17 = vpop.xlane.xlu0 %2084 }
 0x12e   :  { %13977 = vst [vmem:[#allocation37_spill] sm:$0xff] %v10191_v17  ;;  %v2672_v11 = vrot.slane %v10191_v17, %v9810_v2  ;;  %v2962_v25 = vsel %vm2905_vm7, %v2668_v38, %v2961_v1 }
 0x12f   :  { %v10196_v0 = vpop.xlane.xlu1 %2087  ;;  %v3053_v62 = vsel %vm3028_vm8, %v2962_v25, -inf }
 0x130   :  { %13978 = vst [vmem:[#allocation38_spill] sm:$0xff] %v10196_v0  ;;  %v2676_v16 = vrot.slane %v10196_v0, %v9810_v2  ;;  %3054 = vmax.xlane.f32.xlu0 %v3053_v62 }
 0x131   :  { %v10201_v47 = vpop.xlane.xlu0 %2090 }
 0x132   :  { %13979 = vst [vmem:[#allocation39_spill] sm:$0xff] %v10201_v47  ;;  %v2963_v21 = vsel %vm2893_vm1, %v2676_v16, %v2672_v11  ;;  %v2680_v63 = vrot.slane %v10201_v47, %v9810_v2 }
 0x133   :  { %v10206_v42 = vpop.xlane.xlu1 %2093 }
 0x134   :  { %13980 = vst [vmem:[#allocation40_spill] sm:$0xff] %v10206_v42  ;;  %v2964_v17 = vsel %vm2895_vm2, %v2680_v63, %v2963_v21  ;;  %v2684_v38 = vrot.slane %v10206_v42, %v9810_v2  ;;  %v14033_v42 = vld [vmem:[#allocation4_spill] sm:$0xff] }
 0x135   :  { %v10211_v1 = vpop.xlane.xlu0 %2096 }
 0x136   :  { %13981 = vst [vmem:[#allocation41_spill] sm:$0xff] %v10211_v1  ;;  %v2965_v25 = vsel %vm2897_vm3, %v2684_v38, %v2964_v17  ;;  %v2688_v62 = vrot.slane %v10211_v1, %v9810_v2 }
 0x137   :  { %v10216_v3 = vpop.xlane.xlu1 %2099 }
 0x138   :  { %13982 = vst [vmem:[#allocation42_spill] sm:$0xff] %v10216_v3  ;;  %v2966_v11 = vsel %vm2899_vm4, %v2688_v62, %v2965_v25  ;;  %v2692_v16 = vrot.slane %v10216_v3, %v9810_v2 }
 0x139   :  { %v10221_v47 = vpop.xlane.xlu0 %2102 }
 0x13a   :  { %13983 = vst [vmem:[#allocation43_spill] sm:$0xff] %v10221_v47  ;;  %v2696_v21 = vrot.slane %v10221_v47, %v9810_v2  ;;  %v2967_v63 = vsel %vm2901_vm5, %v2692_v16, %v2966_v11 }
 0x13b   :  { %v10226_v40 = vpop.xlane.xlu1 %2105 }
 0x13c   :  { %13984 = vst [vmem:[#allocation44_spill] sm:$0xff] %v10226_v40  ;;  %v2700_v17 = vrot.slane %v10226_v40, %v9810_v2  ;;  %v2968_v38 = vsel %vm2903_vm6, %v2696_v21, %v2967_v63 }
 0x13d   :  { %v10231_v1 = vpop.xlane.xlu0 %2108 }
 0x13e   :  { %13985 = vst [vmem:[#allocation45_spill] sm:$0xff] %v10231_v1  ;;  %v2704_v25 = vrot.slane %v10231_v1, %v9810_v2  ;;  %v2969_v62 = vsel %vm2905_vm7, %v2700_v17, %v2968_v38 }
 0x13f   :  { %v10236_v13 = vpop.xlane.xlu1 %2111  ;;  %v3056_v47 = vsel %vm3028_vm8, %v2969_v62, -inf }
 0x140   :  { %13986 = vst [vmem:[#allocation46_spill] sm:$0xff] %v10236_v13  ;;  %v2708_v11 = vrot.slane %v10236_v13, %v9810_v2  ;;  %3057 = vmax.xlane.f32.xlu1 %v3056_v47 }
 0x141   :  { %v10241_v16 = vpop.xlane.xlu0 %2114 }
 0x142   :  { %13987 = vst [vmem:[#allocation47_spill] sm:$0xff] %v10241_v16  ;;  %v2970_v40 = vsel %vm2893_vm1, %v2708_v11, %v2704_v25  ;;  %v2712_v21 = vrot.slane %v10241_v16, %v9810_v2 }
 0x143   :  { %v10246_v63 = vpop.xlane.xlu1 %2117 }
 0x144   :  { %13988 = vst [vmem:[#allocation48_spill] sm:$0xff] %v10246_v63  ;;  %v2971_v1 = vsel %vm2895_vm2, %v2712_v21, %v2970_v40  ;;  %v2716_v17 = vrot.slane %v10246_v63, %v9810_v2 }
 0x145   :  { %v10251_v38 = vpop.xlane.xlu0 %2120 }
 0x146   :  { %13989 = vst [vmem:[#allocation49_spill] sm:$0xff] %v10251_v38  ;;  %v2972_v62 = vsel %vm2897_vm3, %v2716_v17, %v2971_v1  ;;  %v2720_v47 = vrot.slane %v10251_v38, %v9810_v2 }
 0x147   :  { %v10256_v13 = vpop.xlane.xlu1 %2123 }
 0x148   :  { %13990 = vst [vmem:[#allocation50_spill] sm:$0xff] %v10256_v13  ;;  %v2973_v25 = vsel %vm2899_vm4, %v2720_v47, %v2972_v62  ;;  %v2724_v11 = vrot.slane %v10256_v13, %v9810_v2 }
 0x149   :  { %v10261_v16 = vpop.xlane.xlu0 %2126 }
 0x14a   :  { %13991 = vst [vmem:[#allocation51_spill] sm:$0xff] %v10261_v16  ;;  %v2728_v40 = vrot.slane %v10261_v16, %v9810_v2  ;;  %v2974_v21 = vsel %vm2901_vm5, %v2724_v11, %v2973_v25 }
 0x14b   :  { %v10266_v63 = vpop.xlane.xlu1 %2129 }
 0x14c   :  { %13992 = vst [vmem:[#allocation52_spill] sm:$0xff] %v10266_v63  ;;  %v2732_v1 = vrot.slane %v10266_v63, %v9810_v2  ;;  %v2975_v17 = vsel %vm2903_vm6, %v2728_v40, %v2974_v21 }
 0x14d   :  { %v10271_v38 = vpop.xlane.xlu0 %2132 }
 0x14e   :  { %13993 = vst [vmem:[#allocation53_spill] sm:$0xff] %v10271_v38  ;;  %v2736_v62 = vrot.slane %v10271_v38, %v9810_v2  ;;  %v2976_v47 = vsel %vm2905_vm7, %v2732_v1, %v2975_v17 }
 0x14f   :  { %v10276_v13 = vpop.xlane.xlu1 %2135  ;;  %v3059_v16 = vsel %vm3028_vm8, %v2976_v47, -inf }
 0x150   :  { %13994 = vst [vmem:[#allocation54_spill] sm:$0xff] %v10276_v13  ;;  %v2740_v25 = vrot.slane %v10276_v13, %v9810_v2  ;;  %3060 = vmax.xlane.f32.xlu0 %v3059_v16 }
 0x151   :  { %v10281_v11 = vpop.xlane.xlu0 %2138 }
 0x152   :  { %13995 = vst [vmem:[#allocation55_spill] sm:$0xff] %v10281_v11  ;;  %v2977_v63 = vsel %vm2893_vm1, %v2740_v25, %v2736_v62  ;;  %v2744_v40 = vrot.slane %v10281_v11, %v9810_v2 }
 0x153   :  { %v10286_v21 = vpop.xlane.xlu1 %2141 }
 0x154   :  { %13996 = vst [vmem:[#allocation56_spill] sm:$0xff] %v10286_v21  ;;  %v2978_v38 = vsel %vm2895_vm2, %v2744_v40, %v2977_v63  ;;  %v2748_v1 = vrot.slane %v10286_v21, %v9810_v2 }
 0x155   :  { %v10291_v17 = vpop.xlane.xlu0 %2144 }
 0x156   :  { %13997 = vst [vmem:[#allocation57_spill] sm:$0xff] %v10291_v17  ;;  %v2979_v47 = vsel %vm2897_vm3, %v2748_v1, %v2978_v38  ;;  %v2752_v16 = vrot.slane %v10291_v17, %v9810_v2 }
 0x157   :  { %v10296_v13 = vpop.xlane.xlu1 %2147 }
 0x158   :  { %13998 = vst [vmem:[#allocation58_spill] sm:$0xff] %v10296_v13  ;;  %v2980_v62 = vsel %vm2899_vm4, %v2752_v16, %v2979_v47  ;;  %v2756_v25 = vrot.slane %v10296_v13, %v9810_v2  ;;  %v8974_v47 = vmov 0  }
 0x159   :  { %v10301_v11 = vpop.xlane.xlu0 %2150  ;;  %8603 = vset.pattern.permute.xlu0 %v8974_v47  ;;  %8604 = vset.pattern.permute.xlu1 %v8974_v47 }
 0x15a   :  { %13999 = vst [vmem:[#allocation59_spill] sm:$0xff] %v10301_v11  ;;  %v2760_v63 = vrot.slane %v10301_v11, %v9810_v2  ;;  %v2981_v40 = vsel %vm2901_vm5, %v2756_v25, %v2980_v62 }
 0x15b   :  { %v10306_v21 = vpop.xlane.xlu1 %2153 }
 0x15c   :  { %14000 = vst [vmem:[#allocation60_spill] sm:$0xff] %v10306_v21  ;;  %v2764_v38 = vrot.slane %v10306_v21, %v9810_v2  ;;  %v2982_v1 = vsel %vm2903_vm6, %v2760_v63, %v2981_v40 }
 0x15d   :  { %v10311_v17 = vpop.xlane.xlu0 %2156 }
 0x15e   :  { %14001 = vst [vmem:[#allocation61_spill] sm:$0xff] %v10311_v17  ;;  %v2768_v16 = vrot.slane %v10311_v17, %v9810_v2  ;;  %v2983_v13 = vsel %vm2905_vm7, %v2764_v38, %v2982_v1 }
 0x15f   :  { %v10316_v11 = vpop.xlane.xlu1 %2159  ;;  %v3062_v62 = vsel %vm3028_vm8, %v2983_v13, -inf }
 0x160   :  { %14002 = vst [vmem:[#allocation62_spill] sm:$0xff] %v10316_v11  ;;  %v2772_v25 = vrot.slane %v10316_v11, %v9810_v2  ;;  %3063 = vmax.xlane.f32.xlu1 %v3062_v62 }
 0x161   :  { %v10321_v21 = vpop.xlane.xlu0 %2162 }
 0x162   :  { %14003 = vst [vmem:[#allocation63_spill] sm:$0xff] %v10321_v21  ;;  %v2984_v63 = vsel %vm2893_vm1, %v2772_v25, %v2768_v16  ;;  %v2776_v40 = vrot.slane %v10321_v21, %v9810_v2 }
 0x163   :  { %v10326_v47 = vpop.xlane.xlu1 %2165 }
 0x164   :  { %14004 = vst [vmem:[#allocation64_spill] sm:$0xff] %v10326_v47  ;;  %v2985_v17 = vsel %vm2895_vm2, %v2776_v40, %v2984_v63  ;;  %v2780_v38 = vrot.slane %v10326_v47, %v9810_v2 }
 0x165   :  { %v10331_v1 = vpop.xlane.xlu0 %2168 }
 0x166   :  { %14005 = vst [vmem:[#allocation65_spill] sm:$0xff] %v10331_v1  ;;  %v2986_v13 = vsel %vm2897_vm3, %v2780_v38, %v2985_v17  ;;  %v2784_v62 = vrot.slane %v10331_v1, %v9810_v2 }
 0x167   :  { %v10336_v11 = vpop.xlane.xlu1 %2171 }
 0x168   :  { %14006 = vst [vmem:[#allocation66_spill] sm:$0xff] %v10336_v11  ;;  %v2987_v16 = vsel %vm2899_vm4, %v2784_v62, %v2986_v13  ;;  %v2788_v25 = vrot.slane %v10336_v11, %v9810_v2 }
 0x169   :  { %v10341_v21 = vpop.xlane.xlu0 %2174 }
 0x16a   :  { %14007 = vst [vmem:[#allocation67_spill] sm:$0xff] %v10341_v21  ;;  %v2792_v63 = vrot.slane %v10341_v21, %v9810_v2  ;;  %v2988_v40 = vsel %vm2901_vm5, %v2788_v25, %v2987_v16 }
 0x16b   :  { %v10346_v47 = vpop.xlane.xlu1 %2177 }
 0x16c   :  { %14008 = vst [vmem:[#allocation68_spill] sm:$0xff] %v10346_v47  ;;  %v2796_v17 = vrot.slane %v10346_v47, %v9810_v2  ;;  %v2989_v38 = vsel %vm2903_vm6, %v2792_v63, %v2988_v40 }
 0x16d   :  { %v10351_v1 = vpop.xlane.xlu0 %2180 }
 0x16e   :  { %14009 = vst [vmem:[#allocation69_spill] sm:$0xff] %v10351_v1  ;;  %v2800_v13 = vrot.slane %v10351_v1, %v9810_v2  ;;  %v2990_v62 = vsel %vm2905_vm7, %v2796_v17, %v2989_v38 }
 0x16f   :  { %v10356_v11 = vpop.xlane.xlu1 %2183  ;;  %v3065_v21 = vsel %vm3028_vm8, %v2990_v62, -inf }
 0x170   :  { %14010 = vst [vmem:[#allocation70_spill] sm:$0xff] %v10356_v11  ;;  %v2804_v16 = vrot.slane %v10356_v11, %v9810_v2  ;;  %3066 = vmax.xlane.f32.xlu0 %v3065_v21 }
 0x171   :  { %v10361_v25 = vpop.xlane.xlu0 %2186 }
 0x172   :  { %14011 = vst [vmem:[#allocation71_spill] sm:$0xff] %v10361_v25  ;;  %v2991_v47 = vsel %vm2893_vm1, %v2804_v16, %v2800_v13  ;;  %v2808_v63 = vrot.slane %v10361_v25, %v9810_v2 }
 0x173   :  { %v10366_v40 = vpop.xlane.xlu1 %2189 }
 0x174   :  { %14012 = vst [vmem:[#allocation72_spill] sm:$0xff] %v10366_v40  ;;  %v2992_v1 = vsel %vm2895_vm2, %v2808_v63, %v2991_v47  ;;  %v2812_v17 = vrot.slane %v10366_v40, %v9810_v2 }
 0x175   :  { %v10371_v38 = vpop.xlane.xlu0 %2192 }
 0x176   :  { %14013 = vst [vmem:[#allocation73_spill] sm:$0xff] %v10371_v38  ;;  %v2993_v62 = vsel %vm2897_vm3, %v2812_v17, %v2992_v1  ;;  %v2816_v21 = vrot.slane %v10371_v38, %v9810_v2 }
 0x177   :  { %v10376_v11 = vpop.xlane.xlu1 %2195 }
 0x178   :  { %14014 = vst [vmem:[#allocation74_spill] sm:$0xff] %v10376_v11  ;;  %v2994_v13 = vsel %vm2899_vm4, %v2816_v21, %v2993_v62  ;;  %v2820_v16 = vrot.slane %v10376_v11, %v9810_v2 }
 0x179   :  { %v10381_v25 = vpop.xlane.xlu0 %2198 }
 0x17a   :  { %14015 = vst [vmem:[#allocation75_spill] sm:$0xff] %v10381_v25  ;;  %v2824_v47 = vrot.slane %v10381_v25, %v9810_v2  ;;  %v2995_v63 = vsel %vm2901_vm5, %v2820_v16, %v2994_v13 }
 0x17b   :  { %v10386_v40 = vpop.xlane.xlu1 %2201 }
 0x17c   :  { %14016 = vst [vmem:[#allocation76_spill] sm:$0xff] %v10386_v40  ;;  %v2828_v1 = vrot.slane %v10386_v40, %v9810_v2  ;;  %v2996_v17 = vsel %vm2903_vm6, %v2824_v47, %v2995_v63 }
 0x17d   :  { %v10391_v38 = vpop.xlane.xlu0 %2204 }
 0x17e   :  { %14017 = vst [vmem:[#allocation77_spill] sm:$0xff] %v10391_v38  ;;  %v2832_v62 = vrot.slane %v10391_v38, %v9810_v2  ;;  %v2997_v21 = vsel %vm2905_vm7, %v2828_v1, %v2996_v17 }
 0x17f   :  { %v10396_v11 = vpop.xlane.xlu1 %2207  ;;  %v3068_v25 = vsel %vm3028_vm8, %v2997_v21, -inf }
 0x180   :  { %14018 = vst [vmem:[#allocation78_spill] sm:$0xff] %v10396_v11  ;;  %v2836_v13 = vrot.slane %v10396_v11, %v9810_v2  ;;  %3069 = vmax.xlane.f32.xlu1 %v3068_v25 }
 0x181   :  { %v10401_v16 = vpop.xlane.xlu0 %2210 }
 0x182   :  { %14019 = vst [vmem:[#allocation79_spill] sm:$0xff] %v10401_v16  ;;  %v2998_v40 = vsel %vm2893_vm1, %v2836_v13, %v2832_v62  ;;  %v2840_v47 = vrot.slane %v10401_v16, %v9810_v2 }
 0x183   :  { %v10406_v63 = vpop.xlane.xlu1 %2213 }
 0x184   :  { %14020 = vst [vmem:[#allocation80_spill] sm:$0xff] %v10406_v63  ;;  %v2999_v38 = vsel %vm2895_vm2, %v2840_v47, %v2998_v40  ;;  %v2844_v1 = vrot.slane %v10406_v63, %v9810_v2 }
 0x185   :  { %v10411_v17 = vpop.xlane.xlu0 %2216 }
 0x186   :  { %14021 = vst [vmem:[#allocation81_spill] sm:$0xff] %v10411_v17  ;;  %v3000_v21 = vsel %vm2897_vm3, %v2844_v1, %v2999_v38  ;;  %v2848_v25 = vrot.slane %v10411_v17, %v9810_v2 }
 0x187   :  { %v10416_v11 = vpop.xlane.xlu1 %2219 }
 0x188   :  { %14022 = vst [vmem:[#allocation82_spill] sm:$0xff] %v10416_v11  ;;  %v3001_v62 = vsel %vm2899_vm4, %v2848_v25, %v3000_v21  ;;  %v2852_v13 = vrot.slane %v10416_v11, %v9810_v2 }
 0x189   :  { %v10421_v16 = vpop.xlane.xlu0 %2222 }
 0x18a   :  { %14023 = vst [vmem:[#allocation83_spill] sm:$0xff] %v10421_v16  ;;  %v2856_v40 = vrot.slane %v10421_v16, %v9810_v2  ;;  %v3002_v47 = vsel %vm2901_vm5, %v2852_v13, %v3001_v62 }
 0x18b   :  { %v10426_v63 = vpop.xlane.xlu1 %2225 }
 0x18c   :  { %14024 = vst [vmem:[#allocation84_spill] sm:$0xff] %v10426_v63  ;;  %v2860_v38 = vrot.slane %v10426_v63, %v9810_v2  ;;  %v3003_v1 = vsel %vm2903_vm6, %v2856_v40, %v3002_v47 }
 0x18d   :  { %v10431_v17 = vpop.xlane.xlu0 %2228 }
 0x18e   :  { %14025 = vst [vmem:[#allocation85_spill] sm:$0xff] %v10431_v17  ;;  %v3004_v21 = vsel %vm2905_vm7, %v2860_v38, %v3003_v1  ;;  %v2864_v13 = vrot.slane %v10431_v17, %v9810_v2 }
 0x18f   :  { %v10434_v25 = vpop.xlane.xlu1 %2231  ;;  %v3071_v11 = vsel %vm3028_vm8, %v3004_v21, -inf }
 0x190   :  { %14026 = vst [vmem:[#allocation86_spill] sm:$0xff] %v10434_v25  ;;  %3072 = vmax.xlane.f32.xlu0 %v3071_v11  ;;  %v2868_v40 = vrot.slane %v10434_v25, %v9810_v2 }
 0x191   :  { %v10437_v55 = vpop.xlane.xlu0 %2234 }
 0x192   :  { %14027 = vst [vmem:[#allocation87_spill] sm:$0xff] %v10437_v55  ;;  %v2872_v38 = vrot.slane %v10437_v55, %v9810_v2  ;;  %v3005_v11 = vsel %vm2893_vm1, %v2868_v40, %v2864_v13  ;;  %v14034_v40 = vld [vmem:[#allocation2_spill] sm:$0xff] }
 0x193   :  { %v10439_v16 = vpop.xlane.xlu1 %2237  ;;  %v10470_v5 = vsub.s32 1, %v14034_v40  ;;  %v10476_v49 = vsub.s32 3, %v14034_v40  ;;  %v10501_v15 = vsub.s32 7, %v14034_v40 }
 0x194   :  { %14028 = vst [vmem:[#allocation88_spill] sm:$0xff] %v10439_v16  ;;  %v2876_v63 = vrot.slane %v10439_v16, %v9810_v2  ;;  %v3006_v3 = vsel %vm2895_vm2, %v2872_v38, %v3005_v11 }
 0x195   :  { %v10441_v62 = vpop.xlane.xlu0 %2240  ;;  %14035 = vst [vmem:[#allocation4_spill] sm:$0xff] %v10470_v5  ;;  %14036 = vst [vmem:[#allocation2_spill] sm:$0xff] %v10476_v49 }
 0x196   :  { %14029 = vst [vmem:[#allocation89_spill] sm:$0xff] %v10441_v62  ;;  %v2880_v36 = vrot.slane %v10441_v62, %v9810_v2  ;;  %v3007_v55 = vsel %vm2897_vm3, %v2876_v63, %v3006_v3  ;;  %14038 = vst [vmem:[#allocation94_spill] sm:$0xff] %v10501_v15 }
 0x197   :  { %v10447_v47 = vpop.xlane.xlu1 %2243 }
 0x198   :  { %14030 = vst [vmem:[#allocation90_spill] sm:$0xff] %v10447_v47  ;;  %v2884_v38 = vrot.slane %v10447_v47, %v9810_v2  ;;  %v3008_v16 = vsel %vm2899_vm4, %v2880_v36, %v3007_v55 }
 0x199   :  { %v10451_v1 = vpop.xlane.xlu0 %2246 }
 0x19a   :  { %14031 = vst [vmem:[#allocation91_spill] sm:$0xff] %v10451_v1  ;;  %v2888_v3 = vrot.slane %v10451_v1, %v9810_v2  ;;  %v3009_v63 = vsel %vm2901_vm5, %v2884_v38, %v3008_v16 }
 0x19b   :  { %v10454_v21 = vpop.xlane.xlu1 %2249 }
 0x19c   :  { %14032 = vst [vmem:[#allocation92_spill] sm:$0xff] %v10454_v21  ;;  %v2892_v55 = vrot.slane %v10454_v21, %v9810_v2  ;;  %v3010_v38 = vsel %vm2903_vm6, %v2888_v3, %v3009_v63 }
 0x19d   :  { %v10459_v17 = vpop.xlane.xlu0 %3030 }
 0x19e   :  { %v3096_v25 = vrot.slane %v10459_v17, %v9029_v10  ;;  %v3011_v48 = vsel %vm2905_vm7, %v2892_v55, %v3010_v38 }
 0x19f   :  { %v10467_v13 = vpop.xlane.xlu1 %3033 }
 0x1a0   :  { %v3733_v0 = vsub.f32 %v14033_v42, %v3096_v25  ;;  %v3132_v62 = vrot.slane %v10467_v13, %v10470_v5  ;;  %v3140_v42 = vrot.slane %v10467_v13, %v10476_v49  ;;  %v10486_v25 = vsub.s32 5, %v14034_v40 }
 0x1a1   :  { %v3156_v2 = vrot.slane %v10467_v13, %v10501_v15  ;;  %v10513_v63 = vpop.xlane.xlu0 %3036 }
 0x1a2   :  { %v3861_v11 = vmul.f32 1.442695, %v3733_v0  ;;  %14037 = vst [vmem:[#allocation93_spill] sm:$0xff] %v10486_v25  ;;  %v3742_v36 = vsub.f32 %v9533_v59, %v3132_v62  ;;  %v10492_v0 = vsub.s32 2, %v14034_v40  ;;  %v3148_v47 = vrot.slane %v10467_v13, %v10486_v25  ;;  %v14039_v62 = vld [vmem:[#allocation5_spill] sm:$0xff] }
 0x1a3   :  { %v3744_v1 = vsub.f32 %v9582_v43, %v3140_v42  ;;  %v3074_v42 = vsel %vm3028_vm8, %v3011_v48, -inf }
 0x1a4   :  { %8621 = vpow2.f32 %v3861_v11  ;;  %v3100_v11 = vrot.slane %v10459_v17, %v10470_v5  ;;  %v3879_v16 = vmul.f32 1.442695, %v3742_v36  ;;  %v3104_v59 = vrot.slane %v10459_v17, %v10492_v0  ;;  %3075 = vmax.xlane.f32.xlu1 %v3074_v42 }
 0x1a5   :  { %v3746_v4 = vsub.f32 %v9598_v58, %v3148_v47  ;;  %v3883_v43 = vmul.f32 1.442695, %v3744_v1  ;;  %v10517_v36 = vsub.s32 4, %v14034_v40  ;;  %v3748_v47 = vsub.f32 %v13955_v44, %v3156_v2 }
 0x1a6   :  { %v3734_v21 = vsub.f32 %v14039_v62, %v3100_v11  ;;  %8623 = vpow2.f32 %v3879_v16  ;;  %v3108_v11 = vrot.slane %v10459_v17, %v10476_v49  ;;  %v3735_v55 = vsub.f32 %v9502_v33, %v3104_v59 }
 0x1a7   :  { %8625 = vpow2.f32 %v3883_v43  ;;  %v3887_v48 = vmul.f32 1.442695, %v3746_v4  ;;  %v3164_v1 = vrot.slane %v10513_v63, %v10470_v5  ;;  %v3112_v16 = vrot.slane %v10459_v17, %v10517_v36 }
 0x1a8   :  { %v3863_v58 = vmul.f32 1.442695, %v3734_v21  ;;  %v3736_v38 = vsub.f32 %v9551_v14, %v3108_v11  ;;  %v3865_v62 = vmul.f32 1.442695, %v3735_v55  ;;  %v3891_v42 = vmul.f32 1.442695, %v3748_v47 }
 0x1a9   :  { %v3172_v33 = vrot.slane %v10513_v63, %v10476_v49  ;;  %v3750_v21 = vsub.f32 %v9632_v32, %v3164_v1  ;;  %v10534_v44 = vsub.s32 6, %v14034_v40  ;;  %v3116_v4 = vrot.slane %v10459_v17, %v10486_v25 }
 0x1aa   :  { %8627 = vpow2.f32 %v3863_v58  ;;  %v3737_v59 = vsub.f32 %v9508_v39, %v3112_v16  ;;  %v3867_v14 = vmul.f32 1.442695, %v3736_v38  ;;  %v3180_v43 = vrot.slane %v10513_v63, %v10486_v25  ;;  %v10554_v16 = vpop.xlane.xlu1 %3039 }
 0x1ab   :  { %8629 = vpow2.f32 %v3887_v48  ;;  %14042 = vst [vmem:[#allocation96_spill] sm:$0xff] %v10534_v44  ;;  %v3752_v32 = vsub.f32 %v9647_v51, %v3172_v33  ;;  %v3895_v11 = vmul.f32 1.442695, %v3750_v21  ;;  %v3120_v40 = vrot.slane %v10459_v17, %v10534_v44 }
 0x1ac   :  { %8631 = vpow2.f32 %v3865_v62  ;;  %v3738_v58 = vsub.f32 %v9517_v46, %v3116_v4  ;;  %v3869_v39 = vmul.f32 1.442695, %v3737_v59  ;;  %v3188_v47 = vrot.slane %v10513_v63, %v10501_v15 }
 0x1ad   :  { %8633 = vpow2.f32 %v3891_v42  ;;  %v3754_v48 = vsub.f32 %v13952_v26, %v3180_v43  ;;  %v3899_v1 = vmul.f32 1.442695, %v3752_v32  ;;  %v3124_v46 = vrot.slane %v10459_v17, %v10501_v15 }
 0x1ae   :  { %v10511_v3 = vpop.eup %8621  ;;  %8635 = vpow2.f32 %v3867_v14  ;;  %v3739_v62 = vsub.f32 %v9559_v19, %v3120_v40  ;;  %v3871_v42 = vmul.f32 1.442695, %v3738_v58  ;;  %v3756_v26 = vsub.f32 %v13961_v54, %v3188_v47 }
 0x1af   :  { %14040 = vst [vmem:[#allocation5_spill] sm:$0xff] %v10511_v3  ;;  %4246 = vperm.xlu0 %8603, %v10511_v3   ;;  %8637 = vpow2.f32 %v3895_v11  ;;  %v3903_v33 = vmul.f32 1.442695, %v3754_v48  ;;  %v3196_v21 = vrot.slane %v10554_v16, %v10470_v5  ;;  %v3740_v17 = vsub.f32 %v9567_v28, %v3124_v46 }
 0x1b0   :  { %v10531_v2 = vpop.eup %8623  ;;  %8639 = vpow2.f32 %v3869_v39  ;;  %v3873_v19 = vmul.f32 1.442695, %v3739_v62  ;;  %v3128_v14 = vrot.slane %v10467_v13, %v9029_v10  ;;  %v3907_v54 = vmul.f32 1.442695, %v3756_v26 }
 0x1b1   :  { %14041 = vst [vmem:[#allocation95_spill] sm:$0xff] %v10531_v2  ;;  %v10543_v55 = vpop.eup %8625  ;;  %8641 = vpow2.f32 %v3899_v1  ;;  %v3204_v43 = vrot.slane %v10554_v16, %v10476_v49  ;;  %v3758_v32 = vsub.f32 %v9697_v53, %v3196_v21  ;;  %v3875_v28 = vmul.f32 1.442695, %v3740_v17  ;;  %v10604_v17 = vpop.xlane.xlu0 %3042 }
 0x1b2   :  { %14043 = vst [vmem:[#allocation97_spill] sm:$0xff] %v10543_v55  ;;  %8643 = vpow2.f32 %v3871_v42  ;;  %v3136_v58 = vrot.slane %v10467_v13, %v10492_v0  ;;  %v3741_v39 = vsub.f32 %v9525_v52, %v3128_v14  ;;  %v3212_v47 = vrot.slane %v10554_v16, %v10486_v25 }
 0x1b3   :  { %4273 = vperm.xlu0 %8603, %v10531_v2   ;;  %8645 = vpow2.f32 %v3903_v33  ;;  %v3760_v53 = vsub.f32 %v9711_v12, %v3204_v43  ;;  %v3911_v48 = vmul.f32 1.442695, %v3758_v32  ;;  %v3144_v62 = vrot.slane %v10467_v13, %v10517_v36 }
 0x1b4   :  { %v10552_v51 = vpop.eup %8627  ;;  %8647 = vpow2.f32 %v3873_v19  ;;  %v3743_v52 = vsub.f32 %v9573_v35, %v3136_v58  ;;  %v3877_v42 = vmul.f32 1.442695, %v3741_v39  ;;  %v3220_v26 = vrot.slane %v10554_v16, %v10501_v15 }
 0x1b5   :  { %14044 = vst [vmem:[#allocation98_spill] sm:$0xff] %v10552_v51  ;;  %v10556_v38 = vpop.eup %8629  ;;  %4249 = vperm.xlu1 %8604, %v10552_v51   ;;  %8649 = vpow2.f32 %v3907_v54  ;;  %v3762_v12 = vsub.f32 %v13953_v45, %v3212_v47  ;;  %v3915_v33 = vmul.f32 1.442695, %v3760_v53  ;;  %v3152_v35 = vrot.slane %v10467_v13, %v10534_v44 }
 0x1b6   :  { %14045 = vst [vmem:[#allocation99_spill] sm:$0xff] %v10556_v38  ;;  %v10566_v4 = vpop.eup %8631  ;;  %8651 = vpow2.f32 %v3875_v28  ;;  %v3745_v14 = vsub.f32 %v9590_v50, %v3144_v62  ;;  %v3881_v54 = vmul.f32 1.442695, %v3743_v52  ;;  %v3764_v45 = vsub.f32 %v13962_v8, %v3220_v26 }
 0x1b7   :  { %4279 = vperm.xlu0 %8603, %v10543_v55   ;;  %14046 = vst [vmem:[#allocation100_spill] sm:$0xff] %v10566_v4  ;;  %v10568_v59 = vpop.eup %8633  ;;  %8653 = vpow2.f32 %v3911_v48  ;;  %v3919_v43 = vmul.f32 1.442695, %v3762_v12  ;;  %v3228_v32 = vrot.slane %v10604_v17, %v10470_v5  ;;  %v3747_v13 = vsub.f32 %v13950_v29, %v3152_v35 }
 0x1b8   :  { %14047 = vst [vmem:[#allocation101_spill] sm:$0xff] %v10568_v59  ;;  %v10578_v11 = vpop.eup %8635  ;;  %8655 = vpow2.f32 %v3877_v42  ;;  %v3885_v50 = vmul.f32 1.442695, %v3745_v14  ;;  %v3160_v39 = vrot.slane %v10513_v63, %v9029_v10  ;;  %v3923_v8 = vmul.f32 1.442695, %v3764_v45 }
 0x1b9   :  { %4252 = vperm.xlu1 %8604, %v10566_v4   ;;  %14048 = vst [vmem:[#allocation102_spill] sm:$0xff] %v10578_v11  ;;  %v10580_v40 = vpop.eup %8637  ;;  %8657 = vpow2.f32 %v3915_v33  ;;  %v3236_v47 = vrot.slane %v10604_v17, %v10476_v49  ;;  %v3766_v53 = vsub.f32 %v9762_v31, %v3228_v32  ;;  %v3889_v29 = vmul.f32 1.442695, %v3747_v13  ;;  %v10654_v13 = vpop.xlane.xlu1 %3045 }
 0x1ba   :  { %14049 = vst [vmem:[#allocation103_spill] sm:$0xff] %v10580_v40  ;;  %v10590_v1 = vpop.eup %8639  ;;  %8659 = vpow2.f32 %v3881_v54  ;;  %v3168_v52 = vrot.slane %v10513_v63, %v10492_v0  ;;  %v3749_v42 = vsub.f32 %v9624_v22, %v3160_v39  ;;  %v3244_v26 = vrot.slane %v10604_v17, %v10486_v25 }
 0x1bb   :  { %4285 = vperm.xlu0 %8603, %v10556_v38   ;;  %14050 = vst [vmem:[#allocation104_spill] sm:$0xff] %v10590_v1  ;;  %v10592_v46 = vpop.eup %8641  ;;  %8661 = vpow2.f32 %v3919_v43  ;;  %v3768_v31 = vsub.f32 %v9782_v6, %v3236_v47  ;;  %v3927_v12 = vmul.f32 1.442695, %v3766_v53  ;;  %v3176_v14 = vrot.slane %v10513_v63, %v10517_v36 }
 0x1bc   :  { %14051 = vst [vmem:[#allocation105_spill] sm:$0xff] %v10592_v46  ;;  %v10602_v21 = vpop.eup %8643  ;;  %8663 = vpow2.f32 %v3885_v50  ;;  %v3751_v22 = vsub.f32 %v9638_v41, %v3168_v52  ;;  %v3893_v54 = vmul.f32 1.442695, %v3749_v42  ;;  %v3252_v45 = vrot.slane %v10604_v17, %v10501_v15 }
 0x1bd   :  { %4255 = vperm.xlu1 %8604, %v10578_v11   ;;  %14052 = vst [vmem:[#allocation106_spill] sm:$0xff] %v10602_v21  ;;  %v10606_v19 = vpop.eup %8645  ;;  %8665 = vpow2.f32 %v3923_v8  ;;  %v3770_v6 = vsub.f32 %v13959_v30, %v3244_v26  ;;  %v3931_v43 = vmul.f32 1.442695, %v3768_v31  ;;  %v3184_v41 = vrot.slane %v10513_v63, %v10534_v44  ;;  %v14064_v31 = vld [vmem:[#allocation25_spill] sm:$0xff] }
 0x1be   :  { %14053 = vst [vmem:[#allocation107_spill] sm:$0xff] %v10606_v19  ;;  %v10616_v28 = vpop.eup %8647  ;;  %8667 = vpow2.f32 %v3889_v29  ;;  %v3753_v39 = vsub.f32 %v9655_v60, %v3176_v14  ;;  %v3897_v8 = vmul.f32 1.442695, %v3751_v22  ;;  %v3772_v30 = vsub.f32 %v13965_v7, %v3252_v45  ;;  %v14067_v45 = vld [vmem:[#allocation11_spill] sm:$0xff] }
 0x1bf   :  { %4291 = vperm.xlu0 %8603, %v10568_v59   ;;  %14054 = vst [vmem:[#allocation108_spill] sm:$0xff] %v10616_v28  ;;  %v10618_v58 = vpop.eup %8649  ;;  %8669 = vpow2.f32 %v3927_v12  ;;  %v3935_v47 = vmul.f32 1.442695, %v3770_v6  ;;  %v3260_v53 = vrot.slane %v10654_v13, %v10470_v5  ;;  %v3755_v63 = vsub.f32 %v13956_v61, %v3184_v41  ;;  %v14068_v41 = vld [vmem:[#allocation27_spill] sm:$0xff]  ;;  %v14192_v59 = vld [vmem:[#allocation74_spill] sm:$0xff] }
 0x1c0   :  { %14055 = vst [vmem:[#allocation109_spill] sm:$0xff] %v10618_v58  ;;  %v10628_v48 = vpop.eup %8651  ;;  %8671 = vpow2.f32 %v3893_v54  ;;  %v3901_v60 = vmul.f32 1.442695, %v3753_v39  ;;  %v3192_v42 = vrot.slane %v10554_v16, %v9029_v10  ;;  %v3939_v7 = vmul.f32 1.442695, %v3772_v30 }
 0x1c1   :  { %4258 = vperm.xlu1 %8604, %v10590_v1   ;;  %14056 = vst [vmem:[#allocation110_spill] sm:$0xff] %v10628_v48  ;;  %v10630_v62 = vpop.eup %8653  ;;  %8673 = vpow2.f32 %v3931_v43  ;;  %v3268_v26 = vrot.slane %v10654_v13, %v10476_v49  ;;  %v3774_v12 = vsub.f32 %v14064_v31, %v3260_v53  ;;  %v3905_v61 = vmul.f32 1.442695, %v3755_v63  ;;  %v14071_v63 = vld [vmem:[#allocation12_spill] sm:$0xff] }
 0x1c2   :  { %14057 = vst [vmem:[#allocation111_spill] sm:$0xff] %v10630_v62  ;;  %v10640_v33 = vpop.eup %8655  ;;  %8675 = vpow2.f32 %v3897_v8  ;;  %v3200_v54 = vrot.slane %v10554_v16, %v10492_v0  ;;  %v3757_v6 = vsub.f32 %v14067_v45, %v3192_v42  ;;  %v3276_v43 = vrot.slane %v10654_v13, %v10486_v25  ;;  %v10704_v45 = vpop.xlane.xlu0 %3048 }
 0x1c3   :  { %4297 = vperm.xlu0 %8603, %v10580_v40   ;;  %14058 = vst [vmem:[#allocation112_spill] sm:$0xff] %v10640_v33  ;;  %v10642_v35 = vpop.eup %8657  ;;  %8677 = vpow2.f32 %v3935_v47  ;;  %v3776_v39 = vsub.f32 %v14068_v41, %v3268_v26  ;;  %v3943_v8 = vmul.f32 1.442695, %v3774_v12  ;;  %v3208_v53 = vrot.slane %v10554_v16, %v10517_v36 }
 0x1c4   :  { %14059 = vst [vmem:[#allocation113_spill] sm:$0xff] %v10642_v35  ;;  %v10652_v32 = vpop.eup %8659  ;;  %8679 = vpow2.f32 %v3901_v60  ;;  %v3759_v60 = vsub.f32 %v14071_v63, %v3200_v54  ;;  %v3909_v42 = vmul.f32 1.442695, %v3757_v6  ;;  %v3778_v26 = vsub.f32 %v9906_v27, %v3276_v43  ;;  %v14074_v6 = vld [vmem:[#allocation13_spill] sm:$0xff] }
 0x1c5   :  { %4261 = vperm.xlu1 %8604, %v10602_v21   ;;  %14060 = vst [vmem:[#allocation114_spill] sm:$0xff] %v10652_v32  ;;  %v10656_v50 = vpop.eup %8661  ;;  %8681 = vpow2.f32 %v3939_v7  ;;  %v3284_v7 = vrot.slane %v10654_v13, %v10501_v15  ;;  %v3947_v31 = vmul.f32 1.442695, %v3776_v39  ;;  %v3216_v54 = vrot.slane %v10554_v16, %v10534_v44  ;;  %v14077_v16 = vld [vmem:[#allocation15_spill] sm:$0xff] }
 0x1c6   :  { %14061 = vst [vmem:[#allocation115_spill] sm:$0xff] %v10656_v50  ;;  %v10666_v29 = vpop.eup %8663  ;;  %8683 = vpow2.f32 %v3905_v61  ;;  %v3761_v41 = vsub.f32 %v14074_v6, %v3208_v53  ;;  %v3913_v63 = vmul.f32 1.442695, %v3759_v60  ;;  %v3951_v43 = vmul.f32 1.442695, %v3778_v26 }
 0x1c7   :  { %4303 = vperm.xlu0 %8603, %v10592_v46   ;;  %14062 = vst [vmem:[#allocation116_spill] sm:$0xff] %v10666_v29  ;;  %v10668_v52 = vpop.eup %8665  ;;  %8685 = vpow2.f32 %v3943_v8  ;;  %v3780_v27 = vsub.f32 %v9936_v24, %v3284_v7  ;;  %v3292_v39 = vrot.slane %v10704_v45, %v10470_v5  ;;  %v3224_v60 = vrot.slane %v10604_v17, %v9029_v10  ;;  %v14078_v7 = vld [vmem:[#allocation30_spill] sm:$0xff] }
 0x1c8   :  { %14063 = vst [vmem:[#allocation117_spill] sm:$0xff] %v10668_v52  ;;  %v10678_v14 = vpop.eup %8667  ;;  %8687 = vpow2.f32 %v3909_v42  ;;  %v3917_v53 = vmul.f32 1.442695, %v3761_v41  ;;  %v3300_v42 = vrot.slane %v10704_v45, %v10476_v49  ;;  %v3232_v41 = vrot.slane %v10604_v17, %v10492_v0 }
 0x1c9   :  { %4264 = vperm.xlu1 %8604, %v10616_v28   ;;  %14065 = vst [vmem:[#allocation25_spill] sm:$0xff] %v10678_v14  ;;  %v10680_v22 = vpop.eup %8669  ;;  %8689 = vpow2.f32 %v3947_v31  ;;  %v3955_v24 = vmul.f32 1.442695, %v3780_v27  ;;  %v3782_v26 = vsub.f32 %v14078_v7, %v3292_v39  ;;  %v3308_v27 = vrot.slane %v10704_v45, %v10486_v25 }
 0x1ca   :  { %14066 = vst [vmem:[#allocation118_spill] sm:$0xff] %v10680_v22  ;;  %v10690_v30 = vpop.eup %8671  ;;  %8691 = vpow2.f32 %v3913_v63  ;;  %v14081_v63 = vld [vmem:[#allocation17_spill] sm:$0xff] }
 0x1cb   :  { %4309 = vperm.xlu0 %8603, %v10606_v19   ;;  %14069 = vst [vmem:[#allocation11_spill] sm:$0xff] %v10690_v30  ;;  %v10692_v47 = vpop.eup %8673  ;;  %8693 = vpow2.f32 %v3951_v43  ;;  %v14082_v43 = vld [vmem:[#allocation32_spill] sm:$0xff]  ;;  %v3959_v7 = vmul.f32 1.442695, %v3782_v26 }
 0x1cc   :  { %14070 = vst [vmem:[#allocation27_spill] sm:$0xff] %v10692_v47  ;;  %v10702_v12 = vpop.eup %8675  ;;  %8695 = vpow2.f32 %v3917_v53  ;;  %v3784_v39 = vsub.f32 %v14082_v43, %v3300_v42  ;;  %v14085_v53 = vld [vmem:[#allocation18_spill] sm:$0xff]  ;;  %v3786_v42 = vsub.f32 %v10033_v23, %v3308_v27 }
 0x1cd   :  { %4267 = vperm.xlu1 %8604, %v10628_v48   ;;  %14072 = vst [vmem:[#allocation12_spill] sm:$0xff] %v10702_v12  ;;  %v10706_v61 = vpop.eup %8677  ;;  %8697 = vpow2.f32 %v3955_v24  ;;  %v3316_v24 = vrot.slane %v10704_v45, %v10501_v15 }
 0x1ce   :  { %14073 = vst [vmem:[#allocation119_spill] sm:$0xff] %v10706_v61  ;;  %v10716_v8 = vpop.eup %8679  ;;  %v3963_v26 = vmul.f32 1.442695, %v3784_v39  ;;  %v3967_v27 = vmul.f32 1.442695, %v3786_v42 }
 0x1cf   :  { %4315 = vperm.xlu0 %8603, %v10618_v58   ;;  %14075 = vst [vmem:[#allocation13_spill] sm:$0xff] %v10716_v8  ;;  %v3788_v23 = vsub.f32 %v10060_v20, %v3316_v24 }
 0x1d1   :  { %4270 = vperm.xlu1 %8604, %v10640_v33   ;;  %v3971_v20 = vmul.f32 1.442695, %v3788_v23 }
 0x1d3   :  { %4321 = vperm.xlu0 %8603, %v10630_v62  }
 0x1d5   :  { %4276 = vperm.xlu1 %8604, %v10652_v32  }
 0x1d7   :  { %4327 = vperm.xlu0 %8603, %v10642_v35  }
 0x1d9   :  { %4282 = vperm.xlu1 %8604, %v10666_v29  }
 0x1db   :  { %4333 = vperm.xlu0 %8603, %v10656_v50  }
 0x1dd   :  { %4288 = vperm.xlu1 %8604, %v10678_v14  }
 0x1df   :  { %4339 = vperm.xlu0 %8603, %v10668_v52  }
 0x1e1   :  { %4294 = vperm.xlu1 %8604, %v10690_v30  }
 0x1e3   :  { %4345 = vperm.xlu0 %8603, %v10680_v22   ;;  %v10718_v22 = vpop.eup %8681 }
 0x1e4   :  { %14076 = vst [vmem:[#allocation120_spill] sm:$0xff] %v10718_v22  ;;  %v10728_v31 = vpop.eup %8683 }
 0x1e5   :  { %4300 = vperm.xlu1 %8604, %v10702_v12   ;;  %v3763_v12 = vsub.f32 %v14077_v16, %v3216_v54  ;;  %14079 = vst [vmem:[#allocation15_spill] sm:$0xff] %v10728_v31  ;;  %v10730_v6 = vpop.eup %8685  ;;  %v3765_v16 = vsub.f32 %v14081_v63, %v3224_v60  ;;  %v3767_v60 = vsub.f32 %v14085_v53, %v3232_v41 }
 0x1e6   :  { %14080 = vst [vmem:[#allocation30_spill] sm:$0xff] %v10730_v6  ;;  %v3248_v41 = vrot.slane %v10604_v17, %v10534_v44 }
 0x1e7   :  { %4351 = vperm.xlu0 %8603, %v10692_v47   ;;  %v3921_v54 = vmul.f32 1.442695, %v3763_v12  ;;  %v3240_v12 = vrot.slane %v10604_v17, %v10517_v36  ;;  %v3925_v63 = vmul.f32 1.442695, %v3765_v16  ;;  %v14088_v16 = vld [vmem:[#allocation19_spill] sm:$0xff] }
 0x1e8   :  { %v3771_v17 = vsub.f32 %v13963_v18, %v3248_v41  ;;  %v14093_v41 = vld [vmem:[#allocation24_spill] sm:$0xff] }
 0x1e9   :  { %4306 = vperm.xlu1 %8604, %v10716_v8   ;;  %8699 = vpow2.f32 %v3921_v54  ;;  %v3769_v53 = vsub.f32 %v14088_v16, %v3240_v12 }
 0x1ea   :  { %8701 = vpow2.f32 %v3959_v7  ;;  %v3937_v18 = vmul.f32 1.442695, %v3771_v17  ;;  %v3272_v17 = vrot.slane %v10654_v13, %v10517_v36 }
 0x1eb   :  { %4357 = vperm.xlu0 %8603, %v10706_v61   ;;  %8703 = vpow2.f32 %v3925_v63  ;;  %v3933_v12 = vmul.f32 1.442695, %v3769_v53 }
 0x1ec   :  { %8705 = vpow2.f32 %v3963_v26 }
 0x1ed   :  { %4312 = vperm.xlu1 %8604, %v10728_v31   ;;  %v10754_v31 = vpop.xlane.xlu1 %3051 }
 0x1ee   :  { %v3324_v39 = vrot.slane %v10754_v31, %v10470_v5  ;;  %v3332_v63 = vrot.slane %v10754_v31, %v10476_v49  ;;  %v3340_v53 = vrot.slane %v10754_v31, %v10486_v25 }
 0x1ef   :  { %4363 = vperm.xlu0 %8603, %v10718_v22   ;;  %v10740_v22 = vpop.eup %8687 }
 0x1f0   :  { %14083 = vst [vmem:[#allocation17_spill] sm:$0xff] %v10740_v22  ;;  %v10742_v61 = vpop.eup %8689  ;;  %v3790_v24 = vsub.f32 %v10092_v9, %v3324_v39  ;;  %v3792_v9 = vsub.f32 %v10114_v57, %v3332_v63  ;;  %v3794_v57 = vsub.f32 %v10132_v56, %v3340_v53 }
 0x1f1   :  { %14084 = vst [vmem:[#allocation32_spill] sm:$0xff] %v10742_v61  ;;  %4318 = vperm.xlu1 %8604, %v10740_v22   ;;  %v10752_v43 = vpop.eup %8691 }
 0x1f2   :  { %14086 = vst [vmem:[#allocation18_spill] sm:$0xff] %v10752_v43  ;;  %v10756_v54 = vpop.eup %8693  ;;  %v3975_v23 = vmul.f32 1.442695, %v3790_v24  ;;  %v3979_v63 = vmul.f32 1.442695, %v3792_v9 }
 0x1f3   :  { %4369 = vperm.xlu0 %8603, %v10730_v6   ;;  %14087 = vst [vmem:[#allocation121_spill] sm:$0xff] %v10756_v54  ;;  %v10766_v7 = vpop.eup %8695  ;;  %v3983_v53 = vmul.f32 1.442695, %v3794_v57 }
 0x1f4   :  { %14089 = vst [vmem:[#allocation19_spill] sm:$0xff] %v10766_v7  ;;  %v10768_v22 = vpop.eup %8697 }
 0x1f5   :  { %4324 = vperm.xlu1 %8604, %v10752_v43   ;;  %14090 = vst [vmem:[#allocation122_spill] sm:$0xff] %v10768_v22  ;;  %v10778_v42 = vpop.eup %8699 }
 0x1f6   :  { %14091 = vst [vmem:[#allocation123_spill] sm:$0xff] %v10778_v42  ;;  %v10780_v26 = vpop.eup %8701 }
 0x1f7   :  { %4375 = vperm.xlu0 %8603, %v10742_v61   ;;  %v3929_v61 = vmul.f32 1.442695, %v3767_v60  ;;  %v3256_v60 = vrot.slane %v10654_v13, %v9029_v10  ;;  %14092 = vst [vmem:[#allocation124_spill] sm:$0xff] %v10780_v26 }
 0x1f9   :  { %4330 = vperm.xlu1 %8604, %v10766_v7   ;;  %8707 = vpow2.f32 %v3929_v61  ;;  %v3264_v61 = vrot.slane %v10654_v13, %v10492_v0  ;;  %v3773_v16 = vsub.f32 %v14093_v41, %v3256_v60 }
 0x1fa   :  { %8709 = vpow2.f32 %v3967_v27  ;;  %v10790_v27 = vpop.eup %8703 }
 0x1fb   :  { %4381 = vperm.xlu0 %8603, %v10756_v54   ;;  %8711 = vpow2.f32 %v3933_v12  ;;  %14094 = vst [vmem:[#allocation24_spill] sm:$0xff] %v10790_v27  ;;  %v10792_v39 = vpop.eup %8705  ;;  %v14096_v12 = vld [vmem:[#allocation26_spill] sm:$0xff]  ;;  %v3941_v41 = vmul.f32 1.442695, %v3773_v16  ;;  %v14099_v16 = vld [vmem:[#allocation28_spill] sm:$0xff] }
 0x1fc   :  { %8713 = vpow2.f32 %v3971_v20  ;;  %14095 = vst [vmem:[#allocation125_spill] sm:$0xff] %v10792_v39  ;;  %v3775_v60 = vsub.f32 %v14096_v12, %v3264_v61  ;;  %v3348_v20 = vrot.slane %v10754_v31, %v10501_v15  ;;  %v3280_v61 = vrot.slane %v10654_v13, %v10534_v44 }
 0x1fd   :  { %4336 = vperm.xlu1 %8604, %v10778_v42   ;;  %8715 = vpow2.f32 %v3937_v18  ;;  %v3777_v12 = vsub.f32 %v14099_v16, %v3272_v17 }
 0x1fe   :  { %8717 = vpow2.f32 %v3975_v23  ;;  %v3796_v56 = vsub.f32 %v10145_v37, %v3348_v20  ;;  %v3779_v13 = vsub.f32 %v9918_v34, %v3280_v61  ;;  %v14102_v20 = vld [vmem:[#allocation16_spill] sm:$0xff]  ;;  %v14105_v61 = vld [vmem:[#allocation29_spill] sm:$0xff] }
 0x1ff   :  { %4387 = vperm.xlu0 %8603, %v10768_v22   ;;  %v10804_v22 = vpop.xlane.xlu0 %3054  ;;  %8719 = vpow2.f32 %v3941_v41  ;;  %v3949_v17 = vmul.f32 1.442695, %v3777_v12 }
 0x200   :  { %8721 = vpow2.f32 %v3979_v63  ;;  %v3356_v9 = vrot.slane %v10804_v22, %v10470_v5  ;;  %v3987_v37 = vmul.f32 1.442695, %v3796_v56  ;;  %v3364_v41 = vrot.slane %v10804_v22, %v10476_v49 }
 0x201   :  { %4342 = vperm.xlu1 %8604, %v10790_v27   ;;  %v3953_v34 = vmul.f32 1.442695, %v3779_v13  ;;  %v3372_v56 = vrot.slane %v10804_v22, %v10486_v25  ;;  %v3304_v13 = vrot.slane %v10704_v45, %v10517_v36 }
 0x202   :  { %v3798_v57 = vsub.f32 %v14102_v20, %v3356_v9 }
 0x203   :  { %4393 = vperm.xlu0 %8603, %v10780_v26   ;;  %v10802_v24 = vpop.eup %8707 }
 0x204   :  { %14097 = vst [vmem:[#allocation26_spill] sm:$0xff] %v10802_v24  ;;  %v10806_v18 = vpop.eup %8709  ;;  %v3991_v20 = vmul.f32 1.442695, %v3798_v57 }
 0x205   :  { %14098 = vst [vmem:[#allocation126_spill] sm:$0xff] %v10806_v18  ;;  %4348 = vperm.xlu1 %8604, %v10802_v24   ;;  %v10816_v23 = vpop.eup %8711 }
 0x206   :  { %14100 = vst [vmem:[#allocation28_spill] sm:$0xff] %v10816_v23  ;;  %v10818_v54 = vpop.eup %8713 }
 0x207   :  { %4399 = vperm.xlu0 %8603, %v10792_v39   ;;  %v3945_v39 = vmul.f32 1.442695, %v3775_v60  ;;  %14101 = vst [vmem:[#allocation127_spill] sm:$0xff] %v10818_v54  ;;  %v3288_v60 = vrot.slane %v10704_v45, %v9029_v10  ;;  %v10828_v63 = vpop.eup %8715 }
 0x208   :  { %14103 = vst [vmem:[#allocation16_spill] sm:$0xff] %v10828_v63  ;;  %v10830_v16 = vpop.eup %8717 }
 0x209   :  { %4354 = vperm.xlu1 %8604, %v10816_v23   ;;  %8723 = vpow2.f32 %v3945_v39  ;;  %14104 = vst [vmem:[#allocation128_spill] sm:$0xff] %v10830_v16  ;;  %v3296_v39 = vrot.slane %v10704_v45, %v10492_v0  ;;  %v3781_v12 = vsub.f32 %v14105_v61, %v3288_v60 }
 0x20a   :  { %8725 = vpow2.f32 %v3983_v53  ;;  %v14106_v53 = vld [vmem:[#allocation23_spill] sm:$0xff] }
 0x20b   :  { %4405 = vperm.xlu0 %8603, %v10806_v18   ;;  %8727 = vpow2.f32 %v3949_v17  ;;  %v3800_v9 = vsub.f32 %v14106_v53, %v3364_v41  ;;  %v14109_v17 = vld [vmem:[#allocation31_spill] sm:$0xff]  ;;  %v3957_v61 = vmul.f32 1.442695, %v3781_v12  ;;  %v14110_v41 = vld [vmem:[#allocation34_spill] sm:$0xff] }
 0x20c   :  { %8729 = vpow2.f32 %v3987_v37  ;;  %v3783_v60 = vsub.f32 %v14109_v17, %v3296_v39  ;;  %v3380_v37 = vrot.slane %v10804_v22, %v10501_v15  ;;  %v3802_v57 = vsub.f32 %v14110_v41, %v3372_v56  ;;  %v14113_v12 = vld [vmem:[#allocation6_spill] sm:$0xff]  ;;  %v14114_v56 = vld [vmem:[#allocation36_spill] sm:$0xff] }
 0x20d   :  { %4360 = vperm.xlu1 %8604, %v10828_v63   ;;  %8731 = vpow2.f32 %v3953_v34  ;;  %v3995_v53 = vmul.f32 1.442695, %v3800_v9  ;;  %v10854_v63 = vpop.xlane.xlu1 %3057  ;;  %v3312_v39 = vrot.slane %v10704_v45, %v10534_v44  ;;  %v3785_v17 = vsub.f32 %v14113_v12, %v3304_v13  ;;  %v14117_v45 = vld [vmem:[#allocation8_spill] sm:$0xff]  ;;  %v10878_v12 = vpop.xlane.xlu0 %3060 }
 0x20e   :  { %8733 = vpow2.f32 %v3991_v20  ;;  %v3804_v20 = vsub.f32 %v14114_v56, %v3380_v37  ;;  %v3999_v9 = vmul.f32 1.442695, %v3802_v57  ;;  %v3388_v41 = vrot.slane %v10854_v63, %v10470_v5  ;;  %v14118_v57 = vld [vmem:[#allocation38_spill] sm:$0xff] }
 0x20f   :  { %4411 = vperm.xlu0 %8603, %v10818_v54   ;;  %v10840_v54 = vpop.eup %8719  ;;  %8735 = vpow2.f32 %v3957_v61  ;;  %v3965_v13 = vmul.f32 1.442695, %v3785_v17  ;;  %v3396_v37 = vrot.slane %v10854_v63, %v10476_v49  ;;  %v14121_v17 = vld [vmem:[#allocation14_spill] sm:$0xff] }
 0x210   :  { %14107 = vst [vmem:[#allocation29_spill] sm:$0xff] %v10840_v54  ;;  %v10842_v18 = vpop.eup %8721  ;;  %8737 = vpow2.f32 %v3995_v53  ;;  %v4003_v61 = vmul.f32 1.442695, %v3804_v20  ;;  %v3806_v53 = vsub.f32 %v14118_v57, %v3388_v41  ;;  %v14122_v41 = vld [vmem:[#allocation40_spill] sm:$0xff] }
 0x211   :  { %14108 = vst [vmem:[#allocation23_spill] sm:$0xff] %v10842_v18  ;;  %4366 = vperm.xlu1 %8604, %v10840_v54  }
 0x212   :  { %v4007_v57 = vmul.f32 1.442695, %v3806_v53  ;;  %v14126_v53 = vld [vmem:[#allocation42_spill] sm:$0xff] }
 0x213   :  { %4417 = vperm.xlu0 %8603, %v10830_v16   ;;  %v10852_v16 = vpop.eup %8723 }
 0x214   :  { %14111 = vst [vmem:[#allocation31_spill] sm:$0xff] %v10852_v16  ;;  %v10856_v34 = vpop.eup %8725 }
 0x215   :  { %14112 = vst [vmem:[#allocation34_spill] sm:$0xff] %v10856_v34  ;;  %4372 = vperm.xlu1 %8604, %v10852_v16   ;;  %v10866_v54 = vpop.eup %8727  ;;  %v3787_v16 = vsub.f32 %v14117_v45, %v3312_v39  ;;  %v3328_v39 = vrot.slane %v10754_v31, %v10492_v0  ;;  %v3808_v45 = vsub.f32 %v14122_v41, %v3396_v37 }
 0x216   :  { %14115 = vst [vmem:[#allocation6_spill] sm:$0xff] %v10866_v54  ;;  %v10868_v27 = vpop.eup %8729  ;;  %v3412_v37 = vrot.slane %v10854_v63, %v10501_v15 }
 0x217   :  { %4423 = vperm.xlu0 %8603, %v10842_v18   ;;  %v3961_v18 = vmul.f32 1.442695, %v3783_v60  ;;  %14116 = vst [vmem:[#allocation36_spill] sm:$0xff] %v10868_v27  ;;  %v3320_v60 = vrot.slane %v10754_v31, %v9029_v10  ;;  %v10880_v56 = vpop.eup %8731 }
 0x218   :  { %14119 = vst [vmem:[#allocation8_spill] sm:$0xff] %v10880_v56 }
 0x219   :  { %4378 = vperm.xlu1 %8604, %v10866_v54   ;;  %8739 = vpow2.f32 %v3961_v18  ;;  %v3969_v18 = vmul.f32 1.442695, %v3787_v16  ;;  %v3789_v20 = vsub.f32 %v14121_v17, %v3320_v60  ;;  %v3336_v16 = vrot.slane %v10754_v31, %v10517_v36  ;;  %v14125_v60 = vld [vmem:[#allocation7_spill] sm:$0xff] }
 0x21a   :  { %8741 = vpow2.f32 %v3999_v9  ;;  %v3404_v9 = vrot.slane %v10854_v63, %v10486_v25 }
 0x21b   :  { %4429 = vperm.xlu0 %8603, %v10856_v34   ;;  %v10882_v34 = vpop.eup %8733  ;;  %8743 = vpow2.f32 %v3965_v13  ;;  %v3973_v17 = vmul.f32 1.442695, %v3789_v20  ;;  %v14129_v20 = vld [vmem:[#allocation9_spill] sm:$0xff] }
 0x21c   :  { %14120 = vst [vmem:[#allocation38_spill] sm:$0xff] %v10882_v34  ;;  %8745 = vpow2.f32 %v4003_v61  ;;  %v10894_v26 = vpop.eup %8735  ;;  %v3791_v61 = vsub.f32 %v14125_v60, %v3328_v39  ;;  %v3810_v41 = vsub.f32 %v14126_v53, %v3404_v9  ;;  %v3344_v39 = vrot.slane %v10754_v31, %v10534_v44  ;;  %v14130_v9 = vld [vmem:[#allocation44_spill] sm:$0xff]  ;;  %v10926_v31 = vpop.xlane.xlu1 %3063 }
 0x21d   :  { %4384 = vperm.xlu1 %8604, %v10880_v56   ;;  %14123 = vst [vmem:[#allocation14_spill] sm:$0xff] %v10894_v26  ;;  %v10896_v13 = vpop.eup %8737  ;;  %8747 = vpow2.f32 %v3969_v18  ;;  %v4011_v56 = vmul.f32 1.442695, %v3808_v45  ;;  %v3793_v60 = vsub.f32 %v14129_v20, %v3336_v16  ;;  %v3420_v53 = vrot.slane %v10878_v12, %v10470_v5  ;;  %v14133_v16 = vld [vmem:[#allocation20_spill] sm:$0xff]  ;;  %v14134_v20 = vld [vmem:[#allocation46_spill] sm:$0xff] }
 0x21e   :  { %14124 = vst [vmem:[#allocation40_spill] sm:$0xff] %v10896_v13  ;;  %8749 = vpow2.f32 %v4007_v57  ;;  %v3812_v57 = vsub.f32 %v14130_v9, %v3412_v37  ;;  %v4015_v45 = vmul.f32 1.442695, %v3810_v41  ;;  %v3428_v41 = vrot.slane %v10878_v12, %v10476_v49 }
 0x21f   :  { %4435 = vperm.xlu0 %8603, %v10868_v27   ;;  %v10892_v27 = vpop.xlane.xlu0 %3066  ;;  %8751 = vpow2.f32 %v3973_v17  ;;  %v3981_v17 = vmul.f32 1.442695, %v3793_v60  ;;  %v3814_v9 = vsub.f32 %v14134_v20, %v3420_v53  ;;  %v3360_v60 = vrot.slane %v10804_v22, %v10492_v0 }
 0x220   :  { %8753 = vpow2.f32 %v4011_v56  ;;  %v3352_v56 = vrot.slane %v10804_v22, %v9029_v10  ;;  %v4019_v37 = vmul.f32 1.442695, %v3812_v57  ;;  %v14137_v57 = vld [vmem:[#allocation10_spill] sm:$0xff]  ;;  %v3436_v53 = vrot.slane %v10878_v12, %v10486_v25 }
 0x221   :  { %4390 = vperm.xlu1 %8604, %v10894_v26   ;;  %v3977_v26 = vmul.f32 1.442695, %v3791_v61  ;;  %v3795_v61 = vsub.f32 %v14133_v16, %v3344_v39  ;;  %v14138_v16 = vld [vmem:[#allocation48_spill] sm:$0xff]  ;;  %v4023_v43 = vmul.f32 1.442695, %v3814_v9  ;;  %v14142_v9 = vld [vmem:[#allocation50_spill] sm:$0xff]  ;;  %v3464_v40 = vrot.slane %v10926_v31, %v10517_v36 }
 0x222   :  { %v3816_v20 = vsub.f32 %v14138_v16, %v3428_v41  ;;  %v3444_v41 = vrot.slane %v10878_v12, %v10501_v15  ;;  %v3818_v16 = vsub.f32 %v14142_v9, %v3436_v53  ;;  %v3452_v9 = vrot.slane %v10926_v31, %v10470_v5 }
 0x223   :  { %4441 = vperm.xlu0 %8603, %v10882_v34   ;;  %v10906_v34 = vpop.xlane.xlu0 %3072  ;;  %v10908_v42 = vpop.eup %8739  ;;  %8755 = vpow2.f32 %v3977_v26  ;;  %v3985_v39 = vmul.f32 1.442695, %v3795_v61 }
 0x224   :  { %14127 = vst [vmem:[#allocation7_spill] sm:$0xff] %v10908_v42  ;;  %v10910_v18 = vpop.eup %8741  ;;  %8757 = vpow2.f32 %v4015_v45  ;;  %v3797_v45 = vsub.f32 %v14137_v57, %v3352_v56  ;;  %v3368_v56 = vrot.slane %v10804_v22, %v10517_v36 }
 0x225   :  { %14128 = vst [vmem:[#allocation42_spill] sm:$0xff] %v10910_v18  ;;  %4396 = vperm.xlu1 %8604, %v10908_v42   ;;  %v10922_v54 = vpop.eup %8743  ;;  %8759 = vpow2.f32 %v3981_v17 }
 0x226   :  { %14131 = vst [vmem:[#allocation9_spill] sm:$0xff] %v10922_v54  ;;  %v10924_v42 = vpop.eup %8745  ;;  %8761 = vpow2.f32 %v4019_v37  ;;  %v14141_v37 = vld [vmem:[#allocation22_spill] sm:$0xff]  ;;  %v3989_v8 = vmul.f32 1.442695, %v3797_v45  ;;  %v14145_v45 = vld [vmem:[#allocation33_spill] sm:$0xff] }
 0x227   :  { %4447 = vperm.xlu0 %8603, %v10896_v13   ;;  %14132 = vst [vmem:[#allocation44_spill] sm:$0xff] %v10924_v42  ;;  %8763 = vpow2.f32 %v3985_v39  ;;  %v3799_v57 = vsub.f32 %v14141_v37, %v3360_v60  ;;  %v3376_v60 = vrot.slane %v10804_v22, %v10534_v44  ;;  %v3801_v37 = vsub.f32 %v14145_v45, %v3368_v56 }
 0x228   :  { %8765 = vpow2.f32 %v4023_v43  ;;  %v14146_v43 = vld [vmem:[#allocation52_spill] sm:$0xff] }
 0x229   :  { %4402 = vperm.xlu1 %8604, %v10922_v54   ;;  %v10940_v54 = vpop.xlane.xlu1 %3069  ;;  %8767 = vpow2.f32 %v3989_v8  ;;  %v3993_v29 = vmul.f32 1.442695, %v3799_v57  ;;  %v3820_v53 = vsub.f32 %v14146_v43, %v3444_v41  ;;  %v14149_v8 = vld [vmem:[#allocation35_spill] sm:$0xff]  ;;  %v3997_v45 = vmul.f32 1.442695, %v3801_v37  ;;  %v14150_v43 = vld [vmem:[#allocation54_spill] sm:$0xff] }
 0x22a   :  { %v3803_v57 = vsub.f32 %v14149_v8, %v3376_v60 }
 0x22b   :  { %4453 = vperm.xlu0 %8603, %v10910_v18   ;;  %v10936_v18 = vpop.eup %8747  ;;  %v4035_v41 = vmul.f32 1.442695, %v3820_v53  ;;  %v3392_v53 = vrot.slane %v10854_v63, %v10492_v0 }
 0x22c   :  { %14135 = vst [vmem:[#allocation20_spill] sm:$0xff] %v10936_v18  ;;  %v10938_v7 = vpop.eup %8749  ;;  %v4001_v37 = vmul.f32 1.442695, %v3803_v57 }
 0x22d   :  { %14136 = vst [vmem:[#allocation46_spill] sm:$0xff] %v10938_v7  ;;  %4408 = vperm.xlu1 %8604, %v10936_v18   ;;  %v10952_v23 = vpop.eup %8751 }
 0x22e   :  { %v10920_v13 = vpop.permute.xlu0 %4246  ;;  %14139 = vst [vmem:[#allocation10_spill] sm:$0xff] %v10952_v23  ;;  %v10954_v18 = vpop.eup %8753 }
 0x22f   :  { %4459 = vperm.xlu0 %8603, %v10924_v42   ;;  %14140 = vst [vmem:[#allocation48_spill] sm:$0xff] %v10954_v18  ;;  %v10968_v47 = vpop.eup %8755 }
 0x230   :  { %14143 = vst [vmem:[#allocation22_spill] sm:$0xff] %v10968_v47  ;;  %v10970_v30 = vpop.eup %8757 }
 0x231   :  { %4414 = vperm.xlu1 %8604, %v10952_v23   ;;  %v10957_v61 = vpop.xlane.xlu1 %3075  ;;  %v4027_v23 = vmul.f32 1.442695, %v3816_v20  ;;  %14144 = vst [vmem:[#allocation50_spill] sm:$0xff] %v10970_v30  ;;  %v4031_v20 = vmul.f32 1.442695, %v3818_v16  ;;  %v3460_v16 = vrot.slane %v10926_v31, %v10476_v49 }
 0x232   :  { %v10943_v26 = vpop.permute.xlu0 %4273 }
 0x233   :  { %4465 = vperm.xlu0 %8603, %v10938_v7   ;;  %8769 = vpow2.f32 %v4027_v23  ;;  %v3384_v23 = vrot.slane %v10854_v63, %v9029_v10 }
 0x234   :  { %8771 = vpow2.f32 %v3993_v29 }
 0x235   :  { %4420 = vperm.xlu1 %8604, %v10968_v47   ;;  %v10973_v39 = vpop.permute.xlu1 %4249  ;;  %v10984_v47 = vpop.eup %8759  ;;  %8773 = vpow2.f32 %v4031_v20  ;;  %v14153_v20 = vld [vmem:[#allocation37_spill] sm:$0xff] }
 0x236   :  { %v10959_v17 = vpop.permute.xlu0 %4279  ;;  %14147 = vst [vmem:[#allocation33_spill] sm:$0xff] %v10984_v47  ;;  %v10986_v6 = vpop.eup %8761  ;;  %8775 = vpow2.f32 %v3997_v45  ;;  %v3805_v8 = vsub.f32 %v14153_v20, %v3384_v23  ;;  %v3400_v23 = vrot.slane %v10854_v63, %v10517_v36 }
 0x237   :  { %4471 = vperm.xlu0 %8603, %v10954_v18   ;;  %14148 = vst [vmem:[#allocation52_spill] sm:$0xff] %v10986_v6  ;;  %v11000_v32 = vpop.eup %8763  ;;  %8777 = vpow2.f32 %v4035_v41  ;;  %v14157_v41 = vld [vmem:[#allocation39_spill] sm:$0xff] }
 0x238   :  { %14151 = vst [vmem:[#allocation35_spill] sm:$0xff] %v11000_v32  ;;  %v11002_v24 = vpop.eup %8765  ;;  %8779 = vpow2.f32 %v4001_v37  ;;  %v3807_v20 = vsub.f32 %v14157_v41, %v3392_v53  ;;  %v4005_v4 = vmul.f32 1.442695, %v3805_v8  ;;  %v3408_v53 = vrot.slane %v10854_v63, %v10534_v44  ;;  %v14161_v8 = vld [vmem:[#allocation41_spill] sm:$0xff] }
 0x239   :  { %4426 = vperm.xlu1 %8604, %v10984_v47   ;;  %v10989_v22 = vpop.permute.xlu1 %4252  ;;  %v3822_v47 = vsub.f32 %v14150_v43, %v3452_v9  ;;  %14152 = vst [vmem:[#allocation54_spill] sm:$0xff] %v11002_v24  ;;  %v3468_v9 = vrot.slane %v10926_v31, %v10486_v25  ;;  %v14154_v43 = vld [vmem:[#allocation56_spill] sm:$0xff]  ;;  %v11016_v28 = vpop.eup %8767  ;;  %v3809_v41 = vsub.f32 %v14161_v8, %v3400_v23 }
 0x23a   :  { %v10975_v14 = vpop.permute.xlu0 %4285  ;;  %v3824_v33 = vsub.f32 %v14154_v43, %v3460_v16  ;;  %14155 = vst [vmem:[#allocation37_spill] sm:$0xff] %v11016_v28  ;;  %v14158_v16 = vld [vmem:[#allocation58_spill] sm:$0xff] }
 0x23b   :  { %4477 = vperm.xlu0 %8603, %v10970_v30   ;;  %v3826_v43 = vsub.f32 %v14158_v16, %v3468_v9  ;;  %v3484_v16 = vrot.slane %v10892_v27, %v10470_v5  ;;  %v4013_v8 = vmul.f32 1.442695, %v3809_v41 }
 0x23d   :  { %4432 = vperm.xlu1 %8604, %v11000_v32   ;;  %v11005_v29 = vpop.permute.xlu1 %4255  ;;  %v4039_v32 = vmul.f32 1.442695, %v3822_v47  ;;  %v11018_v1 = vpop.eup %8769  ;;  %v3476_v47 = vrot.slane %v10926_v31, %v10501_v15  ;;  %v4047_v9 = vmul.f32 1.442695, %v3826_v43  ;;  %v3492_v43 = vrot.slane %v10892_v27, %v10476_v49 }
 0x23e   :  { %v10991_v56 = vpop.permute.xlu0 %4291  ;;  %14156 = vst [vmem:[#allocation56_spill] sm:$0xff] %v11018_v1  ;;  %v11032_v51 = vpop.eup %8771 }
 0x23f   :  { %4483 = vperm.xlu0 %8603, %v10986_v6   ;;  %8781 = vpow2.f32 %v4039_v32  ;;  %v4043_v6 = vmul.f32 1.442695, %v3824_v33  ;;  %14159 = vst [vmem:[#allocation39_spill] sm:$0xff] %v11032_v51  ;;  %v11034_v42 = vpop.eup %8773  ;;  %v14162_v33 = vld [vmem:[#allocation60_spill] sm:$0xff] }
 0x240   :  { %14160 = vst [vmem:[#allocation58_spill] sm:$0xff] %v11034_v42  ;;  %8783 = vpow2.f32 %v4005_v4  ;;  %v3828_v32 = vsub.f32 %v14162_v33, %v3476_v47  ;;  %v14165_v4 = vld [vmem:[#allocation43_spill] sm:$0xff]  ;;  %v14166_v33 = vld [vmem:[#allocation62_spill] sm:$0xff] }
 0x241   :  { %4438 = vperm.xlu1 %8604, %v11016_v28   ;;  %v11021_v57 = vpop.permute.xlu1 %4258  ;;  %8785 = vpow2.f32 %v4043_v6  ;;  %v3416_v6 = vrot.slane %v10878_v12, %v9029_v10 }
 0x242   :  { %v11007_v60 = vpop.permute.xlu0 %4297  ;;  %v4051_v47 = vmul.f32 1.442695, %v3828_v32  ;;  %v3424_v32 = vrot.slane %v10878_v12, %v10492_v0 }
 0x243   :  { %4489 = vperm.xlu0 %8603, %v11002_v24   ;;  %v11048_v24 = vpop.eup %8775 }
 0x244   :  { %14163 = vst [vmem:[#allocation41_spill] sm:$0xff] %v11048_v24  ;;  %v11050_v18 = vpop.eup %8777 }
 0x245   :  { %4444 = vperm.xlu1 %8604, %v11032_v51   ;;  %v11037_v37 = vpop.permute.xlu1 %4261  ;;  %14164 = vst [vmem:[#allocation60_spill] sm:$0xff] %v11050_v18 }
 0x246   :  { %v11023_v45 = vpop.permute.xlu0 %4303 }
 0x247   :  { %4495 = vperm.xlu0 %8603, %v11018_v1   ;;  %v4009_v1 = vmul.f32 1.442695, %v3807_v20  ;;  %v3811_v20 = vsub.f32 %v14165_v4, %v3408_v53 }
 0x249   :  { %4450 = vperm.xlu1 %8604, %v11048_v24   ;;  %v11053_v63 = vpop.permute.xlu1 %4264  ;;  %8787 = vpow2.f32 %v4009_v1  ;;  %v3830_v24 = vsub.f32 %v14166_v33, %v3484_v16  ;;  %v4017_v41 = vmul.f32 1.442695, %v3811_v20  ;;  %v3500_v16 = vrot.slane %v10892_v27, %v10486_v25  ;;  %v14170_v33 = vld [vmem:[#allocation64_spill] sm:$0xff] }
 0x24a   :  { %v11039_v30 = vpop.permute.xlu0 %4309  ;;  %8789 = vpow2.f32 %v4047_v9  ;;  %v14169_v9 = vld [vmem:[#allocation45_spill] sm:$0xff] }
 0x24b   :  { %4501 = vperm.xlu0 %8603, %v11034_v42   ;;  %v11064_v42 = vpop.eup %8779  ;;  %8791 = vpow2.f32 %v4013_v8  ;;  %v3813_v4 = vsub.f32 %v14169_v9, %v3416_v6  ;;  %v3432_v6 = vrot.slane %v10878_v12, %v10517_v36 }
 0x24c   :  { %14167 = vst [vmem:[#allocation43_spill] sm:$0xff] %v11064_v42  ;;  %v11066_v7 = vpop.eup %8781  ;;  %8793 = vpow2.f32 %v4051_v47  ;;  %v14173_v47 = vld [vmem:[#allocation47_spill] sm:$0xff] }
 0x24d   :  { %14168 = vst [vmem:[#allocation62_spill] sm:$0xff] %v11066_v7  ;;  %4456 = vperm.xlu1 %8604, %v11064_v42   ;;  %v11069_v1 = vpop.permute.xlu1 %4267  ;;  %v4055_v42 = vmul.f32 1.442695, %v3830_v24  ;;  %v11080_v51 = vpop.eup %8783  ;;  %8795 = vpow2.f32 %v4017_v41  ;;  %v3815_v9 = vsub.f32 %v14173_v47, %v3424_v32  ;;  %v3508_v24 = vrot.slane %v10892_v27, %v10501_v15 }
 0x24e   :  { %v11055_v23 = vpop.permute.xlu0 %4315  ;;  %14171 = vst [vmem:[#allocation45_spill] sm:$0xff] %v11080_v51  ;;  %v11082_v28 = vpop.eup %8785  ;;  %v3440_v32 = vrot.slane %v10878_v12, %v10534_v44 }
 0x24f   :  { %4507 = vperm.xlu0 %8603, %v11050_v18   ;;  %v3832_v18 = vsub.f32 %v14170_v33, %v3492_v43  ;;  %14172 = vst [vmem:[#allocation64_spill] sm:$0xff] %v11082_v28  ;;  %v14174_v43 = vld [vmem:[#allocation66_spill] sm:$0xff]  ;;  %8797 = vpow2.f32 %v4055_v42  ;;  %v14178_v42 = vld [vmem:[#allocation68_spill] sm:$0xff] }
 0x250   :  { %v3834_v33 = vsub.f32 %v14174_v43, %v3500_v16  ;;  %v3516_v43 = vrot.slane %v10940_v54, %v10470_v5 }
 0x251   :  { %4462 = vperm.xlu1 %8604, %v11080_v51   ;;  %v11085_v20 = vpop.permute.xlu1 %4270  ;;  %v4059_v51 = vmul.f32 1.442695, %v3832_v18  ;;  %v3836_v18 = vsub.f32 %v14178_v42, %v3508_v24  ;;  %v14183_v42 = vld [vmem:[#allocation70_spill] sm:$0xff] }
 0x252   :  { %v11071_v53 = vpop.permute.xlu0 %4321  ;;  %v4063_v16 = vmul.f32 1.442695, %v3834_v33  ;;  %v3524_v33 = vrot.slane %v10940_v54, %v10476_v49 }
 0x253   :  { %4513 = vperm.xlu0 %8603, %v11066_v7   ;;  %v4021_v7 = vmul.f32 1.442695, %v3813_v4  ;;  %v11096_v52 = vpop.eup %8787  ;;  %v14177_v4 = vld [vmem:[#allocation49_spill] sm:$0xff]  ;;  %v4067_v24 = vmul.f32 1.442695, %v3836_v18 }
 0x254   :  { %14175 = vst [vmem:[#allocation47_spill] sm:$0xff] %v11096_v52  ;;  %v11098_v50 = vpop.eup %8789  ;;  %v3817_v47 = vsub.f32 %v14177_v4, %v3432_v6 }
 0x255   :  { %14176 = vst [vmem:[#allocation66_spill] sm:$0xff] %v11098_v50  ;;  %4468 = vperm.xlu1 %8604, %v11096_v52   ;;  %v11101_v41 = vpop.permute.xlu1 %4276  ;;  %8799 = vpow2.f32 %v4021_v7  ;;  %v11112_v52 = vpop.eup %8791  ;;  %v14182_v7 = vld [vmem:[#allocation51_spill] sm:$0xff] }
 0x256   :  { %v11087_v8 = vpop.permute.xlu0 %4327  ;;  %8801 = vpow2.f32 %v4059_v51  ;;  %14179 = vst [vmem:[#allocation49_spill] sm:$0xff] %v11112_v52  ;;  %v11114_v62 = vpop.eup %8793  ;;  %v4029_v4 = vmul.f32 1.442695, %v3817_v47  ;;  %v3448_v51 = vrot.slane %v10926_v31, %v9029_v10 }
 0x257   :  { %4519 = vperm.xlu0 %8603, %v11082_v28   ;;  %v4025_v28 = vmul.f32 1.442695, %v3815_v9  ;;  %14180 = vst [vmem:[#allocation68_spill] sm:$0xff] %v11114_v62  ;;  %v3819_v9 = vsub.f32 %v14182_v7, %v3440_v32 }
 0x259   :  { %4474 = vperm.xlu1 %8604, %v11112_v52   ;;  %v11117_v12 = vpop.permute.xlu1 %4282  ;;  %8803 = vpow2.f32 %v4025_v28  ;;  %v11128_v52 = vpop.eup %8795  ;;  %v3456_v28 = vrot.slane %v10926_v31, %v10492_v0  ;;  %v4033_v18 = vmul.f32 1.442695, %v3819_v9 }
 0x25a   :  { %v11103_v35 = vpop.permute.xlu0 %4333  ;;  %8805 = vpow2.f32 %v4063_v16  ;;  %14184 = vst [vmem:[#allocation51_spill] sm:$0xff] %v11128_v52  ;;  %v11130_v58 = vpop.eup %8797  ;;  %v14186_v16 = vld [vmem:[#allocation53_spill] sm:$0xff] }
 0x25b   :  { %4525 = vperm.xlu0 %8603, %v11098_v50   ;;  %v3838_v50 = vsub.f32 %v14183_v42, %v3516_v43  ;;  %14185 = vst [vmem:[#allocation70_spill] sm:$0xff] %v11130_v58  ;;  %8807 = vpow2.f32 %v4029_v4  ;;  %v3821_v7 = vsub.f32 %v14186_v16, %v3448_v51  ;;  %v3532_v43 = vrot.slane %v10940_v54, %v10486_v25  ;;  %v14187_v42 = vld [vmem:[#allocation72_spill] sm:$0xff]  ;;  %v14190_v4 = vld [vmem:[#allocation55_spill] sm:$0xff] }
 0x25c   :  { %8809 = vpow2.f32 %v4067_v24  ;;  %v3823_v9 = vsub.f32 %v14190_v4, %v3456_v28 }
 0x25d   :  { %4480 = vperm.xlu1 %8604, %v11128_v52   ;;  %v11135_v32 = vpop.permute.xlu1 %4288  ;;  %v4071_v19 = vmul.f32 1.442695, %v3838_v50  ;;  %8811 = vpow2.f32 %v4033_v18  ;;  %v4037_v24 = vmul.f32 1.442695, %v3821_v7  ;;  %v3842_v38 = vsub.f32 %v14192_v59, %v3532_v43 }
 0x25e   :  { %v11119_v6 = vpop.permute.xlu0 %4339 }
 0x25f   :  { %14181 = vst [vmem:[#allocation129_spill] sm:$0xff] %v11119_v6  ;;  %4531 = vperm.xlu0 %8603, %v11114_v62   ;;  %v3840_v62 = vsub.f32 %v14187_v42, %v3524_v33  ;;  %v11144_v46 = vpop.eup %8799  ;;  %v3540_v42 = vrot.slane %v10940_v54, %v10501_v15  ;;  %8813 = vpow2.f32 %v4071_v19  ;;  %v4041_v19 = vmul.f32 1.442695, %v3823_v9 }
 0x260   :  { %14188 = vst [vmem:[#allocation53_spill] sm:$0xff] %v11144_v46  ;;  %v11146_v52 = vpop.eup %8801  ;;  %8815 = vpow2.f32 %v4037_v24 }
 0x261   :  { %14189 = vst [vmem:[#allocation72_spill] sm:$0xff] %v11146_v52  ;;  %4486 = vperm.xlu1 %8604, %v11144_v46   ;;  %v4295_v51 = vpop.permute.xlu1 %4294  ;;  %v4075_v28 = vmul.f32 1.442695, %v3840_v62  ;;  %v14196_v62 = vld [vmem:[#allocation76_spill] sm:$0xff] }
 0x262   :  { %v11137_v47 = vpop.permute.xlu0 %4345  ;;  %v3844_v43 = vsub.f32 %v14196_v62, %v3540_v42  ;;  %v14200_v62 = vld [vmem:[#allocation78_spill] sm:$0xff] }
 0x263   :  { %4537 = vperm.xlu0 %8603, %v11130_v58   ;;  %v14191_v58 = vld [vmem:[#allocation21_spill] sm:$0xff]  ;;  %v11161_v4 = vpop.eup %8803  ;;  %8817 = vpow2.f32 %v4075_v28  ;;  %v3556_v28 = vrot.slane %v10906_v34, %v10476_v49 }
 0x264   :  { %v4700_v33 = vrot.slane %v11007_v60, %v14191_v58  ;;  %v4696_v50 = vrot.slane %v4295_v51, %v14191_v58  ;;  %14193 = vst [vmem:[#allocation55_spill] sm:$0xff] %v11161_v4  ;;  %v11166_v18 = vpop.eup %8805  ;;  %v3472_v51 = vrot.slane %v10926_v31, %v10534_v44  ;;  %8819 = vpow2.f32 %v4041_v19 }
 0x265   :  { %14194 = vst [vmem:[#allocation21_spill] sm:$0xff] %v11166_v18  ;;  %4492 = vperm.xlu1 %8604, %v11161_v4   ;;  %v11169_v60 = vpop.permute.xlu1 %4300  ;;  %v11180_v4 = vpop.eup %8807  ;;  %v4083_v42 = vmul.f32 1.442695, %v3844_v43  ;;  %v3488_v43 = vrot.slane %v10892_v27, %v10492_v0 }
 0x266   :  { %v11152_v16 = vpop.permute.xlu0 %4351  ;;  %v11164_v46 = vsel %vm2893_vm1, %v4700_v33, %v4696_v50  ;;  %v4079_v33 = vmul.f32 1.442695, %v3842_v38  ;;  %v3548_v50 = vrot.slane %v10906_v34, %v10470_v5  ;;  %14197 = vst [vmem:[#allocation74_spill] sm:$0xff] %v11180_v4  ;;  %v11182_v55 = vpop.eup %8809  ;;  %v3480_v38 = vrot.slane %v10892_v27, %v9029_v10 }
 0x267   :  { %4543 = vperm.xlu0 %8603, %v11146_v52   ;;  %v14195_v52 = vld [vmem:[#allocation57_spill] sm:$0xff] }
 0x268   :  { %v3825_v59 = vsub.f32 %v14195_v52, %v3464_v40  ;;  %14198 = vst [vmem:[#allocation57_spill] sm:$0xff] %v11182_v55  ;;  %v14199_v52 = vld [vmem:[#allocation59_spill] sm:$0xff]  ;;  %8821 = vpow2.f32 %v4079_v33  ;;  %v14203_v33 = vld [vmem:[#allocation61_spill] sm:$0xff] }
 0x269   :  { %4498 = vperm.xlu1 %8604, %v11180_v4   ;;  %v11185_v31 = vpop.permute.xlu1 %4306  ;;  %v3827_v9 = vsub.f32 %v14199_v52, %v3472_v51  ;;  %v11196_v4 = vpop.eup %8811  ;;  %v3829_v52 = vsub.f32 %v14203_v33, %v3480_v38  ;;  %v3496_v38 = vrot.slane %v10892_v27, %v10517_v36 }
 0x26a   :  { %v11171_v7 = vpop.permute.xlu0 %4357  ;;  %v4045_v24 = vmul.f32 1.442695, %v3825_v59  ;;  %14201 = vst [vmem:[#allocation76_spill] sm:$0xff] %v11196_v4  ;;  %v11198_v2 = vpop.eup %8813 }
 0x26b   :  { %4549 = vperm.xlu0 %8603, %v11166_v18   ;;  %v3846_v18 = vsub.f32 %v14200_v62, %v3548_v50  ;;  %14202 = vst [vmem:[#allocation59_spill] sm:$0xff] %v11198_v2  ;;  %v4049_v19 = vmul.f32 1.442695, %v3827_v9  ;;  %v3564_v50 = vrot.slane %v10906_v34, %v10486_v25  ;;  %v14204_v62 = vld [vmem:[#allocation80_spill] sm:$0xff]  ;;  %v11212_v48 = vpop.eup %8815 }
 0x26c   :  { %8823 = vpow2.f32 %v4045_v24  ;;  %14205 = vst [vmem:[#allocation78_spill] sm:$0xff] %v11212_v48 }
 0x26d   :  { %4504 = vperm.xlu1 %8604, %v11196_v4   ;;  %v11201_v51 = vpop.permute.xlu1 %4312  ;;  %8825 = vpow2.f32 %v4083_v42  ;;  %v4087_v4 = vmul.f32 1.442695, %v3846_v18  ;;  %v11214_v21 = vpop.eup %8817  ;;  %v14208_v42 = vld [vmem:[#allocation63_spill] sm:$0xff]  ;;  %v3572_v18 = vrot.slane %v10906_v34, %v10501_v15 }
 0x26e   :  { %v11187_v40 = vpop.permute.xlu0 %4363  ;;  %14206 = vst [vmem:[#allocation61_spill] sm:$0xff] %v11214_v21  ;;  %8827 = vpow2.f32 %v4049_v19  ;;  %v3831_v33 = vsub.f32 %v14208_v42, %v3488_v43  ;;  %v11228_v11 = vpop.eup %8819  ;;  %v3504_v43 = vrot.slane %v10892_v27, %v10534_v44  ;;  %v14218_v27 = vld [vmem:[#allocation67_spill] sm:$0xff] }
 0x26f   :  { %4555 = vperm.xlu0 %8603, %v11182_v55   ;;  %v3848_v55 = vsub.f32 %v14204_v62, %v3556_v28  ;;  %v14209_v28 = vld [vmem:[#allocation82_spill] sm:$0xff]  ;;  %8829 = vpow2.f32 %v4087_v4  ;;  %14210 = vst [vmem:[#allocation63_spill] sm:$0xff] %v11228_v11 }
 0x270   :  { %v3850_v62 = vsub.f32 %v14209_v28, %v3564_v50 }
 0x271   :  { %4510 = vperm.xlu1 %8604, %v11212_v48   ;;  %v11217_v9 = vpop.permute.xlu1 %4318  ;;  %v4091_v48 = vmul.f32 1.442695, %v3848_v55  ;;  %v14214_v55 = vld [vmem:[#allocation84_spill] sm:$0xff] }
 0x272   :  { %v11203_v59 = vpop.permute.xlu0 %4369  ;;  %v11230_v3 = vpop.eup %8821  ;;  %v3852_v4 = vsub.f32 %v14214_v55, %v3572_v18  ;;  %v4095_v50 = vmul.f32 1.442695, %v3850_v62 }
 0x273   :  { %4561 = vperm.xlu0 %8603, %v11198_v2   ;;  %v4053_v2 = vmul.f32 1.442695, %v3829_v52  ;;  %14211 = vst [vmem:[#allocation82_spill] sm:$0xff] %v11230_v3  ;;  %v14213_v52 = vld [vmem:[#allocation65_spill] sm:$0xff] }
 0x274   :  { %v3833_v42 = vsub.f32 %v14213_v52, %v3496_v38  ;;  %v3835_v38 = vsub.f32 %v14218_v27, %v3504_v43  ;;  %v3520_v43 = vrot.slane %v10940_v54, %v10492_v0 }
 0x275   :  { %4516 = vperm.xlu1 %8604, %v11228_v11   ;;  %v11233_v19 = vpop.permute.xlu1 %4324  ;;  %8831 = vpow2.f32 %v4053_v2 }
 0x276   :  { %v11219_v24 = vpop.permute.xlu0 %4375  ;;  %8833 = vpow2.f32 %v4091_v48  ;;  %v11242_v28 = vpop.eup %8823  ;;  %v4061_v2 = vmul.f32 1.442695, %v3833_v42  ;;  %v4099_v48 = vmul.f32 1.442695, %v3852_v4  ;;  %v14222_v42 = vld [vmem:[#allocation69_spill] sm:$0xff] }
 0x277   :  { %14207 = vst [vmem:[#allocation80_spill] sm:$0xff] %v11219_v24  ;;  %4567 = vperm.xlu0 %8603, %v11214_v21   ;;  %v4057_v21 = vmul.f32 1.442695, %v3831_v33  ;;  %14215 = vst [vmem:[#allocation65_spill] sm:$0xff] %v11242_v28  ;;  %v11244_v11 = vpop.eup %8825  ;;  %v3512_v33 = vrot.slane %v10940_v54, %v9029_v10 }
 0x278   :  { %14216 = vst [vmem:[#allocation84_spill] sm:$0xff] %v11244_v11  ;;  %v11255_v18 = vpop.eup %8827 }
 0x279   :  { %4522 = vperm.xlu1 %8604, %v11242_v28   ;;  %v11247_v15 = vpop.permute.xlu1 %4330  ;;  %8835 = vpow2.f32 %v4057_v21  ;;  %14219 = vst [vmem:[#allocation67_spill] sm:$0xff] %v11255_v18  ;;  %v11257_v62 = vpop.eup %8829  ;;  %v4065_v21 = vmul.f32 1.442695, %v3835_v38  ;;  %v3837_v27 = vsub.f32 %v14222_v42, %v3512_v33  ;;  %v3528_v38 = vrot.slane %v10940_v54, %v10517_v36 }
 0x27a   :  { %v11235_v25 = vpop.permute.xlu0 %4381  ;;  %8837 = vpow2.f32 %v4095_v50  ;;  %14220 = vst [vmem:[#allocation132_spill] sm:$0xff] %v11257_v62 }
 0x27b   :  { %14212 = vst [vmem:[#allocation130_spill] sm:$0xff] %v11235_v25  ;;  %4573 = vperm.xlu0 %8603, %v11230_v3   ;;  %8839 = vpow2.f32 %v4061_v2  ;;  %v14225_v2 = vld [vmem:[#allocation71_spill] sm:$0xff]  ;;  %v4069_v33 = vmul.f32 1.442695, %v3837_v27 }
 0x27c   :  { %8841 = vpow2.f32 %v4099_v48  ;;  %v14237_v25 = vld [vmem:[#allocation79_spill] sm:$0xff] }
 0x27d   :  { %4528 = vperm.xlu1 %8604, %v11255_v18   ;;  %v11260_v52 = vpop.permute.xlu1 %4336  ;;  %8843 = vpow2.f32 %v4065_v21  ;;  %v3839_v18 = vsub.f32 %v14225_v2, %v3520_v43  ;;  %v3536_v21 = vrot.slane %v10940_v54, %v10534_v44 }
 0x27e   :  { %v11249_v49 = vpop.permute.xlu0 %4387  ;;  %14221 = vst [vmem:[#allocation133_spill] sm:$0xff] %v11260_v52  ;;  %8845 = vpow2.f32 %v4069_v33  ;;  %v14239_v52 = vld [vmem:[#allocation81_spill] sm:$0xff] }
 0x27f   :  { %14217 = vst [vmem:[#allocation131_spill] sm:$0xff] %v11249_v49  ;;  %4579 = vperm.xlu0 %8603, %v11244_v11   ;;  %v11268_v4 = vpop.eup %8831  ;;  %v4073_v43 = vmul.f32 1.442695, %v3839_v18  ;;  %v14231_v49 = vld [vmem:[#allocation75_spill] sm:$0xff] }
 0x280   :  { %14223 = vst [vmem:[#allocation69_spill] sm:$0xff] %v11268_v4  ;;  %v11270_v50 = vpop.eup %8833  ;;  %v3843_v6 = vsub.f32 %v14231_v49, %v3536_v21  ;;  %v3552_v49 = vrot.slane %v10906_v34, %v10492_v0  ;;  %v14234_v21 = vld [vmem:[#allocation77_spill] sm:$0xff] }
 0x281   :  { %14224 = vst [vmem:[#allocation134_spill] sm:$0xff] %v11270_v50  ;;  %4534 = vperm.xlu1 %8604, %v11268_v4   ;;  %v11273_v3 = vpop.permute.xlu1 %4342  ;;  %v14228_v4 = vld [vmem:[#allocation73_spill] sm:$0xff]  ;;  %8847 = vpow2.f32 %v4073_v43 }
 0x282   :  { %v11262_v55 = vpop.permute.xlu0 %4393  ;;  %v3841_v5 = vsub.f32 %v14228_v4, %v3528_v38  ;;  %v3544_v4 = vrot.slane %v10906_v34, %v9029_v10 }
 0x283   :  { %4585 = vperm.xlu0 %8603, %v11257_v62   ;;  %v11281_v48 = vpop.eup %8835 }
 0x284   :  { %14226 = vst [vmem:[#allocation71_spill] sm:$0xff] %v11281_v48  ;;  %v11283_v42 = vpop.eup %8837  ;;  %v4077_v54 = vmul.f32 1.442695, %v3841_v5  ;;  %v3845_v5 = vsub.f32 %v14234_v21, %v3544_v4  ;;  %v3568_v4 = vrot.slane %v10906_v34, %v10534_v44  ;;  %v4664_v21 = vrot.slane %v11085_v20, %v14191_v58 }
 0x285   :  { %14227 = vst [vmem:[#allocation135_spill] sm:$0xff] %v11283_v42  ;;  %4540 = vperm.xlu1 %8604, %v11281_v48   ;;  %v11286_v28 = vpop.permute.xlu1 %4348  ;;  %v11294_v27 = vpop.eup %8839 }
 0x286   :  { %v11275_v11 = vpop.permute.xlu0 %4399  ;;  %14229 = vst [vmem:[#allocation73_spill] sm:$0xff] %v11294_v27  ;;  %v11296_v2 = vpop.eup %8841  ;;  %8849 = vpow2.f32 %v4077_v54  ;;  %v3847_v54 = vsub.f32 %v14237_v25, %v3552_v49  ;;  %v4668_v49 = vrot.slane %v10943_v26, %v14191_v58 }
 0x287   :  { %4591 = vperm.xlu0 %8603, %v11270_v50   ;;  %14230 = vst [vmem:[#allocation136_spill] sm:$0xff] %v11296_v2  ;;  %v11307_v18 = vpop.eup %8843 }
 0x288   :  { %14232 = vst [vmem:[#allocation75_spill] sm:$0xff] %v11307_v18  ;;  %v11317_v43 = vpop.eup %8845  ;;  %v4089_v25 = vmul.f32 1.442695, %v3847_v54 }
 0x289   :  { %4546 = vperm.xlu1 %8604, %v11294_v27   ;;  %v11299_v50 = vpop.permute.xlu1 %4354  ;;  %14235 = vst [vmem:[#allocation77_spill] sm:$0xff] %v11317_v43 }
 0x28a   :  { %v11288_v62 = vpop.permute.xlu0 %4405 }
 0x28b   :  { %4597 = vperm.xlu0 %8603, %v11283_v42   ;;  %v4081_v42 = vmul.f32 1.442695, %v3843_v6  ;;  %v4085_v6 = vmul.f32 1.442695, %v3845_v5  ;;  %v14242_v5 = vld [vmem:[#allocation83_spill] sm:$0xff] }
 0x28c   :  { %v3851_v20 = vsub.f32 %v14242_v5, %v3568_v4  ;;  %v4704_v4 = vrot.slane %v11169_v60, %v14191_v58 }
 0x28d   :  { %4552 = vperm.xlu1 %8604, %v11307_v18   ;;  %v11310_v38 = vpop.permute.xlu1 %4360  ;;  %8851 = vpow2.f32 %v4081_v42 }
 0x28e   :  { %v11301_v48 = vpop.permute.xlu0 %4411  ;;  %8853 = vpow2.f32 %v4085_v6  ;;  %v4676_v6 = vrot.slane %v10959_v17, %v14191_v58  ;;  %v4760_v17 = vrot.slane %v11273_v3, %v14191_v58  ;;  %v4708_v3 = vrot.slane %v11023_v45, %v14191_v58 }
 0x28f   :  { %4603 = vperm.xlu0 %8603, %v11296_v2   ;;  %v3560_v2 = vrot.slane %v10906_v34, %v10517_v36  ;;  %8855 = vpow2.f32 %v4089_v25  ;;  %v4688_v25 = vrot.slane %v11135_v32, %v14191_v58  ;;  %v4768_v32 = vrot.slane %v11286_v28, %v14191_v58 }
 0x291   :  { %4558 = vperm.xlu1 %8604, %v11317_v43   ;;  %v11322_v27 = vpop.permute.xlu1 %4366  ;;  %v3849_v24 = vsub.f32 %v14239_v52, %v3560_v2  ;;  %v4672_v43 = vrot.slane %v11101_v41, %v14191_v58  ;;  %v3576_v52 = vrot.slane %v10957_v61, %v9029_v10  ;;  %v5148_v41 = vsel %vm2893_vm1, %v4668_v49, %v4664_v21 }
 0x292   :  { %v11312_v33 = vpop.permute.xlu0 %4417 }
 0x293   :  { %14233 = vst [vmem:[#allocation137_spill] sm:$0xff] %v11312_v33  ;;  %v11327_v33 = vpop.eup %8847  ;;  %v4093_v2 = vmul.f32 1.442695, %v3849_v24  ;;  %v4097_v24 = vmul.f32 1.442695, %v3851_v20 }
 0x294   :  { %14238 = vst [vmem:[#allocation79_spill] sm:$0xff] %v11327_v33  ;;  %v11343_v34 = vpop.eup %8849 }
 0x295   :  { %4564 = vperm.xlu1 %8604, %v11327_v33   ;;  %14241 = vst [vmem:[#allocation139_spill] sm:$0xff] %v11343_v34  ;;  %v5149_v33 = vsel %vm2895_vm2, %v4672_v43, %v5148_v41  ;;  %v3584_v43 = vrot.slane %v10957_v61, %v10492_v0  ;;  %8857 = vpow2.f32 %v4093_v2  ;;  %v4764_v2 = vrot.slane %v11137_v47, %v14191_v58 }
 0x296   :  { %v11324_v18 = vpop.permute.xlu0 %4423  ;;  %v5150_v5 = vsel %vm2897_vm3, %v4676_v6, %v5149_v33  ;;  %v5156_v33 = vsel %vm2895_vm2, %v4704_v4, %v11164_v46  ;;  %8859 = vpow2.f32 %v4097_v24  ;;  %v4776_v24 = vrot.slane %v11299_v50, %v14191_v58 }
 0x297   :  { %14236 = vst [vmem:[#allocation138_spill] sm:$0xff] %v11324_v18  ;;  %v11337_v18 = vpop.permute.xlu1 %4372  ;;  %v11361_v21 = vpop.eup %8851  ;;  %v5169_v28 = vsel %vm2893_vm1, %v4764_v2, %v4760_v17  ;;  %v4716_v17 = vrot.slane %v11039_v30, %v14191_v58 }
 0x298   :  { %14243 = vst [vmem:[#allocation83_spill] sm:$0xff] %v11361_v21  ;;  %v11389_v6 = vpop.eup %8853 }
 0x299   :  { %4570 = vperm.xlu1 %8604, %v11343_v34  }
 0x29a   :  { %v11339_v42 = vpop.permute.xlu0 %4429 }
 0x29b   :  { %14240 = vst [vmem:[#allocation81_spill] sm:$0xff] %v11339_v42  ;;  %v4680_v42 = vrot.slane %v11117_v12, %v14191_v58  ;;  %v11353_v54 = vpop.permute.xlu1 %4378  ;;  %v14244_v12 = vld [vmem:[#allocation85_spill] sm:$0xff] }
 0x29c   :  { %v3853_v49 = vsub.f32 %v14244_v12, %v3576_v52  ;;  %v4684_v52 = vrot.slane %v10975_v14, %v14191_v58  ;;  %v3592_v14 = vrot.slane %v10957_v61, %v10517_v36  ;;  %v14245_v12 = vld [vmem:[#allocation87_spill] sm:$0xff] }
 0x29d   :  { %v5151_v41 = vsel %vm2899_vm4, %v4680_v42, %v5150_v5  ;;  %4576 = vperm.xlu1 %8604, %v11361_v21   ;;  %v4712_v42 = vrot.slane %v11185_v31, %v14191_v58  ;;  %v3855_v5 = vsub.f32 %v14245_v12, %v3584_v43  ;;  %v5157_v31 = vsel %vm2897_vm3, %v4708_v3, %v5156_v33  ;;  %v11414_v33 = vpop.eup %8855 }
 0x29e   :  { %v11355_v26 = vpop.permute.xlu0 %4435  ;;  %v4101_v46 = vmul.f32 1.442695, %v3853_v49  ;;  %v5152_v4 = vsel %vm2901_vm5, %v4684_v52, %v5151_v41  ;;  %v4720_v43 = vrot.slane %v11201_v51, %v14191_v58  ;;  %v5170_v49 = vsel %vm2895_vm2, %v4768_v32, %v5169_v28 }
 0x29f   :  { %v11373_v60 = vpop.permute.xlu1 %4384  ;;  %v5153_v47 = vsel %vm2903_vm6, %v4688_v25, %v5152_v4  ;;  %v5158_v34 = vsel %vm2899_vm4, %v4712_v42, %v5157_v31  ;;  %v4692_v41 = vrot.slane %v10991_v56, %v14191_v58  ;;  %v4772_v52 = vrot.slane %v11152_v16, %v14191_v58  ;;  %v14246_v42 = vld [vmem:[#allocation89_spill] sm:$0xff] }
 0x2a0   :  { %v3600_v51 = vrot.slane %v10957_v61, %v10534_v44  ;;  %v3857_v32 = vsub.f32 %v14246_v42, %v3592_v14  ;;  %8861 = vpow2.f32 %v4101_v46  ;;  %v4105_v50 = vmul.f32 1.442695, %v3855_v5  ;;  %v11432_v46 = vpop.eup %8857 }
 0x2a1   :  { %4582 = vperm.xlu1 %8604, %v11389_v6   ;;  %v4828_v56 = vrot.slane %v11262_v55, %v14191_v58  ;;  %v5171_v3 = vsel %vm2897_vm3, %v4772_v52, %v5170_v49  ;;  %v5154_v2 = vsel %vm2905_vm7, %v4692_v41, %v5153_v47  ;;  %v5159_v12 = vsel %vm2901_vm5, %v4716_v17, %v5158_v34  ;;  %v14247_v34 = vld [vmem:[#allocation91_spill] sm:$0xff] }
 0x2a2   :  { %v11375_v20 = vpop.permute.xlu0 %4441  ;;  %v5172_v4 = vsel %vm2899_vm4, %v4776_v24, %v5171_v3  ;;  %v4784_v14 = vrot.slane %v11310_v38, %v14191_v58  ;;  %v5160_v55 = vsel %vm2903_vm6, %v4720_v43, %v5159_v12  ;;  %v4724_v31 = vrot.slane %v11055_v23, %v14191_v58 }
 0x2a3   :  { %v4391_v45 = vpop.permute.xlu1 %4390  ;;  %v4780_v28 = vrot.slane %v11171_v7, %v14191_v58  ;;  %v3859_v47 = vsub.f32 %v14247_v34, %v3600_v51  ;;  %v5272_v38 = vsel %vm3028_vm8, %v5154_v2, 0.0  ;;  %v4836_v24 = vrot.slane %v11275_v11, %v14191_v58  ;;  %v11451_v51 = vpop.eup %8859 }
 0x2a4   :  { %v4824_v25 = vrot.slane %v4391_v45, %v14191_v58  ;;  %v5161_v23 = vsel %vm2905_vm7, %v4724_v31, %v5160_v55  ;;  %8863 = vpow2.f32 %v4105_v50  ;;  %v4109_v17 = vmul.f32 1.442695, %v3857_v32 }
 0x2a5   :  { %4588 = vperm.xlu1 %8604, %v11414_v33   ;;  %v5173_v7 = vsel %vm2901_vm5, %v4780_v28, %v5172_v4  ;;  %v4788_v11 = vrot.slane %v11187_v40, %v14191_v58  ;;  %v5275_v3 = vsel %vm3028_vm8, %v5161_v23, 0.0  ;;  %v4113_v40 = vmul.f32 1.442695, %v3859_v47 }
 0x2a6   :  { %v11398_v21 = vpop.permute.xlu0 %4447  ;;  %v5183_v45 = vsel %vm2893_vm1, %v4828_v56, %v4824_v25  ;;  %v5174_v25 = vsel %vm2903_vm6, %v4784_v14, %v5173_v7  ;;  %8865 = vpow2.f32 %v4109_v17  ;;  %v4852_v14 = vrot.slane %v11301_v48, %v14191_v58 }
 0x2a7   :  { %v4397_v30 = vpop.permute.xlu1 %4396  ;;  %v5175_v2 = vsel %vm2905_vm7, %v4788_v11, %v5174_v25  ;;  %8867 = vpow2.f32 %v4113_v40  ;;  %v4900_v40 = vrot.slane %v11398_v21, %v14191_v58 }
 0x2a8   :  { %v4832_v5 = vrot.slane %v4397_v30, %v14191_v58  ;;  %v4844_v30 = vrot.slane %v11288_v62, %v14191_v58  ;;  %v5281_v62 = vsel %vm3028_vm8, %v5175_v2, 0.0 }
 0x2a9   :  { %4594 = vperm.xlu1 %8604, %v11432_v46  }
 0x2aa   :  { %v11423_v16 = vpop.permute.xlu0 %4453  ;;  %v5184_v49 = vsel %vm2895_vm2, %v4832_v5, %v5183_v45  ;;  %v11464_v12 = vpop.eup %8861 }
 0x2ab   :  { %v4403_v43 = vpop.permute.xlu1 %4402  ;;  %v5185_v42 = vsel %vm2897_vm3, %v4836_v24, %v5184_v49  ;;  %14248 = vst [vmem:[#allocation85_spill] sm:$0xff] %v11464_v12 }
 0x2ac   :  { %v4840_v52 = vrot.slane %v4403_v43, %v14191_v58 }
 0x2ad   :  { %4600 = vperm.xlu1 %8604, %v11451_v51  }
 0x2ae   :  { %v11445_v41 = vpop.permute.xlu0 %4459  ;;  %5273 = vadd.xlane.f32.xlu0 %v5272_v38  ;;  %v5186_v56 = vsel %vm2899_vm4, %v4840_v52, %v5185_v42  ;;  %v11478_v34 = vpop.eup %8863  ;;  %v4892_v42 = vrot.slane %v11375_v20, %v14191_v58 }
 0x2af   :  { %v4409_v32 = vpop.permute.xlu1 %4408  ;;  %v5187_v5 = vsel %vm2901_vm5, %v4844_v30, %v5186_v56  ;;  %14249 = vst [vmem:[#allocation87_spill] sm:$0xff] %v11478_v34 }
 0x2b0   :  { %v4848_v4 = vrot.slane %v4409_v32, %v14191_v58  ;;  %v11486_v38 = vpop.eup %8865 }
 0x2b1   :  { %4606 = vperm.xlu1 %8604, %v11464_v12   ;;  %14250 = vst [vmem:[#allocation89_spill] sm:$0xff] %v11486_v38  ;;  %v11493_v23 = vpop.eup %8867 }
 0x2b2   :  { %v11461_v50 = vpop.permute.xlu0 %4465  ;;  %5276 = vadd.xlane.f32.xlu0 %v5275_v3  ;;  %v5188_v55 = vsel %vm2903_vm6, %v4848_v4, %v5187_v5  ;;  %14251 = vst [vmem:[#allocation91_spill] sm:$0xff] %v11493_v23 }
 0x2b3   :  { %v11473_v31 = vpop.permute.xlu1 %4414  ;;  %v5189_v45 = vsel %vm2905_vm7, %v4852_v14, %v5188_v55  ;;  %v4908_v55 = vrot.slane %v11423_v16, %v14191_v58  ;;  %v4736_v16 = vrot.slane %v11233_v19, %v14191_v58 }
 0x2b4   :  { %v5287_v48 = vsel %vm3028_vm8, %v5189_v45, 0.0 }
 0x2b5   :  { %4612 = vperm.xlu1 %8604, %v11478_v34  }
 0x2b6   :  { %v11475_v28 = vpop.permute.xlu0 %4471  ;;  %5282 = vadd.xlane.f32.xlu0 %v5281_v62 }
 0x2b7   :  { %v11482_v47 = vpop.permute.xlu1 %4420 }
 0x2b9   :  { %4618 = vperm.xlu1 %8604, %v11486_v38  }
 0x2ba   :  { %v11484_v49 = vpop.permute.xlu0 %4477  ;;  %5288 = vadd.xlane.f32.xlu0 %v5287_v48 }
 0x2bb   :  { %v11489_v24 = vpop.permute.xlu1 %4426 }
 0x2bd   :  { %4624 = vperm.xlu1 %8604, %v11493_v23  }
 0x2be   :  { %v11491_v43 = vpop.permute.xlu0 %4483 }
 0x2bf   :  { %v11496_v7 = vpop.permute.xlu1 %4432 }
 0x2c2   :  { %v11498_v17 = vpop.permute.xlu0 %4489 }
 0x2c3   :  { %v4439_v52 = vpop.permute.xlu1 %4438 }
 0x2c4   :  { %v4888_v11 = vrot.slane %v4439_v52, %v14191_v58  ;;  %v4916_v52 = vrot.slane %v11445_v41, %v14191_v58  ;;  %v4632_v41 = vrot.slane %v10920_v13, %v14191_v58 }
 0x2c6   :  { %v11500_v25 = vpop.permute.xlu0 %4495  ;;  %v5197_v32 = vsel %vm2893_vm1, %v4892_v42, %v4888_v11  ;;  %v4636_v11 = vrot.slane %v10973_v39, %v14191_v58  ;;  %v4728_v42 = vrot.slane %v11217_v9, %v14191_v58  ;;  %v4644_v39 = vrot.slane %v11005_v29, %v14191_v58 }
 0x2c7   :  { %v4445_v56 = vpop.permute.xlu1 %4444  ;;  %v4732_v9 = vrot.slane %v11071_v53, %v14191_v58  ;;  %v4792_v29 = vrot.slane %v11322_v27, %v14191_v58 }
 0x2c8   :  { %v4896_v3 = vrot.slane %v4445_v56, %v14191_v58  ;;  %v5141_v19 = vsel %vm2893_vm1, %v4636_v11, %v4632_v41  ;;  %v14253_v41 = vld [vmem:[#allocation133_spill] sm:$0xff] }
 0x2c9   :  { %v5162_v13 = vsel %vm2893_vm1, %v4732_v9, %v4728_v42  ;;  %v4864_v9 = vrot.slane %v11482_v47, %v14191_v58 }
 0x2ca   :  { %v11506_v30 = vpop.permute.xlu0 %4501  ;;  %v5198_v2 = vsel %vm2895_vm2, %v4896_v3, %v5197_v32  ;;  %v4640_v3 = vrot.slane %v10989_v22, %v14191_v58  ;;  %v4648_v22 = vrot.slane %v11021_v57, %v14191_v58  ;;  %v4800_v57 = vrot.slane %v11337_v18, %v14191_v58 }
 0x2cb   :  { %v4451_v4 = vpop.permute.xlu1 %4450  ;;  %v5199_v5 = vsel %vm2897_vm3, %v4900_v40, %v5198_v2 }
 0x2cc   :  { %v4904_v14 = vrot.slane %v4451_v4, %v14191_v58  ;;  %v5142_v53 = vsel %vm2895_vm2, %v4640_v3, %v5141_v19 }
 0x2ce   :  { %v5200_v62 = vsel %vm2899_vm4, %v4904_v14, %v5199_v5  ;;  %v11515_v20 = vpop.permute.xlu0 %4507  ;;  %v4652_v14 = vrot.slane %v11037_v37, %v14191_v58  ;;  %v5163_v5 = vsel %vm2895_vm2, %v4736_v16, %v5162_v13  ;;  %v4740_v37 = vrot.slane %v11087_v8, %v14191_v58  ;;  %v14252_v16 = vld [vmem:[#allocation80_spill] sm:$0xff] }
 0x2cf   :  { %v4457_v45 = vpop.permute.xlu1 %4456  ;;  %v5201_v21 = vsel %vm2901_vm5, %v4908_v55, %v5200_v62  ;;  %v4744_v62 = vrot.slane %v11247_v15, %v14191_v58  ;;  %v4660_v15 = vrot.slane %v11069_v1, %v14191_v58  ;;  %v4748_v1 = vrot.slane %v11103_v35, %v14191_v58 }
 0x2d0   :  { %v4912_v48 = vrot.slane %v4457_v45, %v14191_v58  ;;  %v5143_v45 = vsel %vm2897_vm3, %v4644_v39, %v5142_v53  ;;  %v5164_v18 = vsel %vm2897_vm3, %v4740_v37, %v5163_v5  ;;  %v4752_v39 = vrot.slane %v14253_v41, %v14191_v58 }
 0x2d1   :  { %v5144_v27 = vsel %vm2899_vm4, %v4648_v22, %v5143_v45  ;;  %v5165_v8 = vsel %vm2899_vm4, %v4744_v62, %v5164_v18  ;;  %v4816_v53 = vrot.slane %v11373_v60, %v14191_v58  ;;  %v4872_v45 = vrot.slane %v11489_v24, %v14191_v58  ;;  %v14257_v60 = vld [vmem:[#allocation138_spill] sm:$0xff] }
 0x2d2   :  { %v5202_v56 = vsel %vm2903_vm6, %v4912_v48, %v5201_v21  ;;  %v11540_v4 = vpop.permute.xlu0 %4513  ;;  %v4796_v48 = vrot.slane %v11203_v59, %v14191_v58  ;;  %v5145_v21 = vsel %vm2901_vm5, %v4652_v14, %v5144_v27  ;;  %v5166_v13 = vsel %vm2901_vm5, %v4748_v1, %v5165_v8 }
 0x2d3   :  { %v4463_v32 = vpop.permute.xlu1 %4462  ;;  %v5203_v2 = vsel %vm2905_vm7, %v4916_v52, %v5202_v56  ;;  %v4656_v52 = vrot.slane %v11053_v63, %v14191_v58  ;;  %v4808_v56 = vrot.slane %v11353_v54, %v14191_v58  ;;  %v4856_v63 = vrot.slane %v11473_v31, %v14191_v58  ;;  %v14255_v31 = vld [vmem:[#allocation130_spill] sm:$0xff] }
 0x2d4   :  { %v5293_v40 = vsel %vm3028_vm8, %v5203_v2, 0.0  ;;  %v5176_v11 = vsel %vm2893_vm1, %v4796_v48, %v4792_v29  ;;  %v4804_v2 = vrot.slane %v14252_v16, %v14191_v58  ;;  %v4812_v19 = vrot.slane %v14255_v31, %v14191_v58 }
 0x2d5   :  { %5294 = vadd.xlane.f32.xlu0 %v5293_v40  ;;  %v5177_v59 = vsel %vm2895_vm2, %v4800_v57, %v5176_v11  ;;  %v14254_v40 = vld [vmem:[#allocation137_spill] sm:$0xff]  ;;  %v5146_v54 = vsel %vm2903_vm6, %v4656_v52, %v5145_v21  ;;  %v4920_v5 = vrot.slane %v4463_v32, %v14191_v58  ;;  %v5167_v27 = vsel %vm2903_vm6, %v4752_v39, %v5166_v13 }
 0x2d6   :  { %v11569_v42 = vpop.permute.xlu0 %4519  ;;  %v4860_v22 = vrot.slane %v14254_v40, %v14191_v58  ;;  %v5178_v14 = vsel %vm2897_vm3, %v4804_v2, %v5177_v59  ;;  %v5147_v35 = vsel %vm2905_vm7, %v4660_v15, %v5146_v54  ;;  %v14256_v52 = vld [vmem:[#allocation129_spill] sm:$0xff]  ;;  %v4868_v15 = vrot.slane %v14257_v60, %v14191_v58  ;;  %v14258_v2 = vld [vmem:[#allocation131_spill] sm:$0xff] }
 0x2d7   :  { %v4469_v55 = vpop.permute.xlu1 %4468  ;;  %v5179_v29 = vsel %vm2899_vm4, %v4808_v56, %v5178_v14  ;;  %v4756_v21 = vrot.slane %v14256_v52, %v14191_v58  ;;  %v4924_v32 = vrot.slane %v11461_v50, %v14191_v58  ;;  %v5269_v18 = vsel %vm3028_vm8, %v5147_v35, 0.0  ;;  %v14259_v39 = vld [vmem:[#allocation81_spill] sm:$0xff] }
 0x2d8   :  { %v5190_v47 = vsel %vm2893_vm1, %v4860_v22, %v4856_v63  ;;  %v4928_v37 = vrot.slane %v4469_v55, %v14191_v58  ;;  %v5180_v11 = vsel %vm2901_vm5, %v4812_v19, %v5179_v29  ;;  %v4880_v1 = vrot.slane %v11496_v7, %v14191_v58 }
 0x2d9   :  { %v5191_v57 = vsel %vm2895_vm2, %v4864_v9, %v5190_v47  ;;  %v5204_v55 = vsel %vm2893_vm1, %v4924_v32, %v4920_v5  ;;  %v5168_v59 = vsel %vm2905_vm7, %v4756_v21, %v5167_v27  ;;  %v5181_v56 = vsel %vm2903_vm6, %v4816_v53, %v5180_v11 }
 0x2da   :  { %v11602_v48 = vpop.permute.xlu0 %4525  ;;  %v5192_v24 = vsel %vm2897_vm3, %v4868_v15, %v5191_v57  ;;  %v5205_v50 = vsel %vm2895_vm2, %v4928_v37, %v5204_v55  ;;  %v4820_v41 = vrot.slane %v14258_v2, %v14191_v58  ;;  %v4876_v9 = vrot.slane %v14259_v39, %v14191_v58 }
 0x2db   :  { %v4475_v3 = vpop.permute.xlu1 %4474  ;;  %v5193_v63 = vsel %vm2899_vm4, %v4872_v45, %v5192_v24  ;;  %v4932_v40 = vrot.slane %v11475_v28, %v14191_v58  ;;  %v5278_v31 = vsel %vm3028_vm8, %v5168_v59, 0.0  ;;  %v4956_v7 = vrot.slane %v11498_v17, %v14191_v58 }
 0x2dc   :  { %v4936_v16 = vrot.slane %v4475_v3, %v14191_v58  ;;  %v5182_v14 = vsel %vm2905_vm7, %v4820_v41, %v5181_v56  ;;  %v5194_v35 = vsel %vm2901_vm5, %v4876_v9, %v5193_v63  ;;  %v4884_v47 = vrot.slane %v11355_v26, %v14191_v58 }
 0x2dd   :  { %v5206_v3 = vsel %vm2897_vm3, %v4932_v40, %v5205_v50  ;;  %v5195_v53 = vsel %vm2903_vm6, %v4880_v1, %v5194_v35  ;;  %v4940_v17 = vrot.slane %v11484_v49, %v14191_v58  ;;  %v5284_v45 = vsel %vm3028_vm8, %v5182_v14, 0.0 }
 0x2de   :  { %v11629_v54 = vpop.permute.xlu0 %4531  ;;  %v5207_v13 = vsel %vm2899_vm4, %v4936_v16, %v5206_v3  ;;  %v4964_v37 = vrot.slane %v11500_v25, %v14191_v58  ;;  %v5196_v27 = vsel %vm2905_vm7, %v4884_v47, %v5195_v53  ;;  %v4948_v60 = vrot.slane %v11491_v43, %v14191_v58 }
 0x2df   :  { %v4481_v62 = vpop.permute.xlu1 %4480  ;;  %v5208_v52 = vsel %vm2901_vm5, %v4940_v17, %v5207_v13  ;;  %v5290_v25 = vsel %vm3028_vm8, %v5196_v27, 0.0  ;;  %v4988_v2 = vrot.slane %v11540_v4, %v14191_v58  ;;  %v5004_v4 = vrot.slane %v11602_v48, %v14191_v58 }
 0x2e0   :  { %v4944_v28 = vrot.slane %v4481_v62, %v14191_v58 }
 0x2e1   :  { %5270 = vadd.xlane.f32.xlu1 %v5269_v18  ;;  %v4972_v18 = vrot.slane %v11506_v30, %v14191_v58 }
 0x2e2   :  { %v4538_v21 = vpop.permute.xlu0 %4537  ;;  %v5209_v49 = vsel %vm2903_vm6, %v4944_v28, %v5208_v52  ;;  %v5012_v28 = vrot.slane %v11629_v54, %v14191_v58 }
 0x2e3   :  { %v4487_v8 = vpop.permute.xlu1 %4486  ;;  %v5210_v24 = vsel %vm2905_vm7, %v4948_v60, %v5209_v49  ;;  %v5020_v48 = vrot.slane %v4538_v21, %v14191_v58 }
 0x2e4   :  { %v4952_v22 = vrot.slane %v4487_v8, %v14191_v58  ;;  %v4980_v8 = vrot.slane %v11515_v20, %v14191_v58  ;;  %v5296_v56 = vsel %vm3028_vm8, %v5210_v24, 0.0 }
 0x2e5   :  { %5279 = vadd.xlane.f32.xlu1 %v5278_v31 }
 0x2e6   :  { %v5211_v5 = vsel %vm2893_vm1, %v4956_v7, %v4952_v22  ;;  %v4544_v59 = vpop.permute.xlu0 %4543  ;;  %v4996_v22 = vrot.slane %v11569_v42, %v14191_v58 }
 0x2e7   :  { %v4493_v19 = vpop.permute.xlu1 %4492  ;;  %v5028_v52 = vrot.slane %v4544_v59, %v14191_v58 }
 0x2e8   :  { %v4960_v29 = vrot.slane %v4493_v19, %v14191_v58 }
 0x2e9   :  { %5285 = vadd.xlane.f32.xlu1 %v5284_v45 }
 0x2ea   :  { %v5212_v57 = vsel %vm2895_vm2, %v4960_v29, %v5211_v5  ;;  %v4550_v41 = vpop.permute.xlu0 %4549 }
 0x2eb   :  { %v4499_v62 = vpop.permute.xlu1 %4498  ;;  %v5213_v15 = vsel %vm2897_vm3, %v4964_v37, %v5212_v57 }
 0x2ec   :  { %v4968_v26 = vrot.slane %v4499_v62, %v14191_v58 }
 0x2ed   :  { %5291 = vadd.xlane.f32.xlu1 %v5290_v25 }
 0x2ee   :  { %v5214_v32 = vsel %vm2899_vm4, %v4968_v26, %v5213_v15  ;;  %v4556_v19 = vpop.permute.xlu0 %4555 }
 0x2ef   :  { %v4505_v11 = vpop.permute.xlu1 %4504  ;;  %v5215_v43 = vsel %vm2901_vm5, %v4972_v18, %v5214_v32  ;;  %v5036_v32 = vrot.slane %v4550_v41, %v14191_v58 }
 0x2f0   :  { %v4976_v55 = vrot.slane %v4505_v11, %v14191_v58  ;;  %v5044_v11 = vrot.slane %v4556_v19, %v14191_v58 }
 0x2f1   :  { %5297 = vadd.xlane.f32.xlu1 %v5296_v56 }
 0x2f2   :  { %v5216_v63 = vsel %vm2903_vm6, %v4976_v55, %v5215_v43  ;;  %v4562_v17 = vpop.permute.xlu0 %4561 }
 0x2f3   :  { %v4511_v1 = vpop.permute.xlu1 %4510  ;;  %v5217_v30 = vsel %vm2905_vm7, %v4980_v8, %v5216_v63 }
 0x2f4   :  { %v5299_v50 = vsel %vm3028_vm8, %v5217_v30, 0.0  ;;  %v4984_v16 = vrot.slane %v4511_v1, %v14191_v58  ;;  %v5052_v1 = vrot.slane %v4562_v17, %v14191_v58 }
 0x2f5   :  { %5300 = vadd.xlane.f32.xlu0 %v5299_v50 }
 0x2f6   :  { %v5218_v9 = vsel %vm2893_vm1, %v4988_v2, %v4984_v16  ;;  %v4568_v62 = vpop.permute.xlu0 %4567 }
 0x2f7   :  { %v4517_v20 = vpop.permute.xlu1 %4516 }
 0x2f8   :  { %v4992_v39 = vrot.slane %v4517_v20, %v14191_v58  ;;  %v5060_v20 = vrot.slane %v4568_v62, %v14191_v58 }
 0x2fa   :  { %v5219_v40 = vsel %vm2895_vm2, %v4992_v39, %v5218_v9  ;;  %v4574_v25 = vpop.permute.xlu0 %4573 }
 0x2fb   :  { %v4523_v31 = vpop.permute.xlu1 %4522  ;;  %v5220_v3 = vsel %vm2897_vm3, %v4996_v22, %v5219_v40 }
 0x2fc   :  { %v5000_v7 = vrot.slane %v4523_v31, %v14191_v58  ;;  %v5068_v31 = vrot.slane %v4574_v25, %v14191_v58 }
 0x2fe   :  { %v5221_v14 = vsel %vm2899_vm4, %v5000_v7, %v5220_v3  ;;  %v4580_v63 = vpop.permute.xlu0 %4579 }
 0x2ff   :  { %v4529_v35 = vpop.permute.xlu1 %4528  ;;  %v5222_v29 = vsel %vm2901_vm5, %v5004_v4, %v5221_v14  ;;  %v5076_v19 = vrot.slane %v4580_v63, %v14191_v58 }
 0x300   :  { %v5008_v13 = vrot.slane %v4529_v35, %v14191_v58 }
 0x302   :  { %v5223_v42 = vsel %vm2903_vm6, %v5008_v13, %v5222_v29  ;;  %v4586_v39 = vpop.permute.xlu0 %4585 }
 0x303   :  { %v4535_v53 = vpop.permute.xlu1 %4534  ;;  %v5224_v47 = vsel %vm2905_vm7, %v5012_v28, %v5223_v42 }
 0x304   :  { %v5302_v5 = vsel %vm3028_vm8, %v5224_v47, 0.0  ;;  %v5016_v57 = vrot.slane %v4535_v53, %v14191_v58  ;;  %v5084_v53 = vrot.slane %v4586_v39, %v14191_v58 }
 0x305   :  { %5303 = vadd.xlane.f32.xlu1 %v5302_v5 }
 0x306   :  { %v5225_v54 = vsel %vm2893_vm1, %v5020_v48, %v5016_v57  ;;  %v4592_v4 = vpop.permute.xlu0 %4591 }
 0x307   :  { %v4541_v45 = vpop.permute.xlu1 %4540 }
 0x308   :  { %v5024_v37 = vrot.slane %v4541_v45, %v14191_v58  ;;  %v5092_v45 = vrot.slane %v4592_v4, %v14191_v58 }
 0x30a   :  { %v5226_v27 = vsel %vm2895_vm2, %v5024_v37, %v5225_v54  ;;  %v4598_v17 = vpop.permute.xlu0 %4597 }
 0x30b   :  { %v4547_v26 = vpop.permute.xlu1 %4546  ;;  %v5227_v60 = vsel %vm2897_vm3, %v5028_v52, %v5226_v27 }
 0x30c   :  { %v5032_v49 = vrot.slane %v4547_v26, %v14191_v58  ;;  %v5100_v26 = vrot.slane %v4598_v17, %v14191_v58 }
 0x30e   :  { %v5228_v15 = vsel %vm2899_vm4, %v5032_v49, %v5227_v60  ;;  %v4604_v27 = vpop.permute.xlu0 %4603 }
 0x30f   :  { %v4553_v21 = vpop.permute.xlu1 %4552  ;;  %v5229_v24 = vsel %vm2901_vm5, %v5036_v32, %v5228_v15  ;;  %v5108_v15 = vrot.slane %v4604_v27, %v14191_v58 }
 0x310   :  { %v5040_v18 = vrot.slane %v4553_v21, %v14191_v58 }
 0x312   :  { %v5230_v55 = vsel %vm2903_vm6, %v5040_v18, %v5229_v24  ;;  %v14260_v18 = vld [vmem:[#allocation4_spill] sm:$0xff] }
 0x313   :  { %v4559_v8 = vpop.permute.xlu1 %4558  ;;  %v5231_v43 = vsel %vm2905_vm7, %v5044_v11, %v5230_v55  ;;  %v3580_v11 = vrot.slane %v10957_v61, %v14260_v18  ;;  %v14261_v55 = vld [vmem:[#allocation2_spill] sm:$0xff] }
 0x314   :  { %v5305_v59 = vsel %vm3028_vm8, %v5231_v43, 0.0  ;;  %v5048_v56 = vrot.slane %v4559_v8, %v14191_v58  ;;  %v3588_v8 = vrot.slane %v10957_v61, %v14261_v55  ;;  %v14262_v43 = vld [vmem:[#allocation86_spill] sm:$0xff] }
 0x315   :  { %5306 = vadd.xlane.f32.xlu0 %v5305_v59  ;;  %v3854_v59 = vsub.f32 %v14262_v43, %v3580_v11 }
 0x316   :  { %v5232_v16 = vsel %vm2893_vm1, %v5052_v1, %v5048_v56  ;;  %v14263_v56 = vld [vmem:[#allocation93_spill] sm:$0xff]  ;;  %v14264_v1 = vld [vmem:[#allocation88_spill] sm:$0xff] }
 0x317   :  { %v4565_v30 = vpop.permute.xlu1 %4564  ;;  %v3596_v63 = vrot.slane %v10957_v61, %v14263_v56 }
 0x318   :  { %v5056_v50 = vrot.slane %v4565_v30, %v14191_v58  ;;  %v3856_v30 = vsub.f32 %v14264_v1, %v3588_v8  ;;  %v14277_v8 = vld [vmem:[#allocation99_spill] sm:$0xff] }
 0x31a   :  { %v5233_v2 = vsel %vm2895_vm2, %v5056_v50, %v5232_v16  ;;  %v4103_v50 = vmul.f32 1.442695, %v3854_v59  ;;  %v14265_v16 = vld [vmem:[#allocation94_spill] sm:$0xff]  ;;  %v4107_v39 = vmul.f32 1.442695, %v3856_v30  ;;  %v14278_v30 = vld [vmem:[#allocation101_spill] sm:$0xff] }
 0x31b   :  { %v4571_v41 = vpop.permute.xlu1 %4570  ;;  %v5234_v40 = vsel %vm2897_vm3, %v5060_v20, %v5233_v2  ;;  %v3604_v2 = vrot.slane %v10957_v61, %v14265_v16  ;;  %v14266_v20 = vld [vmem:[#allocation90_spill] sm:$0xff] }
 0x31c   :  { %v5064_v9 = vrot.slane %v4571_v41, %v14191_v58  ;;  %v3858_v41 = vsub.f32 %v14266_v20, %v3596_v63  ;;  %8869 = vpow2.f32 %v4103_v50  ;;  %v14279_v20 = vld [vmem:[#allocation103_spill] sm:$0xff] }
 0x31d   :  { %8871 = vpow2.f32 %v4107_v39 }
 0x31e   :  { %v5235_v22 = vsel %vm2899_vm4, %v5064_v9, %v5234_v40  ;;  %v14267_v9 = vld [vmem:[#allocation92_spill] sm:$0xff] }
 0x31f   :  { %v4577_v7 = vpop.permute.xlu1 %4576  ;;  %v5236_v14 = vsel %vm2901_vm5, %v5068_v31, %v5235_v22  ;;  %v3860_v40 = vsub.f32 %v14267_v9, %v3604_v2  ;;  %v4111_v22 = vmul.f32 1.442695, %v3858_v41 }
 0x320   :  { %v5072_v3 = vrot.slane %v4577_v7, %v14191_v58 }
 0x321   :  { %8873 = vpow2.f32 %v4111_v22  ;;  %v4115_v31 = vmul.f32 1.442695, %v3860_v40  ;;  %v14280_v40 = vld [vmem:[#allocation105_spill] sm:$0xff] }
 0x322   :  { %v5237_v35 = vsel %vm2903_vm6, %v5072_v3, %v5236_v14 }
 0x323   :  { %v4583_v13 = vpop.permute.xlu1 %4582  ;;  %v5238_v28 = vsel %vm2905_vm7, %v5076_v19, %v5237_v35  ;;  %8875 = vpow2.f32 %v4115_v31 }
 0x324   :  { %v5308_v29 = vsel %vm3028_vm8, %v5238_v28, 0.0  ;;  %v5080_v42 = vrot.slane %v4583_v13, %v14191_v58 }
 0x325   :  { %5309 = vadd.xlane.f32.xlu1 %v5308_v29 }
 0x326   :  { %v5239_v57 = vsel %vm2893_vm1, %v5084_v53, %v5080_v42  ;;  %v11750_v7 = vpop.eup %8869 }
 0x327   :  { %v4589_v47 = vpop.permute.xlu1 %4588  ;;  %v11753_v3 = vpop.eup %8871 }
 0x328   :  { %v5088_v5 = vrot.slane %v4589_v47, %v14191_v58  ;;  %14268 = vst [vmem:[#allocation80_spill] sm:$0xff] %v11753_v3  ;;  %v14271_v47 = vld [vmem:[#allocation5_spill] sm:$0xff] }
 0x32a   :  { %v5240_v48 = vsel %vm2895_vm2, %v5088_v5, %v5239_v57  ;;  %v14272_v57 = vld [vmem:[#allocation102_spill] sm:$0xff] }
 0x32b   :  { %v4595_v37 = vpop.permute.xlu1 %4594  ;;  %v5241_v62 = vsel %vm2897_vm3, %v5092_v45, %v5240_v48  ;;  %v11756_v61 = vpop.eup %8873 }
 0x32c   :  { %v5096_v54 = vrot.slane %v4595_v37, %v14191_v58  ;;  %14269 = vst [vmem:[#allocation133_spill] sm:$0xff] %v11756_v61  ;;  %v14273_v37 = vld [vmem:[#allocation106_spill] sm:$0xff] }
 0x32d   :  { %v11759_v19 = vpop.eup %8875 }
 0x32e   :  { %v5242_v52 = vsel %vm2899_vm4, %v5096_v54, %v5241_v62  ;;  %14270 = vst [vmem:[#allocation137_spill] sm:$0xff] %v11759_v19 }
 0x32f   :  { %v4601_v49 = vpop.permute.xlu1 %4600  ;;  %v5243_v32 = vsel %vm2901_vm5, %v5100_v26, %v5242_v52  ;;  %v14274_v26 = vld [vmem:[#allocation110_spill] sm:$0xff] }
 0x330   :  { %v5104_v60 = vrot.slane %v4601_v49, %v14191_v58 }
 0x332   :  { %v5244_v21 = vsel %vm2903_vm6, %v5104_v60, %v5243_v32 }
 0x333   :  { %v5245_v25 = vsel %vm2905_vm7, %v5108_v15, %v5244_v21  ;;  %v11762_v14 = vpop.permute.xlu1 %4606  ;;  %v14275_v15 = vld [vmem:[#allocation95_spill] sm:$0xff] }
 0x334   :  { %v5311_v24 = vsel %vm3028_vm8, %v5245_v25, 0.0  ;;  %v14276_v25 = vld [vmem:[#allocation97_spill] sm:$0xff] }
 0x335   :  { %5312 = vadd.xlane.f32.xlu0 %v5311_v24 }
 0x337   :  { %v11764_v4 = vpop.permute.xlu1 %4612 }
 0x33b   :  { %v11766_v35 = vpop.permute.xlu1 %4618  ;;  %v5274_v29 = vpop.xlane.xlu0 %5273 }
 0x33f   :  { %v11768_v13 = vpop.permute.xlu1 %4624  ;;  %v5277_v52 = vpop.xlane.xlu0 %5276 }
 0x343   :  { %v11805_v9 = vpop.xlane.xlu0 %5282 }
 0x34b   :  { %4609 = vperm.xlu0 %8603, %v11750_v7  }
 0x34f   :  { %4615 = vperm.xlu0 %8603, %v11753_v3  }
 0x353   :  { %4621 = vperm.xlu0 %8603, %v11756_v61  }
 0x357   :  { %4627 = vperm.xlu0 %8603, %v11759_v19   ;;  %v14353_v19 = vld [vmem:[#allocation14_spill] sm:$0xff] }
 0x36e   :  { %v5271_v28 = vpop.xlane.xlu1 %5270 }
 0x36f   :  { %8877 = vrcp.f32 %v5271_v28  ;;  %v11810_v28 = vpop.xlane.xlu0 %5288 }
 0x370   :  { %8879 = vrcp.f32 %v5274_v29 }
 0x371   :  { %8881 = vrcp.f32 %v5277_v52 }
 0x372   :  { %v5280_v1 = vpop.xlane.xlu1 %5279 }
 0x373   :  { %8883 = vrcp.f32 %v5280_v1 }
 0x376   :  { %v11812_v29 = vpop.xlane.xlu1 %5285 }
 0x379   :  { %v11770_v42 = vpop.eup %8877 }
 0x37a   :  { %v5352_v53 = vrot.slane %v11770_v42, %v9029_v10  ;;  %v5364_v5 = vrot.slane %v11770_v42, %v14261_v55  ;;  %v5372_v45 = vrot.slane %v11770_v42, %v14263_v56  ;;  %v5380_v62 = vrot.slane %v11770_v42, %v14265_v16  ;;  %v11783_v27 = vpop.eup %8879 }
 0x37b   :  { %v5388_v60 = vrot.slane %v11783_v27, %v14260_v18  ;;  %v5396_v21 = vrot.slane %v11783_v27, %v14261_v55  ;;  %v5404_v24 = vrot.slane %v11783_v27, %v14263_v56  ;;  %v5412_v59 = vrot.slane %v11783_v27, %v14265_v16  ;;  %v11797_v63 = vpop.eup %8881 }
 0x37c   :  { %v5989_v17 = vmul.f32 %v14271_v47, %v5352_v53  ;;  %v5992_v48 = vmul.f32 %v14272_v57, %v5364_v5  ;;  %v5994_v54 = vmul.f32 %v14273_v37, %v5372_v45  ;;  %v5996_v49 = vmul.f32 %v14274_v26, %v5380_v62  ;;  %v14281_v53 = vld [vmem:[#allocation107_spill] sm:$0xff]  ;;  %v5295_v57 = vpop.xlane.xlu0 %5294 }
 0x37d   :  { %v5998_v32 = vmul.f32 %v14275_v15, %v5388_v60  ;;  %v6000_v11 = vmul.f32 %v14276_v25, %v5396_v21  ;;  %v6002_v43 = vmul.f32 %v14277_v8, %v5404_v24  ;;  %v6004_v50 = vmul.f32 %v14278_v30, %v5412_v59  ;;  %v11817_v5 = vpop.eup %8883  ;;  %v14283_v62 = vld [vmem:[#allocation111_spill] sm:$0xff]  ;;  %v14284_v60 = vld [vmem:[#allocation113_spill] sm:$0xff] }
 0x37e   :  { %6119 = vperm.xlu0 %8603, %v5989_v17   ;;  %v5420_v2 = vrot.slane %v11797_v63, %v14260_v18  ;;  %v5428_v39 = vrot.slane %v11797_v63, %v14261_v55  ;;  %v5436_v31 = vrot.slane %v11797_v63, %v14263_v56  ;;  %v5444_v17 = vrot.slane %v11797_v63, %v14265_v16  ;;  %v14285_v21 = vld [vmem:[#allocation115_spill] sm:$0xff]  ;;  %v14286_v8 = vld [vmem:[#allocation117_spill] sm:$0xff] }
 0x37f   :  { %v5452_v37 = vrot.slane %v11817_v5, %v14260_v18  ;;  %8885 = vrcp.f32 %v5295_v57  ;;  %v5460_v26 = vrot.slane %v11817_v5, %v14261_v55  ;;  %v14287_v30 = vld [vmem:[#allocation37_spill] sm:$0xff] }
 0x380   :  { %v6006_v41 = vmul.f32 %v14279_v20, %v5420_v2  ;;  %v6008_v22 = vmul.f32 %v14280_v40, %v5428_v39  ;;  %v6010_v47 = vmul.f32 %v14281_v53, %v5436_v31  ;;  %v14288_v39 = vld [vmem:[#allocation39_spill] sm:$0xff]  ;;  %v14289_v53 = vld [vmem:[#allocation46_spill] sm:$0xff] }
 0x381   :  { %v6014_v52 = vmul.f32 %v14283_v62, %v5452_v37  ;;  %v6016_v15 = vmul.f32 %v14284_v60, %v5460_v26  ;;  %v5120_v60 = vrot.slane %v11764_v4, %v14191_v58  ;;  %v14292_v4 = vld [vmem:[#allocation49_spill] sm:$0xff] }
 0x382   :  { %6134 = vperm.xlu0 %8603, %v5992_v48   ;;  %v14282_v48 = vld [vmem:[#allocation109_spill] sm:$0xff]  ;;  %v5301_v1 = vpop.xlane.xlu0 %5300 }
 0x383   :  { %v6012_v45 = vmul.f32 %v14282_v48, %v5444_v17 }
 0x386   :  { %6144 = vperm.xlu0 %8603, %v5994_v54   ;;  %v11822_v54 = vpop.xlane.xlu1 %5291 }
 0x389   :  { %v11833_v24 = vpop.eup %8885 }
 0x38a   :  { %6154 = vperm.xlu0 %8603, %v5996_v49   ;;  %v5298_v49 = vpop.xlane.xlu1 %5297  ;;  %v5608_v59 = vrot.slane %v11833_v24, %v9029_v10  ;;  %v5616_v2 = vrot.slane %v11833_v24, %v10492_v0 }
 0x38b   :  { %8887 = vrcp.f32 %v5298_v49 }
 0x38c   :  { %v6055_v40 = vmul.f32 %v14288_v39, %v5616_v2  ;;  %8889 = vrcp.f32 %v5301_v1 }
 0x38e   :  { %6164 = vperm.xlu0 %8603, %v5998_v32   ;;  %v5468_v32 = vrot.slane %v11817_v5, %v14263_v56 }
 0x390   :  { %v6018_v25 = vmul.f32 %v14285_v21, %v5468_v32  ;;  %v14291_v32 = vld [vmem:[#allocation48_spill] sm:$0xff] }
 0x392   :  { %6174 = vperm.xlu0 %8603, %v6000_v11   ;;  %v5476_v11 = vrot.slane %v11817_v5, %v14265_v16  ;;  %v5304_v57 = vpop.xlane.xlu1 %5303 }
 0x393   :  { %8891 = vrcp.f32 %v5304_v57 }
 0x395   :  { %v11841_v20 = vpop.eup %8887 }
 0x396   :  { %6184 = vperm.xlu0 %8603, %v6002_v43   ;;  %v6020_v43 = vmul.f32 %v14286_v8, %v5476_v11  ;;  %v5648_v17 = vrot.slane %v11841_v20, %v10492_v0  ;;  %v5652_v62 = vrot.slane %v11841_v20, %v14261_v55  ;;  %v11863_v11 = vpop.eup %8889 }
 0x398   :  { %v6064_v21 = vmul.f32 %v14291_v32, %v5652_v62 }
 0x39a   :  { %6194 = vperm.xlu0 %8603, %v6004_v50   ;;  %v6053_v50 = vmul.f32 %v14287_v30, %v5608_v59  ;;  %v5128_v59 = vrot.slane %v11766_v35, %v14191_v58  ;;  %v5660_v35 = vrot.slane %v11841_v20, %v14263_v56 }
 0x39d   :  { %v11881_v57 = vpop.eup %8891 }
 0x39e   :  { %6204 = vperm.xlu0 %8603, %v6006_v41  }
 0x3a2   :  { %6214 = vperm.xlu0 %8603, %v6008_v22   ;;  %v5307_v41 = vpop.xlane.xlu0 %5306  ;;  %v5644_v22 = vrot.slane %v11841_v20, %v14260_v18 }
 0x3a3   :  { %8893 = vrcp.f32 %v5307_v41  ;;  %v5716_v41 = vrot.slane %v11881_v57, %v14261_v55 }
 0x3a4   :  { %8895 = vrcp.f32 %v11805_v9  ;;  %v5368_v9 = vrot.slane %v11770_v42, %v10517_v36 }
 0x3a5   :  { %8897 = vrcp.f32 %v11812_v29  ;;  %v5376_v29 = vrot.slane %v11770_v42, %v10534_v44 }
 0x3a6   :  { %6224 = vperm.xlu0 %8603, %v6010_v47   ;;  %v6062_v47 = vmul.f32 %v14289_v53, %v5644_v22  ;;  %v5136_v22 = vrot.slane %v11768_v13, %v14191_v58  ;;  %v5704_v13 = vrot.slane %v11881_v57, %v9029_v10 }
 0x3aa   :  { %6234 = vperm.xlu0 %8603, %v6012_v45   ;;  %v14290_v45 = vld [vmem:[#allocation47_spill] sm:$0xff] }
 0x3ab   :  { %v6063_v37 = vmul.f32 %v14290_v45, %v5648_v17 }
 0x3ae   :  { %6244 = vperm.xlu0 %8603, %v6014_v52   ;;  %v5112_v52 = vrot.slane %v11762_v14, %v14191_v58 }
 0x3b2   :  { %6254 = vperm.xlu0 %8603, %v6016_v15  }
 0x3b6   :  { %6264 = vperm.xlu0 %8603, %v6018_v25   ;;  %v5656_v25 = vrot.slane %v11841_v20, %v10517_v36 }
 0x3b8   :  { %v6065_v30 = vmul.f32 %v14292_v4, %v5656_v25  ;;  %v14297_v25 = vld [vmem:[#allocation56_spill] sm:$0xff] }
 0x3b9   :  { %v14299_v4 = vld [vmem:[#allocation52_spill] sm:$0xff] }
 0x3ba   :  { %6274 = vperm.xlu0 %8603, %v6020_v43  }
 0x3be   :  { %6439 = vperm.xlu0 %8603, %v6053_v50   ;;  %v5676_v50 = vrot.slane %v11863_v11, %v14260_v18 }
 0x3c2   :  { %6449 = vperm.xlu0 %8603, %v6055_v40   ;;  %v11846_v31 = vpop.xlane.xlu0 %5312 }
 0x3c6   :  { %6484 = vperm.xlu0 %8603, %v6062_v47   ;;  %v14293_v47 = vld [vmem:[#allocation54_spill] sm:$0xff] }
 0x3c7   :  { %v6070_v17 = vmul.f32 %v14293_v47, %v5676_v50  ;;  %v5360_v50 = vrot.slane %v11770_v42, %v10492_v0  ;;  %v11915_v47 = vpop.eup %8893 }
 0x3ca   :  { %v4610_v48 = vpop.permute.xlu0 %4609  ;;  %6489 = vperm.xlu0 %8603, %v6063_v37  }
 0x3cb   :  { %v5116_v26 = vrot.slane %v4610_v48, %v14191_v58 }
 0x3cd   :  { %v5246_v49 = vsel %vm2893_vm1, %v5116_v26, %v5112_v52  ;;  %v14294_v52 = vld [vmem:[#allocation50_spill] sm:$0xff] }
 0x3ce   :  { %v4616_v15 = vpop.permute.xlu0 %4615  ;;  %v5247_v14 = vsel %vm2895_vm2, %v5120_v60, %v5246_v49  ;;  %6494 = vperm.xlu0 %8603, %v6064_v21   ;;  %v6066_v26 = vmul.f32 %v14294_v52, %v5660_v35  ;;  %v14295_v49 = vld [vmem:[#allocation78_spill] sm:$0xff]  ;;  %v5684_v21 = vrot.slane %v11863_v11, %v14261_v55  ;;  %v14302_v35 = vld [vmem:[#allocation104_spill] sm:$0xff]  ;;  %v11923_v52 = vpop.eup %8895 }
 0x3cf   :  { %v5124_v8 = vrot.slane %v4616_v15, %v14191_v58  ;;  %v6077_v60 = vmul.f32 %v14295_v49, %v5704_v13  ;;  %v5636_v15 = vrot.slane %v11833_v24, %v14265_v16  ;;  %v14305_v49 = vld [vmem:[#allocation69_spill] sm:$0xff] }
 0x3d1   :  { %v5248_v43 = vsel %vm2897_vm3, %v5124_v8, %v5247_v14  ;;  %v6072_v8 = vmul.f32 %v14297_v25, %v5684_v21  ;;  %v5356_v14 = vrot.slane %v11770_v42, %v14260_v18  ;;  %v14306_v42 = vld [vmem:[#allocation112_spill] sm:$0xff]  ;;  %v14307_v25 = vld [vmem:[#allocation26_spill] sm:$0xff] }
 0x3d2   :  { %v4622_v1 = vpop.permute.xlu0 %4621  ;;  %v5249_v39 = vsel %vm2899_vm4, %v5128_v59, %v5248_v43  ;;  %6499 = vperm.xlu0 %8603, %v6065_v30   ;;  %v5668_v43 = vrot.slane %v11841_v20, %v14265_v16  ;;  %v14298_v59 = vld [vmem:[#allocation98_spill] sm:$0xff] }
 0x3d3   :  { %v5132_v2 = vrot.slane %v4622_v1, %v14191_v58  ;;  %v5990_v1 = vmul.f32 %v14298_v59, %v5356_v14  ;;  %v5392_v14 = vrot.slane %v11783_v27, %v10492_v0  ;;  %v14308_v59 = vld [vmem:[#allocation114_spill] sm:$0xff] }
 0x3d4   :  { %v6068_v30 = vmul.f32 %v14299_v4, %v5668_v43  ;;  %v14309_v4 = vld [vmem:[#allocation30_spill] sm:$0xff] }
 0x3d5   :  { %v5250_v40 = vsel %vm2901_vm5, %v5132_v2, %v5249_v39  ;;  %v14300_v2 = vld [vmem:[#allocation100_spill] sm:$0xff] }
 0x3d6   :  { %v4628_v53 = vpop.permute.xlu0 %4627  ;;  %6524 = vperm.xlu0 %8603, %v6070_v17   ;;  %v5251_v45 = vsel %vm2903_vm6, %v5136_v22, %v5250_v40  ;;  %v5991_v39 = vmul.f32 %v14300_v2, %v5360_v50  ;;  %v14301_v40 = vld [vmem:[#allocation64_spill] sm:$0xff]  ;;  %v5310_v17 = vpop.xlane.xlu1 %5309  ;;  %v5400_v50 = vrot.slane %v11783_v27, %v10517_v36 }
 0x3d7   :  { %v5140_v48 = vrot.slane %v4628_v53, %v14191_v58  ;;  %v14296_v58 = vld [vmem:[#allocation44_spill] sm:$0xff]  ;;  %v6080_v22 = vmul.f32 %v14301_v40, %v5716_v41  ;;  %v5692_v53 = vrot.slane %v11863_v11, %v14263_v56  ;;  %8899 = vrcp.f32 %v5310_v17 }
 0x3d8   :  { %v6060_v32 = vmul.f32 %v14296_v58, %v5636_v15  ;;  %v5384_v15 = vrot.slane %v11783_v27, %v9029_v10  ;;  %v5488_v58 = vrot.slane %v11923_v52, %v10492_v0  ;;  %v5724_v41 = vrot.slane %v11881_v57, %v14263_v56  ;;  %v14310_v40 = vld [vmem:[#allocation116_spill] sm:$0xff] }
 0x3d9   :  { %v5252_v37 = vsel %vm2905_vm7, %v5140_v48, %v5251_v45  ;;  %v5993_v48 = vmul.f32 %v14302_v35, %v5368_v9  ;;  %v14303_v45 = vld [vmem:[#allocation58_spill] sm:$0xff]  ;;  %v5408_v17 = vrot.slane %v11783_v27, %v10534_v44  ;;  %v14314_v27 = vld [vmem:[#allocation11_spill] sm:$0xff]  ;;  %8901 = vrcp.f32 %v11810_v28 }
 0x3da   :  { %v5314_v62 = vsel %vm3028_vm8, %v5252_v37, 0.0  ;;  %6504 = vperm.xlu0 %8603, %v6066_v26   ;;  %v6074_v37 = vmul.f32 %v14303_v45, %v5692_v53  ;;  %v14304_v26 = vld [vmem:[#allocation108_spill] sm:$0xff]  ;;  %v5997_v21 = vmul.f32 %v14306_v42, %v5384_v15  ;;  %v14311_v9 = vld [vmem:[#allocation66_spill] sm:$0xff]  ;;  %v14312_v45 = vld [vmem:[#allocation25_spill] sm:$0xff]  ;;  %v5424_v42 = vrot.slane %v11797_v63, %v10492_v0 }
 0x3db   :  { %5315 = vadd.xlane.f32.xlu1 %v5314_v62  ;;  %v5736_v62 = vrot.slane %v11915_v47, %v9029_v10  ;;  %v5995_v13 = vmul.f32 %v14304_v26, %v5376_v29  ;;  %v6082_v53 = vmul.f32 %v14311_v9, %v5724_v41  ;;  %v14313_v29 = vld [vmem:[#allocation77_spill] sm:$0xff]  ;;  %v5416_v26 = vrot.slane %v11797_v63, %v9029_v10  ;;  %v14315_v15 = vld [vmem:[#allocation27_spill] sm:$0xff] }
 0x3dc   :  { %v5440_v9 = vrot.slane %v11797_v63, %v10534_v44  ;;  %v5456_v28 = vrot.slane %v11817_v5, %v10492_v0  ;;  %8903 = vrcp.f32 %v11846_v31 }
 0x3dd   :  { %8905 = vrcp.f32 %v11822_v54  ;;  %v14330_v54 = vld [vmem:[#allocation24_spill] sm:$0xff] }
 0x3de   :  { %6559 = vperm.xlu0 %8603, %v6077_v60   ;;  %v6085_v60 = vmul.f32 %v14305_v49, %v5736_v62 }
 0x3e2   :  { %6474 = vperm.xlu0 %8603, %v6060_v32   ;;  %v11931_v32 = vpop.eup %8897 }
 0x3e3   :  { %v5516_v43 = vrot.slane %v11931_v32, %v14260_v18  ;;  %v11945_v2 = vpop.eup %8899 }
 0x3e4   :  { %v5768_v35 = vrot.slane %v11945_v2, %v9029_v10 }
 0x3e6   :  { %6534 = vperm.xlu0 %8603, %v6072_v8   ;;  %v6023_v8 = vmul.f32 %v14307_v25, %v5488_v58  ;;  %v6093_v62 = vmul.f32 %v14313_v29, %v5768_v35  ;;  %v14320_v35 = vld [vmem:[#allocation15_spill] sm:$0xff] }
 0x3ea   :  { %6514 = vperm.xlu0 %8603, %v6068_v30   ;;  %v6030_v30 = vmul.f32 %v14309_v4, %v5516_v43  ;;  %v14317_v43 = vld [vmem:[#allocation60_spill] sm:$0xff]  ;;  %v5748_v4 = vrot.slane %v11915_v47, %v14261_v55 }
 0x3ec   :  { %6124 = vperm.xlu1 %8604, %v5990_v1   ;;  %v5999_v1 = vmul.f32 %v14308_v59, %v5392_v14 }
 0x3ee   :  { %6574 = vperm.xlu0 %8603, %v6080_v22   ;;  %v6001_v22 = vmul.f32 %v14310_v40, %v5400_v50  ;;  %v14318_v50 = vld [vmem:[#allocation13_spill] sm:$0xff]  ;;  %v14319_v40 = vld [vmem:[#allocation72_spill] sm:$0xff] }
 0x3f0   :  { %6129 = vperm.xlu1 %8604, %v5991_v39  }
 0x3f2   :  { %6544 = vperm.xlu0 %8603, %v6074_v37   ;;  %v6003_v37 = vmul.f32 %v14312_v45, %v5408_v17  ;;  %v6011_v45 = vmul.f32 %v14320_v35, %v5440_v9  ;;  %v5472_v9 = vrot.slane %v11817_v5, %v10534_v44 }
 0x3f4   :  { %6139 = vperm.xlu1 %8604, %v5993_v48  }
 0x3f6   :  { %6599 = vperm.xlu0 %8603, %v6085_v60   ;;  %v6005_v60 = vmul.f32 %v14314_v27, %v5416_v26  ;;  %v5732_v26 = vrot.slane %v11881_v57, %v14265_v16 }
 0x3f8   :  { %6149 = vperm.xlu1 %8604, %v5995_v13   ;;  %v5492_v13 = vrot.slane %v11923_v52, %v14261_v55 }
 0x3fa   :  { %6289 = vperm.xlu0 %8603, %v6023_v8   ;;  %v6024_v58 = vmul.f32 %v14315_v15, %v5492_v13  ;;  %v14316_v8 = vld [vmem:[#allocation12_spill] sm:$0xff]  ;;  %v14322_v13 = vld [vmem:[#allocation17_spill] sm:$0xff] }
 0x3fb   :  { %v6007_v14 = vmul.f32 %v14316_v8, %v5424_v42 }
 0x3fc   :  { %6159 = vperm.xlu1 %8604, %v5997_v21   ;;  %v5700_v21 = vrot.slane %v11863_v11, %v14265_v16 }
 0x3fd   :  { %v11947_v39 = vpop.permute.xlu0 %6119 }
 0x3fe   :  { %6324 = vperm.xlu0 %8603, %v6030_v30   ;;  %v6076_v59 = vmul.f32 %v14317_v43, %v5700_v21  ;;  %v14324_v21 = vld [vmem:[#allocation18_spill] sm:$0xff] }
 0x3ff   :  { %v6015_v8 = vmul.f32 %v14324_v21, %v5456_v28  ;;  %v14331_v28 = vld [vmem:[#allocation139_spill] sm:$0xff] }
 0x400   :  { %6169 = vperm.xlu1 %8604, %v5999_v1   ;;  %v5432_v1 = vrot.slane %v11797_v63, %v10517_v36 }
 0x401   :  { %v11955_v48 = vpop.permute.xlu0 %6134 }
 0x402   :  { %6584 = vperm.xlu0 %8603, %v6082_v53   ;;  %v6009_v41 = vmul.f32 %v14318_v50, %v5432_v1  ;;  %v5496_v53 = vrot.slane %v11923_v52, %v10517_v36  ;;  %v5528_v1 = vrot.slane %v11931_v32, %v10517_v36 }
 0x404   :  { %6179 = vperm.xlu1 %8604, %v6001_v22   ;;  %v6088_v22 = vmul.f32 %v14319_v40, %v5748_v4  ;;  %v12013_v4 = vpop.eup %8901 }
 0x405   :  { %v11963_v49 = vpop.permute.xlu0 %6144 }
 0x406   :  { %6639 = vperm.xlu0 %8603, %v6093_v62   ;;  %v5448_v62 = vrot.slane %v11817_v5, %v9029_v10 }
 0x408   :  { %6189 = vperm.xlu1 %8604, %v6003_v37   ;;  %v14321_v37 = vld [vmem:[#allocation28_spill] sm:$0xff]  ;;  %v6013_v27 = vmul.f32 %v14322_v13, %v5448_v62  ;;  %v5784_v13 = vrot.slane %v11945_v2, %v10517_v36 }
 0x409   :  { %v11971_v25 = vpop.permute.xlu0 %6154  ;;  %v6025_v29 = vmul.f32 %v14321_v37, %v5496_v53  ;;  %v5548_v53 = vrot.slane %v12013_v4, %v14260_v18 }
 0x40a   :  { %6294 = vperm.xlu0 %8603, %v6024_v58   ;;  %v5780_v58 = vrot.slane %v11945_v2, %v14261_v55 }
 0x40c   :  { %6199 = vperm.xlu1 %8604, %v6005_v60   ;;  %v14323_v60 = vld [vmem:[#allocation68_spill] sm:$0xff] }
 0x40d   :  { %v11979_v30 = vpop.permute.xlu0 %6164  ;;  %v6084_v15 = vmul.f32 %v14323_v60, %v5732_v26  ;;  %v5480_v26 = vrot.slane %v11923_v52, %v9029_v10  ;;  %v5612_v60 = vrot.slane %v11833_v24, %v14260_v18 }
 0x40e   :  { %6554 = vperm.xlu0 %8603, %v6076_v59   ;;  %v5464_v59 = vrot.slane %v11817_v5, %v10517_v36  ;;  %v12032_v5 = vpop.eup %8903 }
 0x40f   :  { %v5804_v21 = vrot.slane %v12032_v5, %v14260_v18 }
 0x410   :  { %6209 = vperm.xlu1 %8604, %v6007_v14   ;;  %v14325_v14 = vld [vmem:[#allocation61_spill] sm:$0xff] }
 0x411   :  { %v11987_v17 = vpop.permute.xlu0 %6174  ;;  %v6096_v43 = vmul.f32 %v14325_v14, %v5780_v58  ;;  %v6097_v58 = vmul.f32 %v14331_v28, %v5784_v13  ;;  %v8070_v14 = vld [vmem:[%s13676_s5 + $0x8] sm:$0xff]  ;;  %v5620_v13 = vrot.slane %v11833_v24, %v14261_v55 }
 0x412   :  { %6614 = vperm.xlu0 %8603, %v6088_v22   ;;  %v14327_v22 = vld [vmem:[#allocation6_spill] sm:$0xff] }
 0x413   :  { %v6033_v31 = vmul.f32 %v14327_v22, %v5528_v1  ;;  %v14332_v1 = vld [vmem:[#allocation38_spill] sm:$0xff] }
 0x414   :  { %6219 = vperm.xlu1 %8604, %v6009_v41   ;;  %v14326_v41 = vld [vmem:[#allocation19_spill] sm:$0xff] }
 0x415   :  { %v11996_v63 = vpop.permute.xlu0 %6184  ;;  %v6017_v40 = vmul.f32 %v14326_v41, %v5464_v59  ;;  %v6054_v41 = vmul.f32 %v14332_v1, %v5612_v60  ;;  %v14338_v1 = vld [vmem:[#allocation41_spill] sm:$0xff] }
 0x416   :  { %6299 = vperm.xlu0 %8603, %v6025_v29   ;;  %v14329_v29 = vld [vmem:[#allocation124_spill] sm:$0xff] }
 0x417   :  { %v6038_v62 = vmul.f32 %v14329_v29, %v5548_v53  ;;  %v12056_v53 = vpop.eup %8905 }
 0x418   :  { %6229 = vperm.xlu1 %8604, %v6011_v45   ;;  %v14328_v45 = vld [vmem:[#allocation123_spill] sm:$0xff]  ;;  %v5576_v60 = vrot.slane %v12056_v53, %v9029_v10 }
 0x419   :  { %v12004_v42 = vpop.permute.xlu0 %6194  ;;  %v6019_v37 = vmul.f32 %v14328_v45, %v5472_v9  ;;  %v5532_v9 = vrot.slane %v11931_v32, %v14263_v56 }
 0x41a   :  { %6594 = vperm.xlu0 %8603, %v6084_v15   ;;  %v6021_v15 = vmul.f32 %v14330_v54, %v5480_v26 }
 0x41c   :  { %6239 = vperm.xlu1 %8604, %v6013_v27  }
 0x41d   :  { %v12015_v50 = vpop.permute.xlu0 %6204 }
 0x41e   :  { %6654 = vperm.xlu0 %8603, %v6096_v43  }
 0x420   :  { %6249 = vperm.xlu1 %8604, %v6015_v8   ;;  %v8069_v8 = vld [vmem:[%s13676_s5] sm:$0xff] }
 0x421   :  { %v12023_v35 = vpop.permute.xlu0 %6214  ;;  %v8595_v59 = vpack.c.bf16 %v8070_v14, %v8069_v8  ;;  %v5624_v8 = vrot.slane %v11833_v24, %v10517_v36  ;;  %v5760_v14 = vrot.slane %v11915_v47, %v10534_v44 }
 0x422   :  { %6339 = vperm.xlu0 %8603, %v6033_v31   ;;  %v5640_v31 = vrot.slane %v11841_v20, %v9029_v10 }
 0x423   :  { %8596 = vmatprep.subr.bf16.mxu0 %v8595_v59  ;;  %8599 = vmatprep.subr.bf16.mxu1 %v8595_v59 }
 0x424   :  { %6259 = vperm.xlu1 %8604, %v6017_v40   ;;  %v14333_v40 = vld [vmem:[#allocation132_spill] sm:$0xff]  ;;  %8598 = vmatpush3.bf16.msra.mxu0 %v8595_v59 }
 0x425   :  { %v12034_v27 = vpop.permute.xlu0 %6224  ;;  %v6102_v22 = vmul.f32 %v14333_v40, %v5804_v21  ;;  %8600 = vmatpush3.bf16.msra.mxu1 %v8595_v59  ;;  %v14339_v40 = vld [vmem:[#allocation75_spill] sm:$0xff] }
 0x426   :  { %6364 = vperm.xlu0 %8603, %v6038_v62   ;;  %v14335_v62 = vld [vmem:[#allocation121_spill] sm:$0xff] }
 0x427   :  { %v6034_v26 = vmul.f32 %v14335_v62, %v5532_v9  ;;  %v5808_v9 = vrot.slane %v12032_v5, %v10492_v0 }
 0x428   :  { %6269 = vperm.xlu1 %8604, %v6019_v37   ;;  %v14334_v37 = vld [vmem:[#allocation45_spill] sm:$0xff] }
 0x429   :  { %v12048_v43 = vpop.permute.xlu0 %6234  ;;  %v6061_v29 = vmul.f32 %v14334_v37, %v5640_v31  ;;  %v5628_v31 = vrot.slane %v11833_v24, %v14263_v56  ;;  %v14340_v37 = vld [vmem:[#allocation42_spill] sm:$0xff]  ;;  %v6103_v62 = vmul.f32 %v11414_v33, %v5808_v9  ;;  %v5504_v33 = vrot.slane %v11923_v52, %v10534_v44 }
 0x42a   :  { %6659 = vperm.xlu0 %8603, %v6097_v58   ;;  %v14337_v58 = vld [vmem:[#allocation10_spill] sm:$0xff] }
 0x42b   :  { %v6045_v21 = vmul.f32 %v14337_v58, %v5576_v60  ;;  %v14341_v60 = vld [vmem:[#allocation53_spill] sm:$0xff]  ;;  %v5484_v58 = vrot.slane %v11923_v52, %v14260_v18 }
 0x42c   :  { %6279 = vperm.xlu1 %8604, %v6021_v15   ;;  %v14336_v15 = vld [vmem:[#allocation40_spill] sm:$0xff] }
 0x42d   :  { %v12058_v45 = vpop.permute.xlu0 %6244  ;;  %v6056_v28 = vmul.f32 %v14336_v15, %v5620_v13 }
 0x42e   :  { %6684 = vperm.xlu0 %8603, %v6102_v22   ;;  %v6091_v22 = vmul.f32 %v14339_v40, %v5760_v14  ;;  %v5508_v14 = vrot.slane %v11923_v52, %v14265_v16  ;;  %v5560_v40 = vrot.slane %v12013_v4, %v10517_v36 }
 0x430   :  { %6444 = vperm.xlu1 %8604, %v6054_v41   ;;  %v6057_v41 = vmul.f32 %v14338_v1, %v5624_v8  ;;  %v14342_v1 = vld [vmem:[#allocation43_spill] sm:$0xff] }
 0x431   :  { %v12066_v54 = vpop.permute.xlu0 %6254 }
 0x432   :  { %6344 = vperm.xlu0 %8603, %v6034_v26   ;;  %v5672_v26 = vrot.slane %v11863_v11, %v9029_v10 }
 0x434   :  { %6479 = vperm.xlu1 %8604, %v6061_v29   ;;  %v6058_v29 = vmul.f32 %v14340_v37, %v5628_v31  ;;  %v6069_v15 = vmul.f32 %v14341_v60, %v5672_v26  ;;  %v14343_v31 = vld [vmem:[#allocation118_spill] sm:$0xff]  ;;  %v5552_v37 = vrot.slane %v12013_v4, %v10492_v0  ;;  %v5556_v60 = vrot.slane %v12013_v4, %v14261_v55 }
 0x435   :  { %v12074_v59 = vpop.permute.xlu0 %6264  ;;  %v12109_v9 = vmul.f32 %v14343_v31, %v5484_v58  ;;  %v14348_v58 = vld [vmem:[#allocation120_spill] sm:$0xff] }
 0x436   :  { %6399 = vperm.xlu0 %8603, %v6045_v21   ;;  %v5500_v21 = vrot.slane %v11923_v52, %v14263_v56 }
 0x438   :  { %6454 = vperm.xlu1 %8604, %v6056_v28   ;;  %v5632_v28 = vrot.slane %v11833_v24, %v10534_v44  ;;  %v5680_v24 = vrot.slane %v11863_v11, %v10492_v0 }
 0x439   :  { %v12086_v13 = vpop.permute.xlu0 %6274 }
 0x43a   :  { %6629 = vperm.xlu0 %8603, %v6091_v22   ;;  %v5544_v22 = vrot.slane %v12013_v4, %v9029_v10 }
 0x43c   :  { %6459 = vperm.xlu1 %8604, %v6057_v41   ;;  %v6059_v41 = vmul.f32 %v14342_v1, %v5632_v28  ;;  %v5512_v28 = vrot.slane %v11931_v32, %v9029_v10  ;;  %v12126_v1 = vmul.f32 %v14348_v58, %v5508_v14  ;;  %v12139_v23 = vmul.f32 %v14353_v19, %v5544_v22  ;;  %v14358_v22 = vld [vmem:[#allocation125_spill] sm:$0xff] }
 0x43d   :  { %v12097_v8 = vpop.permute.xlu0 %6439  ;;  %v5520_v14 = vrot.slane %v11931_v32, %v10492_v0  ;;  %v5536_v58 = vrot.slane %v11931_v32, %v10534_v44  ;;  %v5592_v19 = vrot.slane %v12056_v53, %v10517_v36 }
 0x43e   :  { %6689 = vperm.xlu0 %8603, %v6103_v62   ;;  %v14346_v62 = vld [vmem:[#allocation16_spill] sm:$0xff]  ;;  %14349 = vst [vmem:[#allocation138_spill] sm:$0xff] %v12126_v1  ;;  %14354 = vst [vmem:[#allocation81_spill] sm:$0xff] %v12139_v23  ;;  %v14360_v1 = vld [vmem:[#allocation126_spill] sm:$0xff] }
 0x43f   :  { %v12117_v26 = vmul.f32 %v14346_v62, %v5504_v33  ;;  %v14350_v33 = vld [vmem:[#allocation55_spill] sm:$0xff]  ;;  %v14351_v62 = vld [vmem:[#allocation9_spill] sm:$0xff] }
 0x440   :  { %6464 = vperm.xlu1 %8604, %v6058_v29   ;;  %v14344_v29 = vld [vmem:[#allocation119_spill] sm:$0xff]  ;;  %v6071_v31 = vmul.f32 %v14350_v33, %v5680_v24  ;;  %v12136_v12 = vmul.f32 %v14351_v62, %v5560_v40  ;;  %v5584_v40 = vrot.slane %v12056_v53, %v10492_v0  ;;  %v12157_v62 = vmul.f32 %v14358_v22, %v5556_v60  ;;  %v42_v60 = vld [vmem:[%s13677_s3] sm:$0xff] }
 0x441   :  { %v12114_v52 = vmul.f32 %v14344_v29, %v5500_v21  ;;  %14347 = vst [vmem:[#allocation129_spill] sm:$0xff] %v12117_v26  ;;  %v5572_v21 = vrot.slane %v12013_v4, %v14265_v16  ;;  %v5708_v29 = vrot.slane %v11881_v57, %v14260_v18  ;;  %v12141_v61 = vpop.permute.xlu0 %6449  ;;  %v14356_v24 = vld [vmem:[#allocation7_spill] sm:$0xff]  ;;  %v14362_v26 = vld [vmem:[#allocation29_spill] sm:$0xff]  ;;  %v14367_v22 = vld [vmem:[#allocation62_spill] sm:$0xff] }
 0x442   :  { %14352 = vst [vmem:[#allocation131_spill] sm:$0xff] %v12136_v12  ;;  %14355 = vst [vmem:[#allocation4_spill] sm:$0xff] %v12141_v61  ;;  %v12150_v33 = vmul.f32 %v14356_v24, %v5552_v37  ;;  %v12163_v3 = vmul.f32 %v14362_v26, %v5512_v28  ;;  %v5596_v37 = vrot.slane %v12056_v53, %v14263_v56  ;;  %v14363_v24 = vld [vmem:[#allocation20_spill] sm:$0xff] }
 0x443   :  { %14345 = vst [vmem:[#allocation130_spill] sm:$0xff] %v12114_v52  ;;  %14359 = vst [vmem:[#allocation86_spill] sm:$0xff] %v12157_v62  ;;  %v6078_v62 = vmul.f32 %v14367_v22, %v5708_v29  ;;  %v5580_v26 = vrot.slane %v12056_v53, %v14260_v18  ;;  %v5600_v28 = vrot.slane %v12056_v53, %v10534_v44  ;;  %v14370_v29 = vld [vmem:[#allocation32_spill] sm:$0xff]  ;;  %v14373_v52 = vld [vmem:[#allocation33_spill] sm:$0xff] }
 0x444   :  { %6519 = vperm.xlu1 %8604, %v6069_v15   ;;  %v5564_v15 = vrot.slane %v12013_v4, %v14263_v56  ;;  %14357 = vst [vmem:[#allocation2_spill] sm:$0xff] %v12150_v33  ;;  %v14365_v33 = vld [vmem:[#allocation127_spill] sm:$0xff]  ;;  %v12203_v12 = vmul.f32 %v14373_v52, %v5592_v19  ;;  %v5696_v52 = vrot.slane %v11863_v11, %v10534_v44  ;;  %v14376_v19 = vld [vmem:[#allocation34_spill] sm:$0xff] }
 0x445   :  { %v12171_v23 = vmul.f32 %v14365_v33, %v5572_v21  ;;  %v14369_v33 = vld [vmem:[#allocation8_spill] sm:$0xff] }
 0x446   :  { %v12160_v38 = vmul.f32 %v14360_v1, %v5564_v15  ;;  %v5664_v15 = vrot.slane %v11841_v20, %v10534_v44  ;;  %v45_v1 = vld [vmem:[%s13677_s3 + $0x18] sm:$0xff]  ;;  %v5540_v20 = vrot.slane %v11931_v32, %v14265_v16  ;;  %14374 = vst [vmem:[#allocation102_spill] sm:$0xff] %v12203_v12 }
 0x447   :  { %14366 = vst [vmem:[#allocation92_spill] sm:$0xff] %v12171_v23  ;;  %v5688_v23 = vrot.slane %v11863_v11, %v10517_v36  ;;  %v5720_v11 = vrot.slane %v11881_v57, %v10517_v36 }
 0x448   :  { %6469 = vperm.xlu1 %8604, %v6059_v41   ;;  %v5568_v41 = vrot.slane %v12013_v4, %v10534_v44  ;;  %v5524_v4 = vrot.slane %v11931_v32, %v14261_v55  ;;  %14361 = vst [vmem:[#allocation88_spill] sm:$0xff] %v12160_v38  ;;  %v49_v32 = vld [vmem:[%s13677_s3 + $0x38] sm:$0xff] }
 0x44a   :  { %v12193_v22 = vmul.f32 %v14370_v29, %v5524_v4  ;;  %v47_v4 = vld [vmem:[%s13677_s3 + $0x28] sm:$0xff]  ;;  %v14379_v29 = vld [vmem:[#allocation128_spill] sm:$0xff] }
 0x44b   :  { %v12229_v12 = vmul.f32 %v14379_v29, %v5580_v26  ;;  %v6764_v26 = vmul.f32 %v11971_v25, %v49_v32  ;;  %v5752_v25 = vrot.slane %v11915_v47, %v10517_v36  ;;  %v14392_v32 = vld [vmem:[#allocation67_spill] sm:$0xff] }
 0x44c   :  { %6529 = vperm.xlu1 %8604, %v6071_v31   ;;  %v12168_v31 = vmul.f32 %v14363_v24, %v5568_v41  ;;  %v14368_v41 = vld [vmem:[#allocation31_spill] sm:$0xff]  ;;  %v12190_v24 = vmul.f32 %v14369_v33, %v5536_v58  ;;  %14371 = vst [vmem:[#allocation5_spill] sm:$0xff] %v12193_v22  ;;  %v6757_v58 = vmul.f32 %v11947_v39, %v42_v60 }
 0x44d   :  { %v12187_v21 = vmul.f32 %v14368_v41, %v5520_v14  ;;  %v5588_v14 = vrot.slane %v12056_v53, %v14261_v55  ;;  %v6760_v39 = vmul.f32 %v11955_v48, %v45_v1  ;;  %v51_v60 = vld [vmem:[%s13677_s3 + $0x48] sm:$0xff]  ;;  %14380 = vst [vmem:[#allocation95_spill] sm:$0xff] %v12229_v12  ;;  %v5604_v1 = vrot.slane %v12056_v53, %v14265_v16  ;;  %v14399_v12 = vld [vmem:[#allocation21_spill] sm:$0xff] }
 0x44e   :  { %14364 = vst [vmem:[#allocation90_spill] sm:$0xff] %v12168_v31  ;;  %v14372_v31 = vld [vmem:[#allocation22_spill] sm:$0xff]  ;;  %v14378_v41 = vld [vmem:[#allocation51_spill] sm:$0xff] }
 0x44f   :  { %v12200_v38 = vmul.f32 %v14372_v31, %v5584_v40  ;;  %v5712_v40 = vrot.slane %v11881_v57, %v10492_v0  ;;  %v12221_v31 = vmul.f32 %v14376_v19, %v5596_v37  ;;  %v6067_v33 = vmul.f32 %v14378_v41, %v5664_v15  ;;  %v14381_v22 = vld [vmem:[#allocation35_spill] sm:$0xff]  ;;  %v14383_v19 = vld [vmem:[#allocation122_spill] sm:$0xff] }
 0x450   :  { %6564 = vperm.xlu1 %8604, %v6078_v62   ;;  %v12214_v62 = vpop.permute.xlu0 %6484  ;;  %v12232_v34 = vmul.f32 %v14381_v22, %v5600_v28  ;;  %v5728_v37 = vrot.slane %v11881_v57, %v10534_v44  ;;  %v12239_v48 = vmul.f32 %v14383_v19, %v5540_v20  ;;  %v6762_v15 = vmul.f32 %v11963_v49, %v47_v4  ;;  %v14385_v41 = vld [vmem:[#allocation74_spill] sm:$0xff]  ;;  %v14386_v22 = vld [vmem:[#allocation23_spill] sm:$0xff]  ;;  %v14389_v19 = vld [vmem:[#allocation76_spill] sm:$0xff] }
 0x451   :  { %14375 = vst [vmem:[#allocation106_spill] sm:$0xff] %v12214_v62  ;;  %14377 = vst [vmem:[#allocation110_spill] sm:$0xff] %v12221_v31  ;;  %v6073_v28 = vmul.f32 %v14385_v41, %v5688_v23  ;;  %v12247_v29 = vmul.f32 %v14386_v22, %v5588_v14  ;;  %v6766_v57 = vmul.f32 %v11979_v30, %v51_v60  ;;  %v14388_v31 = vld [vmem:[#allocation63_spill] sm:$0xff]  ;;  %v6906_v53 = vsel %vm1866_vm0, %v6760_v39, 0.0  ;;  %v53_v30 = vld [vmem:[%s13677_s3 + $0x58] sm:$0xff] }
 0x452   :  { %14382 = vst [vmem:[#allocation97_spill] sm:$0xff] %v12232_v34  ;;  %14384 = vst [vmem:[#allocation99_spill] sm:$0xff] %v12239_v48  ;;  %v6885_v34 = vsel %vm1866_vm0, %v6757_v58, 0.0  ;;  %v6079_v20 = vmul.f32 %v14388_v31, %v5712_v40  ;;  %v12253_v48 = vmul.f32 %v14389_v19, %v5696_v52  ;;  %v5740_v49 = vrot.slane %v11915_v47, %v14260_v18  ;;  %v14391_v58 = vld [vmem:[#allocation65_spill] sm:$0xff]  ;;  %v14393_v31 = vld [vmem:[#allocation36_spill] sm:$0xff] }
 0x453   :  { %14387 = vst [vmem:[#allocation101_spill] sm:$0xff] %v12247_v29  ;;  %v5744_v23 = vrot.slane %v11915_v47, %v10492_v0  ;;  %v12268_v4 = vmul.f32 %v14391_v58, %v5720_v11  ;;  %v12271_v40 = vmul.f32 %v14392_v32, %v5728_v37  ;;  %v5756_v52 = vrot.slane %v11915_v47, %v14263_v56  ;;  %v14395_v32 = vld [vmem:[#allocation70_spill] sm:$0xff] }
 0x454   :  { %6509 = vperm.xlu1 %8604, %v6067_v33   ;;  %v12265_v14 = vpop.permute.xlu0 %6489  ;;  %v12276_v39 = vmul.f32 %v14393_v31, %v5604_v1  ;;  %v6886_v60 = vrot.slane %v6885_v34, 4  ;;  %v6920_v33 = vsel %vm1866_vm0, %v6762_v15, 0.0  ;;  %v6934_v41 = vsel %vm1866_vm0, %v6764_v26, 0.0  ;;  %v14396_v15 = vld [vmem:[#allocation71_spill] sm:$0xff] }
 0x455   :  { %14390 = vst [vmem:[#allocation103_spill] sm:$0xff] %v12265_v14  ;;  %v5764_v22 = vrot.slane %v11915_v47, %v14265_v16  ;;  %v6907_v11 = vrot.slane %v6906_v53, 4  ;;  %v6948_v19 = vsel %vm1866_vm0, %v6766_v57, 0.0  ;;  %v5772_v37 = vrot.slane %v11945_v2, %v14260_v18 }
 0x456   :  { %14394 = vst [vmem:[#allocation105_spill] sm:$0xff] %v12276_v39  ;;  %v5776_v58 = vrot.slane %v11945_v2, %v10492_v0  ;;  %v6768_v1 = vmul.f32 %v11987_v17, %v53_v30  ;;  %v12289_v31 = vmul.f32 %v14395_v32, %v5740_v49  ;;  %v12292_v26 = vmul.f32 %v14396_v15, %v5744_v23  ;;  %v14400_v49 = vld [vmem:[#allocation57_spill] sm:$0xff]  ;;  %v14402_v32 = vld [vmem:[#allocation59_spill] sm:$0xff] }
 0x457   :  { %v6921_v47 = vrot.slane %v6920_v33, 4  ;;  %v6935_v29 = vrot.slane %v6934_v41, 4  ;;  %v5792_v57 = vrot.slane %v11945_v2, %v10534_v44  ;;  %v12300_v14 = vmul.f32 %v14399_v12, %v5756_v52 }
 0x458   :  { %6569 = vperm.xlu1 %8604, %v6079_v20   ;;  %v14397_v20 = vld [vmem:[#allocation73_spill] sm:$0xff]  ;;  %v6887_v62 = vadd.f32 %v6886_v60, %v6885_v34  ;;  %v6949_v61 = vrot.slane %v6948_v19, 4  ;;  %v5796_v17 = vrot.slane %v11945_v2, %v14265_v16  ;;  %v12305_v23 = vmul.f32 %v14400_v49, %v5764_v22 }
 0x459   :  { %v12295_v39 = vmul.f32 %v14397_v20, %v5752_v25  ;;  %v6908_v30 = vadd.f32 %v6907_v11, %v6906_v53  ;;  %v12307_v25 = vpop.permute.xlu0 %6494  ;;  %v12310_v15 = vmul.f32 %v14402_v32, %v5772_v37  ;;  %v14403_v20 = vld [vmem:[#allocation79_spill] sm:$0xff]  ;;  %v5788_v12 = vrot.slane %v11945_v2, %v14263_v56  ;;  %v57_v2 = vld [vmem:[%s13677_s3 + $0x78] sm:$0xff] }
 0x45a   :  { %14401 = vst [vmem:[#allocation109_spill] sm:$0xff] %v12305_v23  ;;  %v6962_v34 = vsel %vm1866_vm0, %v6768_v1, 0.0  ;;  %v5800_v53 = vrot.slane %v12032_v5, %v9029_v10  ;;  %v5812_v52 = vrot.slane %v12032_v5, %v14261_v55  ;;  %v5816_v60 = vrot.slane %v12032_v5, %v10517_v36  ;;  %v14404_v37 = vld [vmem:[#allocation83_spill] sm:$0xff]  ;;  %v14406_v23 = vld [vmem:[#allocation82_spill] sm:$0xff] }
 0x45b   :  { %14398 = vst [vmem:[#allocation107_spill] sm:$0xff] %v12295_v39  ;;  %v12313_v39 = vmul.f32 %v14403_v20, %v5776_v58  ;;  %v6922_v22 = vadd.f32 %v6921_v47, %v6920_v33  ;;  %v6936_v11 = vadd.f32 %v6935_v29, %v6934_v41  ;;  %v12331_v58 = vmul.f32 %v14404_v37, %v5792_v57  ;;  %v59_v20 = vld [vmem:[%s13677_s3 + $0x88] sm:$0xff]  ;;  %v14405_v33 = vld [vmem:[#allocation84_spill] sm:$0xff] }
 0x45c   :  { %6539 = vperm.xlu1 %8604, %v6073_v28   ;;  %v55_v28 = vld [vmem:[%s13677_s3 + $0x68] sm:$0xff]  ;;  %v5820_v1 = vrot.slane %v12032_v5, %v14263_v56  ;;  %v6888_v49 = vrot.slane %v6887_v62, 2  ;;  %v6950_v32 = vadd.f32 %v6949_v61, %v6948_v19  ;;  %v12340_v29 = vmul.f32 %v14405_v33, %v5796_v17  ;;  %v61_v19 = vld [vmem:[%s13677_s3 + $0x98] sm:$0xff]  ;;  %v14408_v17 = vld [vmem:[#allocation134_spill] sm:$0xff] }
 0x45d   :  { %v5824_v41 = vrot.slane %v12032_v5, %v10534_v44  ;;  %v6909_v47 = vrot.slane %v6908_v30, 2  ;;  %v6963_v57 = vrot.slane %v6962_v34, 4  ;;  %v6770_v37 = vmul.f32 %v11996_v63, %v55_v28  ;;  %v12371_v28 = vpop.permute.xlu0 %6499 }
 0x45e   :  { %v12346_v10 = vmul.f32 %v14406_v23, %v5788_v12  ;;  %v6772_v61 = vmul.f32 %v12004_v42, %v57_v2  ;;  %v12356_v33 = vmul.f32 %v14408_v17, %v5812_v52  ;;  %v12359_v44 = vmul.f32 %v11432_v46, %v5816_v60  ;;  %v63_v42 = vld [vmem:[%s13677_s3 + $0xa8] sm:$0xff]  ;;  %v65_v12 = vld [vmem:[%s13677_s3 + $0xb8] sm:$0xff] }
 0x45f   :  { %v6923_v56 = vrot.slane %v6922_v22, 2  ;;  %v6937_v63 = vrot.slane %v6936_v11, 2  ;;  %v6774_v23 = vmul.f32 %v12015_v50, %v59_v20  ;;  %v14411_v46 = vld [vmem:[#allocation135_spill] sm:$0xff]  ;;  %v6889_v52 = vadd.f32 %v6888_v49, %v6887_v62  ;;  %v69_v50 = vld [vmem:[%s13677_s3 + $0xd8] sm:$0xff] }
 0x460   :  { %6284 = vperm.xlu1 %8604, %v12109_v9   ;;  %14407 = vst [vmem:[#allocation111_spill] sm:$0xff] %v12346_v10  ;;  %v12353_v9 = vmul.f32 %v11389_v6, %v5800_v53  ;;  %14409 = vst [vmem:[#allocation113_spill] sm:$0xff] %v12356_v33  ;;  %v67_v6 = vld [vmem:[%s13677_s3 + $0xc8] sm:$0xff]  ;;  %v12374_v53 = vmul.f32 %v14411_v46, %v5820_v1  ;;  %v6951_v60 = vrot.slane %v6950_v32, 2  ;;  %v6976_v33 = vsel %vm1866_vm0, %v6770_v37, 0.0 }
 0x461   :  { %14410 = vst [vmem:[#allocation115_spill] sm:$0xff] %v12359_v44  ;;  %v12381_v2 = vmul.f32 %v11451_v51, %v5824_v41  ;;  %v5828_v20 = vrot.slane %v12032_v5, %v14265_v16  ;;  %v6910_v17 = vadd.f32 %v6909_v47, %v6908_v30  ;;  %v6964_v44 = vadd.f32 %v6963_v57, %v6962_v34  ;;  %v14414_v57 = vld [vmem:[#allocation136_spill] sm:$0xff] }
 0x462   :  { %14412 = vst [vmem:[#allocation117_spill] sm:$0xff] %v12374_v53  ;;  %v6776_v1 = vmul.f32 %v12023_v35, %v61_v19  ;;  %v6990_v62 = vsel %vm1866_vm0, %v6772_v61, 0.0  ;;  %v6778_v49 = vmul.f32 %v12034_v27, %v63_v42  ;;  %v6780_v46 = vmul.f32 %v12048_v43, %v65_v12 }
 0x463   :  { %14413 = vst [vmem:[#allocation37_spill] sm:$0xff] %v12381_v2  ;;  %v6924_v53 = vadd.f32 %v6923_v56, %v6922_v22  ;;  %v6938_v51 = vadd.f32 %v6937_v63, %v6936_v11  ;;  %v7004_v41 = vsel %vm1866_vm0, %v6774_v23, 0.0  ;;  %v6784_v5 = vmul.f32 %v12066_v54, %v69_v50  ;;  %v71_v50 = vld [vmem:[%s13677_s3 + $0xe8] sm:$0xff] }
 0x464   :  { %6579 = vperm.xlu1 %8604, %v12268_v4   ;;  %v6782_v4 = vmul.f32 %v12058_v45, %v67_v6  ;;  %v6890_v30 = vrot.slane %v6889_v52, 1  ;;  %v6952_v34 = vadd.f32 %v6951_v60, %v6950_v32  ;;  %v6977_v47 = vrot.slane %v6976_v33, 4  ;;  %v12398_v45 = vpop.permute.xlu0 %6524 }
 0x465   :  { %v12395_v37 = vmul.f32 %v14414_v57, %v5828_v20  ;;  %v6965_v27 = vrot.slane %v6964_v44, 2  ;;  %v6991_v61 = vrot.slane %v6990_v62, 4  ;;  %v7018_v43 = vsel %vm1866_vm0, %v6776_v1, 0.0 }
 0x466   :  { %v7005_v56 = vrot.slane %v7004_v41, 4  ;;  %v7032_v22 = vsel %vm1866_vm0, %v6778_v49, 0.0  ;;  %v7046_v54 = vsel %vm1866_vm0, %v6780_v46, 0.0  ;;  %v7060_v11 = vsel %vm1866_vm0, %v6782_v4, 0.0 }
 0x467   :  { %14415 = vst [vmem:[#allocation39_spill] sm:$0xff] %v12395_v37  ;;  %v6911_v32 = vrot.slane %v6910_v17, 1  ;;  %v6925_v19 = vrot.slane %v6924_v53, 1  ;;  %v6939_v63 = vrot.slane %v6938_v51, 1  ;;  %v7074_v23 = vsel %vm1866_vm0, %v6784_v5, 0.0 }
 0x468   :  { %6604 = vperm.xlu1 %8604, %v12289_v31   ;;  %v5316_v35 = vpop.xlane.xlu1 %5315  ;;  %v43_v31 = vld [vmem:[%s13677_s3 + $0x8] sm:$0xff]  ;;  %v12407_v42 = vadd.f32 %v6890_v30, %v6889_v52  ;;  %v6953_v12 = vrot.slane %v6952_v34, 1  ;;  %v6978_v6 = vadd.f32 %v6977_v47, %v6976_v33  ;;  %v7019_v60 = vrot.slane %v7018_v43, 4  ;;  %v44_v33 = vld [vmem:[%s13677_s3 + $0x10] sm:$0xff] }
 0x469   :  { %8907 = vrcp.f32 %v5316_v35  ;;  %v7033_v1 = vrot.slane %v7032_v22, 4  ;;  %v7047_v49 = vrot.slane %v7046_v54, 4  ;;  %v7061_v46 = vrot.slane %v7060_v11, 4 }
 0x46a   :  { %v6966_v35 = vadd.f32 %v6965_v27, %v6964_v44  ;;  %v6992_v57 = vadd.f32 %v6991_v61, %v6990_v62  ;;  %v7006_v37 = vadd.f32 %v7005_v56, %v7004_v41  ;;  %v7075_v5 = vrot.slane %v7074_v23, 4  ;;  %v73_v41 = vld [vmem:[%s13677_s3 + $0xf8] sm:$0xff] }
 0x46b   :  { %v12416_v52 = vadd.f32 %v6911_v32, %v6910_v17  ;;  %v12418_v30 = vadd.f32 %v6925_v19, %v6924_v53  ;;  %v6786_v47 = vmul.f32 %v12074_v59, %v71_v50  ;;  %v12423_v2 = vadd.f32 %v6939_v63, %v6938_v51 }
 0x46c   :  { %6319 = vperm.xlu1 %8604, %v12163_v3   ;;  %v6125_v20 = vpop.permute.xlu1 %6124  ;;  %v12421_v3 = vpop.permute.xlu0 %6504  ;;  %v12425_v16 = vadd.f32 %v6953_v12, %v6952_v34  ;;  %v6979_v44 = vrot.slane %v6978_v6, 2  ;;  %v7020_v62 = vadd.f32 %v7019_v60, %v7018_v43  ;;  %v7034_v17 = vadd.f32 %v7033_v1, %v7032_v22  ;;  %v46_v43 = vld [vmem:[%s13677_s3 + $0x20] sm:$0xff] }
 0x46d   :  { %v6758_v4 = vmul.f32 %v6125_v20, %v43_v31  ;;  %v7048_v61 = vadd.f32 %v7047_v49, %v7046_v54  ;;  %v7062_v59 = vadd.f32 %v7061_v46, %v7060_v11  ;;  %v6967_v31 = vrot.slane %v6966_v35, 1 }
 0x46e   :  { %v6993_v51 = vrot.slane %v6992_v57, 2  ;;  %v7007_v32 = vrot.slane %v7006_v37, 2  ;;  %v7076_v34 = vadd.f32 %v7075_v5, %v7074_v23  ;;  %v7088_v63 = vsel %vm1866_vm0, %v6786_v47, 0.0 }
 0x46f   :  { %v6892_v27 = vsel %vm1866_vm0, %v6758_v4, 0.0  ;;  %v6788_v12 = vmul.f32 %v12086_v13, %v73_v41  ;;  %v6980_v54 = vadd.f32 %v6979_v44, %v6978_v6  ;;  %v7021_v11 = vrot.slane %v7020_v62, 2  ;;  %v48_v6 = vld [vmem:[%s13677_s3 + $0x30] sm:$0xff] }
 0x470   :  { %6549 = vperm.xlu1 %8604, %v12253_v48   ;;  %v6130_v53 = vpop.permute.xlu1 %6129  ;;  %v6893_v48 = vrot.slane %v6892_v27, 4  ;;  %v7035_v20 = vrot.slane %v7034_v17, 2  ;;  %v7049_v1 = vrot.slane %v7048_v61, 2  ;;  %v7063_v49 = vrot.slane %v7062_v59, 2  ;;  %v12443_v46 = vpop.permute.xlu0 %6559 }
 0x471   :  { %v6759_v56 = vmul.f32 %v6130_v53, %v44_v33  ;;  %v6994_v5 = vadd.f32 %v6993_v51, %v6992_v57  ;;  %v7008_v13 = vadd.f32 %v7007_v32, %v7006_v37  ;;  %v7089_v33 = vrot.slane %v7088_v63, 4  ;;  %v106_v32 = vld [vmem:[%s13677_s3 + $0x200] sm:$0xff] }
 0x472   :  { %v7102_v44 = vsel %vm1866_vm0, %v6788_v12, 0.0  ;;  %v6894_v41 = vadd.f32 %v6893_v48, %v6892_v27  ;;  %v12451_v53 = vadd.f32 %v6967_v31, %v6966_v35  ;;  %v7050_v57 = vadd.f32 %v7049_v1, %v7048_v61 }
 0x473   :  { %v12435_v19 = vpop.eup %8907  ;;  %v6899_v22 = vsel %vm1866_vm0, %v6759_v56, 0.0  ;;  %v7022_v56 = vadd.f32 %v7021_v11, %v7020_v62  ;;  %v7064_v51 = vadd.f32 %v7063_v49, %v7062_v59  ;;  %v6981_v27 = vrot.slane %v6980_v54, 1 }
 0x474   :  { %v6900_v60 = vrot.slane %v6899_v22, 4  ;;  %6609 = vperm.xlu1 %8604, %v12292_v26   ;;  %v6140_v50 = vpop.permute.xlu1 %6139  ;;  %v5836_v23 = vrot.slane %v12435_v19, %v14260_v18  ;;  %v7077_v26 = vrot.slane %v7076_v34, 2  ;;  %v6995_v48 = vrot.slane %v6994_v5, 1 }
 0x475   :  { %v6761_v4 = vmul.f32 %v6140_v50, %v46_v43  ;;  %v7090_v50 = vadd.f32 %v7089_v33, %v7088_v63  ;;  %v7103_v35 = vrot.slane %v7102_v44, 4  ;;  %v7009_v31 = vrot.slane %v7008_v13, 1  ;;  %v50_v63 = vld [vmem:[%s13677_s3 + $0x40] sm:$0xff] }
 0x476   :  { %v6110_v47 = vmul.f32 %v11750_v7, %v5836_v23  ;;  %v6901_v10 = vadd.f32 %v6900_v60, %v6899_v22  ;;  %v7036_v7 = vadd.f32 %v7035_v20, %v7034_v17  ;;  %v7078_v62 = vadd.f32 %v7077_v26, %v7076_v34  ;;  %v12457_v22 = vpop.permute.xlu0 %6474 }
 0x477   :  { %v6913_v18 = vsel %vm1866_vm0, %v6761_v4, 0.0  ;;  %v6895_v11 = vrot.slane %v6894_v41, 2  ;;  %v6821_v17 = vmul.f32 %v12097_v8, %v106_v32  ;;  %v7023_v34 = vrot.slane %v7022_v56, 1 }
 0x478   :  { %v6914_v43 = vrot.slane %v6913_v18, 4  ;;  %6644 = vperm.xlu1 %8604, %v12310_v15   ;;  %6724 = vperm.xlu0 %8603, %v6110_v47   ;;  %v6150_v37 = vpop.permute.xlu1 %6149  ;;  %v6902_v61 = vrot.slane %v6901_v10, 2  ;;  %v7037_v20 = vrot.slane %v7036_v7, 1  ;;  %v7051_v1 = vrot.slane %v7050_v57, 1 }
 0x479   :  { %v6763_v12 = vmul.f32 %v6150_v37, %v48_v6  ;;  %v7065_v49 = vrot.slane %v7064_v51, 1  ;;  %v12466_v4 = vadd.f32 %v6981_v27, %v6980_v54  ;;  %v7091_v33 = vrot.slane %v7090_v50, 2  ;;  %v52_v54 = vld [vmem:[%s13677_s3 + $0x50] sm:$0xff] }
 0x47a   :  { %v6915_v59 = vadd.f32 %v6914_v43, %v6913_v18  ;;  %v7104_v8 = vadd.f32 %v7103_v35, %v7102_v44  ;;  %v12468_v6 = vadd.f32 %v6995_v48, %v6994_v5  ;;  %v12470_v26 = vadd.f32 %v7009_v31, %v7008_v13  ;;  %v115_v48 = vld [vmem:[%s13677_s3 + $0x248] sm:$0xff] }
 0x47b   :  { %v6927_v15 = vsel %vm1866_vm0, %v6763_v12, 0.0  ;;  %v7079_v18 = vrot.slane %v7078_v62, 1  ;;  %v7333_v43 = vsel %vm1866_vm0, %v6821_v17, 0.0  ;;  %v6903_v37 = vadd.f32 %v6902_v61, %v6901_v10  ;;  %v108_v10 = vld [vmem:[%s13677_s3 + $0x210] sm:$0xff] }
 0x47c   :  { %v6928_v60 = vrot.slane %v6927_v15, 4  ;;  %6329 = vperm.xlu1 %8604, %v12187_v21   ;;  %6349 = vperm.xlu0 %8603, %v12190_v24   ;;  %v6160_v23 = vpop.permute.xlu1 %6159  ;;  %v6896_v21 = vadd.f32 %v6895_v11, %v6894_v41  ;;  %v6916_v32 = vrot.slane %v6915_v59, 2  ;;  %v12478_v5 = vadd.f32 %v7023_v34, %v7022_v56  ;;  %v116_v56 = vld [vmem:[%s13677_s3 + $0x250] sm:$0xff]  ;;  %v14417_v34 = vld [vmem:[#allocation106_spill] sm:$0xff] }
 0x47d   :  { %v6765_v24 = vmul.f32 %v6160_v23, %v50_v63  ;;  %v12480_v13 = vadd.f32 %v7037_v20, %v7036_v7  ;;  %v12482_v41 = vadd.f32 %v7051_v1, %v7050_v57  ;;  %v12484_v12 = vadd.f32 %v7065_v49, %v7064_v51  ;;  %v54_v57 = vld [vmem:[%s13677_s3 + $0x60] sm:$0xff]  ;;  %v14416_v17 = vld [vmem:[#allocation4_spill] sm:$0xff]  ;;  %v14418_v1 = vld [vmem:[#allocation103_spill] sm:$0xff] }
 0x47e   :  { %v6929_v47 = vadd.f32 %v6928_v60, %v6927_v15  ;;  %v7105_v27 = vrot.slane %v7104_v8, 2  ;;  %v5840_v51 = vrot.slane %v12435_v19, %v10492_v0  ;;  %v7334_v35 = vrot.slane %v7333_v43, 4 }
 0x47f   :  { %v6897_v31 = vrot.slane %v6896_v21, 1  ;;  %v12503_v15 = vadd.f32 %v7079_v18, %v7078_v62  ;;  %v6823_v61 = vmul.f32 %v14416_v17, %v108_v10  ;;  %v6904_v60 = vrot.slane %v6903_v37, 1  ;;  %v117_v62 = vld [vmem:[%s13677_s3 + $0x258] sm:$0xff]  ;;  %v118_v10 = vld [vmem:[%s13677_s3 + $0x260] sm:$0xff] }
 0x480   :  { %6589 = vperm.xlu1 %8604, %v12271_v40   ;;  %6409 = vperm.xlu0 %8603, %v12200_v38   ;;  %v6170_v44 = vpop.permute.xlu1 %6169  ;;  %v12489_v40 = vpop.permute.xlu0 %6534  ;;  %v7092_v38 = vadd.f32 %v7091_v33, %v7090_v50  ;;  %v6930_v7 = vrot.slane %v6929_v47, 2  ;;  %v6941_v50 = vsel %vm1866_vm0, %v6765_v24, 0.0  ;;  %v6917_v63 = vadd.f32 %v6916_v32, %v6915_v59  ;;  %v14419_v59 = vld [vmem:[#allocation87_spill] sm:$0xff]  ;;  %v14420_v17 = vld [vmem:[#allocation5_spill] sm:$0xff] }
 0x481   :  { %v6767_v11 = vmul.f32 %v6170_v44, %v52_v54  ;;  %v6830_v20 = vmul.f32 %v14417_v34, %v115_v48  ;;  %v6831_v0 = vmul.f32 %v14418_v1, %v116_v56  ;;  %v6942_v54 = vrot.slane %v6941_v50, 4 }
 0x482   :  { %v7093_v24 = vrot.slane %v7092_v38, 1  ;;  %v6931_v18 = vadd.f32 %v6930_v7, %v6929_v47  ;;  %v6111_v32 = vmul.f32 %v14419_v59, %v5840_v51  ;;  %v7335_v44 = vadd.f32 %v7334_v35, %v7333_v43 }
 0x483   :  { %v6955_v49 = vsel %vm1866_vm0, %v6767_v11, 0.0  ;;  %v6898_v56 = vadd.f32 %v6897_v31, %v6896_v21  ;;  %v7347_v11 = vsel %vm1866_vm0, %v6823_v61, 0.0  ;;  %v6905_v47 = vadd.f32 %v6904_v60, %v6903_v37 }
 0x484   :  { %6649 = vperm.xlu1 %8604, %v12313_v39   ;;  %6669 = vperm.xlu0 %8603, %v12331_v58   ;;  %v6180_v23 = vpop.permute.xlu1 %6179  ;;  %v56_v39 = vld [vmem:[%s13677_s3 + $0x70] sm:$0xff]  ;;  %v7106_v58 = vadd.f32 %v7105_v27, %v7104_v8  ;;  %v12521_v48 = vpop.permute.xlu0 %6514  ;;  %v6918_v7 = vrot.slane %v6917_v63, 1  ;;  %v7396_v8 = vsel %vm1866_vm0, %v6830_v20, 0.0  ;;  %v7403_v43 = vsel %vm1866_vm0, %v6831_v0, 0.0 }
 0x485   :  { %v6769_v33 = vmul.f32 %v6180_v23, %v54_v57  ;;  %v6956_v57 = vrot.slane %v6955_v49, 4  ;;  %v6832_v27 = vmul.f32 %v12307_v25, %v117_v62  ;;  %v6833_v21 = vmul.f32 %v12371_v28, %v118_v10  ;;  %v14422_v25 = vld [vmem:[#allocation131_spill] sm:$0xff] }
 0x486   :  { %v6932_v31 = vrot.slane %v6931_v18, 1  ;;  %v6943_v34 = vadd.f32 %v6942_v54, %v6941_v50  ;;  %v7336_v37 = vrot.slane %v7335_v44, 2  ;;  %v7348_v60 = vrot.slane %v7347_v11, 4 }
 0x487   :  { %v6969_v51 = vsel %vm1866_vm0, %v6769_v33, 0.0  ;;  %v6957_v61 = vadd.f32 %v6956_v57, %v6955_v49  ;;  %v7925_v1 = vsel %vm2893_vm1, %v6898_v56, %v12407_v42  ;;  %v7397_v59 = vrot.slane %v7396_v8, 4 }
 0x488   :  { %6334 = vperm.xlu1 %8604, %v14420_v17   ;;  %6729 = vperm.xlu0 %8603, %v6111_v32   ;;  %v6190_v23 = vpop.permute.xlu1 %6189  ;;  %v6970_v33 = vrot.slane %v6969_v51, 4  ;;  %v7926_v32 = vsel %vm2895_vm2, %v6905_v47, %v7925_v1  ;;  %v6919_v20 = vadd.f32 %v6918_v7, %v6917_v63  ;;  %v14421_v17 = vld [vmem:[#allocation107_spill] sm:$0xff]  ;;  %v12536_v62 = vadd.f32 %v7093_v24, %v7092_v38 }
 0x489   :  { %v6771_v35 = vmul.f32 %v6190_v23, %v56_v39  ;;  %v7107_v50 = vrot.slane %v7106_v58, 1  ;;  %v7404_v49 = vrot.slane %v7403_v43, 4  ;;  %v7410_v54 = vsel %vm1866_vm0, %v6832_v27, 0.0  ;;  %v12539_v39 = vpop.permute.xlu0 %6574  ;;  %v123_v63 = vld [vmem:[%s13677_s3 + $0x288] sm:$0xff] }
 0x48a   :  { %v7417_v42 = vsel %vm1866_vm0, %v6833_v21, 0.0  ;;  %v6933_v10 = vadd.f32 %v6932_v31, %v6931_v18  ;;  %v6944_v56 = vrot.slane %v6943_v34, 2  ;;  %v6958_v57 = vrot.slane %v6957_v61, 2  ;;  %v14423_v21 = vld [vmem:[#allocation130_spill] sm:$0xff] }
 0x48b   :  { %v6983_v0 = vsel %vm1866_vm0, %v6771_v35, 0.0  ;;  %v12545_v47 = vadd.f32 %v7336_v37, %v7335_v44  ;;  %v6971_v7 = vadd.f32 %v6970_v33, %v6969_v51  ;;  %v7927_v24 = vsel %vm2897_vm3, %v12416_v52, %v7926_v32  ;;  %v7781_v51 = vld [vmem:[%s13678_s2] sm:$0xff] }
 0x48c   :  { %6619 = vperm.xlu1 %8604, %v14421_v17   ;;  %6379 = vperm.xlu0 %8603, %v14422_v25   ;;  %v6200_v28 = vpop.permute.xlu1 %6199  ;;  %v6984_v38 = vrot.slane %v6983_v0, 4  ;;  %v7349_v23 = vadd.f32 %v7348_v60, %v7347_v11  ;;  %v7398_v27 = vadd.f32 %v7397_v59, %v7396_v8  ;;  %v7411_v35 = vrot.slane %v7410_v54, 4 }
 0x48d   :  { %v7928_v1 = vsel %vm2899_vm4, %v6919_v20, %v7927_v24  ;;  %v7405_v18 = vadd.f32 %v7404_v49, %v7403_v43  ;;  %v7418_v31 = vrot.slane %v7417_v42, 4  ;;  %v6838_v44 = vmul.f32 %v12398_v45, %v123_v63  ;;  %v119_v45 = vld [vmem:[%s13677_s3 + $0x268] sm:$0xff]  ;;  %v12568_v33 = vpop.permute.xlu0 %6544 }
 0x48e   :  { %v7929_v52 = vsel %vm2901_vm5, %v12418_v30, %v7928_v1  ;;  %v12558_v11 = vadd.f32 %v7107_v50, %v7106_v58  ;;  %v6945_v8 = vadd.f32 %v6944_v56, %v6943_v34  ;;  %v6959_v37 = vadd.f32 %v6958_v57, %v6957_v61  ;;  %v60_v34 = vld [vmem:[%s13677_s3 + $0x90] sm:$0xff]  ;;  %v14424_v50 = vld [vmem:[#allocation81_spill] sm:$0xff] }
 0x48f   :  { %v7930_v60 = vsel %vm2903_vm6, %v6933_v10, %v7929_v52  ;;  %v7338_v43 = vrot.slane %v12545_v47, 1  ;;  %v6972_v59 = vrot.slane %v6971_v7, 2  ;;  %v6985_v30 = vadd.f32 %v6984_v38, %v6983_v0 }
 0x490   :  { %6304 = vperm.xlu1 %8604, %v14423_v21   ;;  %6674 = vperm.xlu0 %8603, %v12340_v29   ;;  %v6210_v17 = vpop.permute.xlu1 %6209  ;;  %v58_v29 = vld [vmem:[%s13677_s3 + $0x80] sm:$0xff]  ;;  %v7931_v58 = vsel %vm2905_vm7, %v12423_v2, %v7930_v60  ;;  %v7350_v61 = vrot.slane %v7349_v23, 2  ;;  %v7399_v32 = vrot.slane %v7398_v27, 2  ;;  %v7412_v20 = vadd.f32 %v7411_v35, %v7410_v54 }
 0x491   :  { %v8053_v25 = vadd.f32 %v7931_v58, %v7781_v51  ;;  %v7406_v63 = vrot.slane %v7405_v18, 2  ;;  %v7419_v10 = vadd.f32 %v7418_v31, %v7417_v42  ;;  %v7452_v56 = vsel %vm1866_vm0, %v6838_v44, 0.0  ;;  %v62_v54 = vld [vmem:[%s13677_s3 + $0xa0] sm:$0xff]  ;;  %v12587_v60 = vpop.permute.xlu0 %6599 }
 0x492   :  { %v6773_v57 = vmul.f32 %v6200_v28, %v58_v29  ;;  %v6834_v0 = vmul.f32 %v12421_v3, %v119_v45  ;;  %v6946_v38 = vrot.slane %v6945_v8, 1  ;;  %v6960_v2 = vrot.slane %v6959_v37, 1  ;;  %v14425_v29 = vld [vmem:[#allocation80_spill] sm:$0xff] }
 0x493   :  { %8571 = vmatprep.mubr.msk.f32.mxu0 %vm1866_vm0, %v8053_v25  ;;  %v6775_v24 = vmul.f32 %v6210_v17, %v60_v34  ;;  %v6973_v35 = vadd.f32 %v6972_v59, %v6971_v7  ;;  %v6986_v1 = vrot.slane %v6985_v30, 2  ;;  %v5844_v42 = vrot.slane %v12435_v19, %v14261_v55  ;;  %v64_v59 = vld [vmem:[%s13677_s3 + $0xb0] sm:$0xff] }
 0x494   :  { %6359 = vperm.xlu1 %8604, %v14424_v50   ;;  %v6220_v49 = vpop.permute.xlu1 %6219  ;;  %v6997_v21 = vsel %vm1866_vm0, %v6773_v57, 0.0  ;;  %v7351_v31 = vadd.f32 %v7350_v61, %v7349_v23  ;;  %v7413_v28 = vrot.slane %v7412_v20, 2  ;;  %v7453_v44 = vrot.slane %v7452_v56, 4 }
 0x495   :  { %v7011_v3 = vsel %vm1866_vm0, %v6775_v24, 0.0  ;;  %v7400_v17 = vadd.f32 %v7399_v32, %v7398_v27  ;;  %v7420_v52 = vrot.slane %v7419_v10, 2  ;;  %v6112_v7 = vmul.f32 %v14425_v29, %v5844_v42 }
 0x496   :  { %v6777_v45 = vmul.f32 %v6220_v49, %v62_v54  ;;  %v7424_v55 = vsel %vm1866_vm0, %v6834_v0, 0.0  ;;  %v6947_v23 = vadd.f32 %v6946_v38, %v6945_v8  ;;  %v6998_v58 = vrot.slane %v6997_v21, 4 }
 0x497   :  { %v7012_v34 = vrot.slane %v7011_v3, 4  ;;  %v7407_v61 = vadd.f32 %v7406_v63, %v7405_v18  ;;  %v6961_v25 = vadd.f32 %v6960_v2, %v6959_v37  ;;  %v6987_v50 = vadd.f32 %v6986_v1, %v6985_v30  ;;  %6734 = vperm.xlu0 %8603, %v6112_v7   ;;  %v130_v37 = vld [vmem:[%s13677_s3 + $0x2c0] sm:$0xff]  ;;  %v113_v7 = vld [vmem:[%s13677_s3 + $0x238] sm:$0xff] }
 0x498   :  { %6624 = vperm.xlu1 %8604, %v12300_v14   ;;  %v6230_v51 = vpop.permute.xlu1 %6229  ;;  %v6974_v14 = vrot.slane %v6973_v35, 1  ;;  %v7414_v27 = vadd.f32 %v7413_v28, %v7412_v20  ;;  %v7454_v32 = vadd.f32 %v7453_v44, %v7452_v56  ;;  %v7025_v57 = vsel %vm1866_vm0, %v6777_v45, 0.0  ;;  %v12606_v56 = vpop.permute.xlu0 %6289  ;;  %v14426_v1 = vld [vmem:[#allocation102_spill] sm:$0xff]  ;;  %v125_v45 = vld [vmem:[%s13677_s3 + $0x298] sm:$0xff] }
 0x499   :  { %v6779_v24 = vmul.f32 %v6230_v51, %v64_v59  ;;  %v12599_v54 = vadd.f32 %v7338_v43, %v12545_v47  ;;  %v7352_v8 = vrot.slane %v7351_v31, 1  ;;  %v7401_v0 = vrot.slane %v7400_v17, 1  ;;  %v14427_v51 = vld [vmem:[#allocation129_spill] sm:$0xff] }
 0x49a   :  { %v7425_v38 = vrot.slane %v7424_v55, 4  ;;  %v7421_v18 = vadd.f32 %v7420_v52, %v7419_v10  ;;  %v7932_v30 = vsel %vm2893_vm1, %v12425_v16, %v6947_v23  ;;  %v6999_v20 = vadd.f32 %v6998_v58, %v6997_v21 }
 0x49b   :  { %v7013_v63 = vadd.f32 %v7012_v34, %v7011_v3  ;;  %v6975_v2 = vadd.f32 %v6974_v14, %v6973_v35  ;;  %v6988_v47 = vrot.slane %v6987_v50, 1  ;;  %v7026_v43 = vrot.slane %v7025_v57, 4  ;;  %6419 = vperm.xlu0 %8603, %v14426_v1  }
 0x49c   :  { %6679 = vperm.xlu1 %8604, %v12353_v9   ;;  %v12596_v49 = vpop.permute.xlu1 %6239  ;;  %v7933_v9 = vsel %vm2895_vm2, %v6961_v25, %v7932_v30  ;;  %v7408_v42 = vrot.slane %v7407_v61, 1  ;;  %v7415_v10 = vrot.slane %v7414_v27, 1  ;;  %v7455_v28 = vrot.slane %v7454_v32, 2  ;;  %v14429_v30 = vld [vmem:[#allocation89_spill] sm:$0xff] }
 0x49d   :  { %v7039_v44 = vsel %vm1866_vm0, %v6779_v24, 0.0  ;;  %v12612_v16 = vadd.f32 %v7352_v8, %v7351_v31  ;;  %v12614_v21 = vadd.f32 %v7401_v0, %v7400_v17  ;;  %v7426_v3 = vadd.f32 %v7425_v38, %v7424_v55  ;;  %v14428_v8 = vld [vmem:[#allocation2_spill] sm:$0xff] }
 0x49e   :  { %v6845_v29 = vmul.f32 %v12443_v46, %v130_v37  ;;  %v7422_v35 = vrot.slane %v7421_v18, 1  ;;  %v7934_v59 = vsel %vm2897_vm3, %v12451_v53, %v7933_v9  ;;  %v7000_v23 = vrot.slane %v6999_v20, 2  ;;  %v7782_v9 = vld [vmem:[%s13678_s2 + $0x8] sm:$0xff] }
 0x49f   :  { %v7014_v31 = vrot.slane %v7013_v63, 2  ;;  %v7935_v17 = vsel %vm2899_vm4, %v6975_v2, %v7934_v59  ;;  %v6989_v58 = vadd.f32 %v6988_v47, %v6987_v50  ;;  %v7027_v55 = vadd.f32 %v7026_v43, %v7025_v57  ;;  %v12638_v57 = vpop.permute.xlu0 %6324 }
 0x4a0   :  { %6309 = vperm.xlu1 %8604, %v14427_v51   ;;  %v6250_v52 = vpop.permute.xlu1 %6249  ;;  %v7040_v34 = vrot.slane %v7039_v44, 4  ;;  %v12626_v46 = vadd.f32 %v7408_v42, %v7407_v61  ;;  %v12628_v25 = vadd.f32 %v7415_v10, %v7414_v27  ;;  %v12630_v14 = vadd.f32 %v7455_v28, %v7454_v32  ;;  %v66_v61 = vld [vmem:[%s13677_s3 + $0xc0] sm:$0xff] }
 0x4a1   :  { %v5848_v24 = vrot.slane %v12435_v19, %v10517_v36  ;;  %v7427_v53 = vrot.slane %v7426_v3, 2  ;;  %v7501_v38 = vsel %vm1866_vm0, %v6845_v29, 0.0  ;;  %v6828_v37 = vmul.f32 %v12457_v22, %v113_v7  ;;  %v70_v29 = vld [vmem:[%s13677_s3 + $0xe0] sm:$0xff]  ;;  %v121_v7 = vld [vmem:[%s13677_s3 + $0x278] sm:$0xff] }
 0x4a2   :  { %v6840_v50 = vmul.f32 %v12489_v40, %v125_v45  ;;  %v7001_v27 = vadd.f32 %v7000_v23, %v6999_v20  ;;  %v7015_v32 = vadd.f32 %v7014_v31, %v7013_v63  ;;  %v7936_v2 = vsel %vm2901_vm5, %v12466_v4, %v7935_v17  ;;  %v68_v20 = vld [vmem:[%s13677_s3 + $0xd0] sm:$0xff] }
 0x4a3   :  { %v6113_v36 = vmul.f32 %v14429_v30, %v5848_v24  ;;  %v12649_v22 = vadd.f32 %v7422_v35, %v7421_v18  ;;  %v7028_v40 = vrot.slane %v7027_v55, 2  ;;  %v7041_v47 = vadd.f32 %v7040_v34, %v7039_v44  ;;  %v14430_v35 = vld [vmem:[#allocation95_spill] sm:$0xff]  ;;  %v12669_v59 = vpop.permute.xlu0 %6584  ;;  %v72_v24 = vld [vmem:[%s13677_s3 + $0xf0] sm:$0xff] }
 0x4a4   :  { %6369 = vperm.xlu1 %8604, %v14428_v8   ;;  %v6260_v0 = vpop.permute.xlu1 %6259  ;;  %v7937_v43 = vsel %vm2903_vm6, %v6989_v58, %v7936_v2  ;;  %v7457_v63 = vrot.slane %v12630_v14, 1  ;;  %v7502_v1 = vrot.slane %v7501_v38, 4  ;;  %v6781_v10 = vmul.f32 %v12596_v49, %v66_v61  ;;  %v14431_v58 = vld [vmem:[#allocation93_spill] sm:$0xff]  ;;  %v14433_v2 = vld [vmem:[#allocation111_spill] sm:$0xff] }
 0x4a5   :  { %6739 = vperm.xlu0 %8603, %v6113_v36   ;;  %v7938_v42 = vsel %vm2905_vm7, %v12468_v6, %v7937_v43  ;;  %v7428_v18 = vadd.f32 %v7427_v53, %v7426_v3  ;;  %v7382_v28 = vsel %vm1866_vm0, %v6828_v37, 0.0  ;;  %v7466_v44 = vsel %vm1866_vm0, %v6840_v50, 0.0  ;;  %v14432_v37 = vld [vmem:[#allocation110_spill] sm:$0xff]  ;;  %v14434_v43 = vld [vmem:[#allocation133_spill] sm:$0xff] }
 0x4a6   :  { %v8054_v51 = vadd.f32 %v7938_v42, %v7782_v9  ;;  %v7002_v6 = vrot.slane %v7001_v27, 1  ;;  %v7016_v45 = vrot.slane %v7015_v32, 1  ;;  %v7053_v49 = vsel %vm1866_vm0, %v6781_v10, 0.0 }
 0x4a7   :  { %v6783_v3 = vmul.f32 %v6250_v52, %v68_v20  ;;  %v7029_v23 = vadd.f32 %v7028_v40, %v7027_v55  ;;  %v7042_v31 = vrot.slane %v7041_v47, 2  ;;  %v7054_v17 = vrot.slane %v7053_v49, 4  ;;  %v127_v40 = vld [vmem:[%s13677_s3 + $0x2a8] sm:$0xff] }
 0x4a8   :  { %v6270_v4 = vpop.permute.xlu1 %6269  ;;  %6404 = vperm.xlu1 %8604, %v14430_v35   ;;  %8572 = vmatmul.mubr.msk.f32.vlgmr.msra.gmra.mrb[0].mxu0 %vm1866_vm0, %v8054_v51  ;;  %v5852_v34 = vrot.slane %v12435_v19, %v14431_v58  ;;  %v7503_v8 = vadd.f32 %v7502_v1, %v7501_v38  ;;  %v7383_v53 = vrot.slane %v7382_v28, 4  ;;  %v6785_v50 = vmul.f32 %v6260_v0, %v70_v29 }
 0x4a9   :  { %6424 = vperm.xlu0 %8603, %v14432_v37   ;;  %v7067_v52 = vsel %vm1866_vm0, %v6783_v3, 0.0  ;;  %v7467_v55 = vrot.slane %v7466_v44, 4  ;;  %v6836_v30 = vmul.f32 %v12521_v48, %v121_v7  ;;  %v7055_v36 = vadd.f32 %v7054_v17, %v7053_v49 }
 0x4aa   :  { %v7068_v9 = vrot.slane %v7067_v52, 4  ;;  %v7003_v38 = vadd.f32 %v7002_v6, %v7001_v27  ;;  %v6114_v20 = vmul.f32 %v14434_v43, %v5852_v34  ;;  %v7081_v1 = vsel %vm1866_vm0, %v6785_v50, 0.0  ;;  %v138_v6 = vld [vmem:[%s13677_s3 + $0x300] sm:$0xff]  ;;  %v14435_v50 = vld [vmem:[#allocation97_spill] sm:$0xff] }
 0x4ab   :  { %v6787_v42 = vmul.f32 %v6270_v4, %v72_v24  ;;  %v7017_v0 = vadd.f32 %v7016_v45, %v7015_v32  ;;  %v7030_v10 = vrot.slane %v7029_v23, 1  ;;  %v7043_v51 = vadd.f32 %v7042_v31, %v7041_v47  ;;  %v12695_v4 = vpop.permute.xlu0 %6639 }
 0x4ac   :  { %v12679_v61 = vpop.permute.xlu1 %6279  ;;  %6664 = vperm.xlu1 %8604, %v14433_v2   ;;  %v7069_v29 = vadd.f32 %v7068_v9, %v7067_v52  ;;  %v7429_v35 = vrot.slane %v7428_v18, 1  ;;  %v7384_v48 = vadd.f32 %v7383_v53, %v7382_v28  ;;  %v7082_v7 = vrot.slane %v7081_v1, 4 }
 0x4ad   :  { %6744 = vperm.xlu0 %8603, %v6114_v20   ;;  %v7095_v49 = vsel %vm1866_vm0, %v6787_v42, 0.0  ;;  %v7468_v17 = vadd.f32 %v7467_v55, %v7466_v44  ;;  %v6842_v27 = vmul.f32 %v12568_v33, %v127_v40  ;;  %v7056_v32 = vrot.slane %v7055_v36, 2 }
 0x4ae   :  { %v7070_v47 = vrot.slane %v7069_v29, 2  ;;  %v12698_v45 = vadd.f32 %v7457_v63, %v12630_v14  ;;  %v7939_v28 = vsel %vm2893_vm1, %v12470_v26, %v7003_v38  ;;  %v7083_v31 = vadd.f32 %v7082_v7, %v7081_v1  ;;  %v133_v14 = vld [vmem:[%s13677_s3 + $0x2d8] sm:$0xff] }
 0x4af   :  { %v7096_v58 = vrot.slane %v7095_v49, 4  ;;  %v7438_v44 = vsel %vm1866_vm0, %v6836_v30, 0.0  ;;  %v7940_v33 = vsel %vm2895_vm2, %v7017_v0, %v7939_v28  ;;  %v7031_v34 = vadd.f32 %v7030_v10, %v7029_v23  ;;  %v76_v23 = vld [vmem:[%s13677_s3 + $0x110] sm:$0xff]  ;;  %v12718_v20 = vpop.permute.xlu0 %6294 }
 0x4b0   :  { %v12689_v3 = vpop.permute.xlu1 %6444  ;;  %v7044_v24 = vrot.slane %v7043_v51, 1  ;;  %v12704_v53 = vadd.f32 %v7429_v35, %v7428_v18  ;;  %v7504_v37 = vrot.slane %v7503_v8, 2  ;;  %v7385_v52 = vrot.slane %v7384_v48, 2  ;;  %v14436_v0 = vld [vmem:[#allocation96_spill] sm:$0xff] }
 0x4b1   :  { %v6853_v63 = vmul.f32 %v12587_v60, %v138_v6  ;;  %6429 = vperm.xlu0 %8603, %v14435_v50   ;;  %v7469_v55 = vrot.slane %v7468_v17, 2  ;;  %v7480_v30 = vsel %vm1866_vm0, %v6842_v27, 0.0  ;;  %v7057_v18 = vadd.f32 %v7056_v32, %v7055_v36 }
 0x4b2   :  { %v7071_v9 = vadd.f32 %v7070_v47, %v7069_v29  ;;  %v7439_v2 = vrot.slane %v7438_v44, 4  ;;  %v7941_v40 = vsel %vm2897_vm3, %v12478_v5, %v7940_v33  ;;  %v7084_v38 = vrot.slane %v7083_v31, 2 }
 0x4b3   :  { %v7097_v43 = vadd.f32 %v7096_v58, %v7095_v49  ;;  %v6848_v60 = vmul.f32 %v12539_v39, %v133_v14  ;;  %v7942_v1 = vsel %vm2899_vm4, %v7031_v34, %v7941_v40  ;;  %v7045_v42 = vadd.f32 %v7044_v24, %v7043_v51  ;;  %v83_v39 = vld [vmem:[%s13677_s3 + $0x148] sm:$0xff]  ;;  %v7783_v58 = vld [vmem:[%s13678_s2 + $0x10] sm:$0xff] }
 0x4b4   :  { %v6480_v26 = vpop.permute.xlu1 %6479  ;;  %v5856_v10 = vrot.slane %v12435_v19, %v14436_v0  ;;  %v12723_v35 = vadd.f32 %v7504_v37, %v7503_v8  ;;  %v7481_v36 = vrot.slane %v7480_v30, 4  ;;  %v7557_v29 = vsel %vm1866_vm0, %v6853_v63, 0.0  ;;  %v14437_v51 = vld [vmem:[#allocation91_spill] sm:$0xff]  ;;  %v12754_v63 = vpop.permute.xlu0 %6554  ;;  %v14440_v0 = vld [vmem:[#allocation137_spill] sm:$0xff] }
 0x4b5   :  { %v6791_v7 = vmul.f32 %v12606_v56, %v76_v23  ;;  %v12727_v27 = vadd.f32 %v7385_v52, %v7384_v48  ;;  %v7058_v49 = vrot.slane %v7057_v18, 1  ;;  %v7072_v6 = vrot.slane %v7071_v9, 1 }
 0x4b6   :  { %v6115_v32 = vmul.f32 %v14437_v51, %v5856_v10  ;;  %v12733_v47 = vadd.f32 %v7469_v55, %v7468_v17  ;;  %v7085_v8 = vadd.f32 %v7084_v38, %v7083_v31  ;;  %v7098_v28 = vrot.slane %v7097_v43, 2  ;;  %v107_v17 = vld [vmem:[%s13677_s3 + $0x208] sm:$0xff] }
 0x4b7   :  { %v7943_v56 = vsel %vm2901_vm5, %v12480_v13, %v7942_v1  ;;  %v7440_v48 = vadd.f32 %v7439_v2, %v7438_v44  ;;  %v7522_v33 = vsel %vm1866_vm0, %v6848_v60, 0.0  ;;  %v7558_v34 = vrot.slane %v7557_v29, 4  ;;  %v114_v13 = vld [vmem:[%s13677_s3 + $0x240] sm:$0xff] }
 0x4b8   :  { %v6455_v5 = vpop.permute.xlu1 %6454  ;;  %6749 = vperm.xlu0 %8603, %v6115_v32   ;;  %v7944_v24 = vsel %vm2903_vm6, %v7045_v42, %v7943_v56  ;;  %v7482_v31 = vadd.f32 %v7481_v36, %v7480_v30  ;;  %v7123_v37 = vsel %vm1866_vm0, %v6791_v7, 0.0  ;;  %v6798_v52 = vmul.f32 %v12638_v57, %v83_v39  ;;  %v14438_v2 = vld [vmem:[#allocation94_spill] sm:$0xff]  ;;  %v14439_v57 = vld [vmem:[#allocation3_spill] sm:$0xff]  ;;  %v14441_v7 = vld [vmem:[#allocation85_spill] sm:$0xff] }
 0x4b9   :  { %v7945_v14 = vsel %vm2905_vm7, %v12482_v41, %v7944_v24  ;;  %v7059_v50 = vadd.f32 %v7058_v49, %v7057_v18  ;;  %v7073_v55 = vadd.f32 %v7072_v6, %v7071_v9  ;;  %v5860_v30 = vrot.slane %v12435_v19, %v14438_v2 }
 0x4ba   :  { %v8055_v23 = vadd.f32 %v7945_v14, %v7783_v58  ;;  %v7086_v40 = vrot.slane %v7085_v8, 1  ;;  %v7099_v38 = vadd.f32 %v7098_v28, %v7097_v43  ;;  %v5832_v60 = vrot.slane %v12435_v19, %v14439_v57  ;;  %v109_v43 = vld [vmem:[%s13677_s3 + $0x218] sm:$0xff] }
 0x4bb   :  { %v6822_v41 = vmul.f32 %v12689_v3, %v107_v17  ;;  %v7441_v1 = vrot.slane %v7440_v48, 2  ;;  %v7559_v42 = vadd.f32 %v7558_v34, %v7557_v29  ;;  %v6116_v10 = vmul.f32 %v14440_v0, %v5860_v30  ;;  %v12776_v34 = vpop.permute.xlu0 %6614 }
 0x4bc   :  { %v12752_v44 = vpop.permute.xlu1 %6459  ;;  %8574 = vmatprep.mubr.msk.f32.mxu0 %vm1866_vm0, %v8055_v23  ;;  %v6829_v36 = vmul.f32 %v6480_v26, %v114_v13  ;;  %v7523_v18 = vrot.slane %v7522_v33, 4  ;;  %v7124_v9 = vrot.slane %v7123_v37, 4  ;;  %v6109_v39 = vmul.f32 %v14441_v7, %v5832_v60 }
 0x4bd   :  { %v7340_v49 = vsel %vm1866_vm0, %v6822_v41, 0.0  ;;  %v7506_v3 = vrot.slane %v12723_v35, 1  ;;  %v7387_v29 = vrot.slane %v12727_v27, 1  ;;  %v7483_v6 = vrot.slane %v7482_v31, 2  ;;  %6754 = vperm.xlu0 %8603, %v6116_v10   ;;  %v77_v41 = vld [vmem:[%s13677_s3 + $0x118] sm:$0xff]  ;;  %v110_v10 = vld [vmem:[%s13677_s3 + $0x220] sm:$0xff] }
 0x4be   :  { %v7946_v26 = vsel %vm2893_vm1, %v12484_v12, %v7059_v50  ;;  %v7172_v51 = vsel %vm1866_vm0, %v6798_v52, 0.0  ;;  %v7087_v28 = vadd.f32 %v7086_v40, %v7085_v8  ;;  %v7100_v58 = vrot.slane %v7099_v38, 1  ;;  %6719 = vperm.xlu1 %8604, %v6109_v39   ;;  %v14442_v40 = vld [vmem:[#allocation138_spill] sm:$0xff] }
 0x4bf   :  { %v7947_v32 = vsel %vm2895_vm2, %v7073_v55, %v7946_v26  ;;  %v7560_v56 = vrot.slane %v7559_v42, 2  ;;  %v7341_v24 = vrot.slane %v7340_v49, 4  ;;  %v7389_v17 = vsel %vm1866_vm0, %v6829_v36, 0.0  ;;  %v12810_v39 = vpop.permute.xlu0 %6299 }
 0x4c0   :  { %v12768_v19 = vpop.permute.xlu1 %6464  ;;  %v6824_v14 = vmul.f32 %v6455_v5, %v109_v43  ;;  %v7471_v13 = vrot.slane %v12733_v47, 1  ;;  %v7442_v23 = vadd.f32 %v7441_v1, %v7440_v48  ;;  %v7524_v2 = vadd.f32 %v7523_v18, %v7522_v33  ;;  %v135_v5 = vld [vmem:[%s13677_s3 + $0x2e8] sm:$0xff]  ;;  %v146_v48 = vld [vmem:[%s13677_s3 + $0x340] sm:$0xff] }
 0x4c1   :  { %v7125_v12 = vadd.f32 %v7124_v9, %v7123_v37  ;;  %v12783_v52 = vadd.f32 %v7506_v3, %v12723_v35  ;;  %v7173_v8 = vrot.slane %v7172_v51, 4  ;;  %v7948_v55 = vsel %vm2897_vm3, %v12503_v15, %v7947_v32 }
 0x4c2   :  { %v7354_v30 = vsel %vm1866_vm0, %v6824_v14, 0.0  ;;  %v7949_v33 = vsel %vm2899_vm4, %v7087_v28, %v7948_v55  ;;  %v7101_v37 = vadd.f32 %v7100_v58, %v7099_v38  ;;  %6314 = vperm.xlu1 %8604, %v14442_v40   ;;  %v7390_v35 = vrot.slane %v7389_v17, 4 }
 0x4c3   :  { %v12797_v57 = vadd.f32 %v7387_v29, %v12727_v27  ;;  %v7484_v15 = vadd.f32 %v7483_v6, %v7482_v31  ;;  %v7561_v60 = vadd.f32 %v7560_v56, %v7559_v42  ;;  %v7342_v1 = vadd.f32 %v7341_v24, %v7340_v49  ;;  %v14443_v29 = vld [vmem:[#allocation86_spill] sm:$0xff] }
 0x4c4   :  { %v12780_v50 = vpop.permute.xlu1 %6519  ;;  %v7355_v0 = vrot.slane %v7354_v30, 4  ;;  %v12806_v38 = vadd.f32 %v7471_v13, %v12733_v47  ;;  %v7443_v36 = vrot.slane %v7442_v23, 1  ;;  %v7525_v18 = vrot.slane %v7524_v2, 2  ;;  %v111_v13 = vld [vmem:[%s13677_s3 + $0x228] sm:$0xff] }
 0x4c5   :  { %v7126_v9 = vrot.slane %v7125_v12, 2  ;;  %v7174_v7 = vadd.f32 %v7173_v8, %v7172_v51  ;;  %v6850_v31 = vmul.f32 %v12669_v59, %v135_v5  ;;  %v6861_v42 = vmul.f32 %v12695_v4, %v146_v48  ;;  %v7784_v4 = vld [vmem:[%s13678_s2 + $0x18] sm:$0xff]  ;;  %v12842_v48 = vpop.permute.xlu0 %6594 }
 0x4c6   :  { %v7950_v49 = vsel %vm2901_vm5, %v12536_v62, %v7949_v33  ;;  %v6792_v43 = vmul.f32 %v12718_v20, %v77_v41  ;;  %v7391_v3 = vadd.f32 %v7390_v35, %v7389_v17  ;;  %6374 = vperm.xlu1 %8604, %v14443_v29   ;;  %v6825_v6 = vmul.f32 %v12752_v44, %v110_v10  ;;  %v14444_v8 = vld [vmem:[#allocation109_spill] sm:$0xff]  ;;  %v74_v33 = vld [vmem:[%s13677_s3 + $0x100] sm:$0xff] }
 0x4c7   :  { %v7951_v47 = vsel %vm2903_vm6, %v7101_v37, %v7950_v49  ;;  %v7485_v26 = vrot.slane %v7484_v15, 1  ;;  %v7562_v51 = vrot.slane %v7561_v60, 1  ;;  %v7343_v32 = vrot.slane %v7342_v1, 2 }
 0x4c8   :  { %v6470_v27 = vpop.permute.xlu1 %6469  ;;  %v7356_v59 = vadd.f32 %v7355_v0, %v7354_v30  ;;  %v12821_v28 = vadd.f32 %v7443_v36, %v7442_v23  ;;  %v7127_v62 = vadd.f32 %v7126_v9, %v7125_v12  ;;  %v7952_v20 = vsel %vm2905_vm7, %v12558_v11, %v7951_v47 }
 0x4c9   :  { %v7361_v58 = vsel %vm1866_vm0, %v6825_v6, 0.0  ;;  %v12826_v24 = vadd.f32 %v7525_v18, %v7524_v2  ;;  %v7175_v44 = vrot.slane %v7174_v7, 2  ;;  %v7536_v17 = vsel %vm1866_vm0, %v6850_v31, 0.0  ;;  %v112_v2 = vld [vmem:[%s13677_s3 + $0x230] sm:$0xff] }
 0x4ca   :  { %v7613_v14 = vsel %vm1866_vm0, %v6861_v42, 0.0  ;;  %v7130_v23 = vsel %vm1866_vm0, %v6792_v43, 0.0  ;;  %v7392_v12 = vrot.slane %v7391_v3, 2  ;;  %6634 = vperm.xlu1 %8604, %v14444_v8   ;;  %v8056_v11 = vadd.f32 %v7952_v20, %v7784_v4 }
 0x4cb   :  { %v7362_v55 = vrot.slane %v7361_v58, 4  ;;  %v12838_v30 = vadd.f32 %v7485_v26, %v7484_v15  ;;  %v12840_v5 = vadd.f32 %v7562_v51, %v7561_v60  ;;  %v7344_v37 = vadd.f32 %v7343_v32, %v7342_v1  ;;  %v14445_v1 = vld [vmem:[#allocation113_spill] sm:$0xff] }
 0x4cc   :  { %v6530_v56 = vpop.permute.xlu1 %6529  ;;  %v7357_v40 = vrot.slane %v7356_v59, 2  ;;  %v7128_v35 = vrot.slane %v7127_v62, 1  ;;  %v7537_v41 = vrot.slane %v7536_v17, 4  ;;  %8575 = vmatmul.mubr.msk.f32.gmra.mrb[2].mxu0 %vm1866_vm0, %v8056_v11  ;;  %v6826_v10 = vmul.f32 %v12768_v19, %v111_v13 }
 0x4cd   :  { %v7363_v0 = vadd.f32 %v7362_v55, %v7361_v58  ;;  %v12851_v15 = vadd.f32 %v7175_v44, %v7174_v7  ;;  %v7614_v60 = vrot.slane %v7613_v14, 4  ;;  %v7131_v18 = vrot.slane %v7130_v23, 4  ;;  %v120_v7 = vld [vmem:[%s13677_s3 + $0x270] sm:$0xff]  ;;  %v12868_v58 = vpop.permute.xlu0 %6654 }
 0x4ce   :  { %v6827_v9 = vmul.f32 %v6470_v27, %v112_v2  ;;  %v6789_v31 = vmul.f32 %v12679_v61, %v74_v33  ;;  %v7393_v42 = vadd.f32 %v7392_v12, %v7391_v3  ;;  %6694 = vperm.xlu1 %8604, %v14445_v1   ;;  %v7368_v43 = vsel %vm1866_vm0, %v6826_v10, 0.0  ;;  %v122_v3 = vld [vmem:[%s13677_s3 + $0x280] sm:$0xff]  ;;  %v14446_v12 = vld [vmem:[#allocation99_spill] sm:$0xff]  ;;  %v14447_v1 = vld [vmem:[#allocation101_spill] sm:$0xff] }
 0x4cf   :  { %v7364_v49 = vrot.slane %v7363_v0, 2  ;;  %v7345_v29 = vrot.slane %v7344_v37, 1  ;;  %v7358_v47 = vadd.f32 %v7357_v40, %v7356_v59  ;;  %v7369_v6 = vrot.slane %v7368_v43, 4 }
 0x4d0   :  { %v12849_v36 = vpop.permute.xlu1 %6564  ;;  %v7375_v19 = vsel %vm1866_vm0, %v6827_v9, 0.0  ;;  %v12860_v26 = vadd.f32 %v7128_v35, %v7127_v62  ;;  %v12862_v27 = vadd.f32 %v7537_v41, %v7536_v17  ;;  %v7177_v59 = vrot.slane %v12851_v15, 1  ;;  %v124_v62 = vld [vmem:[%s13677_s3 + $0x290] sm:$0xff] }
 0x4d1   :  { %v7365_v61 = vadd.f32 %v7364_v49, %v7363_v0  ;;  %v7376_v51 = vrot.slane %v7375_v19, 4  ;;  %v7615_v4 = vadd.f32 %v7614_v60, %v7613_v14  ;;  %v7132_v20 = vadd.f32 %v7131_v18, %v7130_v23 }
 0x4d2   :  { %v7370_v44 = vadd.f32 %v7369_v6, %v7368_v43  ;;  %v7109_v17 = vsel %vm1866_vm0, %v6789_v31, 0.0  ;;  %v7394_v13 = vrot.slane %v7393_v42, 1  ;;  %6354 = vperm.xlu1 %8604, %v14446_v12   ;;  %v7346_v55 = vadd.f32 %v7345_v29, %v7344_v37  ;;  %v129_v37 = vld [vmem:[%s13677_s3 + $0x2b8] sm:$0xff] }
 0x4d3   :  { %v7377_v8 = vadd.f32 %v7376_v51, %v7375_v19  ;;  %v7359_v2 = vrot.slane %v7358_v47, 1  ;;  %v6837_v14 = vmul.f32 %v12780_v50, %v122_v3  ;;  %v7366_v23 = vrot.slane %v7365_v61, 1  ;;  %v141_v12 = vld [vmem:[%s13677_s3 + $0x318] sm:$0xff] }
 0x4d4   :  { %v6510_v32 = vpop.permute.xlu1 %6509  ;;  %v7371_v33 = vrot.slane %v7370_v44, 2  ;;  %v6839_v35 = vmul.f32 %v6530_v56, %v124_v62  ;;  %v7539_v10 = vrot.slane %v12862_v27, 2  ;;  %v7616_v60 = vrot.slane %v7615_v4, 2  ;;  %v12884_v56 = vpop.permute.xlu0 %6339 }
 0x4d5   :  { %v6835_v11 = vmul.f32 %v6510_v32, %v120_v7  ;;  %v7378_v40 = vrot.slane %v7377_v8, 2  ;;  %v7110_v18 = vrot.slane %v7109_v17, 4  ;;  %v7133_v31 = vrot.slane %v7132_v20, 2 }
 0x4d6   :  { %v7372_v9 = vadd.f32 %v7371_v33, %v7370_v44  ;;  %v7395_v49 = vadd.f32 %v7394_v13, %v7393_v42  ;;  %6414 = vperm.xlu1 %8604, %v14447_v1   ;;  %v7981_v29 = vsel %vm2893_vm1, %v7346_v55, %v12599_v54  ;;  %v7360_v6 = vadd.f32 %v7359_v2, %v7358_v47  ;;  %v126_v54 = vld [vmem:[%s13677_s3 + $0x2a0] sm:$0xff]  ;;  %v14448_v55 = vld [vmem:[#allocation115_spill] sm:$0xff]  ;;  %v14449_v1 = vld [vmem:[#allocation88_spill] sm:$0xff] }
 0x4d7   :  { %v7431_v41 = vsel %vm1866_vm0, %v6835_v11, 0.0  ;;  %v7379_v50 = vadd.f32 %v7378_v40, %v7377_v8  ;;  %v7445_v7 = vsel %vm1866_vm0, %v6837_v14, 0.0  ;;  %v7367_v3 = vadd.f32 %v7366_v23, %v7365_v61 }
 0x4d8   :  { %v12877_v0 = vpop.permute.xlu1 %6569  ;;  %v7432_v43 = vrot.slane %v7431_v41, 4  ;;  %v7373_v19 = vrot.slane %v7372_v9, 1  ;;  %v7459_v32 = vsel %vm1866_vm0, %v6839_v35, 0.0  ;;  %v7617_v42 = vadd.f32 %v7616_v60, %v7615_v4 }
 0x4d9   :  { %v7380_v51 = vrot.slane %v7379_v50, 1  ;;  %v6844_v13 = vmul.f32 %v12754_v63, %v129_v37  ;;  %v7111_v8 = vadd.f32 %v7110_v18, %v7109_v17  ;;  %v7446_v47 = vrot.slane %v7445_v7, 4  ;;  %v75_v63 = vld [vmem:[%s13677_s3 + $0x108] sm:$0xff] }
 0x4da   :  { %v7433_v44 = vadd.f32 %v7432_v43, %v7431_v41  ;;  %v7374_v11 = vadd.f32 %v7373_v19, %v7372_v9  ;;  %6699 = vperm.xlu1 %8604, %v14448_v55   ;;  %v7982_v4 = vsel %vm2895_vm2, %v12612_v16, %v7981_v29  ;;  %v7134_v33 = vadd.f32 %v7133_v31, %v7132_v20  ;;  %v12909_v9 = vpop.permute.xlu0 %6364  ;;  %v7789_v20 = vld [vmem:[%s13678_s2 + $0x40] sm:$0xff] }
 0x4db   :  { %v7381_v61 = vadd.f32 %v7380_v51, %v7379_v50  ;;  %v7988_v17 = vsel %vm2893_vm1, %v12614_v21, %v7395_v49  ;;  %v7460_v14 = vrot.slane %v7459_v32, 4  ;;  %v7983_v23 = vsel %vm2897_vm3, %v7360_v6, %v7982_v4 }
 0x4dc   :  { %v6540_v62 = vpop.permute.xlu1 %6539  ;;  %v7434_v2 = vrot.slane %v7433_v44, 2  ;;  %v6856_v40 = vmul.f32 %v12776_v34, %v141_v12  ;;  %v7984_v41 = vsel %vm2899_vm4, %v7367_v3, %v7983_v23  ;;  %v7494_v16 = vsel %vm1866_vm0, %v6844_v13, 0.0 }
 0x4dd   :  { %v6841_v60 = vmul.f32 %v6540_v62, %v126_v54  ;;  %v7112_v37 = vrot.slane %v7111_v8, 2  ;;  %v7985_v21 = vsel %vm2901_vm5, %v7374_v11, %v7984_v41  ;;  %v7989_v34 = vsel %vm2895_vm2, %v12626_v46, %v7988_v17  ;;  %v7790_v17 = vld [vmem:[%s13678_s2 + $0x48] sm:$0xff]  ;;  %v78_v41 = vld [vmem:[%s13677_s3 + $0x120] sm:$0xff] }
 0x4de   :  { %v7435_v35 = vadd.f32 %v7434_v2, %v7433_v44  ;;  %v7447_v49 = vadd.f32 %v7446_v47, %v7445_v7  ;;  %6384 = vperm.xlu1 %8604, %v14449_v1   ;;  %v7986_v43 = vsel %vm2903_vm6, %v7381_v61, %v7985_v21  ;;  %v7461_v29 = vadd.f32 %v7460_v14, %v7459_v32  ;;  %v14450_v61 = vld [vmem:[#allocation117_spill] sm:$0xff]  ;;  %v139_v2 = vld [vmem:[%s13677_s3 + $0x308] sm:$0xff]  ;;  %v12940_v4 = vpop.permute.xlu0 %6659  ;;  %v82_v1 = vld [vmem:[%s13677_s3 + $0x140] sm:$0xff] }
 0x4df   :  { %v7987_v6 = vsel %vm2905_vm7, %v12797_v57, %v7986_v43  ;;  %v7473_v19 = vsel %vm1866_vm0, %v6841_v60, 0.0  ;;  %v7618_v51 = vrot.slane %v7617_v42, 1  ;;  %v7495_v44 = vrot.slane %v7494_v16, 4  ;;  %v132_v60 = vld [vmem:[%s13677_s3 + $0x2d0] sm:$0xff] }
 0x4e0   :  { %v6285_v18 = vpop.permute.xlu1 %6284  ;;  %v7436_v50 = vrot.slane %v7435_v35, 1  ;;  %v8061_v13 = vadd.f32 %v7987_v6, %v7789_v20  ;;  %v7578_v46 = vsel %vm1866_vm0, %v6856_v40, 0.0  ;;  %v7474_v7 = vrot.slane %v7473_v19, 4 }
 0x4e1   :  { %v6790_v31 = vmul.f32 %v6285_v18, %v75_v63  ;;  %v7990_v32 = vsel %vm2897_vm3, %v12628_v25, %v7989_v34  ;;  %v12931_v57 = vadd.f32 %v7177_v59, %v12851_v15  ;;  %v7135_v54 = vrot.slane %v7134_v33, 1  ;;  %v131_v15 = vld [vmem:[%s13677_s3 + $0x2c8] sm:$0xff] }
 0x4e2   :  { %v7437_v62 = vadd.f32 %v7436_v50, %v7435_v35  ;;  %v7448_v47 = vrot.slane %v7447_v49, 2  ;;  %6704 = vperm.xlu1 %8604, %v14450_v61   ;;  %8583 = vmatprep.mubr.msk.f32.mxu1 %vm1866_vm0, %v8061_v13  ;;  %v7991_v55 = vsel %vm2899_vm4, %v12649_v22, %v7990_v32  ;;  %v7113_v25 = vadd.f32 %v7112_v37, %v7111_v8  ;;  %v137_v50 = vld [vmem:[%s13677_s3 + $0x2f8] sm:$0xff] }
 0x4e3   :  { %v7116_v3 = vsel %vm1866_vm0, %v6790_v31, 0.0  ;;  %v7462_v63 = vrot.slane %v7461_v29, 2  ;;  %v7992_v22 = vsel %vm2901_vm5, %v12704_v53, %v7991_v55  ;;  %v12950_v14 = vadd.f32 %v7618_v51, %v7617_v42  ;;  %v14451_v31 = vld [vmem:[#allocation90_spill] sm:$0xff] }
 0x4e4   :  { %v12923_v12 = vpop.permute.xlu1 %6579  ;;  %v7117_v11 = vrot.slane %v7116_v3, 4  ;;  %v12952_v23 = vadd.f32 %v7495_v44, %v7494_v16  ;;  %v7579_v40 = vrot.slane %v7578_v46, 4  ;;  %v7993_v8 = vsel %vm2903_vm6, %v7437_v62, %v7992_v22  ;;  %v12980_v62 = vpop.permute.xlu0 %6684 }
 0x4e5   :  { %v7475_v18 = vadd.f32 %v7474_v7, %v7473_v19  ;;  %v7994_v53 = vsel %vm2905_vm7, %v12821_v28, %v7993_v8  ;;  %v7136_v16 = vadd.f32 %v7135_v54, %v7134_v33  ;;  %v7449_v20 = vadd.f32 %v7448_v47, %v7447_v49  ;;  %v134_v7 = vld [vmem:[%s13677_s3 + $0x2e0] sm:$0xff]  ;;  %v14452_v54 = vld [vmem:[#allocation37_spill] sm:$0xff] }
 0x4e6   :  { %v7118_v59 = vadd.f32 %v7117_v11, %v7116_v3  ;;  %v6846_v21 = vmul.f32 %v12849_v36, %v131_v15  ;;  %6389 = vperm.xlu1 %8604, %v14451_v31   ;;  %v8062_v34 = vadd.f32 %v7994_v53, %v7790_v17  ;;  %v7114_v43 = vrot.slane %v7113_v25, 1 }
 0x4e7   :  { %v7463_v6 = vadd.f32 %v7462_v63, %v7461_v29  ;;  %v7497_v33 = vrot.slane %v12952_v23, 2  ;;  %v12974_v36 = vmul.f32 %v12810_v39, %v78_v41  ;;  %v6847_v49 = vmul.f32 %v12877_v0, %v132_v60 }
 0x4e8   :  { %v6605_v35 = vpop.permute.xlu1 %6604  ;;  %v7119_v37 = vrot.slane %v7118_v59, 2  ;;  %8584 = vmatmul.mubr.msk.f32.vlgmr.msra.gmra.mrb[0].mxu1 %vm1866_vm0, %v8062_v34  ;;  %v12978_v44 = vadd.f32 %v7579_v40, %v7578_v46  ;;  %v7476_v13 = vrot.slane %v7475_v18, 2  ;;  %v6852_v39 = vmul.f32 %v12842_v48, %v137_v50  ;;  %v128_v46 = vld [vmem:[%s13677_s3 + $0x2b0] sm:$0xff] }
 0x4e9   :  { %v6854_v42 = vmul.f32 %v6605_v35, %v139_v2  ;;  %v7450_v32 = vrot.slane %v7449_v20, 1  ;;  %v7508_v0 = vsel %vm1866_vm0, %v6846_v21, 0.0  ;;  %v7115_v61 = vadd.f32 %v7114_v43, %v7113_v25  ;;  %v13001_v21 = vpop.permute.xlu0 %6344 }
 0x4ea   :  { %v7120_v19 = vadd.f32 %v7119_v37, %v7118_v59  ;;  %6709 = vperm.xlu1 %8604, %v14452_v54   ;;  %v7464_v55 = vrot.slane %v7463_v6, 1  ;;  %v7515_v15 = vsel %vm1866_vm0, %v6847_v49, 0.0  ;;  %v6849_v59 = vmul.f32 %v12923_v12, %v134_v7  ;;  %v14453_v37 = vld [vmem:[#allocation92_spill] sm:$0xff] }
 0x4eb   :  { %v7564_v28 = vsel %vm1866_vm0, %v6854_v42, 0.0  ;;  %v7509_v40 = vrot.slane %v7508_v0, 4  ;;  %v7477_v8 = vadd.f32 %v7476_v13, %v7475_v18  ;;  %v7451_v60 = vadd.f32 %v7450_v32, %v7449_v20  ;;  %v140_v12 = vld [vmem:[%s13677_s3 + $0x310] sm:$0xff]  ;;  %v14454_v13 = vld [vmem:[#allocation39_spill] sm:$0xff] }
 0x4ec   :  { %v7565_v3 = vrot.slane %v7564_v28, 4  ;;  %v6320_v51 = vpop.permute.xlu1 %6319  ;;  %v7121_v29 = vrot.slane %v7120_v19, 1  ;;  %v7465_v31 = vadd.f32 %v7464_v55, %v7463_v6  ;;  %v7516_v34 = vrot.slane %v7515_v15, 4 }
 0x4ed   :  { %v6797_v11 = vmul.f32 %v6320_v51, %v82_v1  ;;  %v7529_v20 = vsel %vm1866_vm0, %v6849_v59, 0.0  ;;  %v7510_v49 = vadd.f32 %v7509_v40, %v7508_v0  ;;  %v7995_v6 = vsel %vm2893_vm1, %v12698_v45, %v7451_v60 }
 0x4ee   :  { %v7566_v47 = vadd.f32 %v7565_v3, %v7564_v28  ;;  %v7122_v2 = vadd.f32 %v7121_v29, %v7120_v19  ;;  %6394 = vperm.xlu1 %8604, %v14453_v37   ;;  %v7498_v28 = vadd.f32 %v7497_v33, %v12952_v23  ;;  %v7478_v3 = vrot.slane %v7477_v8, 1 }
 0x4ef   :  { %v7165_v63 = vsel %vm1866_vm0, %v6797_v11, 0.0  ;;  %v147_v11 = vld [vmem:[%s13677_s3 + $0x348] sm:$0xff]  ;;  %v7996_v32 = vsel %vm2895_vm2, %v7465_v31, %v7995_v6  ;;  %v7517_v54 = vadd.f32 %v7516_v34, %v7515_v15  ;;  %v7581_v55 = vrot.slane %v12978_v44, 2  ;;  %v14455_v15 = vld [vmem:[#allocation105_spill] sm:$0xff] }
 0x4f0   :  { %v7567_v48 = vrot.slane %v7566_v47, 2  ;;  %v7166_v17 = vrot.slane %v7165_v63, 4  ;;  %v6550_v22 = vpop.permute.xlu1 %6549  ;;  %v7953_v35 = vsel %vm2893_vm1, %v7122_v2, %v7115_v61  ;;  %v7550_v2 = vsel %vm1866_vm0, %v6852_v39, 0.0 }
 0x4f1   :  { %v6843_v41 = vmul.f32 %v6550_v22, %v128_v46  ;;  %v7954_v25 = vsel %vm2895_vm2, %v12860_v26, %v7953_v35  ;;  %v7479_v59 = vadd.f32 %v7478_v3, %v7477_v8  ;;  %v7518_v60 = vrot.slane %v7517_v54, 2  ;;  %v86_v3 = vld [vmem:[%s13677_s3 + $0x160] sm:$0xff] }
 0x4f2   :  { %v7568_v53 = vadd.f32 %v7567_v48, %v7566_v47  ;;  %v7167_v42 = vadd.f32 %v7166_v17, %v7165_v63  ;;  %v13005_v1 = vsel %vm2897_vm3, %v7136_v16, %v7954_v25  ;;  %6714 = vperm.xlu1 %8604, %v14454_v13   ;;  %v7530_v47 = vrot.slane %v7529_v20, 4  ;;  %v13021_v63 = vpop.permute.xlu0 %6399 }
 0x4f3   :  { %v7487_v18 = vsel %vm1866_vm0, %v6843_v41, 0.0  ;;  %v7499_v17 = vrot.slane %v7498_v28, 1  ;;  %v7511_v41 = vrot.slane %v7510_v49, 2  ;;  %v7997_v37 = vsel %vm2897_vm3, %v12806_v38, %v7996_v32 }
 0x4f4   :  { %v7569_v50 = vrot.slane %v7568_v53, 1  ;;  %v7168_v43 = vrot.slane %v7167_v42, 2  ;;  %v7488_v26 = vrot.slane %v7487_v18, 4  ;;  %v6610_v19 = vpop.permute.xlu1 %6609  ;;  %v7531_v25 = vadd.f32 %v7530_v47, %v7529_v20  ;;  %v136_v20 = vld [vmem:[%s13677_s3 + $0x2f0] sm:$0xff] }
 0x4f5   :  { %v6855_v51 = vmul.f32 %v6610_v19, %v140_v12  ;;  %v7551_v31 = vrot.slane %v7550_v2, 4  ;;  %v7998_v34 = vsel %vm2899_vm4, %v7479_v59, %v7997_v37  ;;  %v7512_v6 = vadd.f32 %v7511_v41, %v7510_v49 }
 0x4f6   :  { %v7570_v29 = vadd.f32 %v7569_v50, %v7568_v53  ;;  %v7169_v7 = vadd.f32 %v7168_v43, %v7167_v42  ;;  %v7489_v16 = vadd.f32 %v7488_v26, %v7487_v18  ;;  %6434 = vperm.xlu1 %8604, %v14455_v15   ;;  %v7500_v43 = vadd.f32 %v7499_v17, %v7498_v28  ;;  %v7791_v17 = vld [vmem:[%s13678_s2 + $0x50] sm:$0xff] }
 0x4f7   :  { %v7571_v23 = vsel %vm1866_vm0, %v6855_v51, 0.0  ;;  %v7582_v26 = vadd.f32 %v7581_v55, %v12978_v44  ;;  %v13045_v51 = vpop.permute.xlu0 %6629  ;;  %v7519_v28 = vadd.f32 %v7518_v60, %v7517_v54  ;;  %v7999_v32 = vsel %vm2901_vm5, %v12838_v30, %v7998_v34 }
 0x4f8   :  { %v8009_v33 = vsel %vm2893_vm1, %v7570_v29, %v12840_v5  ;;  %v7170_v0 = vrot.slane %v7169_v7, 1  ;;  %v7490_v45 = vrot.slane %v7489_v16, 2  ;;  %v7572_v46 = vrot.slane %v7571_v23, 4  ;;  %v6645_v61 = vpop.permute.xlu1 %6644  ;;  %v84_v5 = vld [vmem:[%s13677_s3 + $0x150] sm:$0xff] }
 0x4f9   :  { %v6862_v48 = vmul.f32 %v6645_v61, %v147_v11  ;;  %v7532_v29 = vrot.slane %v7531_v25, 2  ;;  %v7552_v47 = vadd.f32 %v7551_v31, %v7550_v2  ;;  %v6801_v49 = vmul.f32 %v12884_v56, %v86_v3 }
 0x4fa   :  { %v7171_v22 = vadd.f32 %v7170_v0, %v7169_v7  ;;  %v7491_v40 = vadd.f32 %v7490_v45, %v7489_v16  ;;  %v7573_v35 = vadd.f32 %v7572_v46, %v7571_v23  ;;  %v7513_v55 = vrot.slane %v7512_v6, 1 }
 0x4fb   :  { %v7620_v39 = vsel %vm1866_vm0, %v6862_v48, 0.0  ;;  %v7520_v2 = vrot.slane %v7519_v28, 1  ;;  %v7533_v15 = vadd.f32 %v7532_v29, %v7531_v25  ;;  %v7583_v56 = vrot.slane %v7582_v26, 1  ;;  %v13066_v41 = vpop.permute.xlu0 %6689 }
 0x4fc   :  { %v13032_v8 = vsel %vm2893_vm1, %v12931_v57, %v7171_v22  ;;  %v7492_v53 = vrot.slane %v7491_v40, 1  ;;  %v7574_v42 = vrot.slane %v7573_v35, 2  ;;  %v6330_v12 = vpop.permute.xlu1 %6329  ;;  %v7621_v18 = vrot.slane %v7620_v39, 4  ;;  %v149_v57 = vld [vmem:[%s13677_s3 + $0x358] sm:$0xff] }
 0x4fd   :  { %v6799_v50 = vmul.f32 %v6330_v12, %v84_v5  ;;  %v6864_v46 = vmul.f32 %v12868_v58, %v149_v57  ;;  %v91_v5 = vld [vmem:[%s13677_s3 + $0x188] sm:$0xff]  ;;  %v7514_v12 = vadd.f32 %v7513_v55, %v7512_v6  ;;  %v7584_v6 = vadd.f32 %v7583_v56, %v7582_v26 }
 0x4fe   :  { %v7493_v19 = vadd.f32 %v7492_v53, %v7491_v40  ;;  %v7575_v38 = vadd.f32 %v7574_v42, %v7573_v35  ;;  %v7622_v13 = vadd.f32 %v7621_v18, %v7620_v39  ;;  %v7137_v35 = vsel %vm1866_vm0, %v12974_v36, 0.0 }
 0x4ff   :  { %v7179_v44 = vsel %vm1866_vm0, %v6799_v50, 0.0  ;;  %v7553_v39 = vrot.slane %v7552_v47, 2  ;;  %v7634_v25 = vsel %vm1866_vm0, %v6864_v46, 0.0  ;;  %v7193_v42 = vsel %vm1866_vm0, %v6801_v49, 0.0  ;;  %v13078_v57 = vpop.permute.xlu0 %6724 }
 0x500   :  { %v7576_v7 = vrot.slane %v7575_v38, 1  ;;  %v7180_v16 = vrot.slane %v7179_v44, 4  ;;  %v6590_v11 = vpop.permute.xlu1 %6589  ;;  %v7623_v23 = vrot.slane %v7622_v13, 2  ;;  %v8000_v45 = vsel %vm2903_vm6, %v7493_v19, %v7999_v32 }
 0x501   :  { %v6851_v0 = vmul.f32 %v6590_v11, %v136_v20  ;;  %v8001_v30 = vsel %vm2905_vm7, %v7500_v43, %v8000_v45  ;;  %v6806_v36 = vmul.f32 %v12909_v9, %v91_v5  ;;  %v7521_v18 = vadd.f32 %v7520_v2, %v7519_v28 }
 0x502   :  { %v7577_v54 = vadd.f32 %v7576_v7, %v7575_v38  ;;  %v7181_v61 = vadd.f32 %v7180_v16, %v7179_v44  ;;  %v7624_v59 = vadd.f32 %v7623_v23, %v7622_v13  ;;  %v7534_v50 = vrot.slane %v7533_v15, 1 }
 0x503   :  { %v7543_v48 = vsel %vm1866_vm0, %v6851_v0, 0.0  ;;  %v7527_v38 = vrot.slane %v12826_v24, 1  ;;  %v7540_v20 = vadd.f32 %v7539_v10, %v12862_v27  ;;  %v7138_v28 = vrot.slane %v7137_v35, 4  ;;  %v155_v27 = vld [vmem:[%s13677_s3 + $0x388] sm:$0xff] }
 0x504   :  { %v8010_v22 = vsel %vm2895_vm2, %v7577_v54, %v8009_v33  ;;  %v7182_v40 = vrot.slane %v7181_v61, 2  ;;  %v13059_v58 = vpop.permute.xlu1 %6649  ;;  %v7625_v60 = vrot.slane %v7624_v59, 1  ;;  %v7544_v37 = vrot.slane %v7543_v48, 4 }
 0x505   :  { %v8063_v33 = vadd.f32 %v8001_v30, %v7791_v17  ;;  %v7554_v13 = vadd.f32 %v7553_v39, %v7552_v47  ;;  %v7635_v29 = vrot.slane %v7634_v25, 4  ;;  %v7194_v7 = vrot.slane %v7193_v42, 4  ;;  %v87_v17 = vld [vmem:[%s13677_s3 + $0x168] sm:$0xff] }
 0x506   :  { %v7183_v53 = vadd.f32 %v7182_v40, %v7181_v61  ;;  %v7626_v31 = vadd.f32 %v7625_v60, %v7624_v59  ;;  %v7545_v34 = vadd.f32 %v7544_v37, %v7543_v48  ;;  %v8002_v16 = vsel %vm2893_vm1, %v7514_v12, %v12783_v52  ;;  %v150_v61 = vld [vmem:[%s13677_s3 + $0x360] sm:$0xff]  ;;  %v13106_v59 = vpop.permute.xlu0 %6349 }
 0x507   :  { %8586 = vmatprep.mubr.msk.f32.mxu1 %vm1866_vm0, %v8063_v33  ;;  %v7228_v32 = vsel %vm1866_vm0, %v6806_v36, 0.0  ;;  %v8003_v10 = vsel %vm2895_vm2, %v7521_v18, %v8002_v16  ;;  %v7528_v23 = vadd.f32 %v7527_v38, %v12826_v24  ;;  %v7541_v0 = vrot.slane %v7540_v20, 1  ;;  %v156_v36 = vld [vmem:[%s13677_s3 + $0x390] sm:$0xff] }
 0x508   :  { %v7184_v43 = vrot.slane %v7183_v53, 1  ;;  %v13072_v19 = vpop.permute.xlu1 %6334  ;;  %v13082_v3 = vsel %vm2893_vm1, %v7626_v31, %v12950_v14  ;;  %v7546_v9 = vrot.slane %v7545_v34, 2  ;;  %v7535_v14 = vadd.f32 %v7534_v50, %v7533_v15  ;;  %v7792_v31 = vld [vmem:[%s13678_s2 + $0x58] sm:$0xff] }
 0x509   :  { %v7139_v45 = vadd.f32 %v7138_v28, %v7137_v35  ;;  %v13099_v46 = vsel %vm2897_vm3, %v7584_v6, %v8010_v22  ;;  %v7555_v49 = vrot.slane %v7554_v13, 1  ;;  %v7229_v54 = vrot.slane %v7228_v32, 4 }
 0x50a   :  { %v7185_v44 = vadd.f32 %v7184_v43, %v7183_v53  ;;  %v7547_v11 = vadd.f32 %v7546_v9, %v7545_v34  ;;  %v6870_v55 = vmul.f32 %v12980_v62, %v155_v27  ;;  %v7636_v48 = vadd.f32 %v7635_v29, %v7634_v25  ;;  %v98_v62 = vld [vmem:[%s13677_s3 + $0x1c0] sm:$0xff] }
 0x50b   :  { %v7195_v24 = vadd.f32 %v7194_v7, %v7193_v42  ;;  %v7542_v22 = vadd.f32 %v7541_v0, %v7540_v20  ;;  %v7140_v40 = vrot.slane %v7139_v45, 2  ;;  %v6865_v56 = vmul.f32 %v12940_v4, %v150_v61  ;;  %v13123_v4 = vpop.permute.xlu0 %6409 }
 0x50c   :  { %v13093_v26 = vsel %vm2895_vm2, %v7185_v44, %v13032_v8  ;;  %v13095_v47 = vpop.permute.xlu1 %6619  ;;  %v7548_v52 = vrot.slane %v7547_v11, 1  ;;  %v8004_v8 = vsel %vm2897_vm3, %v7528_v23, %v8003_v10  ;;  %v7230_v35 = vadd.f32 %v7229_v54, %v7228_v32 }
 0x50d   :  { %v8005_v30 = vsel %vm2899_vm4, %v7535_v14, %v8004_v8  ;;  %v7676_v5 = vsel %vm1866_vm0, %v6870_v55, 0.0  ;;  %v6802_v60 = vmul.f32 %v13001_v21, %v87_v17  ;;  %v7556_v39 = vadd.f32 %v7555_v49, %v7554_v13  ;;  %v144_v21 = vld [vmem:[%s13677_s3 + $0x330] sm:$0xff]  ;;  %v154_v49 = vld [vmem:[%s13677_s3 + $0x380] sm:$0xff] }
 0x50e   :  { %v7549_v2 = vadd.f32 %v7548_v52, %v7547_v11  ;;  %v8006_v37 = vsel %vm2901_vm5, %v7542_v22, %v8005_v30  ;;  %v7637_v25 = vrot.slane %v7636_v48, 2  ;;  %v7196_v53 = vrot.slane %v7195_v24, 2  ;;  %v148_v17 = vld [vmem:[%s13677_s3 + $0x350] sm:$0xff]  ;;  %v163_v22 = vld [vmem:[%s13677_s3 + $0x3c8] sm:$0xff] }
 0x50f   :  { %v6813_v12 = vmul.f32 %v13021_v63, %v98_v62  ;;  %v7677_v34 = vrot.slane %v7676_v5, 4  ;;  %v90_v63 = vld [vmem:[%s13677_s3 + $0x180] sm:$0xff]  ;;  %v7141_v50 = vadd.f32 %v7140_v40, %v7139_v45  ;;  %v7231_v43 = vrot.slane %v7230_v35, 2  ;;  %v6670_v23 = vpop.permute.xlu0 %6669 }
 0x510   :  { %v13112_v15 = vpop.permute.xlu1 %6304  ;;  %v8007_v33 = vsel %vm2903_vm6, %v7549_v2, %v8006_v37  ;;  %v7641_v38 = vsel %vm1866_vm0, %v6865_v56, 0.0  ;;  %v7200_v20 = vsel %vm1866_vm0, %v6802_v60, 0.0  ;;  %v7638_v9 = vadd.f32 %v7637_v25, %v7636_v48  ;;  %v88_v37 = vld [vmem:[%s13677_s3 + $0x170] sm:$0xff] }
 0x511   :  { %v8008_v18 = vsel %vm2905_vm7, %v7556_v39, %v8007_v33  ;;  %v7197_v6 = vadd.f32 %v7196_v53, %v7195_v24  ;;  %v7277_v44 = vsel %vm1866_vm0, %v6813_v12, 0.0  ;;  %v6859_v29 = vmul.f32 %v13045_v51, %v144_v21  ;;  %v100_v25 = vld [vmem:[%s13677_s3 + $0x1d0] sm:$0xff] }
 0x512   :  { %v8064_v28 = vadd.f32 %v8008_v18, %v7792_v31  ;;  %v6871_v7 = vmul.f32 %v13066_v41, %v156_v36  ;;  %v7642_v11 = vrot.slane %v7641_v38, 4  ;;  %v7678_v32 = vadd.f32 %v7677_v34, %v7676_v5  ;;  %v85_v18 = vld [vmem:[%s13677_s3 + $0x158] sm:$0xff] }
 0x513   :  { %v7201_v27 = vrot.slane %v7200_v20, 4  ;;  %v7142_v10 = vrot.slane %v7141_v50, 1  ;;  %v7232_v14 = vadd.f32 %v7231_v43, %v7230_v35  ;;  %v7639_v0 = vrot.slane %v7638_v9, 1  ;;  %v6730_v33 = vpop.permute.xlu0 %6729 }
 0x514   :  { %v6360_v42 = vpop.permute.xlu1 %6359  ;;  %8587 = vmatmul.mubr.msk.f32.gmra.mrb[2].mxu1 %vm1866_vm0, %v8064_v28  ;;  %v7278_v52 = vrot.slane %v7277_v44, 4  ;;  %v7198_v54 = vrot.slane %v7197_v6, 1  ;;  %v7599_v41 = vsel %vm1866_vm0, %v6859_v29, 0.0  ;;  %v7683_v61 = vsel %vm1866_vm0, %v6871_v7, 0.0 }
 0x515   :  { %v6805_v16 = vmul.f32 %v6360_v42, %v90_v63  ;;  %v7643_v8 = vadd.f32 %v7642_v11, %v7641_v38  ;;  %v7679_v48 = vrot.slane %v7678_v32, 2  ;;  %v7202_v24 = vadd.f32 %v7201_v27, %v7200_v20 }
 0x516   :  { %v13155_v30 = vadd.f32 %v7142_v10, %v7141_v50  ;;  %v7233_v2 = vrot.slane %v7232_v14, 1  ;;  %v13160_v62 = vadd.f32 %v7639_v0, %v7638_v9  ;;  %v7279_v35 = vadd.f32 %v7278_v52, %v7277_v44 }
 0x517   :  { %v7221_v45 = vsel %vm1866_vm0, %v6805_v16, 0.0  ;;  %v7600_v5 = vrot.slane %v7599_v41, 4  ;;  %v7684_v60 = vrot.slane %v7683_v61, 4  ;;  %v13165_v39 = vadd.f32 %v7198_v54, %v7197_v6  ;;  %v6380_v0 = vpop.permute.xlu0 %6379 }
 0x518   :  { %v13140_v13 = vpop.permute.xlu1 %6624  ;;  %v7222_v55 = vrot.slane %v7221_v45, 4  ;;  %v6863_v53 = vmul.f32 %v13059_v58, %v148_v17  ;;  %v7644_v31 = vrot.slane %v7643_v8, 2  ;;  %v7680_v34 = vadd.f32 %v7679_v48, %v7678_v32 }
 0x519   :  { %v7203_v21 = vrot.slane %v7202_v24, 2  ;;  %v6878_v36 = vmul.f32 %v13078_v57, %v163_v22  ;;  %v7234_v50 = vadd.f32 %v7233_v2, %v7232_v14  ;;  %v6803_v43 = vmul.f32 %v13106_v59, %v88_v37  ;;  %v152_v57 = vld [vmem:[%s13677_s3 + $0x370] sm:$0xff] }
 0x51a   :  { %v7223_v40 = vadd.f32 %v7222_v55, %v7221_v45  ;;  %v7280_v20 = vrot.slane %v7279_v35, 2  ;;  %v7601_v9 = vadd.f32 %v7600_v5, %v7599_v41  ;;  %v7685_v6 = vadd.f32 %v7684_v60, %v7683_v61  ;;  %v142_v41 = vld [vmem:[%s13677_s3 + $0x320] sm:$0xff] }
 0x51b   :  { %v6815_v28 = vmul.f32 %v13123_v4, %v100_v25  ;;  %v7627_v44 = vsel %vm1866_vm0, %v6863_v53, 0.0  ;;  %v6800_v29 = vmul.f32 %v13072_v19, %v85_v18  ;;  %v7645_v11 = vadd.f32 %v7644_v31, %v7643_v8  ;;  %v164_v4 = vld [vmem:[%s13677_s3 + $0x3d0] sm:$0xff]  ;;  %v79_v18 = vld [vmem:[%s13677_s3 + $0x128] sm:$0xff] }
 0x51c   :  { %v6680_v51 = vpop.permute.xlu1 %6679  ;;  %v7224_v42 = vrot.slane %v7223_v40, 2  ;;  %v7681_v32 = vrot.slane %v7680_v34, 1  ;;  %v7204_v59 = vadd.f32 %v7203_v21, %v7202_v24  ;;  %v7732_v27 = vsel %vm1866_vm0, %v6878_v36, 0.0  ;;  %v6675_v36 = vpop.permute.xlu0 %6674 }
 0x51d   :  { %v6869_v56 = vmul.f32 %v6680_v51, %v154_v49  ;;  %v7207_v10 = vsel %vm1866_vm0, %v6803_v43, 0.0  ;;  %v6867_v14 = vmul.f32 %v6670_v23, %v152_v57  ;;  %v7281_v49 = vadd.f32 %v7280_v20, %v7279_v35  ;;  %v94_v35 = vld [vmem:[%s13677_s3 + $0x1a0] sm:$0xff] }
 0x51e   :  { %v7225_v38 = vadd.f32 %v7224_v42, %v7223_v40  ;;  %v7602_v51 = vrot.slane %v7601_v9, 2  ;;  %v7291_v19 = vsel %vm1866_vm0, %v6815_v28, 0.0  ;;  %v7628_v54 = vrot.slane %v7627_v44, 4 }
 0x51f   :  { %v7669_v12 = vsel %vm1866_vm0, %v6869_v56, 0.0  ;;  %v7686_v55 = vrot.slane %v7685_v6, 2  ;;  %v7186_v23 = vsel %vm1866_vm0, %v6800_v29, 0.0  ;;  %v7646_v24 = vrot.slane %v7645_v11, 1 }
 0x520   :  { %v13176_v63 = vpop.permute.xlu1 %6309  ;;  %v7670_v58 = vrot.slane %v7669_v12, 4  ;;  %v7226_v7 = vrot.slane %v7225_v38, 1  ;;  %v7733_v17 = vrot.slane %v7732_v27, 4  ;;  %v7208_v2 = vrot.slane %v7207_v10, 4 }
 0x521   :  { %v6879_v22 = vmul.f32 %v6730_v33, %v164_v4  ;;  %v7292_v40 = vrot.slane %v7291_v19, 4  ;;  %v7655_v56 = vsel %vm1866_vm0, %v6867_v14, 0.0  ;;  %v6857_v5 = vmul.f32 %v13095_v47, %v142_v41  ;;  %v153_v33 = vld [vmem:[%s13677_s3 + $0x378] sm:$0xff] }
 0x522   :  { %v7671_v16 = vadd.f32 %v7670_v58, %v7669_v12  ;;  %v7227_v52 = vadd.f32 %v7226_v7, %v7225_v38  ;;  %v7682_v37 = vadd.f32 %v7681_v32, %v7680_v34  ;;  %v7205_v25 = vrot.slane %v7204_v59, 1 }
 0x523   :  { %v7629_v53 = vadd.f32 %v7628_v54, %v7627_v44  ;;  %v7187_v42 = vrot.slane %v7186_v23, 4  ;;  %v7282_v12 = vrot.slane %v7281_v49, 1  ;;  %v7603_v31 = vadd.f32 %v7602_v51, %v7601_v9 }
 0x524   :  { %v7672_v45 = vrot.slane %v7671_v16, 2  ;;  %v13194_v61 = vpop.permute.xlu1 %6369  ;;  %v13198_v8 = vsel %vm2893_vm1, %v7234_v50, %v7227_v52  ;;  %v7687_v21 = vadd.f32 %v7686_v55, %v7685_v6  ;;  %v7734_v43 = vadd.f32 %v7733_v17, %v7732_v27 }
 0x525   :  { %v7656_v47 = vrot.slane %v7655_v56, 4  ;;  %v7739_v34 = vsel %vm1866_vm0, %v6879_v22, 0.0  ;;  %v6809_v38 = vmul.f32 %v6380_v0, %v94_v35  ;;  %v7209_v20 = vadd.f32 %v7208_v2, %v7207_v10  ;;  %v6735_v22 = vpop.permute.xlu0 %6734 }
 0x526   :  { %v7673_v48 = vadd.f32 %v7672_v45, %v7671_v16  ;;  %v7293_v9 = vadd.f32 %v7292_v40, %v7291_v19  ;;  %v7585_v6 = vsel %vm1866_vm0, %v6857_v5, 0.0  ;;  %v7630_v57 = vrot.slane %v7629_v53, 2  ;;  %v80_v45 = vld [vmem:[%s13677_s3 + $0x130] sm:$0xff] }
 0x527   :  { %v7188_v44 = vadd.f32 %v7187_v42, %v7186_v23  ;;  %v6868_v29 = vmul.f32 %v6675_v36, %v153_v33  ;;  %v6794_v7 = vmul.f32 %v13112_v15, %v79_v18  ;;  %v13219_v16 = vadd.f32 %v7646_v24, %v7645_v11  ;;  %v151_v24 = vld [vmem:[%s13677_s3 + $0x368] sm:$0xff] }
 0x528   :  { %v7674_v60 = vrot.slane %v7673_v48, 1  ;;  %v13212_v58 = vpop.permute.xlu1 %6404  ;;  %v7604_v32 = vrot.slane %v7603_v31, 1  ;;  %v7688_v27 = vrot.slane %v7687_v21, 1  ;;  %v7740_v14 = vrot.slane %v7739_v34, 4 }
 0x529   :  { %v7735_v4 = vrot.slane %v7734_v43, 2  ;;  %v7657_v0 = vadd.f32 %v7656_v47, %v7655_v56  ;;  %v7249_v10 = vsel %vm1866_vm0, %v6809_v38, 0.0  ;;  %v7586_v52 = vrot.slane %v7585_v6, 4 }
 0x52a   :  { %v7675_v50 = vadd.f32 %v7674_v60, %v7673_v48  ;;  %v13225_v51 = vadd.f32 %v7205_v25, %v7204_v59  ;;  %v13227_v19 = vadd.f32 %v7282_v12, %v7281_v49  ;;  %v7210_v54 = vrot.slane %v7209_v20, 2  ;;  %v143_v48 = vld [vmem:[%s13677_s3 + $0x328] sm:$0xff] }
 0x52b   :  { %v7294_v15 = vrot.slane %v7293_v9, 2  ;;  %v7631_v11 = vadd.f32 %v7630_v57, %v7629_v53  ;;  %v7189_v41 = vrot.slane %v7188_v44, 2  ;;  %v7662_v55 = vsel %vm1866_vm0, %v6868_v29, 0.0 }
 0x52c   :  { %v13216_v28 = vsel %vm2893_vm1, %v7682_v37, %v7675_v50  ;;  %v7144_v23 = vsel %vm1866_vm0, %v6794_v7, 0.0  ;;  %v6665_v59 = vpop.permute.xlu1 %6664  ;;  %v13237_v17 = vadd.f32 %v7604_v32, %v7603_v31  ;;  %v7741_v49 = vadd.f32 %v7740_v14, %v7739_v34  ;;  %v165_v37 = vld [vmem:[%s13677_s3 + $0x3d8] sm:$0xff] }
 0x52d   :  { %v7250_v2 = vrot.slane %v7249_v10, 4  ;;  %v6795_v40 = vmul.f32 %v13176_v63, %v80_v45  ;;  %v13240_v56 = vadd.f32 %v7688_v27, %v7687_v21  ;;  %v7736_v35 = vadd.f32 %v7735_v4, %v7734_v43 }
 0x52e   :  { %v7658_v5 = vrot.slane %v7657_v0, 2  ;;  %v7587_v60 = vadd.f32 %v7586_v52, %v7585_v6  ;;  %v7663_v25 = vrot.slane %v7662_v55, 4  ;;  %v7145_v53 = vrot.slane %v7144_v23, 4 }
 0x52f   :  { %v6858_v42 = vmul.f32 %v13140_v13, %v143_v48  ;;  %v6866_v12 = vmul.f32 %v6665_v59, %v151_v24  ;;  %v7211_v31 = vadd.f32 %v7210_v54, %v7209_v20  ;;  %v7295_v33 = vadd.f32 %v7294_v15, %v7293_v9  ;;  %v102_v20 = vld [vmem:[%s13677_s3 + $0x1e0] sm:$0xff]  ;;  %v6420_v9 = vpop.permute.xlu0 %6419 }
 0x530   :  { %v7632_v36 = vrot.slane %v7631_v11, 1  ;;  %v7190_v18 = vadd.f32 %v7189_v41, %v7188_v44  ;;  %v7742_v50 = vrot.slane %v7741_v49, 2  ;;  %v7251_v63 = vadd.f32 %v7250_v2, %v7249_v10 }
 0x531   :  { %v6880_v21 = vmul.f32 %v6735_v22, %v165_v37  ;;  %v7151_v43 = vsel %vm1866_vm0, %v6795_v40, 0.0  ;;  %v7737_v47 = vrot.slane %v7736_v35, 1  ;;  %v7659_v34 = vadd.f32 %v7658_v5, %v7657_v0 }
 0x532   :  { %v7588_v38 = vrot.slane %v7587_v60, 2  ;;  %v13250_v6 = vsel %vm2899_vm4, %v13155_v30, %v13005_v1  ;;  %v7664_v57 = vadd.f32 %v7663_v25, %v7662_v55  ;;  %v7146_v13 = vadd.f32 %v7145_v53, %v7144_v23 }
 0x533   :  { %v7592_v44 = vsel %vm1866_vm0, %v6858_v42, 0.0  ;;  %v7648_v29 = vsel %vm1866_vm0, %v6866_v12, 0.0  ;;  %v7212_v7 = vrot.slane %v7211_v31, 1  ;;  %v7633_v32 = vadd.f32 %v7632_v36, %v7631_v11  ;;  %v6740_v5 = vpop.permute.xlu0 %6739 }
 0x534   :  { %v7191_v27 = vrot.slane %v7190_v18, 1  ;;  %v7152_v14 = vrot.slane %v7151_v43, 4  ;;  %v7296_v4 = vrot.slane %v7295_v33, 1  ;;  %v7743_v0 = vadd.f32 %v7742_v50, %v7741_v49 }
 0x535   :  { %v7252_v10 = vrot.slane %v7251_v63, 2  ;;  %v7746_v1 = vsel %vm1866_vm0, %v6880_v21, 0.0  ;;  %v7589_v30 = vadd.f32 %v7588_v38, %v7587_v60  ;;  %v6817_v52 = vmul.f32 %v6420_v9, %v102_v20 }
 0x536   :  { %v7593_v45 = vrot.slane %v7592_v44, 4  ;;  %v7649_v54 = vrot.slane %v7648_v29, 4  ;;  %v13258_v15 = vadd.f32 %v7737_v47, %v7736_v35  ;;  %v7660_v41 = vrot.slane %v7659_v34, 1  ;;  %v92_v35 = vld [vmem:[%s13677_s3 + $0x190] sm:$0xff] }
 0x537   :  { %v7665_v55 = vrot.slane %v7664_v57, 2  ;;  %v7147_v23 = vrot.slane %v7146_v13, 2  ;;  %v8017_v48 = vsel %vm2895_vm2, %v7633_v32, %v13082_v3  ;;  %v7192_v11 = vadd.f32 %v7191_v27, %v7190_v18  ;;  %v166_v3 = vld [vmem:[%s13677_s3 + $0x3e0] sm:$0xff]  ;;  %v81_v18 = vld [vmem:[%s13677_s3 + $0x138] sm:$0xff] }
 0x538   :  { %v7747_v24 = vrot.slane %v7746_v1, 4  ;;  %v7153_v59 = vadd.f32 %v7152_v14, %v7151_v43  ;;  %v13262_v2 = vadd.f32 %v7212_v7, %v7211_v31  ;;  %v13264_v49 = vadd.f32 %v7296_v4, %v7295_v33 }
 0x539   :  { %v7744_v22 = vrot.slane %v7743_v0, 1  ;;  %v7253_v40 = vadd.f32 %v7252_v10, %v7251_v63  ;;  %v7590_v37 = vrot.slane %v7589_v30, 1  ;;  %v7305_v25 = vsel %vm1866_vm0, %v6817_v52, 0.0 }
 0x53a   :  { %v7594_v53 = vadd.f32 %v7593_v45, %v7592_v44  ;;  %v7650_v42 = vadd.f32 %v7649_v54, %v7648_v29  ;;  %v13273_v12 = vadd.f32 %v7660_v41, %v7659_v34  ;;  %v8018_v31 = vsel %vm2897_vm3, %v13160_v62, %v8017_v48 }
 0x53b   :  { %v7666_v33 = vadd.f32 %v7665_v55, %v7664_v57  ;;  %v7148_v36 = vadd.f32 %v7147_v23, %v7146_v13  ;;  %v7962_v50 = vsel %vm2897_vm3, %v7192_v11, %v13093_v26  ;;  %v7748_v63 = vadd.f32 %v7747_v24, %v7746_v1  ;;  %v99_v13 = vld [vmem:[%s13677_s3 + $0x1c8] sm:$0xff]  ;;  %v162_v23 = vld [vmem:[%s13677_s3 + $0x3c0] sm:$0xff] }
 0x53c   :  { %v7154_v21 = vrot.slane %v7153_v59, 2  ;;  %v6807_v43 = vmul.f32 %v13194_v61, %v92_v35  ;;  %v13283_v47 = vadd.f32 %v7744_v22, %v7743_v0  ;;  %v7254_v34 = vrot.slane %v7253_v40, 1  ;;  %v6425_v61 = vpop.permute.xlu0 %6424 }
 0x53d   :  { %v6720_v60 = vpop.permute.xlu1 %6719  ;;  %v7306_v38 = vrot.slane %v7305_v25, 4  ;;  %v6881_v20 = vmul.f32 %v6740_v5, %v166_v3  ;;  %v7591_v62 = vadd.f32 %v7590_v37, %v7589_v30  ;;  %v7595_v57 = vrot.slane %v7594_v53, 2 }
 0x53e   :  { %v7651_v44 = vrot.slane %v7650_v42, 2  ;;  %v7963_v26 = vsel %vm2899_vm4, %v13165_v39, %v7962_v50  ;;  %v7667_v7 = vrot.slane %v7666_v33, 1  ;;  %v7149_v32 = vrot.slane %v7148_v36, 1 }
 0x53f   :  { %v13292_v27 = vsel %vm2899_vm4, %v13219_v16, %v8018_v31  ;;  %v7749_v14 = vrot.slane %v7748_v63, 2  ;;  %v7155_v4 = vadd.f32 %v7154_v21, %v7153_v59  ;;  %v7235_v0 = vsel %vm1866_vm0, %v6807_v43, 0.0 }
 0x540   :  { %v7307_v1 = vadd.f32 %v7306_v38, %v7305_v25  ;;  %v7753_v30 = vsel %vm1866_vm0, %v6881_v20, 0.0  ;;  %v6814_v52 = vmul.f32 %v13212_v58, %v99_v13  ;;  %v13300_v54 = vadd.f32 %v7254_v34, %v7253_v40  ;;  %v103_v58 = vld [vmem:[%s13677_s3 + $0x1e8] sm:$0xff]  ;;  %v6745_v25 = vpop.permute.xlu0 %6744 }
 0x541   :  { %v6315_v9 = vpop.permute.xlu1 %6314  ;;  %v13304_v16 = vsel %vm2899_vm4, %v7591_v62, %v13099_v46  ;;  %v7596_v41 = vadd.f32 %v7595_v57, %v7594_v53  ;;  %v7652_v55 = vadd.f32 %v7651_v44, %v7650_v42  ;;  %v13309_v48 = vadd.f32 %v7667_v7, %v7666_v33  ;;  %v145_v46 = vld [vmem:[%s13677_s3 + $0x338] sm:$0xff] }
 0x542   :  { %v6796_v29 = vmul.f32 %v6315_v9, %v81_v18  ;;  %v7150_v11 = vadd.f32 %v7149_v32, %v7148_v36  ;;  %v7236_v24 = vrot.slane %v7235_v0, 4  ;;  %v7750_v22 = vadd.f32 %v7749_v14, %v7748_v63 }
 0x543   :  { %v7754_v40 = vrot.slane %v7753_v30, 4  ;;  %v7156_v5 = vrot.slane %v7155_v4, 1  ;;  %v7964_v35 = vsel %vm2901_vm5, %v13225_v51, %v7963_v26  ;;  %v7308_v37 = vrot.slane %v7307_v1, 2 }
 0x544   :  { %v7158_v10 = vsel %vm1866_vm0, %v6796_v29, 0.0  ;;  %v7284_v53 = vsel %vm1866_vm0, %v6814_v52, 0.0  ;;  %v6877_v3 = vmul.f32 %v6720_v60, %v162_v23  ;;  %v7597_v33 = vrot.slane %v7596_v41, 1  ;;  %v167_v60 = vld [vmem:[%s13677_s3 + $0x3e8] sm:$0xff]  ;;  %v6430_v14 = vpop.permute.xlu0 %6429 }
 0x545   :  { %v7159_v45 = vrot.slane %v7158_v10, 4  ;;  %v13298_v39 = vpop.permute.xlu1 %6374  ;;  %v6818_v36 = vmul.f32 %v6425_v61, %v103_v58  ;;  %v7653_v18 = vrot.slane %v7652_v55, 1  ;;  %v7957_v21 = vsel %vm2901_vm5, %v7150_v11, %v13250_v6 }
 0x546   :  { %v7237_v63 = vadd.f32 %v7236_v24, %v7235_v0  ;;  %v13324_v34 = vsel %vm2903_vm6, %v13262_v2, %v7964_v35  ;;  %v7755_v51 = vadd.f32 %v7754_v40, %v7753_v30  ;;  %v7157_v38 = vadd.f32 %v7156_v5, %v7155_v4  ;;  %v7785_v30 = vld [vmem:[%s13678_s2 + $0x20] sm:$0xff] }
 0x547   :  { %v7160_v59 = vadd.f32 %v7159_v45, %v7158_v10  ;;  %v7285_v20 = vrot.slane %v7284_v53, 4  ;;  %v7751_v62 = vrot.slane %v7750_v22, 1  ;;  %v7725_v57 = vsel %vm1866_vm0, %v6877_v3, 0.0  ;;  %v89_v10 = vld [vmem:[%s13677_s3 + $0x178] sm:$0xff] }
 0x548   :  { %v7309_v29 = vadd.f32 %v7308_v37, %v7307_v1  ;;  %v7598_v26 = vadd.f32 %v7597_v33, %v7596_v41  ;;  %v7312_v2 = vsel %vm1866_vm0, %v6818_v36, 0.0  ;;  %v7654_v7 = vadd.f32 %v7653_v18, %v7652_v55  ;;  %v168_v36 = vld [vmem:[%s13677_s3 + $0x3f0] sm:$0xff]  ;;  %v6750_v18 = vpop.permute.xlu0 %6749 }
 0x549   :  { %v7161_v42 = vrot.slane %v7160_v59, 2  ;;  %v6635_v31 = vpop.permute.xlu1 %6634  ;;  %v6882_v32 = vmul.f32 %v6745_v25, %v167_v60  ;;  %v7238_v61 = vrot.slane %v7237_v63, 2  ;;  %v7756_v52 = vrot.slane %v7755_v51, 2 }
 0x54a   :  { %v6860_v50 = vmul.f32 %v6635_v31, %v145_v46  ;;  %v7286_v45 = vadd.f32 %v7285_v20, %v7284_v53  ;;  %v7726_v1 = vrot.slane %v7725_v57, 4  ;;  %v7958_v41 = vsel %vm2903_vm6, %v7157_v38, %v7957_v21 }
 0x54b   :  { %v7162_v43 = vadd.f32 %v7161_v42, %v7160_v59  ;;  %v13341_v23 = vadd.f32 %v7751_v62, %v7750_v22  ;;  %v7313_v55 = vrot.slane %v7312_v2, 4  ;;  %v7310_v59 = vrot.slane %v7309_v29, 1  ;;  %v93_v22 = vld [vmem:[%s13677_s3 + $0x198] sm:$0xff]  ;;  %v104_v42 = vld [vmem:[%s13677_s3 + $0x1f0] sm:$0xff] }
 0x54c   :  { %v7606_v9 = vsel %vm1866_vm0, %v6860_v50, 0.0  ;;  %v8020_v46 = vsel %vm2901_vm5, %v7654_v7, %v13292_v27  ;;  %v8013_v35 = vsel %vm2901_vm5, %v7598_v26, %v13304_v16  ;;  %v7760_v37 = vsel %vm1866_vm0, %v6882_v32, 0.0 }
 0x54d   :  { %v7163_v13 = vrot.slane %v7162_v43, 1  ;;  %v7607_v6 = vrot.slane %v7606_v9, 4  ;;  %v13331_v44 = vpop.permute.xlu1 %6694  ;;  %v7239_v25 = vadd.f32 %v7238_v61, %v7237_v63  ;;  %v7757_v3 = vadd.f32 %v7756_v52, %v7755_v51 }
 0x54e   :  { %v7287_v31 = vrot.slane %v7286_v45, 2  ;;  %v7727_v27 = vadd.f32 %v7726_v1, %v7725_v57  ;;  %v7314_v16 = vadd.f32 %v7313_v55, %v7312_v2  ;;  %v13362_v51 = vadd.f32 %v7310_v59, %v7309_v29 }
 0x54f   :  { %v7164_v4 = vadd.f32 %v7163_v13, %v7162_v43  ;;  %v7608_v0 = vadd.f32 %v7607_v6, %v7606_v9  ;;  %v8021_v43 = vsel %vm2903_vm6, %v13273_v12, %v8020_v46  ;;  %v7761_v38 = vrot.slane %v7760_v37, 4  ;;  %v101_v6 = vld [vmem:[%s13677_s3 + $0x1d8] sm:$0xff]  ;;  %v7793_v12 = vld [vmem:[%s13678_s2 + $0x60] sm:$0xff] }
 0x550   :  { %v6808_v60 = vmul.f32 %v13298_v39, %v93_v22  ;;  %v8014_v20 = vsel %vm2903_vm6, %v13237_v17, %v8013_v35  ;;  %v7240_v9 = vrot.slane %v7239_v25, 1  ;;  %v6819_v62 = vmul.f32 %v6430_v14, %v104_v42  ;;  %v7794_v39 = vld [vmem:[%s13678_s2 + $0x68] sm:$0xff] }
 0x551   :  { %v7609_v11 = vrot.slane %v7608_v0, 2  ;;  %v6355_v58 = vpop.permute.xlu1 %6354  ;;  %v7959_v24 = vsel %vm2905_vm7, %v7164_v4, %v7958_v41  ;;  %v7288_v29 = vadd.f32 %v7287_v31, %v7286_v45  ;;  %v6883_v26 = vmul.f32 %v6750_v18, %v168_v36 }
 0x552   :  { %v6804_v40 = vmul.f32 %v6355_v58, %v89_v10  ;;  %v8057_v5 = vadd.f32 %v7959_v24, %v7785_v30  ;;  %v7728_v2 = vrot.slane %v7727_v27, 2  ;;  %v8022_v17 = vsel %vm2905_vm7, %v13309_v48, %v8021_v43  ;;  %v157_v30 = vld [vmem:[%s13677_s3 + $0x398] sm:$0xff] }
 0x553   :  { %v7610_v53 = vadd.f32 %v7609_v11, %v7608_v0  ;;  %v7758_v7 = vrot.slane %v7757_v3, 1  ;;  %v7315_v32 = vrot.slane %v7314_v16, 2  ;;  %v7762_v0 = vadd.f32 %v7761_v38, %v7760_v37  ;;  %v95_v11 = vld [vmem:[%s13677_s3 + $0x1a8] sm:$0xff] }
 0x554   :  { %v7214_v33 = vsel %vm1866_vm0, %v6804_v40, 0.0  ;;  %8577 = vmatprep.mubr.msk.f32.mxu0 %vm1866_vm0, %v8057_v5  ;;  %v7242_v10 = vsel %vm1866_vm0, %v6808_v60, 0.0  ;;  %v7241_v1 = vadd.f32 %v7240_v9, %v7239_v25  ;;  %v13386_v48 = vsel %vm2895_vm2, %v13240_v56, %v13216_v28  ;;  %v158_v40 = vld [vmem:[%s13677_s3 + $0x3a0] sm:$0xff]  ;;  %v169_v56 = vld [vmem:[%s13677_s3 + $0x3f8] sm:$0xff]  ;;  %v6755_v5 = vpop.permute.xlu0 %6754 }
 0x555   :  { %v7611_v50 = vrot.slane %v7610_v53, 1  ;;  %v7215_v21 = vrot.slane %v7214_v33, 4  ;;  %v6415_v63 = vpop.permute.xlu1 %6414  ;;  %v8066_v55 = vadd.f32 %v8022_v17, %v7794_v39  ;;  %v7319_v58 = vsel %vm1866_vm0, %v6819_v62, 0.0  ;;  %v96_v17 = vld [vmem:[%s13677_s3 + $0x1b0] sm:$0xff] }
 0x556   :  { %v6816_v52 = vmul.f32 %v6415_v63, %v101_v6  ;;  %v7289_v24 = vrot.slane %v7288_v29, 1  ;;  %v7767_v59 = vsel %vm1866_vm0, %v6883_v26, 0.0  ;;  %v7729_v46 = vadd.f32 %v7728_v2, %v7727_v27 }
 0x557   :  { %v7612_v57 = vadd.f32 %v7611_v50, %v7610_v53  ;;  %v7216_v13 = vadd.f32 %v7215_v21, %v7214_v33  ;;  %v13397_v28 = vadd.f32 %v7758_v7, %v7757_v3  ;;  %v7243_v35 = vrot.slane %v7242_v10, 4  ;;  %v159_v50 = vld [vmem:[%s13677_s3 + $0x3a8] sm:$0xff] }
 0x558   :  { %v6872_v37 = vmul.f32 %v13331_v44, %v157_v30  ;;  %v7316_v53 = vadd.f32 %v7315_v32, %v7314_v16  ;;  %v7763_v42 = vrot.slane %v7762_v0, 2  ;;  %v7298_v31 = vsel %vm1866_vm0, %v6816_v52, 0.0  ;;  %v7786_v44 = vld [vmem:[%s13678_s2 + $0x28] sm:$0xff] }
 0x559   :  { %v7217_v61 = vrot.slane %v7216_v13, 2  ;;  %v6700_v14 = vpop.permute.xlu1 %6699  ;;  %v8015_v4 = vsel %vm2905_vm7, %v7612_v57, %v8014_v20  ;;  %v7320_v33 = vrot.slane %v7319_v58, 4  ;;  %v7768_v3 = vrot.slane %v7767_v59, 4 }
 0x55a   :  { %v8065_v45 = vadd.f32 %v8015_v4, %v7793_v12  ;;  %v6873_v18 = vmul.f32 %v6700_v14, %v158_v40  ;;  %v7290_v21 = vadd.f32 %v7289_v24, %v7288_v29  ;;  %v6884_v63 = vmul.f32 %v6755_v5, %v169_v56  ;;  %v160_v24 = vld [vmem:[%s13677_s3 + $0x3b0] sm:$0xff] }
 0x55b   :  { %v7218_v41 = vadd.f32 %v7217_v61, %v7216_v13  ;;  %v7730_v43 = vrot.slane %v7729_v46, 1  ;;  %v7244_v38 = vadd.f32 %v7243_v35, %v7242_v10  ;;  %v7690_v60 = vsel %vm1866_vm0, %v6872_v37, 0.0 }
 0x55c   :  { %8589 = vmatprep.mubr.msk.f32.mxu1 %vm1866_vm0, %v8065_v45  ;;  %v7299_v20 = vrot.slane %v7298_v31, 4  ;;  %v13417_v57 = vsel %vm2895_vm2, %v7241_v1, %v13198_v8  ;;  %v7317_v29 = vrot.slane %v7316_v53, 1  ;;  %v7321_v26 = vadd.f32 %v7320_v33, %v7319_v58 }
 0x55d   :  { %v7219_v25 = vrot.slane %v7218_v41, 1  ;;  %8590 = vmatmul.mubr.msk.f32.gmra.mrb[4].mxu1 %vm1866_vm0, %v8066_v55  ;;  %v6385_v22 = vpop.permute.xlu1 %6384  ;;  %v7769_v2 = vadd.f32 %v7768_v3, %v7767_v59  ;;  %v7697_v39 = vsel %vm1866_vm0, %v6873_v18, 0.0  ;;  %v7764_v7 = vadd.f32 %v7763_v42, %v7762_v0 }
 0x55e   :  { %v6810_v27 = vmul.f32 %v6385_v22, %v95_v11  ;;  %v7774_v32 = vsel %vm1866_vm0, %v6884_v63, 0.0  ;;  %v7974_v8 = vsel %vm2893_vm1, %v7290_v21, %v13227_v19  ;;  %v7731_v14 = vadd.f32 %v7730_v43, %v7729_v46 }
 0x55f   :  { %v7220_v36 = vadd.f32 %v7219_v25, %v7218_v41  ;;  %v7245_v4 = vrot.slane %v7244_v38, 2  ;;  %v7300_v10 = vadd.f32 %v7299_v20, %v7298_v31  ;;  %v7698_v52 = vrot.slane %v7697_v39, 4 }
 0x560   :  { %v7256_v16 = vsel %vm1866_vm0, %v6810_v27, 0.0  ;;  %v13428_v55 = vadd.f32 %v7317_v29, %v7316_v53  ;;  %v7322_v0 = vrot.slane %v7321_v26, 2  ;;  %v7770_v11 = vrot.slane %v7769_v2, 2 }
 0x561   :  { %v6705_v9 = vpop.permute.xlu1 %6704  ;;  %v7966_v62 = vsel %vm2905_vm7, %v7220_v36, %v13324_v34  ;;  %v7257_v13 = vrot.slane %v7256_v16, 4  ;;  %v7691_v34 = vrot.slane %v7690_v60, 4  ;;  %v7775_v58 = vrot.slane %v7774_v32, 4 }
 0x562   :  { %v6874_v6 = vmul.f32 %v6705_v9, %v159_v50  ;;  %v8058_v12 = vadd.f32 %v7966_v62, %v7786_v44  ;;  %v7765_v59 = vrot.slane %v7764_v7, 1  ;;  %v13435_v19 = vsel %vm2895_vm2, %v13264_v49, %v7974_v8  ;;  %v97_v49 = vld [vmem:[%s13677_s3 + $0x1b8] sm:$0xff] }
 0x563   :  { %v7258_v45 = vadd.f32 %v7257_v13, %v7256_v16  ;;  %v7692_v40 = vadd.f32 %v7691_v34, %v7690_v60  ;;  %v8030_v56 = vsel %vm2893_vm1, %v13258_v15, %v7731_v14  ;;  %v7246_v5 = vadd.f32 %v7245_v4, %v7244_v38 }
 0x564   :  { %v7704_v61 = vsel %vm1866_vm0, %v6874_v6, 0.0  ;;  %8578 = vmatmul.mubr.msk.f32.gmra.mrb[4].mxu0 %vm1866_vm0, %v8058_v12  ;;  %v7301_v35 = vrot.slane %v7300_v10, 2  ;;  %v7699_v22 = vadd.f32 %v7698_v52, %v7697_v39  ;;  %v13440_v27 = vadd.f32 %v7322_v0, %v7321_v26 }
 0x565   :  { %v6390_v30 = vpop.permute.xlu1 %6389  ;;  %v7705_v1 = vrot.slane %v7704_v61, 4  ;;  %v7259_v53 = vrot.slane %v7258_v45, 2  ;;  %v7771_v33 = vadd.f32 %v7770_v11, %v7769_v2  ;;  %v7776_v3 = vadd.f32 %v7775_v58, %v7774_v32 }
 0x566   :  { %v6811_v41 = vmul.f32 %v6390_v30, %v96_v17  ;;  %v7766_v18 = vadd.f32 %v7765_v59, %v7764_v7  ;;  %v8031_v15 = vsel %vm2895_vm2, %v13283_v47, %v8030_v56  ;;  %v7693_v50 = vrot.slane %v7692_v40, 2  ;;  %v161_v47 = vld [vmem:[%s13677_s3 + $0x3b8] sm:$0xff] }
 0x567   :  { %v7706_v42 = vadd.f32 %v7705_v1, %v7704_v61  ;;  %v7247_v21 = vrot.slane %v7246_v5, 1  ;;  %v7302_v63 = vadd.f32 %v7301_v35, %v7300_v10  ;;  %v7700_v60 = vrot.slane %v7699_v22, 2 }
 0x568   :  { %v7263_v46 = vsel %vm1866_vm0, %v6811_v41, 0.0  ;;  %v7260_v20 = vadd.f32 %v7259_v53, %v7258_v45  ;;  %v7324_v13 = vrot.slane %v13440_v27, 1  ;;  %v7772_v6 = vrot.slane %v7771_v33, 1 }
 0x569   :  { %v7264_v37 = vrot.slane %v7263_v46, 4  ;;  %v6710_v25 = vpop.permute.xlu1 %6709  ;;  %v7707_v9 = vrot.slane %v7706_v42, 2  ;;  %v7777_v12 = vrot.slane %v7776_v3, 2  ;;  %v8032_v26 = vsel %vm2897_vm3, %v13341_v23, %v8031_v15  ;;  %v105_v23 = vld [vmem:[%s13677_s3 + $0x1f8] sm:$0xff] }
 0x56a   :  { %v6875_v31 = vmul.f32 %v6710_v25, %v160_v24  ;;  %v7694_v2 = vadd.f32 %v7693_v50, %v7692_v40  ;;  %v7248_v7 = vadd.f32 %v7247_v21, %v7246_v5  ;;  %v7303_v32 = vrot.slane %v7302_v63, 1 }
 0x56b   :  { %v7265_v36 = vadd.f32 %v7264_v37, %v7263_v46  ;;  %v7701_v14 = vadd.f32 %v7700_v60, %v7699_v22  ;;  %v7261_v4 = vrot.slane %v7260_v20, 1  ;;  %v7708_v10 = vadd.f32 %v7707_v9, %v7706_v42 }
 0x56c   :  { %v7711_v44 = vsel %vm1866_vm0, %v6875_v31, 0.0  ;;  %v7773_v52 = vadd.f32 %v7772_v6, %v7771_v33  ;;  %v7778_v45 = vadd.f32 %v7777_v12, %v7776_v3  ;;  %v8033_v41 = vsel %vm2899_vm4, %v13397_v28, %v8032_v26 }
 0x56d   :  { %v7266_v43 = vrot.slane %v7265_v36, 2  ;;  %v7712_v16 = vrot.slane %v7711_v44, 4  ;;  %v6395_v38 = vpop.permute.xlu1 %6394  ;;  %v7695_v0 = vrot.slane %v7694_v2, 1  ;;  %v7969_v59 = vsel %vm2897_vm3, %v7248_v7, %v13417_v57  ;;  %v13468_v57 = vld [vmem:[%s13679_s6] ss:$0 sm:$0xff] }
 0x56e   :  { %v6812_v62 = vmul.f32 %v6395_v38, %v97_v49  ;;  %v7304_v40 = vadd.f32 %v7303_v32, %v7302_v63  ;;  %v7702_v35 = vrot.slane %v7701_v14, 1  ;;  %v7262_v37 = vadd.f32 %v7261_v4, %v7260_v20 }
 0x56f   :  { %v7713_v29 = vadd.f32 %v7712_v16, %v7711_v44  ;;  %v7267_v39 = vadd.f32 %v7266_v43, %v7265_v36  ;;  %v7709_v25 = vrot.slane %v7708_v10, 1  ;;  %v7779_v53 = vrot.slane %v7778_v45, 1 }
 0x570   :  { %v7270_v17 = vsel %vm1866_vm0, %v6812_v62, 0.0  ;;  %v8034_v28 = vsel %vm2901_vm5, %v7766_v18, %v8033_v41  ;;  %v7696_v33 = vadd.f32 %v7695_v0, %v7694_v2  ;;  %v7970_v15 = vsel %vm2899_vm4, %v13300_v54, %v7969_v59  ;;  %v7787_v54 = vld [vmem:[%s13678_s2 + $0x30] sm:$0xff] }
 0x571   :  { %v7714_v34 = vrot.slane %v7713_v29, 2  ;;  %v7271_v61 = vrot.slane %v7270_v17, 4  ;;  %v6715_v8 = vpop.permute.xlu1 %6714  ;;  %v7268_v11 = vrot.slane %v7267_v39, 1  ;;  %v7976_v63 = vsel %vm2897_vm3, %v7304_v40, %v13435_v19  ;;  %v8288_v19 = vld [vmem:[%s13680_s0 + $0x8] sm:$0xff]  ;;  %v7788_v40 = vld [vmem:[%s13678_s2 + $0x38] sm:$0xff] }
 0x572   :  { %v6876_v30 = vmul.f32 %v6715_v8, %v161_v47  ;;  %v7703_v18 = vadd.f32 %v7702_v35, %v7701_v14  ;;  %v7971_v43 = vsel %vm2901_vm5, %v7262_v37, %v7970_v15  ;;  %v7710_v16 = vadd.f32 %v7709_v25, %v7708_v10 }
 0x573   :  { %v7272_v1 = vadd.f32 %v7271_v61, %v7270_v17  ;;  %v7715_v58 = vadd.f32 %v7714_v34, %v7713_v29  ;;  %v7269_v3 = vadd.f32 %v7268_v11, %v7267_v39  ;;  %v8025_v12 = vsel %vm2897_vm3, %v7696_v33, %v13386_v48 }
 0x574   :  { %v7718_v24 = vsel %vm1866_vm0, %v6876_v30, 0.0  ;;  %v8035_v26 = vsel %vm2903_vm6, %v7773_v52, %v8034_v28  ;;  %v7780_v32 = vadd.f32 %v7779_v53, %v7778_v45  ;;  %v7977_v34 = vsel %vm2899_vm4, %v13362_v51, %v7976_v63  ;;  %v7795_v30 = vld [vmem:[%s13678_s2 + $0x70] sm:$0xff]  ;;  %v7796_v51 = vld [vmem:[%s13678_s2 + $0x78] sm:$0xff]  ;;  %v8296_v53 = vld [vmem:[%s13680_s0 + $0x48] sm:$0xff] }
 0x575   :  { %v7273_v46 = vrot.slane %v7272_v1, 2  ;;  %v7719_v56 = vrot.slane %v7718_v24, 4  ;;  %v6435_v5 = vpop.permute.xlu1 %6434  ;;  %v7716_v36 = vrot.slane %v7715_v58, 1  ;;  %v7972_v47 = vsel %vm2903_vm6, %v7269_v3, %v7971_v43  ;;  %v8295_v3 = vld [vmem:[%s13680_s0 + $0x40] sm:$0xff] }
 0x576   :  { %v6820_v22 = vmul.f32 %v6435_v5, %v105_v23  ;;  %v8026_v48 = vsel %vm2899_vm4, %v7703_v18, %v8025_v12  ;;  %v8036_v45 = vsel %vm2905_vm7, %v7780_v32, %v8035_v26  ;;  %v7978_v0 = vsel %vm2901_vm5, %v13428_v55, %v7977_v34 }
 0x577   :  { %v7274_v42 = vadd.f32 %v7273_v46, %v7272_v1  ;;  %v7720_v31 = vadd.f32 %v7719_v56, %v7718_v24  ;;  %v7717_v29 = vadd.f32 %v7716_v36, %v7715_v58  ;;  %v8027_v8 = vsel %vm2901_vm5, %v7710_v16, %v8026_v48  ;;  %v8287_v36 = vld [vmem:[%s13680_s0] sm:$0xff]  ;;  %v8290_v16 = vld [vmem:[%s13680_s0 + $0x18] sm:$0xff] }
 0x578   :  { %v7326_v49 = vsel %vm1866_vm0, %v6820_v22, 0.0  ;;  %v7325_v11 = vadd.f32 %v7324_v13, %v13440_v27  ;;  %v8068_v59 = vadd.f32 %v8036_v45, %v7796_v51 }
 0x579   :  { %v7275_v50 = vrot.slane %v7274_v42, 1  ;;  %v7721_v44 = vrot.slane %v7720_v31, 2  ;;  %v7327_v21 = vrot.slane %v7326_v49, 4  ;;  %v8028_v52 = vsel %vm2903_vm6, %v7717_v29, %v8027_v8 }
 0x57a   :  { %v7979_v46 = vsel %vm2903_vm6, %v7325_v11, %v7978_v0 }
 0x57b   :  { %v8573_v38 = vpop.f32.mrb[0].mxu0  ;;  %v7276_v60 = vadd.f32 %v7275_v50, %v7274_v42  ;;  %v7722_v20 = vadd.f32 %v7721_v44, %v7720_v31  ;;  %v7328_v9 = vadd.f32 %v7327_v21, %v7326_v49  ;;  %v8289_v50 = vld [vmem:[%s13680_s0 + $0x10] sm:$0xff] }
 0x57c   :  { %v8198_v62 = vadd.f32 %v8573_v38, %v13468_v57  ;;  %v8192_v6 = vpop.f32.mrb[1].mxu0 }
 0x57d   :  { %v7723_v2 = vrot.slane %v7722_v20, 1  ;;  %v7329_v39 = vrot.slane %v7328_v9, 2  ;;  %v7973_v7 = vsel %vm2905_vm7, %v7276_v60, %v7972_v47  ;;  %v8193_v5 = vadd.f32 %v13468_v57, %v8192_v6 }
 0x57e   :  { %v8272_v17 = vmax.f32 %v8198_v62, 0.0  ;;  %v8059_v61 = vadd.f32 %v7973_v7, %v7787_v54 }
 0x57f   :  { %v7724_v14 = vadd.f32 %v7723_v2, %v7722_v20  ;;  %v7330_v4 = vadd.f32 %v7329_v39, %v7328_v9  ;;  %v8271_v31 = vmax.f32 %v8193_v5, 0.0  ;;  %v8297_v2 = vld [vmem:[%s13680_s0 + $0x50] sm:$0xff]  ;;  %v8299_v5 = vld [vmem:[%s13680_s0 + $0x60] sm:$0xff] }
 0x580   :  { %v8304_v10 = vmul.f32 %v8288_v19, %v8272_v17  ;;  %8580 = vmatprep.mubr.msk.f32.mxu0 %vm1866_vm0, %v8059_v61  ;;  %v8298_v19 = vld [vmem:[%s13680_s0 + $0x58] sm:$0xff] }
 0x581   :  { %v7331_v1 = vrot.slane %v7330_v4, 1  ;;  %v8029_v23 = vsel %vm2905_vm7, %v7724_v14, %v8028_v52  ;;  %v8303_v63 = vmul.f32 %v8287_v36, %v8271_v31 }
 0x582   :  { %v8322_v41 = vsel %vm1866_vm0, %v8304_v10, 0.0  ;;  %v8067_v58 = vadd.f32 %v8029_v23, %v7795_v30 }
 0x583   :  { %8323 = vadd.xlane.f32.xlu0 %v8322_v41  ;;  %v7332_v24 = vadd.f32 %v7331_v1, %v7330_v4  ;;  %v8319_v9 = vsel %vm1866_vm0, %v8303_v63, 0.0 }
 0x584   :  { %8592 = vmatprep.mubr.msk.f32.mxu1 %vm1866_vm0, %v8067_v58 }
 0x585   :  { %8593 = vmatmul.mubr.msk.f32.gmra.mrb[6].mxu1 %vm1866_vm0, %v8068_v59  ;;  %v7980_v55 = vsel %vm2905_vm7, %v7332_v24, %v7979_v46  ;;  %v8292_v24 = vld [vmem:[%s13680_s0 + $0x28] sm:$0xff] }
 0x586   :  { %v8060_v56 = vadd.f32 %v7980_v55, %v7788_v40  ;;  %v8291_v55 = vld [vmem:[%s13680_s0 + $0x20] sm:$0xff] }
 0x588   :  { %8581 = vmatmul.mubr.msk.f32.gmra.mrb[6].mxu0 %vm1866_vm0, %v8060_v56  ;;  %v8300_v56 = vld [vmem:[%s13680_s0 + $0x68] sm:$0xff] }
 0x59f   :  { %v8576_v27 = vpop.f32.mrb[2].mxu0 }
 0x5a0   :  { %v8202_v13 = vpop.f32.mrb[3].mxu0  ;;  %v8208_v28 = vadd.f32 %v8576_v27, %v13468_v57 }
 0x5a1   :  { %v8203_v35 = vadd.f32 %v13468_v57, %v8202_v13 }
 0x5a2   :  { %v8274_v18 = vmax.f32 %v8208_v28, 0.0 }
 0x5a3   :  { %v8273_v49 = vmax.f32 %v8203_v35, 0.0 }
 0x5a4   :  { %v8306_v20 = vmul.f32 %v8290_v16, %v8274_v18 }
 0x5a5   :  { %v8305_v38 = vmul.f32 %v8289_v50, %v8273_v49 }
 0x5a6   :  { %v8328_v6 = vsel %vm1866_vm0, %v8306_v20, 0.0 }
 0x5a7   :  { %v8325_v62 = vsel %vm1866_vm0, %v8305_v38, 0.0 }
 0x5bb   :  { %v8585_v37 = vpop.f32.mrb[0].mxu1 }
 0x5bc   :  { %v8238_v25 = vadd.f32 %v8585_v37, %v13468_v57  ;;  %v8232_v22 = vpop.f32.mrb[1].mxu1 }
 0x5bd   :  { %v8233_v42 = vadd.f32 %v13468_v57, %v8232_v22 }
 0x5be   :  { %v8280_v33 = vmax.f32 %v8238_v25, 0.0 }
 0x5bf   :  { %v8279_v15 = vmax.f32 %v8233_v42, 0.0 }
 0x5c0   :  { %v8312_v44 = vmul.f32 %v8296_v53, %v8280_v33 }
 0x5c1   :  { %v8311_v21 = vmul.f32 %v8295_v3, %v8279_v15 }
 0x5c2   :  { %v8346_v43 = vsel %vm1866_vm0, %v8312_v44, 0.0 }
 0x5c3   :  { %8347 = vadd.xlane.f32.xlu1 %v8346_v43  ;;  %v8343_v60 = vsel %vm1866_vm0, %v8311_v21, 0.0 }
 0x5c4   :  { %8344 = vadd.xlane.f32.xlu0 %v8343_v60 }
 0x5c7   :  { %8320 = vadd.xlane.f32.xlu1 %v8319_v9 }
 0x5c8   :  { %8326 = vadd.xlane.f32.xlu0 %v8325_v62 }
 0x5cb   :  { %8329 = vadd.xlane.f32.xlu1 %v8328_v6 }
 0x5e7   :  { %v8588_v54 = vpop.f32.mrb[2].mxu1 }
 0x5e8   :  { %v8248_v12 = vadd.f32 %v8588_v54, %v13468_v57  ;;  %v8242_v29 = vpop.f32.mrb[3].mxu1 }
 0x5e9   :  { %v8243_v47 = vadd.f32 %v13468_v57, %v8242_v29 }
 0x5ea   :  { %v8282_v26 = vmax.f32 %v8248_v12, 0.0 }
 0x5eb   :  { %v8281_v39 = vmax.f32 %v8243_v47, 0.0 }
 0x5ec   :  { %v8314_v17 = vmul.f32 %v8298_v19, %v8282_v26 }
 0x5ed   :  { %v8313_v7 = vmul.f32 %v8297_v2, %v8281_v39 }
 0x5ee   :  { %v8352_v32 = vsel %vm1866_vm0, %v8314_v17, 0.0  ;;  %v8294_v17 = vld [vmem:[%s13680_s0 + $0x38] sm:$0xff] }
 0x5ef   :  { %8353 = vadd.xlane.f32.xlu1 %v8352_v32  ;;  %v8349_v34 = vsel %vm1866_vm0, %v8313_v7, 0.0 }
 0x5f0   :  { %8350 = vadd.xlane.f32.xlu0 %v8349_v34 }
 0x610   :  { %v8324_v48 = vpop.xlane.xlu0 %8323 }
 0x611   :  { %v8368_v61 = vand.u32 2147483647, %v8324_v48  ;;  %vm8432_vm9 = vcmp.ge.f32.partialorder %v8324_v48, 0.0 }
 0x613   :  { %v8384_v8 = vsub.f32 0.0, %v8368_v61  ;;  %v8293_v61 = vld [vmem:[%s13680_s0 + $0x30] sm:$0xff] }
 0x615   :  { %v8401_v14 = vmul.f32 1.442695, %v8384_v8  ;;  %v8302_v8 = vld [vmem:[%s13680_s0 + $0x78] sm:$0xff] }
 0x617   :  { %8909 = vpow2.f32 %v8401_v14 }
 0x621   :  { %v8910_v4 = vpop.eup %8909 }
 0x622   :  { %v8464_v10 = vadd.f32 1.0, %v8910_v4  ;;  %v8448_v52 = vsel %vm8432_vm9, 1.0, %v8910_v4 }
 0x624   :  { %8911 = vrcp.f32 %v8464_v10  ;;  %v8301_v10 = vld [vmem:[%s13680_s0 + $0x70] sm:$0xff] }
 0x62e   :  { %v8912_v30 = vpop.eup %8911 }
 0x62f   :  { %v8482_v51 = vmul.f32 %v8912_v30, %v8448_v52 }
 0x630   :  { %v8591_v45 = vpop.f32.mrb[4].mxu1 }
 0x631   :  { %8513 = vst.msk [vmem:[%s13681_s7 + $0x8] sm:$0xff] %vm8511_vm10, %v8482_v51  ;;  %v8252_v1 = vpop.f32.mrb[5].mxu1  ;;  %v8258_v23 = vadd.f32 %v8591_v45, %v13468_v57 }
 0x632   :  { %v8253_v41 = vadd.f32 %v13468_v57, %v8252_v1 }
 0x633   :  { %v8284_v40 = vmax.f32 %v8258_v23, 0.0 }
 0x634   :  { %v8283_v27 = vmax.f32 %v8253_v41, 0.0 }
 0x635   :  { %v8316_v25 = vmul.f32 %v8300_v56, %v8284_v40 }
 0x636   :  { %v8315_v53 = vmul.f32 %v8299_v5, %v8283_v27 }
 0x637   :  { %v8579_v0 = vpop.f32.mrb[4].mxu0  ;;  %v8358_v31 = vsel %vm1866_vm0, %v8316_v25, 0.0 }
 0x638   :  { %v8218_v11 = vadd.f32 %v8579_v0, %v13468_v57  ;;  %v8212_v58 = vpop.f32.mrb[5].mxu0  ;;  %v8355_v28 = vsel %vm1866_vm0, %v8315_v53, 0.0 }
 0x639   :  { %v8213_v59 = vadd.f32 %v13468_v57, %v8212_v58 }
 0x63a   :  { %v8276_v46 = vmax.f32 %v8218_v11, 0.0 }
 0x63b   :  { %v8275_v13 = vmax.f32 %v8213_v59, 0.0 }
 0x63c   :  { %v8308_v35 = vmul.f32 %v8292_v24, %v8276_v46 }
 0x63d   :  { %v8307_v37 = vmul.f32 %v8291_v55, %v8275_v13 }
 0x63e   :  { %v8334_v22 = vsel %vm1866_vm0, %v8308_v35, 0.0 }
 0x63f   :  { %8335 = vadd.xlane.f32.xlu1 %v8334_v22  ;;  %v8331_v42 = vsel %vm1866_vm0, %v8307_v37, 0.0 }
 0x640   :  { %8332 = vadd.xlane.f32.xlu0 %v8331_v42 }
 0x643   :  { %8359 = vadd.xlane.f32.xlu1 %v8358_v31 }
 0x644   :  { %8356 = vadd.xlane.f32.xlu0 %v8355_v28 }
 0x650   :  { %v13574_v33 = vpop.xlane.xlu1 %8347 }
 0x651   :  { %v8376_v3 = vand.u32 2147483647, %v13574_v33  ;;  %v13577_v36 = vpop.xlane.xlu0 %8344  ;;  %vm8440_vm11 = vcmp.ge.f32.partialorder %v13574_v33, 0.0 }
 0x652   :  { %v8375_v49 = vand.u32 2147483647, %v13577_v36  ;;  %vm8439_vm12 = vcmp.ge.f32.partialorder %v13577_v36, 0.0 }
 0x653   :  { %v8392_v15 = vsub.f32 0.0, %v8376_v3 }
 0x654   :  { %v8391_v50 = vsub.f32 0.0, %v8375_v49  ;;  %v13580_v44 = vpop.xlane.xlu1 %8320 }
 0x655   :  { %v8417_v21 = vmul.f32 1.442695, %v8392_v15  ;;  %v8367_v63 = vand.u32 2147483647, %v13580_v44  ;;  %v13583_v18 = vpop.xlane.xlu0 %8326  ;;  %vm8431_vm13 = vcmp.ge.f32.partialorder %v13580_v44, 0.0 }
 0x656   :  { %v8415_v43 = vmul.f32 1.442695, %v8391_v50  ;;  %v8369_v16 = vand.u32 2147483647, %v13583_v18  ;;  %vm8433_vm14 = vcmp.ge.f32.partialorder %v13583_v18, 0.0 }
 0x657   :  { %8913 = vpow2.f32 %v8417_v21  ;;  %v8383_v38 = vsub.f32 0.0, %v8367_v63 }
 0x658   :  { %v8594_v60 = vpop.f32.mrb[6].mxu1  ;;  %8915 = vpow2.f32 %v8415_v43  ;;  %v8385_v20 = vsub.f32 0.0, %v8369_v16  ;;  %v13586_v9 = vpop.xlane.xlu1 %8329 }
 0x659   :  { %v8262_v62 = vpop.f32.mrb[7].mxu1  ;;  %v8399_v6 = vmul.f32 1.442695, %v8383_v38  ;;  %v8370_v54 = vand.u32 2147483647, %v13586_v9  ;;  %v8268_v12 = vadd.f32 %v8594_v60, %v13468_v57  ;;  %vm8434_vm15 = vcmp.ge.f32.partialorder %v13586_v9, 0.0 }
 0x65a   :  { %v8403_v29 = vmul.f32 1.442695, %v8385_v20  ;;  %v8263_v19 = vadd.f32 %v13468_v57, %v8262_v62 }
 0x65b   :  { %v8582_v47 = vpop.f32.mrb[6].mxu0  ;;  %8917 = vpow2.f32 %v8399_v6  ;;  %v8386_v26 = vsub.f32 0.0, %v8370_v54  ;;  %v8286_v34 = vmax.f32 %v8268_v12, 0.0 }
 0x65c   :  { %v8228_v2 = vadd.f32 %v8582_v47, %v13468_v57  ;;  %v8222_v39 = vpop.f32.mrb[7].mxu0  ;;  %8919 = vpow2.f32 %v8403_v29  ;;  %v8285_v14 = vmax.f32 %v8263_v19, 0.0 }
 0x65d   :  { %v8223_v7 = vadd.f32 %v13468_v57, %v8222_v39  ;;  %v8405_v32 = vmul.f32 1.442695, %v8386_v26  ;;  %v8318_v45 = vmul.f32 %v8302_v8, %v8286_v34 }
 0x65e   :  { %v8278_v48 = vmax.f32 %v8228_v2, 0.0  ;;  %v8317_v41 = vmul.f32 %v8301_v10, %v8285_v14 }
 0x65f   :  { %v8277_v4 = vmax.f32 %v8223_v7, 0.0  ;;  %8921 = vpow2.f32 %v8405_v32  ;;  %v8364_v40 = vsel %vm1866_vm0, %v8318_v45, 0.0 }
 0x660   :  { %v8310_v30 = vmul.f32 %v8294_v17, %v8278_v48  ;;  %v8361_v55 = vsel %vm1866_vm0, %v8317_v41, 0.0 }
 0x661   :  { %v8914_v57 = vpop.eup %8913  ;;  %v8309_v52 = vmul.f32 %v8293_v61, %v8277_v4 }
 0x662   :  { %v8916_v51 = vpop.eup %8915  ;;  %v8472_v1 = vadd.f32 1.0, %v8914_v57  ;;  %v8340_v23 = vsel %vm1866_vm0, %v8310_v30, 0.0  ;;  %v8456_v5 = vsel %vm8440_vm11, 1.0, %v8914_v57 }
 0x663   :  { %v8471_v0 = vadd.f32 1.0, %v8916_v51  ;;  %8341 = vadd.xlane.f32.xlu1 %v8340_v23  ;;  %v8337_v11 = vsel %vm1866_vm0, %v8309_v52, 0.0  ;;  %v8455_v25 = vsel %vm8439_vm12, 1.0, %v8916_v51 }
 0x664   :  { %8923 = vrcp.f32 %v8472_v1  ;;  %8338 = vadd.xlane.f32.xlu0 %v8337_v11 }
 0x665   :  { %v8918_v58 = vpop.eup %8917  ;;  %8925 = vrcp.f32 %v8471_v0 }
 0x666   :  { %v8920_v24 = vpop.eup %8919  ;;  %v8463_v59 = vadd.f32 1.0, %v8918_v58  ;;  %v8447_v42 = vsel %vm8431_vm13, 1.0, %v8918_v58 }
 0x667   :  { %v8465_v46 = vadd.f32 1.0, %v8920_v24  ;;  %8365 = vadd.xlane.f32.xlu1 %v8364_v40  ;;  %v8449_v33 = vsel %vm8433_vm14, 1.0, %v8920_v24 }
 0x668   :  { %8927 = vrcp.f32 %v8463_v59  ;;  %8362 = vadd.xlane.f32.xlu0 %v8361_v55 }
 0x669   :  { %v8922_v56 = vpop.eup %8921  ;;  %8929 = vrcp.f32 %v8465_v46 }
 0x66a   :  { %v8466_v27 = vadd.f32 1.0, %v8922_v56  ;;  %v8450_v49 = vsel %vm8434_vm15, 1.0, %v8922_v56 }
 0x66c   :  { %8931 = vrcp.f32 %v8466_v27 }
 0x66e   :  { %v8924_v13 = vpop.eup %8923 }
 0x66f   :  { %v8926_v35 = vpop.eup %8925  ;;  %v8498_v37 = vmul.f32 %v8924_v13, %v8456_v5 }
 0x670   :  { %v8496_v22 = vmul.f32 %v8926_v35, %v8455_v25 }
 0x671   :  { %8521 = vst.msk [vmem:[%s13681_s7 + $0x48] sm:$0xff] %vm8511_vm10, %v8498_v37 }
 0x672   :  { %v8928_v53 = vpop.eup %8927  ;;  %8520 = vst.msk [vmem:[%s13681_s7 + $0x40] sm:$0xff] %vm8511_vm10, %v8496_v22 }
 0x673   :  { %v8930_v31 = vpop.eup %8929  ;;  %v8480_v28 = vmul.f32 %v8928_v53, %v8447_v42 }
 0x674   :  { %v8484_v3 = vmul.f32 %v8930_v31, %v8449_v33 }
 0x675   :  { %8512 = vst.msk [vmem:[%s13681_s7] sm:$0xff] %vm8511_vm10, %v8480_v28 }
 0x676   :  { %v8932_v36 = vpop.eup %8931  ;;  %8514 = vst.msk [vmem:[%s13681_s7 + $0x10] sm:$0xff] %vm8511_vm10, %v8484_v3 }
 0x677   :  { %v8486_v15 = vmul.f32 %v8932_v36, %v8450_v49 }
 0x679   :  { %8515 = vst.msk [vmem:[%s13681_s7 + $0x18] sm:$0xff] %vm8511_vm10, %v8486_v15 }
 0x67c   :  { %v8354_v50 = vpop.xlane.xlu1 %8353 }
 0x67d   :  { %v8378_v44 = vand.u32 2147483647, %v8354_v50  ;;  %v8351_v21 = vpop.xlane.xlu0 %8350  ;;  %vm8442_vm0 = vcmp.ge.f32.partialorder %v8354_v50, 0.0 }
 0x67e   :  { %v8377_v63 = vand.u32 2147483647, %v8351_v21  ;;  %vm8441_vm1 = vcmp.ge.f32.partialorder %v8351_v21, 0.0 }
 0x67f   :  { %v8394_v18 = vsub.f32 0.0, %v8378_v44 }
 0x680   :  { %v8393_v43 = vsub.f32 0.0, %v8377_v63 }
 0x681   :  { %v8421_v16 = vmul.f32 1.442695, %v8394_v18 }
 0x682   :  { %v8419_v38 = vmul.f32 1.442695, %v8393_v43 }
 0x683   :  { %8933 = vpow2.f32 %v8421_v16 }
 0x684   :  { %8935 = vpow2.f32 %v8419_v38 }
 0x68d   :  { %v8934_v60 = vpop.eup %8933 }
 0x68e   :  { %v8936_v20 = vpop.eup %8935  ;;  %v8474_v9 = vadd.f32 1.0, %v8934_v60  ;;  %v8458_v54 = vsel %vm8442_vm0, 1.0, %v8934_v60 }
 0x68f   :  { %v8473_v62 = vadd.f32 1.0, %v8936_v20  ;;  %v8457_v19 = vsel %vm8441_vm1, 1.0, %v8936_v20 }
 0x690   :  { %8937 = vrcp.f32 %v8474_v9 }
 0x691   :  { %8939 = vrcp.f32 %v8473_v62 }
 0x69a   :  { %v8938_v6 = vpop.eup %8937 }
 0x69b   :  { %v8940_v12 = vpop.eup %8939  ;;  %v8502_v29 = vmul.f32 %v8938_v6, %v8458_v54 }
 0x69c   :  { %v8500_v47 = vmul.f32 %v8940_v12, %v8457_v19 }
 0x69d   :  { %8523 = vst.msk [vmem:[%s13681_s7 + $0x58] sm:$0xff] %vm8511_vm10, %v8502_v29 }
 0x69e   :  { %8522 = vst.msk [vmem:[%s13681_s7 + $0x50] sm:$0xff] %vm8511_vm10, %v8500_v47 }
 0x6cc   :  { %v8336_v26 = vpop.xlane.xlu1 %8335 }
 0x6cd   :  { %v8372_v2 = vand.u32 2147483647, %v8336_v26  ;;  %v8333_v39 = vpop.xlane.xlu0 %8332  ;;  %vm8436_vm2 = vcmp.ge.f32.partialorder %v8336_v26, 0.0 }
 0x6ce   :  { %v8371_v17 = vand.u32 2147483647, %v8333_v39  ;;  %vm8435_vm3 = vcmp.ge.f32.partialorder %v8333_v39, 0.0 }
 0x6cf   :  { %v8388_v7 = vsub.f32 0.0, %v8372_v2 }
 0x6d0   :  { %v8387_v32 = vsub.f32 0.0, %v8371_v17  ;;  %v8360_v34 = vpop.xlane.xlu1 %8359 }
 0x6d1   :  { %v8409_v48 = vmul.f32 1.442695, %v8388_v7  ;;  %v8380_v61 = vand.u32 2147483647, %v8360_v34  ;;  %v8357_v8 = vpop.xlane.xlu0 %8356  ;;  %vm8444_vm4 = vcmp.ge.f32.partialorder %v8360_v34, 0.0 }
 0x6d2   :  { %v8407_v14 = vmul.f32 1.442695, %v8387_v32  ;;  %v8379_v4 = vand.u32 2147483647, %v8357_v8  ;;  %vm8443_vm5 = vcmp.ge.f32.partialorder %v8357_v8, 0.0 }
 0x6d3   :  { %8941 = vpow2.f32 %v8409_v48  ;;  %v8396_v10 = vsub.f32 0.0, %v8380_v61 }
 0x6d4   :  { %8943 = vpow2.f32 %v8407_v14  ;;  %v8395_v30 = vsub.f32 0.0, %v8379_v4 }
 0x6d5   :  { %v8425_v57 = vmul.f32 1.442695, %v8396_v10 }
 0x6d6   :  { %v8423_v52 = vmul.f32 1.442695, %v8395_v30 }
 0x6d7   :  { %8945 = vpow2.f32 %v8425_v57 }
 0x6d8   :  { %8947 = vpow2.f32 %v8423_v52 }
 0x6dd   :  { %v8942_v51 = vpop.eup %8941 }
 0x6de   :  { %v8944_v45 = vpop.eup %8943  ;;  %v8468_v1 = vadd.f32 1.0, %v8942_v51  ;;  %v8452_v59 = vsel %vm8436_vm2, 1.0, %v8942_v51 }
 0x6df   :  { %v8467_v23 = vadd.f32 1.0, %v8944_v45  ;;  %v8451_v55 = vsel %vm8435_vm3, 1.0, %v8944_v45 }
 0x6e0   :  { %8949 = vrcp.f32 %v8468_v1 }
 0x6e1   :  { %v8946_v41 = vpop.eup %8945  ;;  %8951 = vrcp.f32 %v8467_v23 }
 0x6e2   :  { %v8948_v0 = vpop.eup %8947  ;;  %v8476_v11 = vadd.f32 1.0, %v8946_v41  ;;  %v8460_v13 = vsel %vm8444_vm4, 1.0, %v8946_v41 }
 0x6e3   :  { %v8475_v58 = vadd.f32 1.0, %v8948_v0  ;;  %v8459_v37 = vsel %vm8443_vm5, 1.0, %v8948_v0 }
 0x6e4   :  { %8953 = vrcp.f32 %v8476_v11 }
 0x6e5   :  { %8955 = vrcp.f32 %v8475_v58 }
 0x6ea   :  { %v8950_v24 = vpop.eup %8949 }
 0x6eb   :  { %v8952_v40 = vpop.eup %8951  ;;  %v8490_v46 = vmul.f32 %v8950_v24, %v8452_v59 }
 0x6ec   :  { %v8488_v56 = vmul.f32 %v8952_v40, %v8451_v55 }
 0x6ed   :  { %8517 = vst.msk [vmem:[%s13681_s7 + $0x28] sm:$0xff] %vm8511_vm10, %v8490_v46 }
 0x6ee   :  { %v8954_v27 = vpop.eup %8953  ;;  %8516 = vst.msk [vmem:[%s13681_s7 + $0x20] sm:$0xff] %vm8511_vm10, %v8488_v56 }
 0x6ef   :  { %v8956_v5 = vpop.eup %8955  ;;  %v8506_v35 = vmul.f32 %v8954_v27, %v8460_v13 }
 0x6f0   :  { %v8504_v25 = vmul.f32 %v8956_v5, %v8459_v37  ;;  %v8342_v22 = vpop.xlane.xlu1 %8341 }
 0x6f1   :  { %8525 = vst.msk [vmem:[%s13681_s7 + $0x68] sm:$0xff] %vm8511_vm10, %v8506_v35  ;;  %v8374_v53 = vand.u32 2147483647, %v8342_v22  ;;  %v8339_v42 = vpop.xlane.xlu0 %8338  ;;  %vm8438_vm6 = vcmp.ge.f32.partialorder %v8342_v22, 0.0 }
 0x6f2   :  { %8524 = vst.msk [vmem:[%s13681_s7 + $0x60] sm:$0xff] %vm8511_vm10, %v8504_v25  ;;  %v8373_v31 = vand.u32 2147483647, %v8339_v42  ;;  %vm8437_vm7 = vcmp.ge.f32.partialorder %v8339_v42, 0.0 }
 0x6f3   :  { %v8390_v28 = vsub.f32 0.0, %v8374_v53 }
 0x6f4   :  { %v8389_v33 = vsub.f32 0.0, %v8373_v31  ;;  %v8366_v3 = vpop.xlane.xlu1 %8365 }
 0x6f5   :  { %v8413_v36 = vmul.f32 1.442695, %v8390_v28  ;;  %v8382_v49 = vand.u32 2147483647, %v8366_v3  ;;  %v8363_v15 = vpop.xlane.xlu0 %8362  ;;  %vm8446_vm8 = vcmp.ge.f32.partialorder %v8366_v3, 0.0 }
 0x6f6   :  { %v8411_v50 = vmul.f32 1.442695, %v8389_v33  ;;  %v8381_v44 = vand.u32 2147483647, %v8363_v15  ;;  %vm8445_vm9 = vcmp.ge.f32.partialorder %v8363_v15, 0.0 }
 0x6f7   :  { %8957 = vpow2.f32 %v8413_v36  ;;  %v8398_v21 = vsub.f32 0.0, %v8382_v49 }
 0x6f8   :  { %8959 = vpow2.f32 %v8411_v50  ;;  %v8397_v63 = vsub.f32 0.0, %v8381_v44 }
 0x6f9   :  { %v8429_v18 = vmul.f32 1.442695, %v8398_v21 }
 0x6fa   :  { %v8427_v43 = vmul.f32 1.442695, %v8397_v63 }
 0x6fb   :  { %8961 = vpow2.f32 %v8429_v18 }
 0x6fc   :  { %8963 = vpow2.f32 %v8427_v43 }
 0x701   :  { %v8958_v16 = vpop.eup %8957 }
 0x702   :  { %v8960_v38 = vpop.eup %8959  ;;  %v8470_v60 = vadd.f32 1.0, %v8958_v16  ;;  %v8454_v29 = vsel %vm8438_vm6, 1.0, %v8958_v16 }
 0x703   :  { %v8469_v20 = vadd.f32 1.0, %v8960_v38  ;;  %v8453_v26 = vsel %vm8437_vm7, 1.0, %v8960_v38 }
 0x704   :  { %8965 = vrcp.f32 %v8470_v60 }
 0x705   :  { %v8962_v9 = vpop.eup %8961  ;;  %8967 = vrcp.f32 %v8469_v20 }
 0x706   :  { %v8964_v62 = vpop.eup %8963  ;;  %v8478_v6 = vadd.f32 1.0, %v8962_v9  ;;  %v8462_v17 = vsel %vm8446_vm8, 1.0, %v8962_v9 }
 0x707   :  { %v8477_v54 = vadd.f32 1.0, %v8964_v62  ;;  %v8461_v34 = vsel %vm8445_vm9, 1.0, %v8964_v62 }
 0x708   :  { %8969 = vrcp.f32 %v8478_v6 }
 0x709   :  { %8971 = vrcp.f32 %v8477_v54 }
 0x70e   :  { %v8966_v12 = vpop.eup %8965 }
 0x70f   :  { %v8968_v19 = vpop.eup %8967  ;;  %v8494_v47 = vmul.f32 %v8966_v12, %v8454_v29 }
 0x710   :  { %v8492_v2 = vmul.f32 %v8968_v19, %v8453_v26 }
 0x711   :  { %8519 = vst.msk [vmem:[%s13681_s7 + $0x38] sm:$0xff] %vm8511_vm10, %v8494_v47 }
 0x712   :  { %v8970_v39 = vpop.eup %8969  ;;  %8518 = vst.msk [vmem:[%s13681_s7 + $0x30] sm:$0xff] %vm8511_vm10, %v8492_v2 }
 0x713   :  { %v8972_v7 = vpop.eup %8971  ;;  %v8510_v32 = vmul.f32 %v8970_v39, %v8462_v17 }
 0x714   :  { %v8508_v48 = vmul.f32 %v8972_v7, %v8461_v34 }
 0x715   :  { %8527 = vst.msk [vmem:[%s13681_s7 + $0x78] sm:$0xff] %vm8511_vm10, %v8510_v32 }
 0x716   :  { %8526 = vst.msk [vmem:[%s13681_s7 + $0x70] sm:$0xff] %vm8511_vm10, %v8508_v48 }

</bundles_post_ra>
